<compile_context>
chip_gen: v5e
topology: v5e:2x2
jax: 0.10.0
libtpu: 0.0.40
codegen_flags: <defaults>
</compile_context>

<pallas_src>
import functools
import math

import jax
import jax.numpy as jnp
from jax.experimental import pallas as pl
from jax.experimental.pallas import tpu as pltpu


def _round_up(v, m):
    return (v + m - 1) // m * m


# ----------------------------------------------------------------------------
# Kernel 1: bidirectional LSTM (one batch row per grid cell, batch-parallel).
# ----------------------------------------------------------------------------
def _bilstm_kernel(x_ref, wih_f_ref, whh_f_ref, b_f_ref,
                   wih_b_ref, whh_b_ref, b_b_ref, out_ref, *, seq_len, hidden):
    x = x_ref[0].astype(jnp.float32)                      # (T, D_in)
    H = hidden

    def run_dir(wih, whh, bias, reverse):
        # Input projection for all timesteps in one MXU matmul.
        xproj = jnp.dot(x, wih, preferred_element_type=jnp.float32) + bias  # (T, 4H)
        h = jnp.zeros((1, H), jnp.float32)
        c = jnp.zeros((1, H), jnp.float32)
        outs = [None] * seq_len
        ts = range(seq_len - 1, -1, -1) if reverse else range(seq_len)
        for t in ts:                                      # static unroll (small T)
            g = xproj[t:t + 1, :] + jnp.dot(h, whh, preferred_element_type=jnp.float32)
            i_g = jax.nn.sigmoid(g[:, 0:H])
            f_g = jax.nn.sigmoid(g[:, H:2 * H])
            g_g = jnp.tanh(g[:, 2 * H:3 * H])
            o_g = jax.nn.sigmoid(g[:, 3 * H:4 * H])
            c = f_g * c + i_g * g_g
            h = o_g * jnp.tanh(c)
            outs[t] = h
        return jnp.concatenate(outs, axis=0)              # (T, H)

    fwd = run_dir(wih_f_ref[...].astype(jnp.float32),
                  whh_f_ref[...].astype(jnp.float32),
                  b_f_ref[...].astype(jnp.float32), reverse=False)
    bwd = run_dir(wih_b_ref[...].astype(jnp.float32),
                  whh_b_ref[...].astype(jnp.float32),
                  b_b_ref[...].astype(jnp.float32), reverse=True)
    out_ref[0] = jnp.concatenate([fwd, bwd], axis=-1).astype(out_ref.dtype)


def bilstm(x, params):
    B, T, D = x.shape
    H = params["w_hh_f"].shape[0]
    kernel = functools.partial(_bilstm_kernel, seq_len=T, hidden=H)
    return pl.pallas_call(
        kernel,
        out_shape=jax.ShapeDtypeStruct((B, T, 2 * H), jnp.float32),
        grid_spec=pltpu.PrefetchScalarGridSpec(
            num_scalar_prefetch=0,
            grid=(B,),
            in_specs=[
                pl.BlockSpec((1, T, D), lambda b: (b, 0, 0)),
                pl.BlockSpec((D, 4 * H), lambda b: (0, 0)),
                pl.BlockSpec((H, 4 * H), lambda b: (0, 0)),
                pl.BlockSpec((1, 4 * H), lambda b: (0, 0)),
                pl.BlockSpec((D, 4 * H), lambda b: (0, 0)),
                pl.BlockSpec((H, 4 * H), lambda b: (0, 0)),
                pl.BlockSpec((1, 4 * H), lambda b: (0, 0)),
            ],
            out_specs=pl.BlockSpec((1, T, 2 * H), lambda b: (b, 0, 0)),
        ),
        compiler_params=pltpu.CompilerParams(
            dimension_semantics=("parallel",),
            vmem_limit_bytes=32 * 1024 * 1024),
    )(x, params["w_ih_f"], params["w_hh_f"], params["b_f"],
      params["w_ih_b"], params["w_hh_b"], params["b_b"])


# ----------------------------------------------------------------------------
# Kernel 2: h_n + scaled-dot-product-attention head + linear -> logits.
# ----------------------------------------------------------------------------
def _attn_head_kernel(lstm_ref, q_ref, w_ref, b_ref, o_ref, *, seq_len, hidden):
    lstm = lstm_ref[...].astype(jnp.float32)              # (B, T, 2H)
    q = q_ref[...].astype(jnp.float32)                    # (Q, 2H)
    B = lstm.shape[0]
    E = lstm.shape[-1]
    H = hidden

    # h_n = cat(forward h_{T-1}, backward h_0)  -> (B, 2H)
    h_n = jnp.concatenate([lstm[:, seq_len - 1, :H], lstm[:, 0, H:]], axis=-1)

    # SDPA: 2-D query broadcasts across the batch dim (torch semantics).
    qb = jnp.broadcast_to(q[None, :, :], (B,) + q.shape)  # (B, Q, 2H)
    s = jnp.einsum('bqe,bte->bqt', qb, lstm,
                   preferred_element_type=jnp.float32) * (1.0 / math.sqrt(E))
    s = s - jnp.max(s, axis=-1, keepdims=True)
    p = jnp.exp(s)
    p = p / jnp.sum(p, axis=-1, keepdims=True)
    attn = jnp.einsum('bqt,bte->bqe', p, lstm, preferred_element_type=jnp.float32)
    attn_mean = jnp.mean(attn, axis=1)                    # (B, 2H)
    # TODO(synk): dropout_p=0.1 inside F.scaled_dot_product_attention is stochastic;
    # omitted in this deterministic forward kernel.

    combined = h_n + attn_mean
    logits = jnp.dot(combined, w_ref[...].astype(jnp.float32),
                     preferred_element_type=jnp.float32) + b_ref[...]
    o_ref[...] = logits.astype(o_ref.dtype)


def attention_head(lstm_out, query, w_lin, b_lin):
    B, T, E = lstm_out.shape
    Q = query.shape[0]
    L = w_lin.shape[1]
    kernel = functools.partial(_attn_head_kernel, seq_len=T, hidden=E // 2)
    return pl.pallas_call(
        kernel,
        out_shape=jax.ShapeDtypeStruct((B, L), jnp.float32),
        grid_spec=pltpu.PrefetchScalarGridSpec(
            num_scalar_prefetch=0,
            grid=(1,),
            in_specs=[
                pl.BlockSpec((B, T, E), lambda i: (0, 0, 0)),
                pl.BlockSpec((Q, E), lambda i: (0, 0)),
                pl.BlockSpec((E, L), lambda i: (0, 0)),
                pl.BlockSpec((1, L), lambda i: (0, 0)),
            ],
            out_specs=pl.BlockSpec((B, L), lambda i: (0, 0)),
        ),
        compiler_params=pltpu.CompilerParams(
            dimension_semantics=("arbitrary",),
            vmem_limit_bytes=32 * 1024 * 1024),
    )(lstm_out, query, w_lin, b_lin)


# ----------------------------------------------------------------------------
# Kernel 3: BCEWithLogitsLoss (mean). Lane-dense flattened tiling, (8,128)
# VMEM partials per grid cell, 2 transcendentals / element.
# ----------------------------------------------------------------------------
def _bce_logits_kernel(x_ref, y_ref, o_ref, *, n_valid):
    i = pl.program_id(0)
    x = x_ref[...].astype(jnp.float32)
    y = y_ref[...].astype(jnp.float32)
    # Numerically stable BCE-with-logits: max(x,0) - x*y + log1p(exp(-|x|)).
    loss = jnp.maximum(x, 0.0) - x * y + jnp.log1p(jnp.exp(-jnp.abs(x)))
    rt, lanes = x.shape
    rows = i * rt + jax.lax.broadcasted_iota(jnp.int32, (rt, lanes), 0)
    cols = jax.lax.broadcasted_iota(jnp.int32, (rt, lanes), 1)
    loss = jnp.where(rows * lanes + cols < n_valid, loss, 0.0)
    # Lane-dense (8,128) partial per grid cell: VPU adds only, no scalar SMEM.
    o_ref[...] = loss.reshape(rt // 8, 8, lanes).sum(axis=0)


def bce_with_logits_loss(logits, labels, *, max_block_elems=512 * 1024):
    assert logits.shape == labels.shape
    n_valid = math.prod(logits.shape)
    lanes = 128
    xf = logits.reshape(-1)
    yf = labels.reshape(-1).astype(jnp.float32)

    n_rows = pl.cdiv(n_valid, lanes)
    row_tile = min(_round_up(n_rows, 8), max(8, _round_up(max_block_elems // lanes, 8)))
    if n_rows >= 16:
        # Keep >= 2 grid cells so double-buffering (and both v7x TCs) are used.
        row_tile = min(row_tile, _round_up(pl.cdiv(n_rows, 2), 8))
    grid0 = pl.cdiv(n_rows, row_tile)
    padded = grid0 * row_tile * lanes
    pad = padded - n_valid
    x2 = jnp.pad(xf, (0, pad)).reshape(grid0 * row_tile, lanes)
    y2 = jnp.pad(yf, (0, pad)).reshape(grid0 * row_tile, lanes)

    cost = pl.CostEstimate(
        flops=6 * padded,
        transcendentals=2 * padded,
        bytes_accessed=int(x2.size * x2.dtype.itemsize
                           + y2.size * y2.dtype.itemsize
                           + grid0 * 8 * lanes * 4))

    partials = pl.pallas_call(
        functools.partial(_bce_logits_kernel, n_valid=n_valid),
        out_shape=jax.ShapeDtypeStruct((grid0 * 8, lanes), jnp.float32),
        grid_spec=pltpu.PrefetchScalarGridSpec(
            num_scalar_prefetch=0,
            grid=(grid0,),
            in_specs=[pl.BlockSpec((row_tile, lanes), lambda i: (i, 0)),
                      pl.BlockSpec((row_tile, lanes), lambda i: (i, 0))],
            out_specs=pl.BlockSpec((8, lanes), lambda i: (i, 0)),
        ),
        compiler_params=pltpu.CompilerParams(
            dimension_semantics=("parallel",),
            vmem_limit_bytes=32 * 1024 * 1024),
        cost_estimate=cost,
    )(x2, y2)
    return jnp.sum(partials) / n_valid


# ----------------------------------------------------------------------------
# Module forward (post-encoder part of LSTM_attention.forward).
# ----------------------------------------------------------------------------
def lstm_attention_forward(hidden_states, target_positions, params, *,
                           num_targets, labels=None):
    # TODO(synk): ELECTRA encoder not implemented; `hidden_states` stands in for
    # self.model(...).hidden_states[-1].
    lstm_out = bilstm(hidden_states, params)                          # (B, T, 256)
    rows, cols = jnp.nonzero(target_positions == 1, size=num_targets)
    # Tiny data-dependent gather (Q rows); TODO(synk): could be fused into the
    # attention kernel via scalar-prefetch indices for large models.
    query = lstm_out[rows, cols, :]                                   # (Q, 256)
    logits = attention_head(lstm_out, query, params["w_lin"], params["b_lin"])
    if labels is not None:
        loss = bce_with_logits_loss(logits, labels)
        return loss, logits
    return logits


# ----------------------------------------------------------------------------
# Pure-JAX reference (for validation).
# ----------------------------------------------------------------------------
def _lstm_dir_ref(x, wih, whh, b, reverse):
    B, T, _ = x.shape
    H = whh.shape[0]
    h = jnp.zeros((B, H), jnp.float32)
    c = jnp.zeros((B, H), jnp.float32)
    outs = [None] * T
    ts = range(T - 1, -1, -1) if reverse else range(T)
    for t in ts:
        g = x[:, t, :] @ wih + h @ whh + b
        i = jax.nn.sigmoid(g[:, :H]); f = jax.nn.sigmoid(g[:, H:2 * H])
        gg = jnp.tanh(g[:, 2 * H:3 * H]); o = jax.nn.sigmoid(g[:, 3 * H:])
        c = f * c + i * gg
        h = o * jnp.tanh(c)
        outs[t] = h
    return jnp.stack(outs, axis=1)


def _reference_forward(hs, target_positions, params, num_targets, labels):
    fwd = _lstm_dir_ref(hs, params["w_ih_f"], params["w_hh_f"], params["b_f"], False)
    bwd = _lstm_dir_ref(hs, params["w_ih_b"], params["w_hh_b"], params["b_b"], True)
    lstm_out = jnp.concatenate([fwd, bwd], axis=-1)
    h_n = jnp.concatenate([fwd[:, -1, :], bwd[:, 0, :]], axis=-1)
    rows, cols = jnp.nonzero(target_positions == 1, size=num_targets)
    query = lstm_out[rows, cols, :]
    E = lstm_out.shape[-1]
    s = jnp.einsum('qe,bte->bqt', query, lstm_out) / math.sqrt(E)
    p = jax.nn.softmax(s, axis=-1)
    attn = jnp.einsum('bqt,bte->bqe', p, lstm_out)
    combined = h_n + attn.mean(axis=1)
    logits = combined @ params["w_lin"] + params["b_lin"]
    loss = jnp.mean(jnp.maximum(logits, 0.0) - logits * labels
                    + jnp.log1p(jnp.exp(-jnp.abs(logits))))
    return loss, logits


if __name__ == "__main__":
    key = jax.random.PRNGKey(0)
    B, T, D_IN, H, L = 2, 8, 768, 128, 8
    keys = jax.random.split(key, 10)

    def init(k, shape, scale):
        return (jax.random.normal(k, shape, jnp.float32) * scale)

    hidden_states = init(keys[0], (B, T, D_IN), 0.5)
    params = {
        "w_ih_f": init(keys[1], (D_IN, 4 * H), 0.05),
        "w_hh_f": init(keys[2], (H, 4 * H), 0.05),
        "b_f":    init(keys[3], (1, 4 * H), 0.05),
        "w_ih_b": init(keys[4], (D_IN, 4 * H), 0.05),
        "w_hh_b": init(keys[5], (H, 4 * H), 0.05),
        "b_b":    init(keys[6], (1, 4 * H), 0.05),
        "w_lin":  init(keys[7], (2 * H, L), 0.1),
        "b_lin":  init(keys[8], (1, L), 0.1),
    }
    target_positions = (jnp.zeros((B, T), jnp.int32)
                        .at[0, 1].set(1).at[0, 5].set(1).at[1, 3].set(1))
    num_targets = 3
    labels = (jax.random.uniform(keys[9], (B, L)) > 0.6).astype(jnp.float32)

    loss, logits = lstm_attention_forward(
        hidden_states, target_positions, params,
        num_targets=num_targets, labels=labels)
    logits_only = lstm_attention_forward(
        hidden_states, target_positions, params, num_targets=num_targets)
    jax.block_until_ready((loss, logits, logits_only))

    ref_loss, ref_logits = _reference_forward(
        hidden_states, target_positions, params, num_targets, labels)
    jax.block_until_ready((ref_loss, ref_logits))

    assert jnp.allclose(logits, ref_logits, rtol=2e-2, atol=2e-2), (logits, ref_logits)
    assert jnp.allclose(logits_only, logits, rtol=1e-5, atol=1e-5)
    assert jnp.allclose(loss, ref_loss, rtol=2e-2, atol=2e-2), (loss, ref_loss)
    print("KERNEL_OK")
</pallas_src>

<mosaic_0001>
module attributes {stable_mosaic.version = 11 : i64} {
  func.func @_bilstm_kernel(%arg0: i32, %arg1: memref<1x8x768xf32, #tpu.memory_space<vmem>>, %arg2: memref<768x512xf32, #tpu.memory_space<vmem>>, %arg3: memref<128x512xf32, #tpu.memory_space<vmem>>, %arg4: memref<1x512xf32, #tpu.memory_space<vmem>>, %arg5: memref<768x512xf32, #tpu.memory_space<vmem>>, %arg6: memref<128x512xf32, #tpu.memory_space<vmem>>, %arg7: memref<1x512xf32, #tpu.memory_space<vmem>>, %arg8: memref<1x8x256xf32, #tpu.memory_space<vmem>>) attributes {dimension_semantics = [#tpu.dimension_semantics<parallel>], iteration_bounds = array<i64: 2>, scalar_prefetch = 0 : i64, scratch_operands = 0 : i64, tpu.core_type = #tpu.core_type<tc>, window_params = [{transform_indices = @transform_0, window_bounds = array<i64: 1, 8, 768>}, {pipeline_mode = #tpu.pipeline_mode<synchronous>, transform_indices = @transform_1, window_bounds = array<i64: 768, 512>}, {pipeline_mode = #tpu.pipeline_mode<synchronous>, transform_indices = @transform_2, window_bounds = array<i64: 128, 512>}, {pipeline_mode = #tpu.pipeline_mode<synchronous>, transform_indices = @transform_3, window_bounds = array<i64: 1, 512>}, {pipeline_mode = #tpu.pipeline_mode<synchronous>, transform_indices = @transform_4, window_bounds = array<i64: 768, 512>}, {pipeline_mode = #tpu.pipeline_mode<synchronous>, transform_indices = @transform_5, window_bounds = array<i64: 128, 512>}, {pipeline_mode = #tpu.pipeline_mode<synchronous>, transform_indices = @transform_6, window_bounds = array<i64: 1, 512>}, {transform_indices = @transform_7, window_bounds = array<i64: 1, 8, 256>}]} {
    %c0 = arith.constant 0 : index
    %c0_0 = arith.constant 0 : index
    %c0_1 = arith.constant 0 : index
    %0 = vector.load %arg1[%c0, %c0_0, %c0_1] : memref<1x8x768xf32, #tpu.memory_space<vmem>>, vector<1x8x768xf32>
    %1 = vector.shape_cast %0 : vector<1x8x768xf32> to vector<8x768xf32>
    %c0_2 = arith.constant 0 : index
    %c0_3 = arith.constant 0 : index
    %2 = vector.load %arg2[%c0_2, %c0_3] : memref<768x512xf32, #tpu.memory_space<vmem>>, vector<768x512xf32>
    %c0_4 = arith.constant 0 : index
    %c0_5 = arith.constant 0 : index
    %3 = vector.load %arg3[%c0_4, %c0_5] : memref<128x512xf32, #tpu.memory_space<vmem>>, vector<128x512xf32>
    %c0_6 = arith.constant 0 : index
    %c0_7 = arith.constant 0 : index
    %4 = vector.load %arg4[%c0_6, %c0_7] : memref<1x512xf32, #tpu.memory_space<vmem>>, vector<1x512xf32>
    %cst = arith.constant dense<0.000000e+00> : vector<8x512xf32>
    %5 = tpu.matmul %1, %2, %cst {dimension_numbers = #tpu.dot_dimension_numbers<[1], [0], [0], [1], [0, 0, 1, 1], [], []>} : vector<8x768xf32>, vector<768x512xf32>, vector<8x512xf32> -> vector<8x512xf32>
    %6 = vector.broadcast %4 : vector<1x512xf32> to vector<8x512xf32>
    %7 = arith.addf %5, %6 : vector<8x512xf32>
    %cst_8 = arith.constant 0.000000e+00 : f32
    %8 = vector.broadcast %cst_8 : f32 to vector<1x128xf32>
    %cst_9 = arith.constant 0.000000e+00 : f32
    %9 = vector.broadcast %cst_9 : f32 to vector<1x128xf32>
    %10 = vector.extract_strided_slice %7 {offsets = [0, 0], sizes = [1, 512], strides = [1, 1]} : vector<8x512xf32> to vector<1x512xf32>
    %cst_10 = arith.constant dense<0.000000e+00> : vector<1x512xf32>
    %11 = tpu.matmul %8, %3, %cst_10 {dimension_numbers = #tpu.dot_dimension_numbers<[1], [0], [0], [1], [0, 0, 1, 1], [], []>} : vector<1x128xf32>, vector<128x512xf32>, vector<1x512xf32> -> vector<1x512xf32>
    %12 = arith.addf %10, %11 : vector<1x512xf32>
    %13 = vector.extract_strided_slice %12 {offsets = [0, 0], sizes = [1, 128], strides = [1, 1]} : vector<1x512xf32> to vector<1x128xf32>
    %14 = arith.negf %13 : vector<1x128xf32>
    %15 = math.exp %14 : vector<1x128xf32>
    %cst_11 = arith.constant 1.000000e+00 : f32
    %16 = vector.broadcast %cst_11 : f32 to vector<1x128xf32>
    %17 = arith.addf %16, %15 : vector<1x128xf32>
    %18 = arith.divf %16, %17 : vector<1x128xf32>
    %19 = vector.extract_strided_slice %12 {offsets = [0, 128], sizes = [1, 128], strides = [1, 1]} : vector<1x512xf32> to vector<1x128xf32>
    %20 = arith.negf %19 : vector<1x128xf32>
    %21 = math.exp %20 : vector<1x128xf32>
    %cst_12 = arith.constant 1.000000e+00 : f32
    %22 = vector.broadcast %cst_12 : f32 to vector<1x128xf32>
    %23 = arith.addf %22, %21 : vector<1x128xf32>
    %24 = arith.divf %22, %23 : vector<1x128xf32>
    %25 = vector.extract_strided_slice %12 {offsets = [0, 256], sizes = [1, 128], strides = [1, 1]} : vector<1x512xf32> to vector<1x128xf32>
    %26 = math.tanh %25 : vector<1x128xf32>
    %27 = vector.extract_strided_slice %12 {offsets = [0, 384], sizes = [1, 128], strides = [1, 1]} : vector<1x512xf32> to vector<1x128xf32>
    %28 = arith.negf %27 : vector<1x128xf32>
    %29 = math.exp %28 : vector<1x128xf32>
    %cst_13 = arith.constant 1.000000e+00 : f32
    %30 = vector.broadcast %cst_13 : f32 to vector<1x128xf32>
    %31 = arith.addf %30, %29 : vector<1x128xf32>
    %32 = arith.divf %30, %31 : vector<1x128xf32>
    %33 = arith.mulf %24, %9 : vector<1x128xf32>
    %34 = arith.mulf %18, %26 : vector<1x128xf32>
    %35 = arith.addf %33, %34 : vector<1x128xf32>
    %36 = math.tanh %35 : vector<1x128xf32>
    %37 = arith.mulf %32, %36 : vector<1x128xf32>
    %38 = vector.extract_strided_slice %7 {offsets = [1, 0], sizes = [1, 512], strides = [1, 1]} : vector<8x512xf32> to vector<1x512xf32>
    %cst_14 = arith.constant dense<0.000000e+00> : vector<1x512xf32>
    %39 = tpu.matmul %37, %3, %cst_14 {dimension_numbers = #tpu.dot_dimension_numbers<[1], [0], [0], [1], [0, 0, 1, 1], [], []>} : vector<1x128xf32>, vector<128x512xf32>, vector<1x512xf32> -> vector<1x512xf32>
    %40 = arith.addf %38, %39 : vector<1x512xf32>
    %41 = vector.extract_strided_slice %40 {offsets = [0, 0], sizes = [1, 128], strides = [1, 1]} : vector<1x512xf32> to vector<1x128xf32>
    %42 = arith.negf %41 : vector<1x128xf32>
    %43 = math.exp %42 : vector<1x128xf32>
    %cst_15 = arith.constant 1.000000e+00 : f32
    %44 = vector.broadcast %cst_15 : f32 to vector<1x128xf32>
    %45 = arith.addf %44, %43 : vector<1x128xf32>
    %46 = arith.divf %44, %45 : vector<1x128xf32>
    %47 = vector.extract_strided_slice %40 {offsets = [0, 128], sizes = [1, 128], strides = [1, 1]} : vector<1x512xf32> to vector<1x128xf32>
    %48 = arith.negf %47 : vector<1x128xf32>
    %49 = math.exp %48 : vector<1x128xf32>
    %cst_16 = arith.constant 1.000000e+00 : f32
    %50 = vector.broadcast %cst_16 : f32 to vector<1x128xf32>
    %51 = arith.addf %50, %49 : vector<1x128xf32>
    %52 = arith.divf %50, %51 : vector<1x128xf32>
    %53 = vector.extract_strided_slice %40 {offsets = [0, 256], sizes = [1, 128], strides = [1, 1]} : vector<1x512xf32> to vector<1x128xf32>
    %54 = math.tanh %53 : vector<1x128xf32>
    %55 = vector.extract_strided_slice %40 {offsets = [0, 384], sizes = [1, 128], strides = [1, 1]} : vector<1x512xf32> to vector<1x128xf32>
    %56 = arith.negf %55 : vector<1x128xf32>
    %57 = math.exp %56 : vector<1x128xf32>
    %cst_17 = arith.constant 1.000000e+00 : f32
    %58 = vector.broadcast %cst_17 : f32 to vector<1x128xf32>
    %59 = arith.addf %58, %57 : vector<1x128xf32>
    %60 = arith.divf %58, %59 : vector<1x128xf32>
    %61 = arith.mulf %52, %35 : vector<1x128xf32>
    %62 = arith.mulf %46, %54 : vector<1x128xf32>
    %63 = arith.addf %61, %62 : vector<1x128xf32>
    %64 = math.tanh %63 : vector<1x128xf32>
    %65 = arith.mulf %60, %64 : vector<1x128xf32>
    %66 = vector.extract_strided_slice %7 {offsets = [2, 0], sizes = [1, 512], strides = [1, 1]} : vector<8x512xf32> to vector<1x512xf32>
    %cst_18 = arith.constant dense<0.000000e+00> : vector<1x512xf32>
    %67 = tpu.matmul %65, %3, %cst_18 {dimension_numbers = #tpu.dot_dimension_numbers<[1], [0], [0], [1], [0, 0, 1, 1], [], []>} : vector<1x128xf32>, vector<128x512xf32>, vector<1x512xf32> -> vector<1x512xf32>
    %68 = arith.addf %66, %67 : vector<1x512xf32>
    %69 = vector.extract_strided_slice %68 {offsets = [0, 0], sizes = [1, 128], strides = [1, 1]} : vector<1x512xf32> to vector<1x128xf32>
    %70 = arith.negf %69 : vector<1x128xf32>
    %71 = math.exp %70 : vector<1x128xf32>
    %cst_19 = arith.constant 1.000000e+00 : f32
    %72 = vector.broadcast %cst_19 : f32 to vector<1x128xf32>
    %73 = arith.addf %72, %71 : vector<1x128xf32>
    %74 = arith.divf %72, %73 : vector<1x128xf32>
    %75 = vector.extract_strided_slice %68 {offsets = [0, 128], sizes = [1, 128], strides = [1, 1]} : vector<1x512xf32> to vector<1x128xf32>
    %76 = arith.negf %75 : vector<1x128xf32>
    %77 = math.exp %76 : vector<1x128xf32>
    %cst_20 = arith.constant 1.000000e+00 : f32
    %78 = vector.broadcast %cst_20 : f32 to vector<1x128xf32>
    %79 = arith.addf %78, %77 : vector<1x128xf32>
    %80 = arith.divf %78, %79 : vector<1x128xf32>
    %81 = vector.extract_strided_slice %68 {offsets = [0, 256], sizes = [1, 128], strides = [1, 1]} : vector<1x512xf32> to vector<1x128xf32>
    %82 = math.tanh %81 : vector<1x128xf32>
    %83 = vector.extract_strided_slice %68 {offsets = [0, 384], sizes = [1, 128], strides = [1, 1]} : vector<1x512xf32> to vector<1x128xf32>
    %84 = arith.negf %83 : vector<1x128xf32>
    %85 = math.exp %84 : vector<1x128xf32>
    %cst_21 = arith.constant 1.000000e+00 : f32
    %86 = vector.broadcast %cst_21 : f32 to vector<1x128xf32>
    %87 = arith.addf %86, %85 : vector<1x128xf32>
    %88 = arith.divf %86, %87 : vector<1x128xf32>
    %89 = arith.mulf %80, %63 : vector<1x128xf32>
    %90 = arith.mulf %74, %82 : vector<1x128xf32>
    %91 = arith.addf %89, %90 : vector<1x128xf32>
    %92 = math.tanh %91 : vector<1x128xf32>
    %93 = arith.mulf %88, %92 : vector<1x128xf32>
    %94 = vector.extract_strided_slice %7 {offsets = [3, 0], sizes = [1, 512], strides = [1, 1]} : vector<8x512xf32> to vector<1x512xf32>
    %cst_22 = arith.constant dense<0.000000e+00> : vector<1x512xf32>
    %95 = tpu.matmul %93, %3, %cst_22 {dimension_numbers = #tpu.dot_dimension_numbers<[1], [0], [0], [1], [0, 0, 1, 1], [], []>} : vector<1x128xf32>, vector<128x512xf32>, vector<1x512xf32> -> vector<1x512xf32>
    %96 = arith.addf %94, %95 : vector<1x512xf32>
    %97 = vector.extract_strided_slice %96 {offsets = [0, 0], sizes = [1, 128], strides = [1, 1]} : vector<1x512xf32> to vector<1x128xf32>
    %98 = arith.negf %97 : vector<1x128xf32>
    %99 = math.exp %98 : vector<1x128xf32>
    %cst_23 = arith.constant 1.000000e+00 : f32
    %100 = vector.broadcast %cst_23 : f32 to vector<1x128xf32>
    %101 = arith.addf %100, %99 : vector<1x128xf32>
    %102 = arith.divf %100, %101 : vector<1x128xf32>
    %103 = vector.extract_strided_slice %96 {offsets = [0, 128], sizes = [1, 128], strides = [1, 1]} : vector<1x512xf32> to vector<1x128xf32>
    %104 = arith.negf %103 : vector<1x128xf32>
    %105 = math.exp %104 : vector<1x128xf32>
    %cst_24 = arith.constant 1.000000e+00 : f32
    %106 = vector.broadcast %cst_24 : f32 to vector<1x128xf32>
    %107 = arith.addf %106, %105 : vector<1x128xf32>
    %108 = arith.divf %106, %107 : vector<1x128xf32>
    %109 = vector.extract_strided_slice %96 {offsets = [0, 256], sizes = [1, 128], strides = [1, 1]} : vector<1x512xf32> to vector<1x128xf32>
    %110 = math.tanh %109 : vector<1x128xf32>
    %111 = vector.extract_strided_slice %96 {offsets = [0, 384], sizes = [1, 128], strides = [1, 1]} : vector<1x512xf32> to vector<1x128xf32>
    %112 = arith.negf %111 : vector<1x128xf32>
    %113 = math.exp %112 : vector<1x128xf32>
    %cst_25 = arith.constant 1.000000e+00 : f32
    %114 = vector.broadcast %cst_25 : f32 to vector<1x128xf32>
    %115 = arith.addf %114, %113 : vector<1x128xf32>
    %116 = arith.divf %114, %115 : vector<1x128xf32>
    %117 = arith.mulf %108, %91 : vector<1x128xf32>
    %118 = arith.mulf %102, %110 : vector<1x128xf32>
    %119 = arith.addf %117, %118 : vector<1x128xf32>
    %120 = math.tanh %119 : vector<1x128xf32>
    %121 = arith.mulf %116, %120 : vector<1x128xf32>
    %122 = vector.extract_strided_slice %7 {offsets = [4, 0], sizes = [1, 512], strides = [1, 1]} : vector<8x512xf32> to vector<1x512xf32>
    %cst_26 = arith.constant dense<0.000000e+00> : vector<1x512xf32>
    %123 = tpu.matmul %121, %3, %cst_26 {dimension_numbers = #tpu.dot_dimension_numbers<[1], [0], [0], [1], [0, 0, 1, 1], [], []>} : vector<1x128xf32>, vector<128x512xf32>, vector<1x512xf32> -> vector<1x512xf32>
    %124 = arith.addf %122, %123 : vector<1x512xf32>
    %125 = vector.extract_strided_slice %124 {offsets = [0, 0], sizes = [1, 128], strides = [1, 1]} : vector<1x512xf32> to vector<1x128xf32>
    %126 = arith.negf %125 : vector<1x128xf32>
    %127 = math.exp %126 : vector<1x128xf32>
    %cst_27 = arith.constant 1.000000e+00 : f32
    %128 = vector.broadcast %cst_27 : f32 to vector<1x128xf32>
    %129 = arith.addf %128, %127 : vector<1x128xf32>
    %130 = arith.divf %128, %129 : vector<1x128xf32>
    %131 = vector.extract_strided_slice %124 {offsets = [0, 128], sizes = [1, 128], strides = [1, 1]} : vector<1x512xf32> to vector<1x128xf32>
    %132 = arith.negf %131 : vector<1x128xf32>
    %133 = math.exp %132 : vector<1x128xf32>
    %cst_28 = arith.constant 1.000000e+00 : f32
    %134 = vector.broadcast %cst_28 : f32 to vector<1x128xf32>
    %135 = arith.addf %134, %133 : vector<1x128xf32>
    %136 = arith.divf %134, %135 : vector<1x128xf32>
    %137 = vector.extract_strided_slice %124 {offsets = [0, 256], sizes = [1, 128], strides = [1, 1]} : vector<1x512xf32> to vector<1x128xf32>
    %138 = math.tanh %137 : vector<1x128xf32>
    %139 = vector.extract_strided_slice %124 {offsets = [0, 384], sizes = [1, 128], strides = [1, 1]} : vector<1x512xf32> to vector<1x128xf32>
    %140 = arith.negf %139 : vector<1x128xf32>
    %141 = math.exp %140 : vector<1x128xf32>
    %cst_29 = arith.constant 1.000000e+00 : f32
    %142 = vector.broadcast %cst_29 : f32 to vector<1x128xf32>
    %143 = arith.addf %142, %141 : vector<1x128xf32>
    %144 = arith.divf %142, %143 : vector<1x128xf32>
    %145 = arith.mulf %136, %119 : vector<1x128xf32>
    %146 = arith.mulf %130, %138 : vector<1x128xf32>
    %147 = arith.addf %145, %146 : vector<1x128xf32>
    %148 = math.tanh %147 : vector<1x128xf32>
    %149 = arith.mulf %144, %148 : vector<1x128xf32>
    %150 = vector.extract_strided_slice %7 {offsets = [5, 0], sizes = [1, 512], strides = [1, 1]} : vector<8x512xf32> to vector<1x512xf32>
    %cst_30 = arith.constant dense<0.000000e+00> : vector<1x512xf32>
    %151 = tpu.matmul %149, %3, %cst_30 {dimension_numbers = #tpu.dot_dimension_numbers<[1], [0], [0], [1], [0, 0, 1, 1], [], []>} : vector<1x128xf32>, vector<128x512xf32>, vector<1x512xf32> -> vector<1x512xf32>
    %152 = arith.addf %150, %151 : vector<1x512xf32>
    %153 = vector.extract_strided_slice %152 {offsets = [0, 0], sizes = [1, 128], strides = [1, 1]} : vector<1x512xf32> to vector<1x128xf32>
    %154 = arith.negf %153 : vector<1x128xf32>
    %155 = math.exp %154 : vector<1x128xf32>
    %cst_31 = arith.constant 1.000000e+00 : f32
    %156 = vector.broadcast %cst_31 : f32 to vector<1x128xf32>
    %157 = arith.addf %156, %155 : vector<1x128xf32>
    %158 = arith.divf %156, %157 : vector<1x128xf32>
    %159 = vector.extract_strided_slice %152 {offsets = [0, 128], sizes = [1, 128], strides = [1, 1]} : vector<1x512xf32> to vector<1x128xf32>
    %160 = arith.negf %159 : vector<1x128xf32>
    %161 = math.exp %160 : vector<1x128xf32>
    %cst_32 = arith.constant 1.000000e+00 : f32
    %162 = vector.broadcast %cst_32 : f32 to vector<1x128xf32>
    %163 = arith.addf %162, %161 : vector<1x128xf32>
    %164 = arith.divf %162, %163 : vector<1x128xf32>
    %165 = vector.extract_strided_slice %152 {offsets = [0, 256], sizes = [1, 128], strides = [1, 1]} : vector<1x512xf32> to vector<1x128xf32>
    %166 = math.tanh %165 : vector<1x128xf32>
    %167 = vector.extract_strided_slice %152 {offsets = [0, 384], sizes = [1, 128], strides = [1, 1]} : vector<1x512xf32> to vector<1x128xf32>
    %168 = arith.negf %167 : vector<1x128xf32>
    %169 = math.exp %168 : vector<1x128xf32>
    %cst_33 = arith.constant 1.000000e+00 : f32
    %170 = vector.broadcast %cst_33 : f32 to vector<1x128xf32>
    %171 = arith.addf %170, %169 : vector<1x128xf32>
    %172 = arith.divf %170, %171 : vector<1x128xf32>
    %173 = arith.mulf %164, %147 : vector<1x128xf32>
    %174 = arith.mulf %158, %166 : vector<1x128xf32>
    %175 = arith.addf %173, %174 : vector<1x128xf32>
    %176 = math.tanh %175 : vector<1x128xf32>
    %177 = arith.mulf %172, %176 : vector<1x128xf32>
    %178 = vector.extract_strided_slice %7 {offsets = [6, 0], sizes = [1, 512], strides = [1, 1]} : vector<8x512xf32> to vector<1x512xf32>
    %cst_34 = arith.constant dense<0.000000e+00> : vector<1x512xf32>
    %179 = tpu.matmul %177, %3, %cst_34 {dimension_numbers = #tpu.dot_dimension_numbers<[1], [0], [0], [1], [0, 0, 1, 1], [], []>} : vector<1x128xf32>, vector<128x512xf32>, vector<1x512xf32> -> vector<1x512xf32>
    %180 = arith.addf %178, %179 : vector<1x512xf32>
    %181 = vector.extract_strided_slice %180 {offsets = [0, 0], sizes = [1, 128], strides = [1, 1]} : vector<1x512xf32> to vector<1x128xf32>
    %182 = arith.negf %181 : vector<1x128xf32>
    %183 = math.exp %182 : vector<1x128xf32>
    %cst_35 = arith.constant 1.000000e+00 : f32
    %184 = vector.broadcast %cst_35 : f32 to vector<1x128xf32>
    %185 = arith.addf %184, %183 : vector<1x128xf32>
    %186 = arith.divf %184, %185 : vector<1x128xf32>
    %187 = vector.extract_strided_slice %180 {offsets = [0, 128], sizes = [1, 128], strides = [1, 1]} : vector<1x512xf32> to vector<1x128xf32>
    %188 = arith.negf %187 : vector<1x128xf32>
    %189 = math.exp %188 : vector<1x128xf32>
    %cst_36 = arith.constant 1.000000e+00 : f32
    %190 = vector.broadcast %cst_36 : f32 to vector<1x128xf32>
    %191 = arith.addf %190, %189 : vector<1x128xf32>
    %192 = arith.divf %190, %191 : vector<1x128xf32>
    %193 = vector.extract_strided_slice %180 {offsets = [0, 256], sizes = [1, 128], strides = [1, 1]} : vector<1x512xf32> to vector<1x128xf32>
    %194 = math.tanh %193 : vector<1x128xf32>
    %195 = vector.extract_strided_slice %180 {offsets = [0, 384], sizes = [1, 128], strides = [1, 1]} : vector<1x512xf32> to vector<1x128xf32>
    %196 = arith.negf %195 : vector<1x128xf32>
    %197 = math.exp %196 : vector<1x128xf32>
    %cst_37 = arith.constant 1.000000e+00 : f32
    %198 = vector.broadcast %cst_37 : f32 to vector<1x128xf32>
    %199 = arith.addf %198, %197 : vector<1x128xf32>
    %200 = arith.divf %198, %199 : vector<1x128xf32>
    %201 = arith.mulf %192, %175 : vector<1x128xf32>
    %202 = arith.mulf %186, %194 : vector<1x128xf32>
    %203 = arith.addf %201, %202 : vector<1x128xf32>
    %204 = math.tanh %203 : vector<1x128xf32>
    %205 = arith.mulf %200, %204 : vector<1x128xf32>
    %206 = vector.extract_strided_slice %7 {offsets = [7, 0], sizes = [1, 512], strides = [1, 1]} : vector<8x512xf32> to vector<1x512xf32>
    %cst_38 = arith.constant dense<0.000000e+00> : vector<1x512xf32>
    %207 = tpu.matmul %205, %3, %cst_38 {dimension_numbers = #tpu.dot_dimension_numbers<[1], [0], [0], [1], [0, 0, 1, 1], [], []>} : vector<1x128xf32>, vector<128x512xf32>, vector<1x512xf32> -> vector<1x512xf32>
    %208 = arith.addf %206, %207 : vector<1x512xf32>
    %209 = vector.extract_strided_slice %208 {offsets = [0, 0], sizes = [1, 128], strides = [1, 1]} : vector<1x512xf32> to vector<1x128xf32>
    %210 = arith.negf %209 : vector<1x128xf32>
    %211 = math.exp %210 : vector<1x128xf32>
    %cst_39 = arith.constant 1.000000e+00 : f32
    %212 = vector.broadcast %cst_39 : f32 to vector<1x128xf32>
    %213 = arith.addf %212, %211 : vector<1x128xf32>
    %214 = arith.divf %212, %213 : vector<1x128xf32>
    %215 = vector.extract_strided_slice %208 {offsets = [0, 128], sizes = [1, 128], strides = [1, 1]} : vector<1x512xf32> to vector<1x128xf32>
    %216 = arith.negf %215 : vector<1x128xf32>
    %217 = math.exp %216 : vector<1x128xf32>
    %cst_40 = arith.constant 1.000000e+00 : f32
    %218 = vector.broadcast %cst_40 : f32 to vector<1x128xf32>
    %219 = arith.addf %218, %217 : vector<1x128xf32>
    %220 = arith.divf %218, %219 : vector<1x128xf32>
    %221 = vector.extract_strided_slice %208 {offsets = [0, 256], sizes = [1, 128], strides = [1, 1]} : vector<1x512xf32> to vector<1x128xf32>
    %222 = math.tanh %221 : vector<1x128xf32>
    %223 = vector.extract_strided_slice %208 {offsets = [0, 384], sizes = [1, 128], strides = [1, 1]} : vector<1x512xf32> to vector<1x128xf32>
    %224 = arith.negf %223 : vector<1x128xf32>
    %225 = math.exp %224 : vector<1x128xf32>
    %cst_41 = arith.constant 1.000000e+00 : f32
    %226 = vector.broadcast %cst_41 : f32 to vector<1x128xf32>
    %227 = arith.addf %226, %225 : vector<1x128xf32>
    %228 = arith.divf %226, %227 : vector<1x128xf32>
    %229 = arith.mulf %220, %203 : vector<1x128xf32>
    %230 = arith.mulf %214, %222 : vector<1x128xf32>
    %231 = arith.addf %229, %230 : vector<1x128xf32>
    %232 = math.tanh %231 : vector<1x128xf32>
    %233 = arith.mulf %228, %232 : vector<1x128xf32>
    %234 = tpu.concatenate %37, %65, %93, %121, %149, %177, %205, %233 in 0 : vector<1x128xf32>, vector<1x128xf32>, vector<1x128xf32>, vector<1x128xf32>, vector<1x128xf32>, vector<1x128xf32>, vector<1x128xf32>, vector<1x128xf32> -> vector<8x128xf32>
    %c0_42 = arith.constant 0 : index
    %c0_43 = arith.constant 0 : index
    %235 = vector.load %arg5[%c0_42, %c0_43] : memref<768x512xf32, #tpu.memory_space<vmem>>, vector<768x512xf32>
    %c0_44 = arith.constant 0 : index
    %c0_45 = arith.constant 0 : index
    %236 = vector.load %arg6[%c0_44, %c0_45] : memref<128x512xf32, #tpu.memory_space<vmem>>, vector<128x512xf32>
    %c0_46 = arith.constant 0 : index
    %c0_47 = arith.constant 0 : index
    %237 = vector.load %arg7[%c0_46, %c0_47] : memref<1x512xf32, #tpu.memory_space<vmem>>, vector<1x512xf32>
    %cst_48 = arith.constant dense<0.000000e+00> : vector<8x512xf32>
    %238 = tpu.matmul %1, %235, %cst_48 {dimension_numbers = #tpu.dot_dimension_numbers<[1], [0], [0], [1], [0, 0, 1, 1], [], []>} : vector<8x768xf32>, vector<768x512xf32>, vector<8x512xf32> -> vector<8x512xf32>
    %239 = vector.broadcast %237 : vector<1x512xf32> to vector<8x512xf32>
    %240 = arith.addf %238, %239 : vector<8x512xf32>
    %cst_49 = arith.constant 0.000000e+00 : f32
    %241 = vector.broadcast %cst_49 : f32 to vector<1x128xf32>
    %cst_50 = arith.constant 0.000000e+00 : f32
    %242 = vector.broadcast %cst_50 : f32 to vector<1x128xf32>
    %243 = vector.extract_strided_slice %240 {offsets = [7, 0], sizes = [1, 512], strides = [1, 1]} : vector<8x512xf32> to vector<1x512xf32>
    %cst_51 = arith.constant dense<0.000000e+00> : vector<1x512xf32>
    %244 = tpu.matmul %241, %236, %cst_51 {dimension_numbers = #tpu.dot_dimension_numbers<[1], [0], [0], [1], [0, 0, 1, 1], [], []>} : vector<1x128xf32>, vector<128x512xf32>, vector<1x512xf32> -> vector<1x512xf32>
    %245 = arith.addf %243, %244 : vector<1x512xf32>
    %246 = vector.extract_strided_slice %245 {offsets = [0, 0], sizes = [1, 128], strides = [1, 1]} : vector<1x512xf32> to vector<1x128xf32>
    %247 = arith.negf %246 : vector<1x128xf32>
    %248 = math.exp %247 : vector<1x128xf32>
    %cst_52 = arith.constant 1.000000e+00 : f32
    %249 = vector.broadcast %cst_52 : f32 to vector<1x128xf32>
    %250 = arith.addf %249, %248 : vector<1x128xf32>
    %251 = arith.divf %249, %250 : vector<1x128xf32>
    %252 = vector.extract_strided_slice %245 {offsets = [0, 128], sizes = [1, 128], strides = [1, 1]} : vector<1x512xf32> to vector<1x128xf32>
    %253 = arith.negf %252 : vector<1x128xf32>
    %254 = math.exp %253 : vector<1x128xf32>
    %cst_53 = arith.constant 1.000000e+00 : f32
    %255 = vector.broadcast %cst_53 : f32 to vector<1x128xf32>
    %256 = arith.addf %255, %254 : vector<1x128xf32>
    %257 = arith.divf %255, %256 : vector<1x128xf32>
    %258 = vector.extract_strided_slice %245 {offsets = [0, 256], sizes = [1, 128], strides = [1, 1]} : vector<1x512xf32> to vector<1x128xf32>
    %259 = math.tanh %258 : vector<1x128xf32>
    %260 = vector.extract_strided_slice %245 {offsets = [0, 384], sizes = [1, 128], strides = [1, 1]} : vector<1x512xf32> to vector<1x128xf32>
    %261 = arith.negf %260 : vector<1x128xf32>
    %262 = math.exp %261 : vector<1x128xf32>
    %cst_54 = arith.constant 1.000000e+00 : f32
    %263 = vector.broadcast %cst_54 : f32 to vector<1x128xf32>
    %264 = arith.addf %263, %262 : vector<1x128xf32>
    %265 = arith.divf %263, %264 : vector<1x128xf32>
    %266 = arith.mulf %257, %242 : vector<1x128xf32>
    %267 = arith.mulf %251, %259 : vector<1x128xf32>
    %268 = arith.addf %266, %267 : vector<1x128xf32>
    %269 = math.tanh %268 : vector<1x128xf32>
    %270 = arith.mulf %265, %269 : vector<1x128xf32>
    %271 = vector.extract_strided_slice %240 {offsets = [6, 0], sizes = [1, 512], strides = [1, 1]} : vector<8x512xf32> to vector<1x512xf32>
    %cst_55 = arith.constant dense<0.000000e+00> : vector<1x512xf32>
    %272 = tpu.matmul %270, %236, %cst_55 {dimension_numbers = #tpu.dot_dimension_numbers<[1], [0], [0], [1], [0, 0, 1, 1], [], []>} : vector<1x128xf32>, vector<128x512xf32>, vector<1x512xf32> -> vector<1x512xf32>
    %273 = arith.addf %271, %272 : vector<1x512xf32>
    %274 = vector.extract_strided_slice %273 {offsets = [0, 0], sizes = [1, 128], strides = [1, 1]} : vector<1x512xf32> to vector<1x128xf32>
    %275 = arith.negf %274 : vector<1x128xf32>
    %276 = math.exp %275 : vector<1x128xf32>
    %cst_56 = arith.constant 1.000000e+00 : f32
    %277 = vector.broadcast %cst_56 : f32 to vector<1x128xf32>
    %278 = arith.addf %277, %276 : vector<1x128xf32>
    %279 = arith.divf %277, %278 : vector<1x128xf32>
    %280 = vector.extract_strided_slice %273 {offsets = [0, 128], sizes = [1, 128], strides = [1, 1]} : vector<1x512xf32> to vector<1x128xf32>
    %281 = arith.negf %280 : vector<1x128xf32>
    %282 = math.exp %281 : vector<1x128xf32>
    %cst_57 = arith.constant 1.000000e+00 : f32
    %283 = vector.broadcast %cst_57 : f32 to vector<1x128xf32>
    %284 = arith.addf %283, %282 : vector<1x128xf32>
    %285 = arith.divf %283, %284 : vector<1x128xf32>
    %286 = vector.extract_strided_slice %273 {offsets = [0, 256], sizes = [1, 128], strides = [1, 1]} : vector<1x512xf32> to vector<1x128xf32>
    %287 = math.tanh %286 : vector<1x128xf32>
    %288 = vector.extract_strided_slice %273 {offsets = [0, 384], sizes = [1, 128], strides = [1, 1]} : vector<1x512xf32> to vector<1x128xf32>
    %289 = arith.negf %288 : vector<1x128xf32>
    %290 = math.exp %289 : vector<1x128xf32>
    %cst_58 = arith.constant 1.000000e+00 : f32
    %291 = vector.broadcast %cst_58 : f32 to vector<1x128xf32>
    %292 = arith.addf %291, %290 : vector<1x128xf32>
    %293 = arith.divf %291, %292 : vector<1x128xf32>
    %294 = arith.mulf %285, %268 : vector<1x128xf32>
    %295 = arith.mulf %279, %287 : vector<1x128xf32>
    %296 = arith.addf %294, %295 : vector<1x128xf32>
    %297 = math.tanh %296 : vector<1x128xf32>
    %298 = arith.mulf %293, %297 : vector<1x128xf32>
    %299 = vector.extract_strided_slice %240 {offsets = [5, 0], sizes = [1, 512], strides = [1, 1]} : vector<8x512xf32> to vector<1x512xf32>
    %cst_59 = arith.constant dense<0.000000e+00> : vector<1x512xf32>
    %300 = tpu.matmul %298, %236, %cst_59 {dimension_numbers = #tpu.dot_dimension_numbers<[1], [0], [0], [1], [0, 0, 1, 1], [], []>} : vector<1x128xf32>, vector<128x512xf32>, vector<1x512xf32> -> vector<1x512xf32>
    %301 = arith.addf %299, %300 : vector<1x512xf32>
    %302 = vector.extract_strided_slice %301 {offsets = [0, 0], sizes = [1, 128], strides = [1, 1]} : vector<1x512xf32> to vector<1x128xf32>
    %303 = arith.negf %302 : vector<1x128xf32>
    %304 = math.exp %303 : vector<1x128xf32>
    %cst_60 = arith.constant 1.000000e+00 : f32
    %305 = vector.broadcast %cst_60 : f32 to vector<1x128xf32>
    %306 = arith.addf %305, %304 : vector<1x128xf32>
    %307 = arith.divf %305, %306 : vector<1x128xf32>
    %308 = vector.extract_strided_slice %301 {offsets = [0, 128], sizes = [1, 128], strides = [1, 1]} : vector<1x512xf32> to vector<1x128xf32>
    %309 = arith.negf %308 : vector<1x128xf32>
    %310 = math.exp %309 : vector<1x128xf32>
    %cst_61 = arith.constant 1.000000e+00 : f32
    %311 = vector.broadcast %cst_61 : f32 to vector<1x128xf32>
    %312 = arith.addf %311, %310 : vector<1x128xf32>
    %313 = arith.divf %311, %312 : vector<1x128xf32>
    %314 = vector.extract_strided_slice %301 {offsets = [0, 256], sizes = [1, 128], strides = [1, 1]} : vector<1x512xf32> to vector<1x128xf32>
    %315 = math.tanh %314 : vector<1x128xf32>
    %316 = vector.extract_strided_slice %301 {offsets = [0, 384], sizes = [1, 128], strides = [1, 1]} : vector<1x512xf32> to vector<1x128xf32>
    %317 = arith.negf %316 : vector<1x128xf32>
    %318 = math.exp %317 : vector<1x128xf32>
    %cst_62 = arith.constant 1.000000e+00 : f32
    %319 = vector.broadcast %cst_62 : f32 to vector<1x128xf32>
    %320 = arith.addf %319, %318 : vector<1x128xf32>
    %321 = arith.divf %319, %320 : vector<1x128xf32>
    %322 = arith.mulf %313, %296 : vector<1x128xf32>
    %323 = arith.mulf %307, %315 : vector<1x128xf32>
    %324 = arith.addf %322, %323 : vector<1x128xf32>
    %325 = math.tanh %324 : vector<1x128xf32>
    %326 = arith.mulf %321, %325 : vector<1x128xf32>
    %327 = vector.extract_strided_slice %240 {offsets = [4, 0], sizes = [1, 512], strides = [1, 1]} : vector<8x512xf32> to vector<1x512xf32>
    %cst_63 = arith.constant dense<0.000000e+00> : vector<1x512xf32>
    %328 = tpu.matmul %326, %236, %cst_63 {dimension_numbers = #tpu.dot_dimension_numbers<[1], [0], [0], [1], [0, 0, 1, 1], [], []>} : vector<1x128xf32>, vector<128x512xf32>, vector<1x512xf32> -> vector<1x512xf32>
    %329 = arith.addf %327, %328 : vector<1x512xf32>
    %330 = vector.extract_strided_slice %329 {offsets = [0, 0], sizes = [1, 128], strides = [1, 1]} : vector<1x512xf32> to vector<1x128xf32>
    %331 = arith.negf %330 : vector<1x128xf32>
    %332 = math.exp %331 : vector<1x128xf32>
    %cst_64 = arith.constant 1.000000e+00 : f32
    %333 = vector.broadcast %cst_64 : f32 to vector<1x128xf32>
    %334 = arith.addf %333, %332 : vector<1x128xf32>
    %335 = arith.divf %333, %334 : vector<1x128xf32>
    %336 = vector.extract_strided_slice %329 {offsets = [0, 128], sizes = [1, 128], strides = [1, 1]} : vector<1x512xf32> to vector<1x128xf32>
    %337 = arith.negf %336 : vector<1x128xf32>
    %338 = math.exp %337 : vector<1x128xf32>
    %cst_65 = arith.constant 1.000000e+00 : f32
    %339 = vector.broadcast %cst_65 : f32 to vector<1x128xf32>
    %340 = arith.addf %339, %338 : vector<1x128xf32>
    %341 = arith.divf %339, %340 : vector<1x128xf32>
    %342 = vector.extract_strided_slice %329 {offsets = [0, 256], sizes = [1, 128], strides = [1, 1]} : vector<1x512xf32> to vector<1x128xf32>
    %343 = math.tanh %342 : vector<1x128xf32>
    %344 = vector.extract_strided_slice %329 {offsets = [0, 384], sizes = [1, 128], strides = [1, 1]} : vector<1x512xf32> to vector<1x128xf32>
    %345 = arith.negf %344 : vector<1x128xf32>
    %346 = math.exp %345 : vector<1x128xf32>
    %cst_66 = arith.constant 1.000000e+00 : f32
    %347 = vector.broadcast %cst_66 : f32 to vector<1x128xf32>
    %348 = arith.addf %347, %346 : vector<1x128xf32>
    %349 = arith.divf %347, %348 : vector<1x128xf32>
    %350 = arith.mulf %341, %324 : vector<1x128xf32>
    %351 = arith.mulf %335, %343 : vector<1x128xf32>
    %352 = arith.addf %350, %351 : vector<1x128xf32>
    %353 = math.tanh %352 : vector<1x128xf32>
    %354 = arith.mulf %349, %353 : vector<1x128xf32>
    %355 = vector.extract_strided_slice %240 {offsets = [3, 0], sizes = [1, 512], strides = [1, 1]} : vector<8x512xf32> to vector<1x512xf32>
    %cst_67 = arith.constant dense<0.000000e+00> : vector<1x512xf32>
    %356 = tpu.matmul %354, %236, %cst_67 {dimension_numbers = #tpu.dot_dimension_numbers<[1], [0], [0], [1], [0, 0, 1, 1], [], []>} : vector<1x128xf32>, vector<128x512xf32>, vector<1x512xf32> -> vector<1x512xf32>
    %357 = arith.addf %355, %356 : vector<1x512xf32>
    %358 = vector.extract_strided_slice %357 {offsets = [0, 0], sizes = [1, 128], strides = [1, 1]} : vector<1x512xf32> to vector<1x128xf32>
    %359 = arith.negf %358 : vector<1x128xf32>
    %360 = math.exp %359 : vector<1x128xf32>
    %cst_68 = arith.constant 1.000000e+00 : f32
    %361 = vector.broadcast %cst_68 : f32 to vector<1x128xf32>
    %362 = arith.addf %361, %360 : vector<1x128xf32>
    %363 = arith.divf %361, %362 : vector<1x128xf32>
    %364 = vector.extract_strided_slice %357 {offsets = [0, 128], sizes = [1, 128], strides = [1, 1]} : vector<1x512xf32> to vector<1x128xf32>
    %365 = arith.negf %364 : vector<1x128xf32>
    %366 = math.exp %365 : vector<1x128xf32>
    %cst_69 = arith.constant 1.000000e+00 : f32
    %367 = vector.broadcast %cst_69 : f32 to vector<1x128xf32>
    %368 = arith.addf %367, %366 : vector<1x128xf32>
    %369 = arith.divf %367, %368 : vector<1x128xf32>
    %370 = vector.extract_strided_slice %357 {offsets = [0, 256], sizes = [1, 128], strides = [1, 1]} : vector<1x512xf32> to vector<1x128xf32>
    %371 = math.tanh %370 : vector<1x128xf32>
    %372 = vector.extract_strided_slice %357 {offsets = [0, 384], sizes = [1, 128], strides = [1, 1]} : vector<1x512xf32> to vector<1x128xf32>
    %373 = arith.negf %372 : vector<1x128xf32>
    %374 = math.exp %373 : vector<1x128xf32>
    %cst_70 = arith.constant 1.000000e+00 : f32
    %375 = vector.broadcast %cst_70 : f32 to vector<1x128xf32>
    %376 = arith.addf %375, %374 : vector<1x128xf32>
    %377 = arith.divf %375, %376 : vector<1x128xf32>
    %378 = arith.mulf %369, %352 : vector<1x128xf32>
    %379 = arith.mulf %363, %371 : vector<1x128xf32>
    %380 = arith.addf %378, %379 : vector<1x128xf32>
    %381 = math.tanh %380 : vector<1x128xf32>
    %382 = arith.mulf %377, %381 : vector<1x128xf32>
    %383 = vector.extract_strided_slice %240 {offsets = [2, 0], sizes = [1, 512], strides = [1, 1]} : vector<8x512xf32> to vector<1x512xf32>
    %cst_71 = arith.constant dense<0.000000e+00> : vector<1x512xf32>
    %384 = tpu.matmul %382, %236, %cst_71 {dimension_numbers = #tpu.dot_dimension_numbers<[1], [0], [0], [1], [0, 0, 1, 1], [], []>} : vector<1x128xf32>, vector<128x512xf32>, vector<1x512xf32> -> vector<1x512xf32>
    %385 = arith.addf %383, %384 : vector<1x512xf32>
    %386 = vector.extract_strided_slice %385 {offsets = [0, 0], sizes = [1, 128], strides = [1, 1]} : vector<1x512xf32> to vector<1x128xf32>
    %387 = arith.negf %386 : vector<1x128xf32>
    %388 = math.exp %387 : vector<1x128xf32>
    %cst_72 = arith.constant 1.000000e+00 : f32
    %389 = vector.broadcast %cst_72 : f32 to vector<1x128xf32>
    %390 = arith.addf %389, %388 : vector<1x128xf32>
    %391 = arith.divf %389, %390 : vector<1x128xf32>
    %392 = vector.extract_strided_slice %385 {offsets = [0, 128], sizes = [1, 128], strides = [1, 1]} : vector<1x512xf32> to vector<1x128xf32>
    %393 = arith.negf %392 : vector<1x128xf32>
    %394 = math.exp %393 : vector<1x128xf32>
    %cst_73 = arith.constant 1.000000e+00 : f32
    %395 = vector.broadcast %cst_73 : f32 to vector<1x128xf32>
    %396 = arith.addf %395, %394 : vector<1x128xf32>
    %397 = arith.divf %395, %396 : vector<1x128xf32>
    %398 = vector.extract_strided_slice %385 {offsets = [0, 256], sizes = [1, 128], strides = [1, 1]} : vector<1x512xf32> to vector<1x128xf32>
    %399 = math.tanh %398 : vector<1x128xf32>
    %400 = vector.extract_strided_slice %385 {offsets = [0, 384], sizes = [1, 128], strides = [1, 1]} : vector<1x512xf32> to vector<1x128xf32>
    %401 = arith.negf %400 : vector<1x128xf32>
    %402 = math.exp %401 : vector<1x128xf32>
    %cst_74 = arith.constant 1.000000e+00 : f32
    %403 = vector.broadcast %cst_74 : f32 to vector<1x128xf32>
    %404 = arith.addf %403, %402 : vector<1x128xf32>
    %405 = arith.divf %403, %404 : vector<1x128xf32>
    %406 = arith.mulf %397, %380 : vector<1x128xf32>
    %407 = arith.mulf %391, %399 : vector<1x128xf32>
    %408 = arith.addf %406, %407 : vector<1x128xf32>
    %409 = math.tanh %408 : vector<1x128xf32>
    %410 = arith.mulf %405, %409 : vector<1x128xf32>
    %411 = vector.extract_strided_slice %240 {offsets = [1, 0], sizes = [1, 512], strides = [1, 1]} : vector<8x512xf32> to vector<1x512xf32>
    %cst_75 = arith.constant dense<0.000000e+00> : vector<1x512xf32>
    %412 = tpu.matmul %410, %236, %cst_75 {dimension_numbers = #tpu.dot_dimension_numbers<[1], [0], [0], [1], [0, 0, 1, 1], [], []>} : vector<1x128xf32>, vector<128x512xf32>, vector<1x512xf32> -> vector<1x512xf32>
    %413 = arith.addf %411, %412 : vector<1x512xf32>
    %414 = vector.extract_strided_slice %413 {offsets = [0, 0], sizes = [1, 128], strides = [1, 1]} : vector<1x512xf32> to vector<1x128xf32>
    %415 = arith.negf %414 : vector<1x128xf32>
    %416 = math.exp %415 : vector<1x128xf32>
    %cst_76 = arith.constant 1.000000e+00 : f32
    %417 = vector.broadcast %cst_76 : f32 to vector<1x128xf32>
    %418 = arith.addf %417, %416 : vector<1x128xf32>
    %419 = arith.divf %417, %418 : vector<1x128xf32>
    %420 = vector.extract_strided_slice %413 {offsets = [0, 128], sizes = [1, 128], strides = [1, 1]} : vector<1x512xf32> to vector<1x128xf32>
    %421 = arith.negf %420 : vector<1x128xf32>
    %422 = math.exp %421 : vector<1x128xf32>
    %cst_77 = arith.constant 1.000000e+00 : f32
    %423 = vector.broadcast %cst_77 : f32 to vector<1x128xf32>
    %424 = arith.addf %423, %422 : vector<1x128xf32>
    %425 = arith.divf %423, %424 : vector<1x128xf32>
    %426 = vector.extract_strided_slice %413 {offsets = [0, 256], sizes = [1, 128], strides = [1, 1]} : vector<1x512xf32> to vector<1x128xf32>
    %427 = math.tanh %426 : vector<1x128xf32>
    %428 = vector.extract_strided_slice %413 {offsets = [0, 384], sizes = [1, 128], strides = [1, 1]} : vector<1x512xf32> to vector<1x128xf32>
    %429 = arith.negf %428 : vector<1x128xf32>
    %430 = math.exp %429 : vector<1x128xf32>
    %cst_78 = arith.constant 1.000000e+00 : f32
    %431 = vector.broadcast %cst_78 : f32 to vector<1x128xf32>
    %432 = arith.addf %431, %430 : vector<1x128xf32>
    %433 = arith.divf %431, %432 : vector<1x128xf32>
    %434 = arith.mulf %425, %408 : vector<1x128xf32>
    %435 = arith.mulf %419, %427 : vector<1x128xf32>
    %436 = arith.addf %434, %435 : vector<1x128xf32>
    %437 = math.tanh %436 : vector<1x128xf32>
    %438 = arith.mulf %433, %437 : vector<1x128xf32>
    %439 = vector.extract_strided_slice %240 {offsets = [0, 0], sizes = [1, 512], strides = [1, 1]} : vector<8x512xf32> to vector<1x512xf32>
    %cst_79 = arith.constant dense<0.000000e+00> : vector<1x512xf32>
    %440 = tpu.matmul %438, %236, %cst_79 {dimension_numbers = #tpu.dot_dimension_numbers<[1], [0], [0], [1], [0, 0, 1, 1], [], []>} : vector<1x128xf32>, vector<128x512xf32>, vector<1x512xf32> -> vector<1x512xf32>
    %441 = arith.addf %439, %440 : vector<1x512xf32>
    %442 = vector.extract_strided_slice %441 {offsets = [0, 0], sizes = [1, 128], strides = [1, 1]} : vector<1x512xf32> to vector<1x128xf32>
    %443 = arith.negf %442 : vector<1x128xf32>
    %444 = math.exp %443 : vector<1x128xf32>
    %cst_80 = arith.constant 1.000000e+00 : f32
    %445 = vector.broadcast %cst_80 : f32 to vector<1x128xf32>
    %446 = arith.addf %445, %444 : vector<1x128xf32>
    %447 = arith.divf %445, %446 : vector<1x128xf32>
    %448 = vector.extract_strided_slice %441 {offsets = [0, 128], sizes = [1, 128], strides = [1, 1]} : vector<1x512xf32> to vector<1x128xf32>
    %449 = arith.negf %448 : vector<1x128xf32>
    %450 = math.exp %449 : vector<1x128xf32>
    %cst_81 = arith.constant 1.000000e+00 : f32
    %451 = vector.broadcast %cst_81 : f32 to vector<1x128xf32>
    %452 = arith.addf %451, %450 : vector<1x128xf32>
    %453 = arith.divf %451, %452 : vector<1x128xf32>
    %454 = vector.extract_strided_slice %441 {offsets = [0, 256], sizes = [1, 128], strides = [1, 1]} : vector<1x512xf32> to vector<1x128xf32>
    %455 = math.tanh %454 : vector<1x128xf32>
    %456 = vector.extract_strided_slice %441 {offsets = [0, 384], sizes = [1, 128], strides = [1, 1]} : vector<1x512xf32> to vector<1x128xf32>
    %457 = arith.negf %456 : vector<1x128xf32>
    %458 = math.exp %457 : vector<1x128xf32>
    %cst_82 = arith.constant 1.000000e+00 : f32
    %459 = vector.broadcast %cst_82 : f32 to vector<1x128xf32>
    %460 = arith.addf %459, %458 : vector<1x128xf32>
    %461 = arith.divf %459, %460 : vector<1x128xf32>
    %462 = arith.mulf %453, %436 : vector<1x128xf32>
    %463 = arith.mulf %447, %455 : vector<1x128xf32>
    %464 = arith.addf %462, %463 : vector<1x128xf32>
    %465 = math.tanh %464 : vector<1x128xf32>
    %466 = arith.mulf %461, %465 : vector<1x128xf32>
    %467 = tpu.concatenate %466, %438, %410, %382, %354, %326, %298, %270 in 0 : vector<1x128xf32>, vector<1x128xf32>, vector<1x128xf32>, vector<1x128xf32>, vector<1x128xf32>, vector<1x128xf32>, vector<1x128xf32>, vector<1x128xf32> -> vector<8x128xf32>
    %468 = tpu.concatenate %234, %467 in 1 : vector<8x128xf32>, vector<8x128xf32> -> vector<8x256xf32>
    %c0_83 = arith.constant 0 : index
    %c0_84 = arith.constant 0 : index
    %c0_85 = arith.constant 0 : index
    %469 = vector.load %arg8[%c0_83, %c0_84, %c0_85] : memref<1x8x256xf32, #tpu.memory_space<vmem>>, vector<1x8x256xf32>
    %470 = vector.shape_cast %469 : vector<1x8x256xf32> to vector<8x256xf32>
    %471 = vector.shape_cast %468 : vector<8x256xf32> to vector<1x8x256xf32>
    tpu.vector_store %arg8[%c0_83, %c0_84, %c0_85], %471 {strides = array<i32>} : memref<1x8x256xf32, #tpu.memory_space<vmem>>, vector<1x8x256xf32>,
    return
  }
  func.func @transform_0(%arg0: i32) -> (i32, i32, i32) {
    %c0_i32 = arith.constant 0 : i32
    %c0_i32_0 = arith.constant 0 : i32
    %c0_i32_1 = arith.constant 0 : i32
    return %arg0, %c0_i32, %c0_i32_0 : i32, i32, i32
  }
  func.func @transform_1(%arg0: i32) -> (i32, i32) {
    %c0_i32 = arith.constant 0 : i32
    %c0_i32_0 = arith.constant 0 : i32
    %c0_i32_1 = arith.constant 0 : i32
    return %c0_i32, %c0_i32_0 : i32, i32
  }
  func.func @transform_2(%arg0: i32) -> (i32, i32) {
    %c0_i32 = arith.constant 0 : i32
    %c0_i32_0 = arith.constant 0 : i32
    %c0_i32_1 = arith.constant 0 : i32
    return %c0_i32, %c0_i32_0 : i32, i32
  }
  func.func @transform_3(%arg0: i32) -> (i32, i32) {
    %c0_i32 = arith.constant 0 : i32
    %c0_i32_0 = arith.constant 0 : i32
    %c0_i32_1 = arith.constant 0 : i32
    return %c0_i32, %c0_i32_0 : i32, i32
  }
  func.func @transform_4(%arg0: i32) -> (i32, i32) {
    %c0_i32 = arith.constant 0 : i32
    %c0_i32_0 = arith.constant 0 : i32
    %c0_i32_1 = arith.constant 0 : i32
    return %c0_i32, %c0_i32_0 : i32, i32
  }
  func.func @transform_5(%arg0: i32) -> (i32, i32) {
    %c0_i32 = arith.constant 0 : i32
    %c0_i32_0 = arith.constant 0 : i32
    %c0_i32_1 = arith.constant 0 : i32
    return %c0_i32, %c0_i32_0 : i32, i32
  }
  func.func @transform_6(%arg0: i32) -> (i32, i32) {
    %c0_i32 = arith.constant 0 : i32
    %c0_i32_0 = arith.constant 0 : i32
    %c0_i32_1 = arith.constant 0 : i32
    return %c0_i32, %c0_i32_0 : i32, i32
  }
  func.func @transform_7(%arg0: i32) -> (i32, i32, i32) {
    %c0_i32 = arith.constant 0 : i32
    %c0_i32_0 = arith.constant 0 : i32
    %c0_i32_1 = arith.constant 0 : i32
    return %arg0, %c0_i32, %c0_i32_0 : i32, i32, i32
  }
}

</mosaic_0001>

<bundles_post_ra>
// kernel: tpu_custom_call.1
= control target key start
LH: loop header
LB: loop body
LE: loop exit
PB: predicated region body
PF: predicated region fallthrough
CT: control target
= control target key end

     0   :  { %s8051_s0 = inlined_call_operand.hbm [shape: f32[2,8,768], index: 0, kind: input, shape index: {}]   ;;  %s8052_s1 = inlined_call_operand.hbm [shape: f32[768,512], index: 1, kind: input, shape index: {}]   ;;  %s8053_s2 = inlined_call_operand.hbm [shape: f32[128,512], index: 2, kind: input, shape index: {}]   ;;  %s8054_s3 = inlined_call_operand.hbm [shape: f32[1,512], index: 3, kind: input, shape index: {}]   ;;  %s8055_s4 = inlined_call_operand.hbm [shape: f32[768,512], index: 4, kind: input, shape index: {}]   ;;  %s8056_s5 = inlined_call_operand.hbm [shape: f32[128,512], index: 5, kind: input, shape index: {}]   ;;  %s8057_s6 = inlined_call_operand.hbm [shape: f32[1,512], index: 6, kind: input, shape index: {}]   ;;  %s8058_s7 = inlined_call_operand.hbm [shape: f32[2,8,256], index: 7, kind: output, shape index: {}]  }
   0x1   :  { %8351 = sst [smem:[#allocation65_spill]] %s8052_s1 }
   0x2   :  { %8352 = sst [smem:[#allocation66_spill]] %s8053_s2 }
   0x3   :  { %8353 = sst [smem:[#allocation67_spill]] %s8054_s3 }
   0x4   :  { %12 = vsyncpa [#allocation3], 0 }
   0x5   :  { %14 = vsyncpa [#allocation3 + $0x1], 0 }
   0x6   :  { %15 = vsyncpa [#allocation6], 0 }
   0x7   :  { %16 = vsyncpa [#allocation9], 0 }
   0x8   :  { %17 = vsyncpa [#allocation12], 0 }
   0x9   :  { %18 = vsyncpa [#allocation4], 0 }
   0xa   :  { %20 = vsyncpa [#allocation4 + $0x1], 0  ;;  %s5968_s24 = smov 0   ;;  %s5970_s25 = smov 0  }
   0xb   :  { %s5972_s26 = smov 0   ;;  %s5974_s27 = smov 0  }
   0xc LB: > { %s8354_s1 = sld [smem:[#allocation65_spill]]  ;;  %s5992_s8 = sadd.s32 4294967295, %s5917_s27   ;;  %s5917_s27 = sphi %s5974_s27, %s8747_s27   ;;  %s5913_s26 = sphi %s5972_s26, %s8746_s26   ;;  %s5909_s25 = sphi %s5970_s25, %s8745_s25   ;;  %s5905_s24 = sphi %s5968_s24, %s8744_s24  }
   0xd   : > { %p5043_p0 = scmp.ge.s32.totalorder %s5917_s27, 1  ;;  %p47_p1 = scmp.eq.s32.totalorder %s5992_s8, 0 }
   0xe   : > { %p209_p2 = scmp.lt.s32.totalorder %s5917_s27, 3  ;;  %s5919_s10 = smov [#allocation5]  }
   0xf   : > { %s222_s11 = sshll.u32 %s5919_s10, 4  ;;  %s8356_s3 = sld [smem:[#allocation67_spill]]  ;;  %s223_s11 = int_to_ptr.vmem [resolvable:$true] %s222_s11 }
  0x10   : > { %p5997_p3 = pnand %p5043_p0, %p209_p2  ;;  %s274_s18 = sshll.u32 %s8056_s5, 4  ;;  %s275_s18 = int_to_ptr.hbm [resolvable:$true] %s274_s18 }
  0x11   : > { %s5920_s19 = smov [#allocation8]   ;;  %s5921_s21 = smov 512  }
  0x12   : > { %s220_s30 = sshll.u32 %s8354_s1, 4  ;;  %p5145_p4 = pneg %p5997_p3  ;;  %s221_s30 = int_to_ptr.hbm [resolvable:$true] %s220_s30 }
  0x13   : > { %s251_s20 = sshll.u32 %s5920_s19, 4  ;;  %s5922_s22 = smov 32   ;;  %s252_s20 = int_to_ptr.vmem [resolvable:$true] %s251_s20 }
  0x14   : > { %p6009_p6 = pnand %p5145_p4, %p47_p1  ;;  %s8358_s2 = sld [smem:[#allocation66_spill]] }
  0x15   : > { %s249_s14 = sshll.u32 %s8356_s3, 4  ;;  %s5923_s10 = smov [#allocation11]   ;;  %s250_s14 = int_to_ptr.hbm [resolvable:$true] %s249_s14 }
  0x16   : > { %5148 = dma.hbm_to_vmem [thread:$0]  (!%p6009_p6), %s221_s30, 49152, %s223_s11, [#allocation6], %s5921_s21, %s5921_s21, %s5922_s22  }
  0x17   : > { %5154 = dma.hbm_to_vmem [thread:$0]  (!%p6009_p6), %s250_s14, 64, %s252_s20, [#allocation9]  }
  0x18   : > { %s276_s12 = sshll.u32 %s5923_s10, 4  ;;  %s5924_s13 = smov [#allocation7]   ;;  %s277_s12 = int_to_ptr.vmem [resolvable:$true] %s276_s12 }
  0x19   : > { %5160 = dma.hbm_to_vmem [thread:$0]  (!%p6009_p6), %s275_s18, 8192, %s277_s12, [#allocation12], %s5921_s21, %s5921_s21, %s5922_s22  }
  0x1a   : > { %s234_s29 = sshll.u32 %s8358_s2, 4  ;;  %s236_s16 = sshll.u32 %s5924_s13, 4  ;;  %s235_s29 = int_to_ptr.hbm [resolvable:$true] %s234_s29  ;;  %s237_s16 = int_to_ptr.vmem [resolvable:$true] %s236_s16 }
  0x1b   : > { %s260_s14 = sshll.u32 %s8055_s4, 4  ;;  %s289_s18 = sshll.u32 %s8057_s6, 4  ;;  %s261_s14 = int_to_ptr.hbm [resolvable:$true] %s260_s14  ;;  %s290_s18 = int_to_ptr.hbm [resolvable:$true] %s289_s18 }
  0x1c   : > { %5151 = dma.hbm_to_vmem [thread:$0]  (!%p6009_p6), %s235_s29, 8192, %s237_s16, [#allocation6], %s5921_s21, %s5921_s21, %s5922_s22  }
  0x1d   : > { %s5925_s20 = smov [#allocation10]   ;;  %s5926_s28 = smov [#allocation13]  }
  0x1e   : > { %s262_s23 = sshll.u32 %s5925_s20, 4  ;;  %s291_s29 = sshll.u32 %s5926_s28, 4  ;;  %s263_s23 = int_to_ptr.vmem [resolvable:$true] %s262_s23  ;;  %s292_s29 = int_to_ptr.vmem [resolvable:$true] %s291_s29 }
  0x1f   : > { %5157 = dma.hbm_to_vmem [thread:$0]  (!%p6009_p6), %s261_s14, 49152, %s263_s23, [#allocation9], %s5921_s21, %s5921_s21, %s5922_s22  }
  0x20   : > { %5163 = dma.hbm_to_vmem [thread:$0]  (!%p6009_p6), %s290_s18, 64, %s292_s29, [#allocation12]  }
  0x21   : > { %s5042_s10 = sadd.s32 4294967294, %s5917_s27   ;;  %s6039_s12 = sadd.s32 1, %s5917_s27  }
  0x22   : > { %s30_s13 = ssub.s32 %s5917_s27, %s6039_s12  ;;  %s33_s16 = sadd.s32 1, %s5913_s26 }
  0x23   : > { %p31_p7 = scmp.eq.s32.totalorder %s30_s13, 0  ;;  %p40_p8 = scmp.ne.s32.totalorder %s5913_s26, %s5909_s25 }
  0x24   : > { %p41_p9 = scmp.eq.s32.totalorder %s5917_s27, 0  ;;  %p46_p10 = scmp.ne.s32.totalorder %s5909_s25, %s5905_s24 }
  0x25   : > { %s6050_s21 = scalar_select %p31_p7, %s5913_s26, %s33_s16  }
  0x26   : > { %p42_p11 = por %p41_p9, %p40_p8  ;;  %p6054_p12 = por %p47_p1, %p46_p10 }
  0x27   : > { %p196_p13 = scmp.eq.s32.totalorder %s5992_s8, 1  ;;  %p202_p0 = scmp.eq.s32.totalorder %s5042_s10, 1 }
  0x28   : > { %p5178_p2 = scmp.lt.s32.totalorder %s5917_s27, 2  ;;  %s302_s15 = sand.u32 1, %s5913_s26  }
  0x29   : > { %p6061_p4 = por %p196_p13, %p40_p8  ;;  %p6065_p6 = por %p202_p0, %p46_p10 }
  0x2a   : > { %s5114_s14 = smul.u32 48, %s302_s15  ;;  %p6070_p7 = pnand %p5178_p2, %p42_p11 }
  0x2b   : > { %s5115_s17 = smul.u32 48, %s5917_s27  ;;  %s303_s13 = scalar_lea.sflag [#allocation3], %s302_s15 }
  0x2c   : > { %s306_s28 = scalar_lea.vmem [#allocation2], %s5114_s14  ;;  %p5813_p9 = pneg %p6070_p7 }
  0x2d   : > { %s311_s23 = scalar_lea.hbm %s8051_s0, %s5115_s17  ;;  %s315_s29 = sshll.u32 %s306_s28, 4  ;;  %s316_s29 = int_to_ptr.vmem [resolvable:$true] %s315_s29 }
  0x2e   : > { %s313_s10 = sshll.u32 %s311_s23, 4  ;;  %s5816_s18 = scalar_lea.hbm %s8051_s0, 96  ;;  %s314_s10 = int_to_ptr.hbm [resolvable:$true] %s313_s10 }
  0x2f   : > { %s5809_s16 = sshra.s32 %s314_s10, 4  ;;  %s5810_s16 = int_to_ptr.hbm [resolvable:$true] %s5809_s16 }
  0x30   : > { %s5811_s1 = scalar_lea.hbm %s5810_s16, 48  ;;  %p5817_p13 = scmp.lt.s32.totalorder %s5810_s16, %s8051_s0 }
  0x31   : > { %p5812_p8 = scmp.ne.s32.totalorder %s5810_s16, %s5811_s1  ;;  %p5818_p0 = scmp.lt.s32.totalorder %s5816_s18, %s5811_s1 }
  0x33   : > { %p5814_p10 = pnand %p5813_p9, %p5812_p8  ;;  %p5819_p2 = por %p5818_p0, %p5817_p13 }
  0x35   : > { %p5815_p11 = pneg %p5814_p10 }
  0x37   : > { %p5820_p5 = pnand %p5819_p2, %p5815_p11 }
  0x39   : > { %5823 = shalt.err (!%p5820_p5)
}
  0x3a   : > { %5167 = dma.hbm_to_vmem [thread:$0]  (!%p6070_p7), %s314_s10, 768, %s316_s29, %s303_s13  }
  0x3b   : > { %324 = sbr.rel (%p5997_p3) target bundleno = 3173 (0xc65), region = 48 }
  0x40   : > { %s6090_s15 = sand.u32 1, %s5909_s25  }
  0x41   : > { %s5116_s2 = smul.u32 48, %s6090_s15  ;;  %s327_s3 = scalar_lea.sflag [#allocation3], %s6090_s15 }
  0x43   : > { %s6094_s14 = scalar_lea.vmem [#allocation2], %s5116_s2 }
  0x44   : > { %5884 = dma.done.wait (%p6054_p12), %s327_s3, 768  }
  0x45   : > { %5886 = vsyncadd (%p6054_p12), %s327_s3, 4294966528 }
  0x46   : > { %5888 = dma.done.wait (%p47_p1), [#allocation6], 57344  }
  0x47   : > { %5890 = vsyncadd (%p47_p1), [#allocation6], 4294909952 }
  0x48   : > { %5892 = dma.done.wait (%p47_p1), [#allocation9], 49216  }
  0x49   : > { %5894 = vsyncadd (%p47_p1), [#allocation9], 4294918080 }
  0x4a   : > { %5896 = dma.done.wait (%p47_p1), [#allocation12], 8256  }
  0x4b   : > { %5898 = vsyncadd (%p47_p1), [#allocation12], 4294959040  ;;  %v458_v0 = vld [vmem:[#allocation5 + $0x1e0] sm:$0xff]  ;;  %s5059_s1 = sshll.u32 %s6090_s15, 4  ;;  %s5113_s22 = sshll.u32 %s5992_s8, 4 }
  0x4c   : > { %v522_v1 = vld [vmem:[#allocation5 + $0x3e0] sm:$0xff]  ;;  %856 = vmatpush.msra.mxu0 %v458_v0  ;;  %s7158_s9 = scalar_lea.vmem [#allocation14], %s5059_s1  ;;  %s4910_s28 = scalar_lea.hbm %s8058_s7, %s5113_s22 }
  0x4d   : > { %v586_v2 = vld [vmem:[#allocation5 + $0x5e0] sm:$0xff]  ;;  %876 = vmatpush.msra.mxu1 %v522_v1  ;;  %s4912_s8 = sshll.u32 %s7158_s9, 4  ;;  %s4914_s29 = sshll.u32 %s4910_s28, 4  ;;  %s4913_s8 = int_to_ptr.vmem [resolvable:$true] %s4912_s8  ;;  %s4915_s29 = int_to_ptr.hbm [resolvable:$true] %s4914_s29 }
  0x4e   : > { %v650_v3 = vld [vmem:[#allocation5 + $0x7e0] sm:$0xff]  ;;  %896 = vmatpush.msra.mxu2 %v586_v2  ;;  %v459_v2 = vld [vmem:[#allocation5 + $0x1e8] sm:$0xff]  ;;  %s4899_s10 = scalar_lea.sflag [#allocation4], %s6090_s15  ;;  %s5853_s13 = sshra.s32 %s4915_s29, 4  ;;  %s5854_s13 = int_to_ptr.hbm [resolvable:$true] %s5853_s13 }
  0x4f   : > { %v454_v4 = vld [vmem:[#allocation5 + $0x1c0] sm:$0xff]  ;;  %916 = vmatpush.msra.mxu3 %v650_v3  ;;  %v523_v3 = vld [vmem:[#allocation5 + $0x3e8] sm:$0xff]  ;;  %s5855_s16 = scalar_lea.hbm %s5854_s13, 16  ;;  %s5859_s17 = scalar_lea.hbm %s8058_s7, 32 }
  0x50   : > { %v518_v5 = vld [vmem:[#allocation5 + $0x3c0] sm:$0xff]  ;;  %857 = vmatpush.msra.mxu0 %v454_v4  ;;  %p5856_p1 = scmp.ne.s32.totalorder %s5854_s13, %s5855_s16  ;;  %p5860_p12 = scmp.lt.s32.totalorder %s5854_s13, %s8058_s7 }
  0x51   : > { %v582_v6 = vld [vmem:[#allocation5 + $0x5c0] sm:$0xff]  ;;  %877 = vmatpush.msra.mxu1 %v518_v5  ;;  %p5861_p7 = scmp.lt.s32.totalorder %s5859_s17, %s5855_s16 }
  0x52   : > { %v646_v7 = vld [vmem:[#allocation5 + $0x7c0] sm:$0xff]  ;;  %897 = vmatpush.msra.mxu2 %v582_v6  ;;  %v455_v6 = vld [vmem:[#allocation5 + $0x1c8] sm:$0xff]  ;;  %p5857_p3 = pnand %p5856_p1, %p6061_p4 }
  0x53   : > { %v450_v8 = vld [vmem:[#allocation5 + $0x1a0] sm:$0xff]  ;;  %917 = vmatpush.msra.mxu3 %v646_v7  ;;  %v519_v7 = vld [vmem:[#allocation5 + $0x3c8] sm:$0xff]  ;;  %p5862_p8 = por %p5861_p7, %p5860_p12 }
  0x54   : > { %v514_v9 = vld [vmem:[#allocation5 + $0x3a0] sm:$0xff]  ;;  %858 = vmatpush.msra.mxu0 %v450_v8  ;;  %p5858_p5 = pneg %p5857_p3 }
  0x55   : > { %v578_v10 = vld [vmem:[#allocation5 + $0x5a0] sm:$0xff]  ;;  %878 = vmatpush.msra.mxu1 %v514_v9 }
  0x56   : > { %v642_v11 = vld [vmem:[#allocation5 + $0x7a0] sm:$0xff]  ;;  %898 = vmatpush.msra.mxu2 %v578_v10  ;;  %v451_v10 = vld [vmem:[#allocation5 + $0x1a8] sm:$0xff]  ;;  %p5863_p9 = pnand %p5862_p8, %p5858_p5 }
  0x57   : > { %v446_v12 = vld [vmem:[#allocation5 + $0x180] sm:$0xff]  ;;  %918 = vmatpush.msra.mxu3 %v642_v11  ;;  %v515_v11 = vld [vmem:[#allocation5 + $0x3a8] sm:$0xff] }
  0x58   : > { %v510_v13 = vld [vmem:[#allocation5 + $0x380] sm:$0xff]  ;;  %859 = vmatpush.msra.mxu0 %v446_v12 }
  0x59   : > { %v574_v14 = vld [vmem:[#allocation5 + $0x580] sm:$0xff]  ;;  %879 = vmatpush.msra.mxu1 %v510_v13 }
  0x5a   : > { %v638_v15 = vld [vmem:[#allocation5 + $0x780] sm:$0xff]  ;;  %899 = vmatpush.msra.mxu2 %v574_v14  ;;  %v447_v14 = vld [vmem:[#allocation5 + $0x188] sm:$0xff] }
  0x5b   : > { %v442_v16 = vld [vmem:[#allocation5 + $0x160] sm:$0xff]  ;;  %919 = vmatpush.msra.mxu3 %v638_v15  ;;  %v511_v15 = vld [vmem:[#allocation5 + $0x388] sm:$0xff] }
  0x5c   : > { %v506_v17 = vld [vmem:[#allocation5 + $0x360] sm:$0xff]  ;;  %860 = vmatpush.msra.mxu0 %v442_v16 }
  0x5d   : > { %v570_v18 = vld [vmem:[#allocation5 + $0x560] sm:$0xff]  ;;  %880 = vmatpush.msra.mxu1 %v506_v17 }
  0x5e   : > { %v634_v19 = vld [vmem:[#allocation5 + $0x760] sm:$0xff]  ;;  %900 = vmatpush.msra.mxu2 %v570_v18  ;;  %v443_v18 = vld [vmem:[#allocation5 + $0x168] sm:$0xff] }
  0x5f   : > { %v438_v20 = vld [vmem:[#allocation5 + $0x140] sm:$0xff]  ;;  %920 = vmatpush.msra.mxu3 %v634_v19  ;;  %v507_v19 = vld [vmem:[#allocation5 + $0x368] sm:$0xff] }
  0x60   : > { %v502_v21 = vld [vmem:[#allocation5 + $0x340] sm:$0xff]  ;;  %861 = vmatpush.msra.mxu0 %v438_v20 }
  0x61   : > { %v566_v22 = vld [vmem:[#allocation5 + $0x540] sm:$0xff]  ;;  %881 = vmatpush.msra.mxu1 %v502_v21 }
  0x62   : > { %v630_v23 = vld [vmem:[#allocation5 + $0x740] sm:$0xff]  ;;  %901 = vmatpush.msra.mxu2 %v566_v22  ;;  %v439_v22 = vld [vmem:[#allocation5 + $0x148] sm:$0xff] }
  0x63   : > { %v434_v24 = vld [vmem:[#allocation5 + $0x120] sm:$0xff]  ;;  %921 = vmatpush.msra.mxu3 %v630_v23  ;;  %v503_v23 = vld [vmem:[#allocation5 + $0x348] sm:$0xff] }
  0x64   : > { %v498_v25 = vld [vmem:[#allocation5 + $0x320] sm:$0xff]  ;;  %862 = vmatpush.msra.mxu0 %v434_v24 }
  0x65   : > { %v562_v26 = vld [vmem:[#allocation5 + $0x520] sm:$0xff]  ;;  %882 = vmatpush.msra.mxu1 %v498_v25 }
  0x66   : > { %v626_v27 = vld [vmem:[#allocation5 + $0x720] sm:$0xff]  ;;  %902 = vmatpush.msra.mxu2 %v562_v26  ;;  %v435_v26 = vld [vmem:[#allocation5 + $0x128] sm:$0xff] }
  0x67   : > { %v430_v28 = vld [vmem:[#allocation5 + $0x100] sm:$0xff]  ;;  %922 = vmatpush.msra.mxu3 %v626_v27  ;;  %v499_v27 = vld [vmem:[#allocation5 + $0x328] sm:$0xff] }
  0x68   : > { %v494_v29 = vld [vmem:[#allocation5 + $0x300] sm:$0xff]  ;;  %863 = vmatpush.msra.mxu0 %v430_v28 }
  0x69   : > { %v558_v30 = vld [vmem:[#allocation5 + $0x500] sm:$0xff]  ;;  %883 = vmatpush.msra.mxu1 %v494_v29 }
  0x6a   : > { %v622_v31 = vld [vmem:[#allocation5 + $0x700] sm:$0xff]  ;;  %903 = vmatpush.msra.mxu2 %v558_v30  ;;  %v431_v30 = vld [vmem:[#allocation5 + $0x108] sm:$0xff] }
  0x6b   : > { %v426_v32 = vld [vmem:[#allocation5 + $0xe0] sm:$0xff]  ;;  %923 = vmatpush.msra.mxu3 %v622_v31  ;;  %v495_v31 = vld [vmem:[#allocation5 + $0x308] sm:$0xff] }
  0x6c   : > { %v490_v33 = vld [vmem:[#allocation5 + $0x2e0] sm:$0xff]  ;;  %864 = vmatpush.msra.mxu0 %v426_v32 }
  0x6d   : > { %v554_v34 = vld [vmem:[#allocation5 + $0x4e0] sm:$0xff]  ;;  %884 = vmatpush.msra.mxu1 %v490_v33 }
  0x6e   : > { %v618_v35 = vld [vmem:[#allocation5 + $0x6e0] sm:$0xff]  ;;  %904 = vmatpush.msra.mxu2 %v554_v34  ;;  %v427_v34 = vld [vmem:[#allocation5 + $0xe8] sm:$0xff] }
  0x6f   : > { %v422_v36 = vld [vmem:[#allocation5 + $0xc0] sm:$0xff]  ;;  %924 = vmatpush.msra.mxu3 %v618_v35  ;;  %v491_v35 = vld [vmem:[#allocation5 + $0x2e8] sm:$0xff] }
  0x70   : > { %v486_v37 = vld [vmem:[#allocation5 + $0x2c0] sm:$0xff]  ;;  %865 = vmatpush.msra.mxu0 %v422_v36 }
  0x71   : > { %v550_v38 = vld [vmem:[#allocation5 + $0x4c0] sm:$0xff]  ;;  %885 = vmatpush.msra.mxu1 %v486_v37 }
  0x72   : > { %v614_v39 = vld [vmem:[#allocation5 + $0x6c0] sm:$0xff]  ;;  %905 = vmatpush.msra.mxu2 %v550_v38  ;;  %v423_v38 = vld [vmem:[#allocation5 + $0xc8] sm:$0xff] }
  0x73   : > { %v418_v40 = vld [vmem:[#allocation5 + $0xa0] sm:$0xff]  ;;  %925 = vmatpush.msra.mxu3 %v614_v39  ;;  %v487_v39 = vld [vmem:[#allocation5 + $0x2c8] sm:$0xff] }
  0x74   : > { %v482_v41 = vld [vmem:[#allocation5 + $0x2a0] sm:$0xff]  ;;  %866 = vmatpush.msra.mxu0 %v418_v40 }
  0x75   : > { %v546_v42 = vld [vmem:[#allocation5 + $0x4a0] sm:$0xff]  ;;  %886 = vmatpush.msra.mxu1 %v482_v41 }
  0x76   : > { %v610_v43 = vld [vmem:[#allocation5 + $0x6a0] sm:$0xff]  ;;  %906 = vmatpush.msra.mxu2 %v546_v42  ;;  %v419_v42 = vld [vmem:[#allocation5 + $0xa8] sm:$0xff] }
  0x77   : > { %v414_v44 = vld [vmem:[#allocation5 + $0x80] sm:$0xff]  ;;  %926 = vmatpush.msra.mxu3 %v610_v43  ;;  %v483_v43 = vld [vmem:[#allocation5 + $0x2a8] sm:$0xff] }
  0x78   : > { %v478_v45 = vld [vmem:[#allocation5 + $0x280] sm:$0xff]  ;;  %867 = vmatpush.msra.mxu0 %v414_v44 }
  0x79   : > { %v542_v46 = vld [vmem:[#allocation5 + $0x480] sm:$0xff]  ;;  %887 = vmatpush.msra.mxu1 %v478_v45 }
  0x7a   : > { %v606_v47 = vld [vmem:[#allocation5 + $0x680] sm:$0xff]  ;;  %907 = vmatpush.msra.mxu2 %v542_v46  ;;  %v415_v46 = vld [vmem:[#allocation5 + $0x88] sm:$0xff] }
  0x7b   : > { %v410_v48 = vld [vmem:[#allocation5 + $0x60] sm:$0xff]  ;;  %927 = vmatpush.msra.mxu3 %v606_v47  ;;  %v479_v47 = vld [vmem:[#allocation5 + $0x288] sm:$0xff] }
  0x7c   : > { %v474_v49 = vld [vmem:[#allocation5 + $0x260] sm:$0xff]  ;;  %868 = vmatpush.msra.mxu0 %v410_v48 }
  0x7d   : > { %v538_v50 = vld [vmem:[#allocation5 + $0x460] sm:$0xff]  ;;  %888 = vmatpush.msra.mxu1 %v474_v49 }
  0x7e   : > { %v602_v51 = vld [vmem:[#allocation5 + $0x660] sm:$0xff]  ;;  %908 = vmatpush.msra.mxu2 %v538_v50  ;;  %v411_v50 = vld [vmem:[#allocation5 + $0x68] sm:$0xff] }
  0x7f   : > { %v406_v52 = vld [vmem:[#allocation5 + $0x40] sm:$0xff]  ;;  %928 = vmatpush.msra.mxu3 %v602_v51  ;;  %v475_v51 = vld [vmem:[#allocation5 + $0x268] sm:$0xff] }
  0x80   : > { %v470_v53 = vld [vmem:[#allocation5 + $0x240] sm:$0xff]  ;;  %869 = vmatpush.msra.mxu0 %v406_v52 }
  0x81   : > { %v534_v54 = vld [vmem:[#allocation5 + $0x440] sm:$0xff]  ;;  %889 = vmatpush.msra.mxu1 %v470_v53 }
  0x82   : > { %v598_v55 = vld [vmem:[#allocation5 + $0x640] sm:$0xff]  ;;  %909 = vmatpush.msra.mxu2 %v534_v54  ;;  %v407_v54 = vld [vmem:[#allocation5 + $0x48] sm:$0xff] }
  0x83   : > { %v402_v56 = vld [vmem:[#allocation5 + $0x20] sm:$0xff]  ;;  %929 = vmatpush.msra.mxu3 %v598_v55  ;;  %v471_v55 = vld [vmem:[#allocation5 + $0x248] sm:$0xff] }
  0x84   : > { %v466_v57 = vld [vmem:[#allocation5 + $0x220] sm:$0xff]  ;;  %870 = vmatpush.msra.mxu0 %v402_v56 }
  0x85   : > { %v530_v58 = vld [vmem:[#allocation5 + $0x420] sm:$0xff]  ;;  %890 = vmatpush.msra.mxu1 %v466_v57 }
  0x86   : > { %v594_v59 = vld [vmem:[#allocation5 + $0x620] sm:$0xff]  ;;  %910 = vmatpush.msra.mxu2 %v530_v58 }
  0x87   : > { %v398_v60 = vld [vmem:[#allocation5] sm:$0xff]  ;;  %930 = vmatpush.msra.mxu3 %v594_v59  ;;  %v403_v59 = vld [vmem:[#allocation5 + $0x28] sm:$0xff] }
  0x88   : > { %v462_v61 = vld [vmem:[#allocation5 + $0x200] sm:$0xff]  ;;  %871 = vmatpush.msra.mxu0 %v398_v60  ;;  %v467_v60 = vld [vmem:[#allocation5 + $0x228] sm:$0xff] }
  0x89   : > { %v526_v62 = vld [vmem:[#allocation5 + $0x400] sm:$0xff]  ;;  %891 = vmatpush.msra.mxu1 %v462_v61 }
  0x8a   : > { %v590_v63 = vld [vmem:[#allocation5 + $0x600] sm:$0xff]  ;;  %911 = vmatpush.msra.mxu2 %v526_v62  ;;  %v6120_v62 = vld [vmem:[%s6094_s14 + $0x18] sm:$0xff] }
  0x8b   : > { %v714_v0 = vld [vmem:[#allocation5 + $0x9e0] sm:$0xff]  ;;  %931 = vmatpush.msra.mxu3 %v590_v63 }
  0x8c   : > { %v778_v1 = vld [vmem:[#allocation5 + $0xbe0] sm:$0xff]  ;;  %936 = vmatpush.msrb.mxu0 %v714_v0  ;;  %976 = vmatpush.msrb.mxu2 %v459_v2  ;;  %v463_v2 = vld [vmem:[#allocation5 + $0x208] sm:$0xff] }
  0x8d   : > { %v710_v4 = vld [vmem:[#allocation5 + $0x9c0] sm:$0xff]  ;;  %956 = vmatpush.msrb.mxu1 %v778_v1  ;;  %996 = vmatpush.msrb.mxu3 %v523_v3  ;;  %v399_v1 = vld [vmem:[#allocation5 + $0x8] sm:$0xff] }
  0x8e   : > { %v774_v5 = vld [vmem:[#allocation5 + $0xbc0] sm:$0xff]  ;;  %937 = vmatpush.msrb.mxu0 %v710_v4  ;;  %977 = vmatpush.msrb.mxu2 %v455_v6  ;;  %v6124_v3 = vld [vmem:[%s6094_s14 + $0x8] sm:$0xff] }
  0x8f   : > { %v706_v8 = vld [vmem:[#allocation5 + $0x9a0] sm:$0xff]  ;;  %957 = vmatpush.msrb.mxu1 %v774_v5  ;;  %997 = vmatpush.msrb.mxu3 %v519_v7  ;;  %v587_v4 = vld [vmem:[#allocation5 + $0x5e8] sm:$0xff] }
  0x90   : > { %v770_v9 = vld [vmem:[#allocation5 + $0xba0] sm:$0xff]  ;;  %938 = vmatpush.msrb.mxu0 %v706_v8  ;;  %978 = vmatpush.msrb.mxu2 %v451_v10  ;;  %v651_v5 = vld [vmem:[#allocation5 + $0x7e8] sm:$0xff] }
  0x91   : > { %v702_v12 = vld [vmem:[#allocation5 + $0x980] sm:$0xff]  ;;  %958 = vmatpush.msrb.mxu1 %v770_v9  ;;  %998 = vmatpush.msrb.mxu3 %v515_v11  ;;  %v715_v6 = vld [vmem:[#allocation5 + $0x9e8] sm:$0xff] }
  0x92   : > { %v766_v13 = vld [vmem:[#allocation5 + $0xb80] sm:$0xff]  ;;  %939 = vmatpush.msrb.mxu0 %v702_v12  ;;  %979 = vmatpush.msrb.mxu2 %v447_v14  ;;  %v779_v7 = vld [vmem:[#allocation5 + $0xbe8] sm:$0xff] }
  0x93   : > { %v698_v16 = vld [vmem:[#allocation5 + $0x960] sm:$0xff]  ;;  %959 = vmatpush.msrb.mxu1 %v766_v13  ;;  %999 = vmatpush.msrb.mxu3 %v511_v15  ;;  %v583_v8 = vld [vmem:[#allocation5 + $0x5c8] sm:$0xff] }
  0x94   : > { %v762_v17 = vld [vmem:[#allocation5 + $0xb60] sm:$0xff]  ;;  %940 = vmatpush.msrb.mxu0 %v698_v16  ;;  %980 = vmatpush.msrb.mxu2 %v443_v18  ;;  %v647_v9 = vld [vmem:[#allocation5 + $0x7c8] sm:$0xff] }
  0x95   : > { %v694_v20 = vld [vmem:[#allocation5 + $0x940] sm:$0xff]  ;;  %960 = vmatpush.msrb.mxu1 %v762_v17  ;;  %1000 = vmatpush.msrb.mxu3 %v507_v19  ;;  %v711_v10 = vld [vmem:[#allocation5 + $0x9c8] sm:$0xff] }
  0x96   : > { %v758_v21 = vld [vmem:[#allocation5 + $0xb40] sm:$0xff]  ;;  %941 = vmatpush.msrb.mxu0 %v694_v20  ;;  %981 = vmatpush.msrb.mxu2 %v439_v22  ;;  %v775_v11 = vld [vmem:[#allocation5 + $0xbc8] sm:$0xff] }
  0x97   : > { %v690_v24 = vld [vmem:[#allocation5 + $0x920] sm:$0xff]  ;;  %961 = vmatpush.msrb.mxu1 %v758_v21  ;;  %1001 = vmatpush.msrb.mxu3 %v503_v23  ;;  %v579_v12 = vld [vmem:[#allocation5 + $0x5a8] sm:$0xff] }
  0x98   : > { %v754_v25 = vld [vmem:[#allocation5 + $0xb20] sm:$0xff]  ;;  %942 = vmatpush.msrb.mxu0 %v690_v24  ;;  %982 = vmatpush.msrb.mxu2 %v435_v26  ;;  %v643_v13 = vld [vmem:[#allocation5 + $0x7a8] sm:$0xff] }
  0x99   : > { %v686_v28 = vld [vmem:[#allocation5 + $0x900] sm:$0xff]  ;;  %962 = vmatpush.msrb.mxu1 %v754_v25  ;;  %1002 = vmatpush.msrb.mxu3 %v499_v27  ;;  %v707_v14 = vld [vmem:[#allocation5 + $0x9a8] sm:$0xff] }
  0x9a   : > { %v750_v29 = vld [vmem:[#allocation5 + $0xb00] sm:$0xff]  ;;  %943 = vmatpush.msrb.mxu0 %v686_v28  ;;  %983 = vmatpush.msrb.mxu2 %v431_v30  ;;  %v771_v15 = vld [vmem:[#allocation5 + $0xba8] sm:$0xff] }
  0x9b   : > { %v682_v32 = vld [vmem:[#allocation5 + $0x8e0] sm:$0xff]  ;;  %963 = vmatpush.msrb.mxu1 %v750_v29  ;;  %1003 = vmatpush.msrb.mxu3 %v495_v31  ;;  %v639_v17 = vld [vmem:[#allocation5 + $0x788] sm:$0xff] }
  0x9c   : > { %v746_v33 = vld [vmem:[#allocation5 + $0xae0] sm:$0xff]  ;;  %944 = vmatpush.msrb.mxu0 %v682_v32  ;;  %984 = vmatpush.msrb.mxu2 %v427_v34  ;;  %v575_v18 = vld [vmem:[#allocation5 + $0x588] sm:$0xff] }
  0x9d   : > { %v678_v36 = vld [vmem:[#allocation5 + $0x8c0] sm:$0xff]  ;;  %964 = vmatpush.msrb.mxu1 %v746_v33  ;;  %1004 = vmatpush.msrb.mxu3 %v491_v35  ;;  %v703_v19 = vld [vmem:[#allocation5 + $0x988] sm:$0xff] }
  0x9e   : > { %v742_v37 = vld [vmem:[#allocation5 + $0xac0] sm:$0xff]  ;;  %945 = vmatpush.msrb.mxu0 %v678_v36  ;;  %985 = vmatpush.msrb.mxu2 %v423_v38  ;;  %v767_v20 = vld [vmem:[#allocation5 + $0xb88] sm:$0xff] }
  0x9f   : > { %v674_v40 = vld [vmem:[#allocation5 + $0x8a0] sm:$0xff]  ;;  %965 = vmatpush.msrb.mxu1 %v742_v37  ;;  %1005 = vmatpush.msrb.mxu3 %v487_v39  ;;  %v6132_v21 = vld [vmem:[%s6094_s14 + $0x28] sm:$0xff] }
  0xa0   : > { %v738_v41 = vld [vmem:[#allocation5 + $0xaa0] sm:$0xff]  ;;  %946 = vmatpush.msrb.mxu0 %v674_v40  ;;  %986 = vmatpush.msrb.mxu2 %v419_v42  ;;  %v571_v22 = vld [vmem:[#allocation5 + $0x568] sm:$0xff] }
  0xa1   : > { %v670_v44 = vld [vmem:[#allocation5 + $0x880] sm:$0xff]  ;;  %966 = vmatpush.msrb.mxu1 %v738_v41  ;;  %1006 = vmatpush.msrb.mxu3 %v483_v43  ;;  %v635_v23 = vld [vmem:[#allocation5 + $0x768] sm:$0xff] }
  0xa2   : > { %v734_v45 = vld [vmem:[#allocation5 + $0xa80] sm:$0xff]  ;;  %947 = vmatpush.msrb.mxu0 %v670_v44  ;;  %987 = vmatpush.msrb.mxu2 %v415_v46  ;;  %v699_v24 = vld [vmem:[#allocation5 + $0x968] sm:$0xff] }
  0xa3   : > { %v666_v48 = vld [vmem:[#allocation5 + $0x860] sm:$0xff]  ;;  %967 = vmatpush.msrb.mxu1 %v734_v45  ;;  %1007 = vmatpush.msrb.mxu3 %v479_v47  ;;  %v763_v25 = vld [vmem:[#allocation5 + $0xb68] sm:$0xff] }
  0xa4   : > { %v730_v49 = vld [vmem:[#allocation5 + $0xa60] sm:$0xff]  ;;  %948 = vmatpush.msrb.mxu0 %v666_v48  ;;  %988 = vmatpush.msrb.mxu2 %v411_v50  ;;  %v567_v26 = vld [vmem:[#allocation5 + $0x548] sm:$0xff] }
  0xa5   : > { %v662_v52 = vld [vmem:[#allocation5 + $0x840] sm:$0xff]  ;;  %968 = vmatpush.msrb.mxu1 %v730_v49  ;;  %1008 = vmatpush.msrb.mxu3 %v475_v51  ;;  %v631_v27 = vld [vmem:[#allocation5 + $0x748] sm:$0xff] }
  0xa6   : > { %v726_v53 = vld [vmem:[#allocation5 + $0xa40] sm:$0xff]  ;;  %949 = vmatpush.msrb.mxu0 %v662_v52  ;;  %989 = vmatpush.msrb.mxu2 %v407_v54  ;;  %v695_v28 = vld [vmem:[#allocation5 + $0x948] sm:$0xff] }
  0xa7   : > { %v6113_v56 = vld [vmem:[%s6094_s14 + $0x10] sm:$0xff]  ;;  %969 = vmatpush.msrb.mxu1 %v726_v53  ;;  %1009 = vmatpush.msrb.mxu3 %v471_v55  ;;  %v6116_v61 = vld [vmem:[%s6094_s14] sm:$0xff]  ;;  %v759_v29 = vld [vmem:[#allocation5 + $0xb48] sm:$0xff] }
  0xa8   : > { %v658_v57 = vld [vmem:[#allocation5 + $0x820] sm:$0xff]  ;;  %912 = vmatmul.f32.vlgmr.msra.gmra.mxu2 %v6113_v56  ;;  %872 = vmatmul.f32.vlgmr.msra.gmra.mxu0 %v6116_v61  ;;  %v563_v30 = vld [vmem:[#allocation5 + $0x528] sm:$0xff] }
  0xa9   : > { %v722_v58 = vld [vmem:[#allocation5 + $0xa20] sm:$0xff]  ;;  %950 = vmatpush.msrb.mxu0 %v658_v57  ;;  %990 = vmatpush.msrb.mxu2 %v403_v59  ;;  %v627_v31 = vld [vmem:[#allocation5 + $0x728] sm:$0xff] }
  0xaa   : > { %v654_v63 = vld [vmem:[#allocation5 + $0x800] sm:$0xff]  ;;  %970 = vmatpush.msrb.mxu1 %v722_v58  ;;  %1010 = vmatpush.msrb.mxu3 %v467_v60  ;;  %v691_v32 = vld [vmem:[#allocation5 + $0x928] sm:$0xff] }
  0xab   : > { %v718_v0 = vld [vmem:[#allocation5 + $0xa00] sm:$0xff]  ;;  %932 = vmatmul.f32.vlgmr.msra.gmra.mxu3 %v6120_v62  ;;  %951 = vmatpush.msrb.mxu0 %v654_v63  ;;  %v755_v33 = vld [vmem:[#allocation5 + $0xb28] sm:$0xff] }
  0xac   : > { %971 = vmatpush.msrb.mxu1 %v718_v0  ;;  %991 = vmatpush.msrb.mxu2 %v399_v1  ;;  %v6129_v16 = vld [vmem:[%s6094_s14 + $0x20] sm:$0xff]  ;;  %v559_v34 = vld [vmem:[#allocation5 + $0x508] sm:$0xff] }
  0xad   : > { %1011 = vmatpush.msrb.mxu3 %v463_v2  ;;  %892 = vmatmul.f32.vlgmr.msra.gmra.mxu1 %v6124_v3  ;;  %v623_v35 = vld [vmem:[#allocation5 + $0x708] sm:$0xff] }
  0xae   : > { %1016 = vmatpush.msra.mxu0 %v587_v4  ;;  %1036 = vmatpush.msra.mxu1 %v651_v5  ;;  %v687_v36 = vld [vmem:[#allocation5 + $0x908] sm:$0xff] }
  0xaf   : > { %1056 = vmatpush.msra.mxu2 %v715_v6  ;;  %1076 = vmatpush.msra.mxu3 %v779_v7  ;;  %v751_v37 = vld [vmem:[#allocation5 + $0xb08] sm:$0xff] }
  0xb0   : > { %1017 = vmatpush.msra.mxu0 %v583_v8  ;;  %1037 = vmatpush.msra.mxu1 %v647_v9  ;;  %v555_v38 = vld [vmem:[#allocation5 + $0x4e8] sm:$0xff] }
  0xb1   : > { %1057 = vmatpush.msra.mxu2 %v711_v10  ;;  %1077 = vmatpush.msra.mxu3 %v775_v11  ;;  %v619_v39 = vld [vmem:[#allocation5 + $0x6e8] sm:$0xff]  ;;  %v460_v10 = vld [vmem:[#allocation5 + $0x1f0] sm:$0xff] }
  0xb2   : > { %1018 = vmatpush.msra.mxu0 %v579_v12  ;;  %1038 = vmatpush.msra.mxu1 %v643_v13  ;;  %v683_v40 = vld [vmem:[#allocation5 + $0x8e8] sm:$0xff]  ;;  %v524_v11 = vld [vmem:[#allocation5 + $0x3f0] sm:$0xff] }
  0xb3   : > { %1058 = vmatpush.msra.mxu2 %v707_v14  ;;  %1078 = vmatpush.msra.mxu3 %v771_v15  ;;  %v747_v41 = vld [vmem:[#allocation5 + $0xae8] sm:$0xff]  ;;  %v588_v12 = vld [vmem:[#allocation5 + $0x5f0] sm:$0xff] }
  0xb4   : > { %952 = vmatmul.f32.vlgmr.msrb.gmra.mxu0 %v6129_v16  ;;  %1039 = vmatpush.msra.mxu1 %v639_v17  ;;  %v551_v42 = vld [vmem:[#allocation5 + $0x4c8] sm:$0xff]  ;;  %v652_v13 = vld [vmem:[#allocation5 + $0x7f0] sm:$0xff] }
  0xb5   : > { %1019 = vmatpush.msra.mxu0 %v575_v18  ;;  %1059 = vmatpush.msra.mxu2 %v703_v19  ;;  %v615_v43 = vld [vmem:[#allocation5 + $0x6c8] sm:$0xff]  ;;  %v456_v14 = vld [vmem:[#allocation5 + $0x1d0] sm:$0xff] }
  0xb6   : > { %1079 = vmatpush.msra.mxu3 %v767_v20  ;;  %972 = vmatmul.f32.vlgmr.msrb.gmra.mxu1 %v6132_v21  ;;  %v679_v44 = vld [vmem:[#allocation5 + $0x8c8] sm:$0xff]  ;;  %v520_v15 = vld [vmem:[#allocation5 + $0x3d0] sm:$0xff] }
  0xb7   : > { %1020 = vmatpush.msra.mxu0 %v571_v22  ;;  %1040 = vmatpush.msra.mxu1 %v635_v23  ;;  %v743_v45 = vld [vmem:[#allocation5 + $0xac8] sm:$0xff]  ;;  %v584_v17 = vld [vmem:[#allocation5 + $0x5d0] sm:$0xff] }
  0xb8   : > { %1060 = vmatpush.msra.mxu2 %v699_v24  ;;  %1080 = vmatpush.msra.mxu3 %v763_v25  ;;  %v547_v46 = vld [vmem:[#allocation5 + $0x4a8] sm:$0xff]  ;;  %v648_v18 = vld [vmem:[#allocation5 + $0x7d0] sm:$0xff] }
  0xb9   : > { %1021 = vmatpush.msra.mxu0 %v567_v26  ;;  %1041 = vmatpush.msra.mxu1 %v631_v27  ;;  %v611_v47 = vld [vmem:[#allocation5 + $0x6a8] sm:$0xff]  ;;  %v452_v19 = vld [vmem:[#allocation5 + $0x1b0] sm:$0xff] }
  0xba   : > { %1061 = vmatpush.msra.mxu2 %v695_v28  ;;  %1081 = vmatpush.msra.mxu3 %v759_v29  ;;  %v675_v48 = vld [vmem:[#allocation5 + $0x8a8] sm:$0xff]  ;;  %v516_v20 = vld [vmem:[#allocation5 + $0x3b0] sm:$0xff] }
  0xbb   : > { %1022 = vmatpush.msra.mxu0 %v563_v30  ;;  %1042 = vmatpush.msra.mxu1 %v627_v31  ;;  %v739_v49 = vld [vmem:[#allocation5 + $0xaa8] sm:$0xff]  ;;  %v580_v22 = vld [vmem:[#allocation5 + $0x5b0] sm:$0xff] }
  0xbc   : > { %1062 = vmatpush.msra.mxu2 %v691_v32  ;;  %1082 = vmatpush.msra.mxu3 %v755_v33  ;;  %v543_v50 = vld [vmem:[#allocation5 + $0x488] sm:$0xff]  ;;  %v644_v23 = vld [vmem:[#allocation5 + $0x7b0] sm:$0xff] }
  0xbd   : > { %1023 = vmatpush.msra.mxu0 %v559_v34  ;;  %1043 = vmatpush.msra.mxu1 %v623_v35  ;;  %v607_v51 = vld [vmem:[#allocation5 + $0x688] sm:$0xff]  ;;  %v448_v24 = vld [vmem:[#allocation5 + $0x190] sm:$0xff] }
  0xbe   : > { %1063 = vmatpush.msra.mxu2 %v687_v36  ;;  %1083 = vmatpush.msra.mxu3 %v751_v37  ;;  %v671_v52 = vld [vmem:[#allocation5 + $0x888] sm:$0xff]  ;;  %v512_v25 = vld [vmem:[#allocation5 + $0x390] sm:$0xff] }
  0xbf   : > { %1024 = vmatpush.msra.mxu0 %v555_v38  ;;  %1044 = vmatpush.msra.mxu1 %v619_v39  ;;  %v735_v53 = vld [vmem:[#allocation5 + $0xa88] sm:$0xff]  ;;  %v576_v26 = vld [vmem:[#allocation5 + $0x590] sm:$0xff] }
  0xc0   : > { %1064 = vmatpush.msra.mxu2 %v683_v40  ;;  %1084 = vmatpush.msra.mxu3 %v747_v41  ;;  %v539_v54 = vld [vmem:[#allocation5 + $0x468] sm:$0xff]  ;;  %v640_v27 = vld [vmem:[#allocation5 + $0x790] sm:$0xff] }
  0xc1   : > { %1025 = vmatpush.msra.mxu0 %v551_v42  ;;  %1045 = vmatpush.msra.mxu1 %v615_v43  ;;  %v603_v55 = vld [vmem:[#allocation5 + $0x668] sm:$0xff]  ;;  %v444_v28 = vld [vmem:[#allocation5 + $0x170] sm:$0xff] }
  0xc2   : > { %1065 = vmatpush.msra.mxu2 %v679_v44  ;;  %1085 = vmatpush.msra.mxu3 %v743_v45  ;;  %v667_v57 = vld [vmem:[#allocation5 + $0x868] sm:$0xff]  ;;  %v508_v29 = vld [vmem:[#allocation5 + $0x370] sm:$0xff] }
  0xc3   : > { %1026 = vmatpush.msra.mxu0 %v547_v46  ;;  %1046 = vmatpush.msra.mxu1 %v611_v47  ;;  %v731_v58 = vld [vmem:[#allocation5 + $0xa68] sm:$0xff]  ;;  %v572_v30 = vld [vmem:[#allocation5 + $0x570] sm:$0xff] }
  0xc4   : > { %1066 = vmatpush.msra.mxu2 %v675_v48  ;;  %1086 = vmatpush.msra.mxu3 %v739_v49  ;;  %v535_v59 = vld [vmem:[#allocation5 + $0x448] sm:$0xff]  ;;  %v636_v31 = vld [vmem:[#allocation5 + $0x770] sm:$0xff] }
  0xc5   : > { %1027 = vmatpush.msra.mxu0 %v543_v50  ;;  %1047 = vmatpush.msra.mxu1 %v607_v51  ;;  %v599_v60 = vld [vmem:[#allocation5 + $0x648] sm:$0xff]  ;;  %v440_v32 = vld [vmem:[#allocation5 + $0x150] sm:$0xff] }
  0xc6   : > { %1067 = vmatpush.msra.mxu2 %v671_v52  ;;  %1087 = vmatpush.msra.mxu3 %v735_v53  ;;  %v663_v63 = vld [vmem:[#allocation5 + $0x848] sm:$0xff]  ;;  %v504_v33 = vld [vmem:[#allocation5 + $0x350] sm:$0xff] }
  0xc7   : > { %1028 = vmatpush.msra.mxu0 %v539_v54  ;;  %1048 = vmatpush.msra.mxu1 %v603_v55  ;;  %v727_v0 = vld [vmem:[#allocation5 + $0xa48] sm:$0xff]  ;;  %v568_v34 = vld [vmem:[#allocation5 + $0x550] sm:$0xff] }
  0xc8   : > { %1068 = vmatpush.msra.mxu2 %v667_v57  ;;  %1088 = vmatpush.msra.mxu3 %v731_v58  ;;  %v531_v1 = vld [vmem:[#allocation5 + $0x428] sm:$0xff]  ;;  %v632_v35 = vld [vmem:[#allocation5 + $0x750] sm:$0xff] }
  0xc9   : > { %v595_v2 = vld [vmem:[#allocation5 + $0x628] sm:$0xff]  ;;  %1029 = vmatpush.msra.mxu0 %v535_v59  ;;  %1049 = vmatpush.msra.mxu1 %v599_v60  ;;  %v436_v36 = vld [vmem:[#allocation5 + $0x130] sm:$0xff] }
  0xca   : > { %v659_v4 = vld [vmem:[#allocation5 + $0x828] sm:$0xff]  ;;  %1069 = vmatpush.msra.mxu2 %v663_v63  ;;  %1089 = vmatpush.msra.mxu3 %v727_v0  ;;  %v500_v37 = vld [vmem:[#allocation5 + $0x330] sm:$0xff] }
  0xcb   : > { %v723_v5 = vld [vmem:[#allocation5 + $0xa28] sm:$0xff]  ;;  %1030 = vmatpush.msra.mxu0 %v531_v1  ;;  %1050 = vmatpush.msra.mxu1 %v595_v2  ;;  %v564_v38 = vld [vmem:[#allocation5 + $0x530] sm:$0xff] }
  0xcc   : > { %v527_v6 = vld [vmem:[#allocation5 + $0x408] sm:$0xff]  ;;  %1070 = vmatpush.msra.mxu2 %v659_v4  ;;  %1090 = vmatpush.msra.mxu3 %v723_v5  ;;  %v628_v39 = vld [vmem:[#allocation5 + $0x730] sm:$0xff] }
  0xcd   : > { %v591_v7 = vld [vmem:[#allocation5 + $0x608] sm:$0xff]  ;;  %1031 = vmatpush.msra.mxu0 %v527_v6  ;;  %992 = vmatmul.f32.vlgmr.msrb.gmra.mxu2 %v6116_v61  ;;  %v432_v40 = vld [vmem:[#allocation5 + $0x110] sm:$0xff] }
  0xce   : > { %v655_v8 = vld [vmem:[#allocation5 + $0x808] sm:$0xff]  ;;  %1051 = vmatpush.msra.mxu1 %v591_v7  ;;  %1012 = vmatmul.f32.vlgmr.msrb.gmra.mxu3 %v6124_v3  ;;  %v496_v41 = vld [vmem:[#allocation5 + $0x310] sm:$0xff] }
  0xcf   : > { %v719_v9 = vld [vmem:[#allocation5 + $0xa08] sm:$0xff]  ;;  %1071 = vmatpush.msra.mxu2 %v655_v8  ;;  %1096 = vmatpush.msrb.mxu0 %v460_v10  ;;  %v560_v42 = vld [vmem:[#allocation5 + $0x510] sm:$0xff] }
  0xd0   : > { %1091 = vmatpush.msra.mxu3 %v719_v9  ;;  %1116 = vmatpush.msrb.mxu1 %v524_v11  ;;  %v624_v43 = vld [vmem:[#allocation5 + $0x710] sm:$0xff] }
  0xd1   : > { %1136 = vmatpush.msrb.mxu2 %v588_v12  ;;  %1097 = vmatpush.msrb.mxu0 %v456_v14  ;;  %v428_v44 = vld [vmem:[#allocation5 + $0xf0] sm:$0xff] }
  0xd2   : > { %1156 = vmatpush.msrb.mxu3 %v652_v13  ;;  %1117 = vmatpush.msrb.mxu1 %v520_v15  ;;  %v492_v45 = vld [vmem:[#allocation5 + $0x2f0] sm:$0xff] }
  0xd3   : > { %1137 = vmatpush.msrb.mxu2 %v584_v17  ;;  %1098 = vmatpush.msrb.mxu0 %v452_v19  ;;  %v556_v46 = vld [vmem:[#allocation5 + $0x4f0] sm:$0xff]  ;;  %v461_v19 = vld [vmem:[#allocation5 + $0x1f8] sm:$0xff] }
  0xd4   : > { %1157 = vmatpush.msrb.mxu3 %v648_v18  ;;  %1118 = vmatpush.msrb.mxu1 %v516_v20  ;;  %v620_v47 = vld [vmem:[#allocation5 + $0x6f0] sm:$0xff]  ;;  %v525_v20 = vld [vmem:[#allocation5 + $0x3f8] sm:$0xff] }
  0xd5   : > { %1138 = vmatpush.msrb.mxu2 %v580_v22  ;;  %1099 = vmatpush.msrb.mxu0 %v448_v24  ;;  %v424_v48 = vld [vmem:[#allocation5 + $0xd0] sm:$0xff]  ;;  %v457_v24 = vld [vmem:[#allocation5 + $0x1d8] sm:$0xff] }
  0xd6   : > { %1158 = vmatpush.msrb.mxu3 %v644_v23  ;;  %1119 = vmatpush.msrb.mxu1 %v512_v25  ;;  %v488_v49 = vld [vmem:[#allocation5 + $0x2d0] sm:$0xff]  ;;  %v521_v25 = vld [vmem:[#allocation5 + $0x3d8] sm:$0xff] }
  0xd7   : > { %1139 = vmatpush.msrb.mxu2 %v576_v26  ;;  %1100 = vmatpush.msrb.mxu0 %v444_v28  ;;  %v552_v50 = vld [vmem:[#allocation5 + $0x4d0] sm:$0xff]  ;;  %v453_v28 = vld [vmem:[#allocation5 + $0x1b8] sm:$0xff] }
  0xd8   : > { %1159 = vmatpush.msrb.mxu3 %v640_v27  ;;  %1120 = vmatpush.msrb.mxu1 %v508_v29  ;;  %v616_v51 = vld [vmem:[#allocation5 + $0x6d0] sm:$0xff]  ;;  %v517_v29 = vld [vmem:[#allocation5 + $0x3b8] sm:$0xff] }
  0xd9   : > { %1140 = vmatpush.msrb.mxu2 %v572_v30  ;;  %1101 = vmatpush.msrb.mxu0 %v440_v32  ;;  %v420_v52 = vld [vmem:[#allocation5 + $0xb0] sm:$0xff]  ;;  %v449_v32 = vld [vmem:[#allocation5 + $0x198] sm:$0xff] }
  0xda   : > { %1160 = vmatpush.msrb.mxu3 %v636_v31  ;;  %1121 = vmatpush.msrb.mxu1 %v504_v33  ;;  %v484_v53 = vld [vmem:[#allocation5 + $0x2b0] sm:$0xff]  ;;  %v513_v33 = vld [vmem:[#allocation5 + $0x398] sm:$0xff] }
  0xdb   : > { %1141 = vmatpush.msrb.mxu2 %v568_v34  ;;  %1102 = vmatpush.msrb.mxu0 %v436_v36  ;;  %v548_v54 = vld [vmem:[#allocation5 + $0x4b0] sm:$0xff]  ;;  %v445_v36 = vld [vmem:[#allocation5 + $0x178] sm:$0xff] }
  0xdc   : > { %1161 = vmatpush.msrb.mxu3 %v632_v35  ;;  %1072 = vmatmul.f32.vlgmr.msra.gmra.mxu2 %v6129_v16  ;;  %v612_v55 = vld [vmem:[#allocation5 + $0x6b0] sm:$0xff] }
  0xdd   : > { %1122 = vmatpush.msrb.mxu1 %v500_v37  ;;  %1142 = vmatpush.msrb.mxu2 %v564_v38  ;;  %v416_v57 = vld [vmem:[#allocation5 + $0x90] sm:$0xff]  ;;  %v509_v37 = vld [vmem:[#allocation5 + $0x378] sm:$0xff] }
  0xde   : > { %1162 = vmatpush.msrb.mxu3 %v628_v39  ;;  %1032 = vmatmul.f32.vlgmr.msra.gmra.mxu0 %v6113_v56  ;;  %v480_v58 = vld [vmem:[#allocation5 + $0x290] sm:$0xff] }
  0xdf   : > { %1092 = vmatmul.f32.vlgmr.msra.gmra.mxu3 %v6132_v21  ;;  %1103 = vmatpush.msrb.mxu0 %v432_v40  ;;  %v544_v59 = vld [vmem:[#allocation5 + $0x490] sm:$0xff]  ;;  %v441_v40 = vld [vmem:[#allocation5 + $0x158] sm:$0xff] }
  0xe0   : > { %1123 = vmatpush.msrb.mxu1 %v496_v41  ;;  %1143 = vmatpush.msrb.mxu2 %v560_v42  ;;  %v608_v60 = vld [vmem:[#allocation5 + $0x690] sm:$0xff]  ;;  %v505_v41 = vld [vmem:[#allocation5 + $0x358] sm:$0xff] }
  0xe1   : > { %1163 = vmatpush.msrb.mxu3 %v624_v43  ;;  %1052 = vmatmul.f32.vlgmr.msra.gmra.mxu1 %v6120_v62  ;;  %v412_v63 = vld [vmem:[#allocation5 + $0x70] sm:$0xff] }
  0xe2   : > { %1104 = vmatpush.msrb.mxu0 %v428_v44  ;;  %1124 = vmatpush.msrb.mxu1 %v492_v45  ;;  %v476_v0 = vld [vmem:[#allocation5 + $0x270] sm:$0xff]  ;;  %v437_v44 = vld [vmem:[#allocation5 + $0x138] sm:$0xff] }
  0xe3   : > { %1144 = vmatpush.msrb.mxu2 %v556_v46  ;;  %1164 = vmatpush.msrb.mxu3 %v620_v47  ;;  %v540_v1 = vld [vmem:[#allocation5 + $0x470] sm:$0xff]  ;;  %v501_v45 = vld [vmem:[#allocation5 + $0x338] sm:$0xff] }
  0xe4   : > { %1105 = vmatpush.msrb.mxu0 %v424_v48  ;;  %1125 = vmatpush.msrb.mxu1 %v488_v49  ;;  %v604_v2 = vld [vmem:[#allocation5 + $0x670] sm:$0xff]  ;;  %v433_v48 = vld [vmem:[#allocation5 + $0x118] sm:$0xff] }
  0xe5   : > { %1145 = vmatpush.msrb.mxu2 %v552_v50  ;;  %1165 = vmatpush.msrb.mxu3 %v616_v51  ;;  %v408_v4 = vld [vmem:[#allocation5 + $0x50] sm:$0xff]  ;;  %v497_v49 = vld [vmem:[#allocation5 + $0x318] sm:$0xff] }
  0xe6   : > { %1106 = vmatpush.msrb.mxu0 %v420_v52  ;;  %1126 = vmatpush.msrb.mxu1 %v484_v53  ;;  %v472_v5 = vld [vmem:[#allocation5 + $0x250] sm:$0xff]  ;;  %v429_v52 = vld [vmem:[#allocation5 + $0xf8] sm:$0xff] }
  0xe7   : > { %1146 = vmatpush.msrb.mxu2 %v548_v54  ;;  %1166 = vmatpush.msrb.mxu3 %v612_v55  ;;  %v536_v6 = vld [vmem:[#allocation5 + $0x450] sm:$0xff]  ;;  %v493_v53 = vld [vmem:[#allocation5 + $0x2f8] sm:$0xff] }
  0xe8   : > { %1107 = vmatpush.msrb.mxu0 %v416_v57  ;;  %1127 = vmatpush.msrb.mxu1 %v480_v58  ;;  %v600_v7 = vld [vmem:[#allocation5 + $0x650] sm:$0xff]  ;;  %v425_v57 = vld [vmem:[#allocation5 + $0xd8] sm:$0xff] }
  0xe9   : > { %1147 = vmatpush.msrb.mxu2 %v544_v59  ;;  %1167 = vmatpush.msrb.mxu3 %v608_v60  ;;  %v404_v8 = vld [vmem:[#allocation5 + $0x30] sm:$0xff]  ;;  %v489_v58 = vld [vmem:[#allocation5 + $0x2d8] sm:$0xff] }
  0xea   : > { %1108 = vmatpush.msrb.mxu0 %v412_v63  ;;  %1128 = vmatpush.msrb.mxu1 %v476_v0  ;;  %v468_v9 = vld [vmem:[#allocation5 + $0x230] sm:$0xff]  ;;  %v421_v63 = vld [vmem:[#allocation5 + $0xb8] sm:$0xff] }
  0xeb   : > { %1148 = vmatpush.msrb.mxu2 %v540_v1  ;;  %1168 = vmatpush.msrb.mxu3 %v604_v2  ;;  %v532_v10 = vld [vmem:[#allocation5 + $0x430] sm:$0xff]  ;;  %v485_v0 = vld [vmem:[#allocation5 + $0x2b8] sm:$0xff] }
  0xec   : > { %1109 = vmatpush.msrb.mxu0 %v408_v4  ;;  %1129 = vmatpush.msrb.mxu1 %v472_v5  ;;  %v596_v11 = vld [vmem:[#allocation5 + $0x630] sm:$0xff]  ;;  %v417_v4 = vld [vmem:[#allocation5 + $0x98] sm:$0xff] }
  0xed   : > { %1149 = vmatpush.msrb.mxu2 %v536_v6  ;;  %1169 = vmatpush.msrb.mxu3 %v600_v7  ;;  %v400_v12 = vld [vmem:[#allocation5 + $0x10] sm:$0xff]  ;;  %v481_v5 = vld [vmem:[#allocation5 + $0x298] sm:$0xff] }
  0xee   : > { %v464_v13 = vld [vmem:[#allocation5 + $0x210] sm:$0xff]  ;;  %1110 = vmatpush.msrb.mxu0 %v404_v8  ;;  %1130 = vmatpush.msrb.mxu1 %v468_v9  ;;  %v413_v8 = vld [vmem:[#allocation5 + $0x78] sm:$0xff] }
  0xef   : > { %v528_v14 = vld [vmem:[#allocation5 + $0x410] sm:$0xff]  ;;  %1150 = vmatpush.msrb.mxu2 %v532_v10  ;;  %1170 = vmatpush.msrb.mxu3 %v596_v11  ;;  %v477_v9 = vld [vmem:[#allocation5 + $0x278] sm:$0xff] }
  0xf0   : > { %v592_v15 = vld [vmem:[#allocation5 + $0x610] sm:$0xff]  ;;  %1111 = vmatpush.msrb.mxu0 %v400_v12  ;;  %1131 = vmatpush.msrb.mxu1 %v464_v13  ;;  %v409_v12 = vld [vmem:[#allocation5 + $0x58] sm:$0xff] }
  0xf1   : > { %v716_v17 = vld [vmem:[#allocation5 + $0x9f0] sm:$0xff]  ;;  %1151 = vmatpush.msrb.mxu2 %v528_v14  ;;  %1171 = vmatpush.msrb.mxu3 %v592_v15  ;;  %v473_v13 = vld [vmem:[#allocation5 + $0x258] sm:$0xff] }
  0xf2   : > { %v780_v18 = vld [vmem:[#allocation5 + $0xbf0] sm:$0xff]  ;;  %1176 = vmatpush.msra.mxu0 %v716_v17  ;;  %v405_v17 = vld [vmem:[#allocation5 + $0x38] sm:$0xff]  ;;  %1152 = vmatmul.f32.vlgmr.msrb.gmra.mxu2 %v6113_v56 }
  0xf3   : > { %v712_v22 = vld [vmem:[#allocation5 + $0x9d0] sm:$0xff]  ;;  %1196 = vmatpush.msra.mxu1 %v780_v18  ;;  %1216 = vmatpush.msra.mxu2 %v461_v19  ;;  %v469_v18 = vld [vmem:[#allocation5 + $0x238] sm:$0xff] }
  0xf4   : > { %v776_v23 = vld [vmem:[#allocation5 + $0xbd0] sm:$0xff]  ;;  %1236 = vmatpush.msra.mxu3 %v525_v20  ;;  %1177 = vmatpush.msra.mxu0 %v712_v22  ;;  %v401_v22 = vld [vmem:[#allocation5 + $0x18] sm:$0xff] }
  0xf5   : > { %v708_v26 = vld [vmem:[#allocation5 + $0x9b0] sm:$0xff]  ;;  %1197 = vmatpush.msra.mxu1 %v776_v23  ;;  %1217 = vmatpush.msra.mxu2 %v457_v24  ;;  %v465_v23 = vld [vmem:[#allocation5 + $0x218] sm:$0xff] }
  0xf6   : > { %v772_v27 = vld [vmem:[#allocation5 + $0xbb0] sm:$0xff]  ;;  %1237 = vmatpush.msra.mxu3 %v521_v25  ;;  %1178 = vmatpush.msra.mxu0 %v708_v26  ;;  %v589_v24 = vld [vmem:[#allocation5 + $0x5f8] sm:$0xff] }
  0xf7   : > { %v704_v30 = vld [vmem:[#allocation5 + $0x990] sm:$0xff]  ;;  %1198 = vmatpush.msra.mxu1 %v772_v27  ;;  %1218 = vmatpush.msra.mxu2 %v453_v28  ;;  %v653_v25 = vld [vmem:[#allocation5 + $0x7f8] sm:$0xff] }
  0xf8   : > { %v768_v31 = vld [vmem:[#allocation5 + $0xb90] sm:$0xff]  ;;  %1238 = vmatpush.msra.mxu3 %v517_v29  ;;  %1179 = vmatpush.msra.mxu0 %v704_v30  ;;  %v717_v26 = vld [vmem:[#allocation5 + $0x9f8] sm:$0xff] }
  0xf9   : > { %v700_v34 = vld [vmem:[#allocation5 + $0x970] sm:$0xff]  ;;  %1199 = vmatpush.msra.mxu1 %v768_v31  ;;  %1219 = vmatpush.msra.mxu2 %v449_v32  ;;  %v781_v27 = vld [vmem:[#allocation5 + $0xbf8] sm:$0xff] }
  0xfa   : > { %v764_v35 = vld [vmem:[#allocation5 + $0xb70] sm:$0xff]  ;;  %1239 = vmatpush.msra.mxu3 %v513_v33  ;;  %1180 = vmatpush.msra.mxu0 %v700_v34  ;;  %v585_v56 = vld [vmem:[#allocation5 + $0x5d8] sm:$0xff] }
  0xfb   : > { %v696_v38 = vld [vmem:[#allocation5 + $0x950] sm:$0xff]  ;;  %1200 = vmatpush.msra.mxu1 %v764_v35  ;;  %1220 = vmatpush.msra.mxu2 %v445_v36  ;;  %v649_v28 = vld [vmem:[#allocation5 + $0x7d8] sm:$0xff] }
  0xfc   : > { %v760_v39 = vld [vmem:[#allocation5 + $0xb50] sm:$0xff]  ;;  %1240 = vmatpush.msra.mxu3 %v509_v37  ;;  %1181 = vmatpush.msra.mxu0 %v696_v38  ;;  %v713_v29 = vld [vmem:[#allocation5 + $0x9d8] sm:$0xff] }
  0xfd   : > { %v692_v42 = vld [vmem:[#allocation5 + $0x930] sm:$0xff]  ;;  %1201 = vmatpush.msra.mxu1 %v760_v39  ;;  %1221 = vmatpush.msra.mxu2 %v441_v40  ;;  %v777_v30 = vld [vmem:[#allocation5 + $0xbd8] sm:$0xff] }
  0xfe   : > { %v756_v43 = vld [vmem:[#allocation5 + $0xb30] sm:$0xff]  ;;  %1241 = vmatpush.msra.mxu3 %v505_v41  ;;  %1182 = vmatpush.msra.mxu0 %v692_v42  ;;  %v709_v31 = vld [vmem:[#allocation5 + $0x9b8] sm:$0xff] }
  0xff   : > { %v688_v46 = vld [vmem:[#allocation5 + $0x910] sm:$0xff]  ;;  %1202 = vmatpush.msra.mxu1 %v756_v43  ;;  %1222 = vmatpush.msra.mxu2 %v437_v44  ;;  %v773_v32 = vld [vmem:[#allocation5 + $0xbb8] sm:$0xff] }
 0x100   : > { %v752_v47 = vld [vmem:[#allocation5 + $0xb10] sm:$0xff]  ;;  %1242 = vmatpush.msra.mxu3 %v501_v45  ;;  %1183 = vmatpush.msra.mxu0 %v688_v46  ;;  %v641_v33 = vld [vmem:[#allocation5 + $0x798] sm:$0xff] }
 0x101   : > { %v684_v50 = vld [vmem:[#allocation5 + $0x8f0] sm:$0xff]  ;;  %1203 = vmatpush.msra.mxu1 %v752_v47  ;;  %1223 = vmatpush.msra.mxu2 %v433_v48  ;;  %v705_v34 = vld [vmem:[#allocation5 + $0x998] sm:$0xff] }
 0x102   : > { %v748_v51 = vld [vmem:[#allocation5 + $0xaf0] sm:$0xff]  ;;  %1243 = vmatpush.msra.mxu3 %v497_v49  ;;  %1184 = vmatpush.msra.mxu0 %v684_v50  ;;  %v769_v35 = vld [vmem:[#allocation5 + $0xb98] sm:$0xff] }
 0x103   : > { %v680_v54 = vld [vmem:[#allocation5 + $0x8d0] sm:$0xff]  ;;  %1204 = vmatpush.msra.mxu1 %v748_v51  ;;  %1224 = vmatpush.msra.mxu2 %v429_v52  ;;  %v573_v36 = vld [vmem:[#allocation5 + $0x578] sm:$0xff] }
 0x104   : > { %v744_v55 = vld [vmem:[#allocation5 + $0xad0] sm:$0xff]  ;;  %1244 = vmatpush.msra.mxu3 %v493_v53  ;;  %1185 = vmatpush.msra.mxu0 %v680_v54  ;;  %v637_v37 = vld [vmem:[#allocation5 + $0x778] sm:$0xff] }
 0x105   : > { %v676_v59 = vld [vmem:[#allocation5 + $0x8b0] sm:$0xff]  ;;  %1205 = vmatpush.msra.mxu1 %v744_v55  ;;  %1225 = vmatpush.msra.mxu2 %v425_v57  ;;  %v701_v38 = vld [vmem:[#allocation5 + $0x978] sm:$0xff] }
 0x106   : > { %v740_v60 = vld [vmem:[#allocation5 + $0xab0] sm:$0xff]  ;;  %1245 = vmatpush.msra.mxu3 %v489_v58  ;;  %1186 = vmatpush.msra.mxu0 %v676_v59  ;;  %v765_v39 = vld [vmem:[#allocation5 + $0xb78] sm:$0xff] }
 0x107   : > { %v672_v1 = vld [vmem:[#allocation5 + $0x890] sm:$0xff]  ;;  %1206 = vmatpush.msra.mxu1 %v740_v60  ;;  %1226 = vmatpush.msra.mxu2 %v421_v63  ;;  %v569_v40 = vld [vmem:[#allocation5 + $0x558] sm:$0xff] }
 0x108   : > { %v736_v2 = vld [vmem:[#allocation5 + $0xa90] sm:$0xff]  ;;  %1246 = vmatpush.msra.mxu3 %v485_v0  ;;  %1187 = vmatpush.msra.mxu0 %v672_v1  ;;  %v633_v41 = vld [vmem:[#allocation5 + $0x758] sm:$0xff] }
 0x109   : > { %v668_v6 = vld [vmem:[#allocation5 + $0x870] sm:$0xff]  ;;  %1207 = vmatpush.msra.mxu1 %v736_v2  ;;  %1227 = vmatpush.msra.mxu2 %v417_v4  ;;  %v697_v42 = vld [vmem:[#allocation5 + $0x958] sm:$0xff] }
 0x10a   : > { %v732_v7 = vld [vmem:[#allocation5 + $0xa70] sm:$0xff]  ;;  %1247 = vmatpush.msra.mxu3 %v481_v5  ;;  %1188 = vmatpush.msra.mxu0 %v668_v6  ;;  %v761_v43 = vld [vmem:[#allocation5 + $0xb58] sm:$0xff] }
 0x10b   : > { %v664_v10 = vld [vmem:[#allocation5 + $0x850] sm:$0xff]  ;;  %1208 = vmatpush.msra.mxu1 %v732_v7  ;;  %1228 = vmatpush.msra.mxu2 %v413_v8  ;;  %v565_v44 = vld [vmem:[#allocation5 + $0x538] sm:$0xff] }
 0x10c   : > { %v728_v11 = vld [vmem:[#allocation5 + $0xa50] sm:$0xff]  ;;  %1248 = vmatpush.msra.mxu3 %v477_v9  ;;  %1189 = vmatpush.msra.mxu0 %v664_v10  ;;  %v693_v45 = vld [vmem:[#allocation5 + $0x938] sm:$0xff] }
 0x10d   : > { %v660_v14 = vld [vmem:[#allocation5 + $0x830] sm:$0xff]  ;;  %1209 = vmatpush.msra.mxu1 %v728_v11  ;;  %1229 = vmatpush.msra.mxu2 %v409_v12  ;;  %v757_v46 = vld [vmem:[#allocation5 + $0xb38] sm:$0xff] }
 0x10e   : > { %v724_v15 = vld [vmem:[#allocation5 + $0xa30] sm:$0xff]  ;;  %1249 = vmatpush.msra.mxu3 %v473_v13  ;;  %1190 = vmatpush.msra.mxu0 %v660_v14  ;;  %v561_v47 = vld [vmem:[#allocation5 + $0x518] sm:$0xff] }
 0x10f   : > { %v656_v19 = vld [vmem:[#allocation5 + $0x810] sm:$0xff]  ;;  %1210 = vmatpush.msra.mxu1 %v724_v15  ;;  %1230 = vmatpush.msra.mxu2 %v405_v17  ;;  %v625_v48 = vld [vmem:[#allocation5 + $0x718] sm:$0xff] }
 0x110   : > { %v720_v20 = vld [vmem:[#allocation5 + $0xa10] sm:$0xff]  ;;  %1250 = vmatpush.msra.mxu3 %v469_v18  ;;  %1112 = vmatmul.f32.vlgmr.msrb.gmra.mxu0 %v6116_v61  ;;  %v581_v61 = vld [vmem:[#allocation5 + $0x5b8] sm:$0xff] }
 0x111   : > { %1172 = vmatmul.f32.vlgmr.msrb.gmra.mxu3 %v6120_v62  ;;  %1191 = vmatpush.msra.mxu0 %v656_v19  ;;  %v645_v62 = vld [vmem:[#allocation5 + $0x7b8] sm:$0xff] }
 0x112   : > { %1211 = vmatpush.msra.mxu1 %v720_v20  ;;  %1231 = vmatpush.msra.mxu2 %v401_v22  ;;  %v753_v49 = vld [vmem:[#allocation5 + $0xb18] sm:$0xff] }
 0x113   : > { %1251 = vmatpush.msra.mxu3 %v465_v23  ;;  %1132 = vmatmul.f32.vlgmr.msrb.gmra.mxu1 %v6124_v3  ;;  %v577_v3 = vld [vmem:[#allocation5 + $0x598] sm:$0xff] }
 0x114   : > { %1256 = vmatpush.msrb.mxu0 %v589_v24  ;;  %1276 = vmatpush.msrb.mxu1 %v653_v25  ;;  %v557_v50 = vld [vmem:[#allocation5 + $0x4f8] sm:$0xff]  ;;  %v6148_v24 = vld [vmem:[#allocation7 + $0x1e0] sm:$0xff]  ;;  %v6150_v25 = vld [vmem:[#allocation7 + $0x1e8] sm:$0xff] }
 0x115   : > { %1296 = vmatpush.msrb.mxu2 %v717_v26  ;;  %1316 = vmatpush.msrb.mxu3 %v781_v27  ;;  %v621_v51 = vld [vmem:[#allocation5 + $0x6f8] sm:$0xff]  ;;  %v6152_v26 = vld [vmem:[#allocation7 + $0x1f0] sm:$0xff] }
 0x116   : > { %1257 = vmatpush.msrb.mxu0 %v585_v56  ;;  %1277 = vmatpush.msrb.mxu1 %v649_v28  ;;  %v685_v52 = vld [vmem:[#allocation5 + $0x8f8] sm:$0xff]  ;;  %v5483_v56 = vld [vmem:[%s6094_s14] sm:$0xff] }
 0x117   : > { %1297 = vmatpush.msrb.mxu2 %v713_v29  ;;  %1317 = vmatpush.msrb.mxu3 %v777_v30  ;;  %v749_v53 = vld [vmem:[#allocation5 + $0xaf8] sm:$0xff]  ;;  %v6158_v29 = vld [vmem:[#allocation7 + $0x1c0] sm:$0xff]  ;;  %v6160_v30 = vld [vmem:[#allocation7 + $0x1c8] sm:$0xff] }
 0x118   : > { %1258 = vmatpush.msrb.mxu0 %v581_v61  ;;  %1278 = vmatpush.msrb.mxu1 %v645_v62  ;;  %v553_v54 = vld [vmem:[#allocation5 + $0x4d8] sm:$0xff]  ;;  %v6164_v61 = vld [vmem:[#allocation7 + $0x1d0] sm:$0xff] }
 0x119   : > { %1298 = vmatpush.msrb.mxu2 %v709_v31  ;;  %1318 = vmatpush.msrb.mxu3 %v773_v32  ;;  %v617_v55 = vld [vmem:[#allocation5 + $0x6d8] sm:$0xff]  ;;  %v6170_v31 = vld [vmem:[#allocation7 + $0x1a0] sm:$0xff]  ;;  %v6172_v32 = vld [vmem:[#allocation7 + $0x1a8] sm:$0xff] }
 0x11a   : > { %1192 = vmatmul.f32.vlgmr.msra.gmra.mxu0 %v6129_v16  ;;  %1279 = vmatpush.msrb.mxu1 %v641_v33  ;;  %v629_v16 = vld [vmem:[#allocation5 + $0x738] sm:$0xff]  ;;  %v6176_v33 = vld [vmem:[#allocation7 + $0x1b0] sm:$0xff] }
 0x11b   : > { %1259 = vmatpush.msrb.mxu0 %v577_v3  ;;  %1299 = vmatpush.msrb.mxu2 %v705_v34  ;;  %v681_v57 = vld [vmem:[#allocation5 + $0x8d8] sm:$0xff]  ;;  %v6182_v34 = vld [vmem:[#allocation7 + $0x180] sm:$0xff] }
 0x11c   : > { %1319 = vmatpush.msrb.mxu3 %v769_v35  ;;  %1212 = vmatmul.f32.vlgmr.msra.gmra.mxu1 %v6132_v21  ;;  %v689_v21 = vld [vmem:[#allocation5 + $0x918] sm:$0xff]  ;;  %v6184_v35 = vld [vmem:[#allocation7 + $0x188] sm:$0xff] }
 0x11d   : > { %1260 = vmatpush.msrb.mxu0 %v573_v36  ;;  %1280 = vmatpush.msrb.mxu1 %v637_v37  ;;  %v745_v58 = vld [vmem:[#allocation5 + $0xad8] sm:$0xff]  ;;  %v6188_v36 = vld [vmem:[#allocation7 + $0x190] sm:$0xff] }
 0x11e   : > { %1300 = vmatpush.msrb.mxu2 %v701_v38  ;;  %1320 = vmatpush.msrb.mxu3 %v765_v39  ;;  %v549_v59 = vld [vmem:[#allocation5 + $0x4b8] sm:$0xff]  ;;  %v6194_v38 = vld [vmem:[#allocation7 + $0x160] sm:$0xff]  ;;  %v6196_v39 = vld [vmem:[#allocation7 + $0x168] sm:$0xff] }
 0x11f   : > { %1261 = vmatpush.msrb.mxu0 %v569_v40  ;;  %1281 = vmatpush.msrb.mxu1 %v633_v41  ;;  %v613_v60 = vld [vmem:[#allocation5 + $0x6b8] sm:$0xff]  ;;  %v6200_v40 = vld [vmem:[#allocation7 + $0x170] sm:$0xff] }
 0x120   : > { %1301 = vmatpush.msrb.mxu2 %v697_v42  ;;  %1321 = vmatpush.msrb.mxu3 %v761_v43  ;;  %v677_v63 = vld [vmem:[#allocation5 + $0x8b8] sm:$0xff]  ;;  %v6206_v42 = vld [vmem:[#allocation7 + $0x140] sm:$0xff]  ;;  %v6208_v43 = vld [vmem:[#allocation7 + $0x148] sm:$0xff] }
 0x121   : > { %1262 = vmatpush.msrb.mxu0 %v565_v44  ;;  %1282 = vmatpush.msrb.mxu1 %v629_v16  ;;  %v741_v0 = vld [vmem:[#allocation5 + $0xab8] sm:$0xff]  ;;  %v6212_v44 = vld [vmem:[#allocation7 + $0x150] sm:$0xff] }
 0x122   : > { %1302 = vmatpush.msrb.mxu2 %v693_v45  ;;  %1322 = vmatpush.msrb.mxu3 %v757_v46  ;;  %v545_v1 = vld [vmem:[#allocation5 + $0x498] sm:$0xff]  ;;  %v6218_v45 = vld [vmem:[#allocation7 + $0x120] sm:$0xff]  ;;  %v6222_v46 = vld [vmem:[#allocation7 + $0x128] sm:$0xff] }
 0x123   : > { %1263 = vmatpush.msrb.mxu0 %v561_v47  ;;  %1283 = vmatpush.msrb.mxu1 %v625_v48  ;;  %v609_v2 = vld [vmem:[#allocation5 + $0x698] sm:$0xff]  ;;  %v6224_v47 = vld [vmem:[#allocation7 + $0x130] sm:$0xff] }
 0x124   : > { %1303 = vmatpush.msrb.mxu2 %v689_v21  ;;  %1323 = vmatpush.msrb.mxu3 %v753_v49  ;;  %v673_v4 = vld [vmem:[#allocation5 + $0x898] sm:$0xff]  ;;  %8363 = vst [vmem:[#allocation20_spill] sm:$0xff] %v6224_v47  ;;  %v5485_v21 = vld [vmem:[%s6094_s14 + $0x20] sm:$0xff] }
 0x125   : > { %1264 = vmatpush.msrb.mxu0 %v557_v50  ;;  %1284 = vmatpush.msrb.mxu1 %v621_v51  ;;  %v737_v5 = vld [vmem:[#allocation5 + $0xa98] sm:$0xff]  ;;  %v6232_v49 = vld [vmem:[#allocation7 + $0x100] sm:$0xff]  ;;  %v6236_v50 = vld [vmem:[#allocation7 + $0x108] sm:$0xff] }
 0x126   : > { %1304 = vmatpush.msrb.mxu2 %v685_v52  ;;  %1324 = vmatpush.msrb.mxu3 %v749_v53  ;;  %v541_v6 = vld [vmem:[#allocation5 + $0x478] sm:$0xff]  ;;  %8365 = vst [vmem:[#allocation22_spill] sm:$0xff] %v6232_v49  ;;  %v6238_v51 = vld [vmem:[#allocation7 + $0x110] sm:$0xff] }
 0x127   : > { %1265 = vmatpush.msrb.mxu0 %v553_v54  ;;  %1285 = vmatpush.msrb.mxu1 %v617_v55  ;;  %v605_v7 = vld [vmem:[#allocation5 + $0x678] sm:$0xff]  ;;  %8366 = vst [vmem:[#allocation23_spill] sm:$0xff] %v6236_v50  ;;  %v5486_v52 = vld [vmem:[%s6094_s14 + $0x10] sm:$0xff] }
 0x128   : > { %1305 = vmatpush.msrb.mxu2 %v681_v57  ;;  %1325 = vmatpush.msrb.mxu3 %v745_v58  ;;  %v669_v8 = vld [vmem:[#allocation5 + $0x878] sm:$0xff]  ;;  %8367 = vst [vmem:[#allocation24_spill] sm:$0xff] %v6238_v51  ;;  %v6246_v55 = vld [vmem:[#allocation7 + $0xe0] sm:$0xff]  ;;  %v6248_v57 = vld [vmem:[#allocation7 + $0xe8] sm:$0xff] }
 0x129   : > { %1266 = vmatpush.msrb.mxu0 %v549_v59  ;;  %1286 = vmatpush.msrb.mxu1 %v613_v60  ;;  %v733_v9 = vld [vmem:[#allocation5 + $0xa78] sm:$0xff]  ;;  %8369 = vst [vmem:[#allocation26_spill] sm:$0xff] %v6246_v55  ;;  %v6252_v58 = vld [vmem:[#allocation7 + $0xf0] sm:$0xff] }
 0x12a   : > { %1306 = vmatpush.msrb.mxu2 %v677_v63  ;;  %1326 = vmatpush.msrb.mxu3 %v741_v0  ;;  %v537_v10 = vld [vmem:[#allocation5 + $0x458] sm:$0xff]  ;;  %8370 = vst [vmem:[#allocation27_spill] sm:$0xff] %v6248_v57  ;;  %v6258_v63 = vld [vmem:[#allocation7 + $0xc0] sm:$0xff]  ;;  %v6260_v0 = vld [vmem:[#allocation7 + $0xc8] sm:$0xff] }
 0x12b   : > { %1267 = vmatpush.msrb.mxu0 %v545_v1  ;;  %1287 = vmatpush.msrb.mxu1 %v609_v2  ;;  %v601_v11 = vld [vmem:[#allocation5 + $0x658] sm:$0xff]  ;;  %8371 = vst [vmem:[#allocation28_spill] sm:$0xff] %v6252_v58  ;;  %v6264_v1 = vld [vmem:[#allocation7 + $0xd0] sm:$0xff] }
 0x12c   : > { %1307 = vmatpush.msrb.mxu2 %v673_v4  ;;  %1327 = vmatpush.msrb.mxu3 %v737_v5  ;;  %v665_v12 = vld [vmem:[#allocation5 + $0x858] sm:$0xff]  ;;  %8373 = vst [vmem:[#allocation30_spill] sm:$0xff] %v6258_v63  ;;  %v6270_v4 = vld [vmem:[#allocation7 + $0xa0] sm:$0xff]  ;;  %v6272_v5 = vld [vmem:[#allocation7 + $0xa8] sm:$0xff] }
 0x12d   : > { %1268 = vmatpush.msrb.mxu0 %v541_v6  ;;  %1288 = vmatpush.msrb.mxu1 %v605_v7  ;;  %v729_v13 = vld [vmem:[#allocation5 + $0xa58] sm:$0xff]  ;;  %8374 = vst [vmem:[#allocation31_spill] sm:$0xff] %v6260_v0  ;;  %v6276_v6 = vld [vmem:[#allocation7 + $0xb0] sm:$0xff] }
 0x12e   : > { %1308 = vmatpush.msrb.mxu2 %v669_v8  ;;  %1328 = vmatpush.msrb.mxu3 %v733_v9  ;;  %v533_v14 = vld [vmem:[#allocation5 + $0x438] sm:$0xff]  ;;  %8375 = vst [vmem:[#allocation32_spill] sm:$0xff] %v6264_v1  ;;  %v6282_v8 = vld [vmem:[#allocation7 + $0x80] sm:$0xff]  ;;  %v6284_v9 = vld [vmem:[#allocation7 + $0x88] sm:$0xff] }
 0x12f   : > { %v597_v15 = vld [vmem:[#allocation5 + $0x638] sm:$0xff]  ;;  %1269 = vmatpush.msrb.mxu0 %v537_v10  ;;  %1289 = vmatpush.msrb.mxu1 %v601_v11  ;;  %8377 = vst [vmem:[#allocation34_spill] sm:$0xff] %v6270_v4  ;;  %v6288_v10 = vld [vmem:[#allocation7 + $0x90] sm:$0xff] }
 0x130   : > { %v661_v17 = vld [vmem:[#allocation5 + $0x838] sm:$0xff]  ;;  %1309 = vmatpush.msrb.mxu2 %v665_v12  ;;  %1329 = vmatpush.msrb.mxu3 %v729_v13  ;;  %8378 = vst [vmem:[#allocation35_spill] sm:$0xff] %v6272_v5  ;;  %v6294_v12 = vld [vmem:[#allocation7 + $0x60] sm:$0xff]  ;;  %v6296_v13 = vld [vmem:[#allocation7 + $0x68] sm:$0xff] }
 0x131   : > { %v725_v18 = vld [vmem:[#allocation5 + $0xa38] sm:$0xff]  ;;  %1270 = vmatpush.msrb.mxu0 %v533_v14  ;;  %1290 = vmatpush.msrb.mxu1 %v597_v15  ;;  %8379 = vst [vmem:[#allocation36_spill] sm:$0xff] %v6276_v6  ;;  %v6300_v14 = vld [vmem:[#allocation7 + $0x70] sm:$0xff] }
 0x132   : > { %v529_v19 = vld [vmem:[#allocation5 + $0x418] sm:$0xff]  ;;  %1310 = vmatpush.msrb.mxu2 %v661_v17  ;;  %1330 = vmatpush.msrb.mxu3 %v725_v18  ;;  %8381 = vst [vmem:[#allocation38_spill] sm:$0xff] %v6282_v8  ;;  %v6306_v17 = vld [vmem:[#allocation7 + $0x40] sm:$0xff]  ;;  %v6308_v18 = vld [vmem:[#allocation7 + $0x48] sm:$0xff] }
 0x133   : > { %v593_v20 = vld [vmem:[#allocation5 + $0x618] sm:$0xff]  ;;  %1271 = vmatpush.msrb.mxu0 %v529_v19  ;;  %1232 = vmatmul.f32.vlgmr.msra.gmra.mxu2 %v5483_v56  ;;  %8382 = vst [vmem:[#allocation39_spill] sm:$0xff] %v6284_v9  ;;  %v6312_v19 = vld [vmem:[#allocation7 + $0x50] sm:$0xff] }
 0x134   : > { %v657_v22 = vld [vmem:[#allocation5 + $0x818] sm:$0xff]  ;;  %1291 = vmatpush.msrb.mxu1 %v593_v20  ;;  %1272 = vmatmul.f32.vlgmr.msrb.gmra.mxu0 %v5486_v52  ;;  %8383 = vst [vmem:[#allocation40_spill] sm:$0xff] %v6288_v10  ;;  %v6324_v56 = vld [vmem:[#allocation7 + $0x30] sm:$0xff]  ;;  %v6332_v52 = vld [vmem:[#allocation7 + $0x8] sm:$0xff] }
 0x135   : > { %v721_v23 = vld [vmem:[#allocation5 + $0xa18] sm:$0xff]  ;;  %1311 = vmatpush.msrb.mxu2 %v657_v22  ;;  %1336 = vmatpush.msra.mxu0 %v6148_v24  ;;  %8385 = vst [vmem:[#allocation42_spill] sm:$0xff] %v6294_v12  ;;  %v6318_v22 = vld [vmem:[#allocation7 + $0x20] sm:$0xff] }
 0x136   : > { %1331 = vmatpush.msrb.mxu3 %v721_v23  ;;  %v6154_v27 = vld [vmem:[#allocation7 + $0x1f8] sm:$0xff]  ;;  %1356 = vmatpush.msra.mxu1 %v6150_v25  ;;  %8386 = vst [vmem:[#allocation43_spill] sm:$0xff] %v6296_v13  ;;  %v6320_v23 = vld [vmem:[#allocation7 + $0x28] sm:$0xff] }
 0x137   : > { %v5484_v28 = vld [vmem:[%s6094_s14 + $0x8] sm:$0xff]  ;;  %1376 = vmatpush.msra.mxu2 %v6152_v26  ;;  %1337 = vmatpush.msra.mxu0 %v6158_v29  ;;  %v5488_v60 = vld [vmem:[%s6094_s14 + $0x18] sm:$0xff]  ;;  %8387 = vst [vmem:[#allocation44_spill] sm:$0xff] %v6300_v14 }
 0x138   : > { %1252 = vmatmul.f32.vlgmr.msra.gmra.mxu3 %v5484_v28  ;;  %v6166_v62 = vld [vmem:[#allocation7 + $0x1d8] sm:$0xff]  ;;  %1357 = vmatpush.msra.mxu1 %v6160_v30  ;;  %8389 = vst [vmem:[#allocation46_spill] sm:$0xff] %v6306_v17 }
 0x139   : > { %1396 = vmatpush.msra.mxu3 %v6154_v27  ;;  %v6178_v3 = vld [vmem:[#allocation7 + $0x1b8] sm:$0xff]  ;;  %1377 = vmatpush.msra.mxu2 %v6164_v61  ;;  %8390 = vst [vmem:[#allocation47_spill] sm:$0xff] %v6308_v18 }
 0x13a   : > { %1338 = vmatpush.msra.mxu0 %v6170_v31  ;;  %1358 = vmatpush.msra.mxu1 %v6172_v32  ;;  %v6190_v37 = vld [vmem:[#allocation7 + $0x198] sm:$0xff]  ;;  %8391 = vst [vmem:[#allocation48_spill] sm:$0xff] %v6312_v19 }
 0x13b   : > { %1397 = vmatpush.msra.mxu3 %v6166_v62  ;;  %1378 = vmatpush.msra.mxu2 %v6176_v33  ;;  %v6202_v41 = vld [vmem:[#allocation7 + $0x178] sm:$0xff]  ;;  %8393 = vst [vmem:[#allocation50_spill] sm:$0xff] %v6318_v22 }
 0x13c   : > { %1339 = vmatpush.msra.mxu0 %v6182_v34  ;;  %1359 = vmatpush.msra.mxu1 %v6184_v35  ;;  %v6214_v16 = vld [vmem:[#allocation7 + $0x158] sm:$0xff]  ;;  %8394 = vst [vmem:[#allocation51_spill] sm:$0xff] %v6320_v23 }
 0x13d   : > { %1398 = vmatpush.msra.mxu3 %v6178_v3  ;;  %1379 = vmatpush.msra.mxu2 %v6188_v36  ;;  %v6228_v48 = vld [vmem:[#allocation7 + $0x138] sm:$0xff]  ;;  %8395 = vst [vmem:[#allocation52_spill] sm:$0xff] %v6324_v56 }
 0x13e   : > { %1340 = vmatpush.msra.mxu0 %v6194_v38  ;;  %1360 = vmatpush.msra.mxu1 %v6196_v39  ;;  %8364 = vst [vmem:[#allocation21_spill] sm:$0xff] %v6228_v48  ;;  %v6242_v53 = vld [vmem:[#allocation7 + $0x118] sm:$0xff] }
 0x13f   : > { %1399 = vmatpush.msra.mxu3 %v6190_v37  ;;  %1380 = vmatpush.msra.mxu2 %v6200_v40  ;;  %8368 = vst [vmem:[#allocation25_spill] sm:$0xff] %v6242_v53  ;;  %v5487_v54 = vld [vmem:[%s6094_s14 + $0x28] sm:$0xff] }
 0x140   : > { %1341 = vmatpush.msra.mxu0 %v6206_v42  ;;  %1361 = vmatpush.msra.mxu1 %v6208_v43  ;;  %v6254_v59 = vld [vmem:[#allocation7 + $0xf8] sm:$0xff]  ;;  %8398 = vst [vmem:[#allocation55_spill] sm:$0xff] %v6332_v52 }
 0x141   : > { %1400 = vmatpush.msra.mxu3 %v6202_v41  ;;  %1381 = vmatpush.msra.mxu2 %v6212_v44  ;;  %8372 = vst [vmem:[#allocation29_spill] sm:$0xff] %v6254_v59  ;;  %v6266_v2 = vld [vmem:[#allocation7 + $0xd8] sm:$0xff] }
 0x142   : > { %1312 = vmatmul.f32.vlgmr.msrb.gmra.mxu2 %v5485_v21  ;;  %1342 = vmatpush.msra.mxu0 %v6218_v45  ;;  %8376 = vst [vmem:[#allocation33_spill] sm:$0xff] %v6266_v2  ;;  %v6278_v7 = vld [vmem:[#allocation7 + $0xb8] sm:$0xff]  ;;  %v6330_v21 = vld [vmem:[#allocation7] sm:$0xff] }
 0x143   : > { %1401 = vmatpush.msra.mxu3 %v6214_v16  ;;  %1362 = vmatpush.msra.mxu1 %v6222_v46  ;;  %8380 = vst [vmem:[#allocation37_spill] sm:$0xff] %v6278_v7  ;;  %v6290_v11 = vld [vmem:[#allocation7 + $0x98] sm:$0xff] }
 0x144   : > { %1382 = vmatpush.msra.mxu2 %v6224_v47  ;;  %1332 = vmatmul.f32.vlgmr.msrb.gmra.mxu3 %v5487_v54  ;;  %8384 = vst [vmem:[#allocation41_spill] sm:$0xff] %v6290_v11  ;;  %v6302_v15 = vld [vmem:[#allocation7 + $0x78] sm:$0xff]  ;;  %v6336_v54 = vld [vmem:[#allocation7 + $0x10] sm:$0xff] }
 0x145   : > { %1402 = vmatpush.msra.mxu3 %v6228_v48  ;;  %1343 = vmatpush.msra.mxu0 %v6232_v49  ;;  %8388 = vst [vmem:[#allocation45_spill] sm:$0xff] %v6302_v15  ;;  %v6314_v20 = vld [vmem:[#allocation7 + $0x58] sm:$0xff] }
 0x146   : > { %1363 = vmatpush.msra.mxu1 %v6236_v50  ;;  %1383 = vmatpush.msra.mxu2 %v6238_v51  ;;  %8392 = vst [vmem:[#allocation49_spill] sm:$0xff] %v6314_v20  ;;  %v6326_v28 = vld [vmem:[#allocation7 + $0x38] sm:$0xff] }
 0x147   : > { %1403 = vmatpush.msra.mxu3 %v6242_v53  ;;  %1292 = vmatmul.f32.vlgmr.msrb.gmra.mxu1 %v5488_v60  ;;  %8396 = vst [vmem:[#allocation53_spill] sm:$0xff] %v6326_v28  ;;  %v6338_v60 = vld [vmem:[#allocation7 + $0x18] sm:$0xff] }
 0x148   : > { %1344 = vmatpush.msra.mxu0 %v6246_v55  ;;  %1364 = vmatpush.msra.mxu1 %v6248_v57  ;;  %8397 = vst [vmem:[#allocation54_spill] sm:$0xff] %v6330_v21 }
 0x149   : > { %1384 = vmatpush.msra.mxu2 %v6252_v58  ;;  %1404 = vmatpush.msra.mxu3 %v6254_v59  ;;  %8399 = vst [vmem:[#allocation56_spill] sm:$0xff] %v6336_v54 }
 0x14a   : > { %1345 = vmatpush.msra.mxu0 %v6258_v63  ;;  %1365 = vmatpush.msra.mxu1 %v6260_v0  ;;  %8400 = vst [vmem:[#allocation57_spill] sm:$0xff] %v6338_v60 }
 0x14b   : > { %1385 = vmatpush.msra.mxu2 %v6264_v1  ;;  %1405 = vmatpush.msra.mxu3 %v6266_v2 }
 0x14c   : > { %1346 = vmatpush.msra.mxu0 %v6270_v4  ;;  %1366 = vmatpush.msra.mxu1 %v6272_v5 }
 0x14d   : > { %1386 = vmatpush.msra.mxu2 %v6276_v6  ;;  %1406 = vmatpush.msra.mxu3 %v6278_v7 }
 0x14e   : > { %1347 = vmatpush.msra.mxu0 %v6282_v8  ;;  %1367 = vmatpush.msra.mxu1 %v6284_v9 }
 0x14f   : > { %1387 = vmatpush.msra.mxu2 %v6288_v10  ;;  %1407 = vmatpush.msra.mxu3 %v6290_v11 }
 0x150   : > { %1348 = vmatpush.msra.mxu0 %v6294_v12  ;;  %1368 = vmatpush.msra.mxu1 %v6296_v13 }
 0x151   : > { %1388 = vmatpush.msra.mxu2 %v6300_v14  ;;  %1408 = vmatpush.msra.mxu3 %v6302_v15 }
 0x152   : > { %1349 = vmatpush.msra.mxu0 %v6306_v17  ;;  %1369 = vmatpush.msra.mxu1 %v6308_v18 }
 0x153   : > { %1389 = vmatpush.msra.mxu2 %v6312_v19  ;;  %1409 = vmatpush.msra.mxu3 %v6314_v20  ;;  %v8061_v20 = vmov 0.0  }
 0x154   : > { %1350 = vmatpush.msra.mxu0 %v6318_v22  ;;  %1370 = vmatpush.msra.mxu1 %v6320_v23 }
 0x155   : > { %1390 = vmatpush.msra.mxu2 %v6324_v56  ;;  %1410 = vmatpush.msra.mxu3 %v6326_v28 }
 0x156   : > { %1351 = vmatpush.msra.mxu0 %v6330_v21  ;;  %1371 = vmatpush.msra.mxu1 %v6332_v52 }
 0x157   : > { %1391 = vmatpush.msra.mxu2 %v6336_v54  ;;  %1411 = vmatpush.msra.mxu3 %v6338_v60 }
 0x158   : > { %1352 = vmatmul.f32.vlgmr.msra.gmra.mxu0 %v8061_v20  ;;  %1372 = vmatmul.f32.vlgmr.msra.gmra.mxu1 %v8061_v20 }
 0x159   : > { %1392 = vmatmul.f32.vlgmr.msra.gmra.mxu2 %v8061_v20  ;;  %1412 = vmatmul.f32.vlgmr.msra.gmra.mxu3 %v8061_v20  ;;  %v8401_v20 = vld [vmem:[#allocation49_spill] sm:$0xff] }
 0x15a   : > { %1483 = vmatpush.msrb.mxu0 %v6148_v24  ;;  %1503 = vmatpush.msrb.mxu1 %v6150_v25 }
 0x15b   : > { %1523 = vmatpush.msrb.mxu2 %v6152_v26  ;;  %1543 = vmatpush.msrb.mxu3 %v6154_v27 }
 0x15c   : > { %1484 = vmatpush.msrb.mxu0 %v6158_v29  ;;  %1504 = vmatpush.msrb.mxu1 %v6160_v30 }
 0x15d   : > { %1524 = vmatpush.msrb.mxu2 %v6164_v61  ;;  %1544 = vmatpush.msrb.mxu3 %v6166_v62 }
 0x15e   : > { %1485 = vmatpush.msrb.mxu0 %v6170_v31  ;;  %1505 = vmatpush.msrb.mxu1 %v6172_v32 }
 0x15f   : > { %1525 = vmatpush.msrb.mxu2 %v6176_v33  ;;  %1545 = vmatpush.msrb.mxu3 %v6178_v3 }
 0x160   : > { %1486 = vmatpush.msrb.mxu0 %v6182_v34  ;;  %1506 = vmatpush.msrb.mxu1 %v6184_v35 }
 0x161   : > { %1526 = vmatpush.msrb.mxu2 %v6188_v36  ;;  %1546 = vmatpush.msrb.mxu3 %v6190_v37 }
 0x162   : > { %1487 = vmatpush.msrb.mxu0 %v6194_v38  ;;  %1507 = vmatpush.msrb.mxu1 %v6196_v39 }
 0x163   : > { %1527 = vmatpush.msrb.mxu2 %v6200_v40  ;;  %1547 = vmatpush.msrb.mxu3 %v6202_v41 }
 0x164   : > { %1488 = vmatpush.msrb.mxu0 %v6206_v42  ;;  %1508 = vmatpush.msrb.mxu1 %v6208_v43 }
 0x165   : > { %1528 = vmatpush.msrb.mxu2 %v6212_v44  ;;  %1548 = vmatpush.msrb.mxu3 %v6214_v16 }
 0x166   : > { %1489 = vmatpush.msrb.mxu0 %v6218_v45  ;;  %1509 = vmatpush.msrb.mxu1 %v6222_v46 }
 0x167   : > { %1529 = vmatpush.msrb.mxu2 %v6224_v47  ;;  %1549 = vmatpush.msrb.mxu3 %v6228_v48 }
 0x168   : > { %1490 = vmatpush.msrb.mxu0 %v6232_v49  ;;  %1510 = vmatpush.msrb.mxu1 %v6236_v50 }
 0x169   : > { %1530 = vmatpush.msrb.mxu2 %v6238_v51  ;;  %1550 = vmatpush.msrb.mxu3 %v6242_v53 }
 0x16a   : > { %1491 = vmatpush.msrb.mxu0 %v6246_v55  ;;  %1511 = vmatpush.msrb.mxu1 %v6248_v57 }
 0x16b   : > { %1531 = vmatpush.msrb.mxu2 %v6252_v58  ;;  %1551 = vmatpush.msrb.mxu3 %v6254_v59 }
 0x16c   : > { %1492 = vmatpush.msrb.mxu0 %v6258_v63  ;;  %1512 = vmatpush.msrb.mxu1 %v6260_v0 }
 0x16d   : > { %1532 = vmatpush.msrb.mxu2 %v6264_v1  ;;  %1552 = vmatpush.msrb.mxu3 %v6266_v2 }
 0x16e   : > { %1493 = vmatpush.msrb.mxu0 %v6270_v4  ;;  %1513 = vmatpush.msrb.mxu1 %v6272_v5 }
 0x16f   : > { %1533 = vmatpush.msrb.mxu2 %v6276_v6  ;;  %1553 = vmatpush.msrb.mxu3 %v6278_v7 }
 0x170   : > { %1494 = vmatpush.msrb.mxu0 %v6282_v8  ;;  %1514 = vmatpush.msrb.mxu1 %v6284_v9 }
 0x171   : > { %1534 = vmatpush.msrb.mxu2 %v6288_v10  ;;  %1554 = vmatpush.msrb.mxu3 %v6290_v11 }
 0x172   : > { %1495 = vmatpush.msrb.mxu0 %v6294_v12  ;;  %1515 = vmatpush.msrb.mxu1 %v6296_v13 }
 0x173   : > { %1535 = vmatpush.msrb.mxu2 %v6300_v14  ;;  %1555 = vmatpush.msrb.mxu3 %v6302_v15 }
 0x174   : > { %1496 = vmatpush.msrb.mxu0 %v6306_v17  ;;  %1516 = vmatpush.msrb.mxu1 %v6308_v18 }
 0x175   : > { %1536 = vmatpush.msrb.mxu2 %v6312_v19  ;;  %1556 = vmatpush.msrb.mxu3 %v8401_v20 }
 0x176   : > { %1497 = vmatpush.msrb.mxu0 %v6318_v22  ;;  %1517 = vmatpush.msrb.mxu1 %v6320_v23 }
 0x177   : > { %1537 = vmatpush.msrb.mxu2 %v6324_v56  ;;  %1557 = vmatpush.msrb.mxu3 %v6326_v28 }
 0x178   : > { %1498 = vmatpush.msrb.mxu0 %v6330_v21  ;;  %1518 = vmatpush.msrb.mxu1 %v6332_v52 }
 0x179   : > { %1538 = vmatpush.msrb.mxu2 %v6336_v54  ;;  %1558 = vmatpush.msrb.mxu3 %v6338_v60 }
 0x17a   : > { %1648 = vmatpush.msra.mxu0 %v6148_v24  ;;  %1668 = vmatpush.msra.mxu1 %v6150_v25 }
 0x17b   : > { %1688 = vmatpush.msra.mxu2 %v6152_v26  ;;  %1708 = vmatpush.msra.mxu3 %v6154_v27 }
 0x17c   : > { %1649 = vmatpush.msra.mxu0 %v6158_v29  ;;  %1669 = vmatpush.msra.mxu1 %v6160_v30 }
 0x17d   : > { %1689 = vmatpush.msra.mxu2 %v6164_v61  ;;  %1709 = vmatpush.msra.mxu3 %v6166_v62 }
 0x17e   : > { %1650 = vmatpush.msra.mxu0 %v6170_v31  ;;  %1670 = vmatpush.msra.mxu1 %v6172_v32 }
 0x17f   : > { %1690 = vmatpush.msra.mxu2 %v6176_v33  ;;  %1710 = vmatpush.msra.mxu3 %v6178_v3 }
 0x180   : > { %1651 = vmatpush.msra.mxu0 %v6182_v34  ;;  %1671 = vmatpush.msra.mxu1 %v6184_v35 }
 0x181   : > { %1691 = vmatpush.msra.mxu2 %v6188_v36  ;;  %1711 = vmatpush.msra.mxu3 %v6190_v37 }
 0x182   : > { %1652 = vmatpush.msra.mxu0 %v6194_v38  ;;  %1672 = vmatpush.msra.mxu1 %v6196_v39 }
 0x183   : > { %1692 = vmatpush.msra.mxu2 %v6200_v40  ;;  %1712 = vmatpush.msra.mxu3 %v6202_v41 }
 0x184   : > { %1653 = vmatpush.msra.mxu0 %v6206_v42  ;;  %1673 = vmatpush.msra.mxu1 %v6208_v43 }
 0x185   : > { %1693 = vmatpush.msra.mxu2 %v6212_v44  ;;  %1713 = vmatpush.msra.mxu3 %v6214_v16 }
 0x186   : > { %1654 = vmatpush.msra.mxu0 %v6218_v45  ;;  %1674 = vmatpush.msra.mxu1 %v6222_v46 }
 0x187   : > { %1694 = vmatpush.msra.mxu2 %v6224_v47  ;;  %1714 = vmatpush.msra.mxu3 %v6228_v48 }
 0x188   : > { %1655 = vmatpush.msra.mxu0 %v6232_v49  ;;  %1675 = vmatpush.msra.mxu1 %v6236_v50 }
 0x189   : > { %1695 = vmatpush.msra.mxu2 %v6238_v51  ;;  %1715 = vmatpush.msra.mxu3 %v6242_v53 }
 0x18a   : > { %1656 = vmatpush.msra.mxu0 %v6246_v55  ;;  %1676 = vmatpush.msra.mxu1 %v6248_v57 }
 0x18b   : > { %1696 = vmatpush.msra.mxu2 %v6252_v58  ;;  %1716 = vmatpush.msra.mxu3 %v6254_v59 }
 0x18c   : > { %1657 = vmatpush.msra.mxu0 %v6258_v63  ;;  %1677 = vmatpush.msra.mxu1 %v6260_v0 }
 0x18d   : > { %1697 = vmatpush.msra.mxu2 %v6264_v1  ;;  %1717 = vmatpush.msra.mxu3 %v6266_v2 }
 0x18e   : > { %1658 = vmatpush.msra.mxu0 %v6270_v4  ;;  %1678 = vmatpush.msra.mxu1 %v6272_v5 }
 0x18f   : > { %1698 = vmatpush.msra.mxu2 %v6276_v6  ;;  %1718 = vmatpush.msra.mxu3 %v6278_v7 }
 0x190   : > { %1659 = vmatpush.msra.mxu0 %v6282_v8  ;;  %1679 = vmatpush.msra.mxu1 %v6284_v9 }
 0x191   : > { %1699 = vmatpush.msra.mxu2 %v6288_v10  ;;  %1719 = vmatpush.msra.mxu3 %v6290_v11  ;;  %v846_v11 = vld [vmem:[#allocation8] sm:$0xf] }
 0x192   : > { %1660 = vmatpush.msra.mxu0 %v6294_v12  ;;  %1680 = vmatpush.msra.mxu1 %v6296_v13  ;;  %v849_v9 = vperm.slane %v846_v11, 1  ;;  %v851_v6 = vperm.slane %v846_v11, 3  ;;  %v850_v48 = vperm.slane %v846_v11, 2 }
 0x193   : > { %1700 = vmatpush.msra.mxu2 %v6300_v14  ;;  %1720 = vmatpush.msra.mxu3 %v6302_v15 }
 0x194   : > { %1661 = vmatpush.msra.mxu0 %v6306_v17  ;;  %1681 = vmatpush.msra.mxu1 %v6308_v18  ;;  %v873_v18 = vpop.f32.mrf.mxu0  ;;  %v913_v17 = vpop.f32.mrf.mxu2 }
 0x195   : > { %1701 = vmatpush.msra.mxu2 %v6312_v19  ;;  %1721 = vmatpush.msra.mxu3 %v8401_v20  ;;  %v893_v19 = vpop.f32.mrf.mxu1  ;;  %v933_v20 = vpop.f32.mrf.mxu3 }
 0x196   : > { %1662 = vmatpush.msra.mxu0 %v6318_v22  ;;  %1682 = vmatpush.msra.mxu1 %v6320_v23 }
 0x197   : > { %1702 = vmatpush.msra.mxu2 %v6324_v56  ;;  %1722 = vmatpush.msra.mxu3 %v6326_v28 }
 0x198   : > { %1663 = vmatpush.msra.mxu0 %v6330_v21  ;;  %1683 = vmatpush.msra.mxu1 %v6332_v52  ;;  %v848_v52 = vperm.slane %v846_v11, 0 }
 0x199   : > { %1703 = vmatpush.msra.mxu2 %v6336_v54  ;;  %1723 = vmatpush.msra.mxu3 %v6338_v60 }
 0x19a   : > { %v874_v8 = vadd.f32 %v873_v18, %v848_v52 }
 0x19c   : > { %v953_v15 = vpop.f32.mrf.mxu0  ;;  %v993_v22 = vpop.f32.mrf.mxu2  ;;  %v894_v5 = vadd.f32 %v893_v19, %v874_v8 }
 0x19d   : > { %v973_v14 = vpop.f32.mrf.mxu1  ;;  %v1013_v23 = vpop.f32.mrf.mxu3  ;;  %v994_v60 = vadd.f32 %v993_v22, %v849_v9 }
 0x19e   : > { %v914_v59 = vadd.f32 %v913_v17, %v894_v5 }
 0x19f   : > { %v1014_v4 = vadd.f32 %v1013_v23, %v994_v60 }
 0x1a0   : > { %v934_v53 = vadd.f32 %v933_v20, %v914_v59 }
 0x1a2   : > { %v954_v18 = vadd.f32 %v953_v15, %v934_v53 }
 0x1a4   : > { %v1033_v13 = vpop.f32.mrf.mxu0  ;;  %v1073_v12 = vpop.f32.mrf.mxu2  ;;  %v6478_v8 = vadd.f32 %v973_v14, %v954_v18 }
 0x1a5   : > { %v1053_v56 = vpop.f32.mrf.mxu1  ;;  %v1093_v28 = vpop.f32.mrf.mxu3  ;;  %v1034_v58 = vadd.f32 %v1033_v13, %v1014_v4 }
 0x1a6   : > { %8402 = vst [vmem:[#allocation58_spill] sm:$0xff] %v6478_v8 }
 0x1a7   : > { %v1054_v51 = vadd.f32 %v1053_v56, %v1034_v58 }
 0x1a9   : > { %v1074_v9 = vadd.f32 %v1073_v12, %v1054_v51 }
 0x1ab   : > { %v6480_v19 = vadd.f32 %v1093_v28, %v1074_v9 }
 0x1ac   : > { %v1113_v21 = vpop.f32.mrf.mxu0  ;;  %v1153_v54 = vpop.f32.mrf.mxu2 }
 0x1ad   : > { %v1133_v10 = vpop.f32.mrf.mxu1  ;;  %v1173_v7 = vpop.f32.mrf.mxu3  ;;  %v1114_v22 = vadd.f32 %v1113_v21, %v850_v48  ;;  %8403 = vst [vmem:[#allocation59_spill] sm:$0xff] %v6480_v19 }
 0x1af   : > { %v1134_v59 = vadd.f32 %v1133_v10, %v1114_v22 }
 0x1b1   : > { %v1154_v51 = vadd.f32 %v1153_v54, %v1134_v59 }
 0x1b3   : > { %v1174_v53 = vadd.f32 %v1173_v7, %v1154_v51 }
 0x1b4   : > { %v1193_v2 = vpop.f32.mrf.mxu0 }
 0x1b5   : > { %v1213_v0 = vpop.f32.mrf.mxu1  ;;  %v1194_v15 = vadd.f32 %v1193_v2, %v1174_v53 }
 0x1b6   : > { %v1233_v1 = vpop.f32.mrf.mxu2 }
 0x1b7   : > { %v1234_v63 = vadd.f32 %v1233_v1, %v851_v6  ;;  %v6487_v20 = vadd.f32 %v1213_v0, %v1194_v15 }
 0x1b9   : > { %8405 = vst [vmem:[#allocation61_spill] sm:$0xff] %v6487_v20 }
 0x1bb   : > { %v1253_v57 = vpop.f32.mrf.mxu3 }
 0x1bc   : > { %v1254_v55 = vadd.f32 %v1253_v57, %v1234_v63  ;;  %v1273_v50 = vpop.f32.mrf.mxu0 }
 0x1be   : > { %v1274_v47 = vadd.f32 %v1273_v50, %v1254_v55 }
 0x1c4   : > { %v1293_v49 = vpop.f32.mrf.mxu1 }
 0x1c5   : > { %v1294_v52 = vadd.f32 %v1293_v49, %v1274_v47  ;;  %v1313_v23 = vpop.f32.mrf.mxu2 }
 0x1c7   : > { %v1333_v1 = vpop.f32.mrf.mxu3  ;;  %v1314_v63 = vadd.f32 %v1313_v23, %v1294_v52 }
 0x1c9   : > { %v6484_v48 = vadd.f32 %v1333_v1, %v1314_v63 }
 0x1cb   : > { %8404 = vst [vmem:[#allocation60_spill] sm:$0xff] %v6484_v48 }
 0x1d5   : > { %v1353_v5 = vpop.f32.mrf.mxu0  ;;  %v1373_v4 = vpop.f32.mrf.mxu1 }
 0x1d6   : > { %v1416_v57 = vadd.f32 %v1353_v5, %v6478_v8  ;;  %v1417_v58 = vadd.f32 %v1373_v4, %v6480_v19 }
 0x1d8   : > { %v5060_v6 = vmul.f32 -1.442695, %v1416_v57  ;;  %v5061_v50 = vmul.f32 -1.442695, %v1417_v58 }
 0x1da   : > { %5227 = vpow2.f32 %v5060_v6 }
 0x1db   : > { %5229 = vpow2.f32 %v5061_v50 }
 0x1dc   : > { %v1413_v47 = vpop.f32.mrf.mxu3  ;;  %v1393_v10 = vpop.f32.mrf.mxu2 }
 0x1dd   : > { %v1419_v49 = vadd.f32 %v1413_v47, %v6484_v48  ;;  %v1418_v21 = vadd.f32 %v1393_v10, %v6487_v20 }
 0x1df   : > { %v5062_v55 = vmul.f32 -1.442695, %v1419_v49 }
 0x1e0   : > { %v5228_v11 = vpop.eup %5227 }
 0x1e1   : > { %v5230_v12 = vpop.eup %5229  ;;  %v1423_v13 = vadd.f32 1.0, %v5228_v11  ;;  %5231 = vpow2.f32 %v5062_v55 }
 0x1e2   : > { %v1442_v14 = vadd.f32 1.0, %v5230_v12 }
 0x1e3   : > { %5233 = vrcp.f32 %v1423_v13  ;;  %v1435_v22 = vand.u32 2147483648, %v1423_v13  ;;  %v1433_v23 = vand.u32 2147483647, %v1423_v13  ;;  %vm1429_vm2 = vweird.f32 %v1423_v13 }
 0x1e4   : > { %5235 = vrcp.f32 %v1442_v14  ;;  %v1454_v52 = vand.u32 2147483648, %v1442_v14  ;;  %v1452_v0 = vand.u32 2147483647, %v1442_v14  ;;  %vm1448_vm3 = vweird.f32 %v1442_v14 }
 0x1e5   : > { %v1436_v57 = vor.u32 1.1754944e-38, %v1435_v22  ;;  %vm1434_vm5 = vcmp.eq.f32.partialorder %v1433_v23, 8.507059e+37  ;;  %v8436_v22 = vld [vmem:[#allocation50_spill] sm:$0xff]  ;;  %v8439_v23 = vld [vmem:[#allocation53_spill] sm:$0xff] }
 0x1e6   : > { %v1455_v63 = vor.u32 1.1754944e-38, %v1454_v52  ;;  %vm1453_vm7 = vcmp.eq.f32.partialorder %v1452_v0, 8.507059e+37  ;;  %v8437_v52 = vld [vmem:[#allocation51_spill] sm:$0xff] }
 0x1e7   : > { %v5232_v17 = vpop.eup %5231  ;;  %v8441_v0 = vld [vmem:[#allocation55_spill] sm:$0xff] }
 0x1e8   : > { %v1462_v56 = vadd.f32 1.0, %v5232_v17 }
 0x1e9   : > { %v5234_v28 = vpop.eup %5233 }
 0x1ea   : > { %v5236_v54 = vpop.eup %5235  ;;  %v1425_v60 = vmul.f32 %v5234_v28, %v1423_v13  ;;  %5237 = vrcp.f32 %v1462_v56  ;;  %vm1430_vm0 = vweird.f32 %v5234_v28  ;;  %vm1468_vm9 = vweird.f32 %v1462_v56 }
 0x1eb   : > { %v1444_v7 = vmul.f32 %v5236_v54, %v1442_v14  ;;  %5239 = vtanh.f32 %v1418_v21  ;;  %vm1449_vm1 = vweird.f32 %v5236_v54  ;;  %vm1431_vm4 = vmor %vm1429_vm2, %vm1430_vm0  ;;  %v1474_v14 = vand.u32 2147483648, %v1462_v56 }
 0x1ec   : > { %v1426_v18 = vsub.f32 1.0, %v1425_v60  ;;  %vm1450_vm6 = vmor %vm1448_vm3, %vm1449_vm1  ;;  %v1472_v10 = vand.u32 2147483647, %v1462_v56 }
 0x1ed   : > { %v1445_v9 = vsub.f32 1.0, %v1444_v7  ;;  %v8433_v7 = vld [vmem:[#allocation47_spill] sm:$0xff] }
 0x1ee   : > { %v1427_v2 = vmul.f32 %v5234_v28, %v1426_v18  ;;  %vm1473_vm11 = vcmp.eq.f32.partialorder %v1472_v10, 8.507059e+37  ;;  %v8434_v18 = vld [vmem:[#allocation48_spill] sm:$0xff] }
 0x1ef   : > { %v1446_v1 = vmul.f32 %v5236_v54, %v1445_v9  ;;  %v8435_v9 = vld [vmem:[#allocation49_spill] sm:$0xff] }
 0x1f0   : > { %v5238_v5 = vpop.eup %5237  ;;  %v1428_v4 = vadd.f32 %v5234_v28, %v1427_v2  ;;  %v8438_v2 = vld [vmem:[#allocation52_spill] sm:$0xff] }
 0x1f1   : > { %v1447_v58 = vadd.f32 %v5236_v54, %v1446_v1  ;;  %v1464_v59 = vmul.f32 %v5238_v5, %v1462_v56  ;;  %v5240_v50 = vpop.eup %5239  ;;  %vm1469_vm8 = vweird.f32 %v5238_v5  ;;  %v8432_v56 = vld [vmem:[#allocation46_spill] sm:$0xff] }
 0x1f2   : > { %v1432_v6 = vsel %vm1431_vm4, %v5234_v28, %v1428_v4  ;;  %vm1470_vm10 = vmor %vm1468_vm9, %vm1469_vm8  ;;  %v1475_v28 = vor.u32 1.1754944e-38, %v1474_v14  ;;  %v8440_v1 = vld [vmem:[#allocation54_spill] sm:$0xff]  ;;  %v8443_v4 = vld [vmem:[#allocation57_spill] sm:$0xff] }
 0x1f3   : > { %v1437_v51 = vsel %vm1434_vm5, %v1436_v57, %v1432_v6  ;;  %v1451_v47 = vsel %vm1450_vm6, %v5236_v54, %v1447_v58  ;;  %v1465_v49 = vsub.f32 1.0, %v1464_v59 }
 0x1f4   : > { %v1456_v53 = vsel %vm1453_vm7, %v1455_v63, %v1451_v47  ;;  %v1479_v55 = vmul.f32 %v5240_v50, %v1437_v51 }
 0x1f5   : > { %v1478_v11 = vmul.f32 0.0, %v1456_v53  ;;  %v1466_v12 = vmul.f32 %v5238_v5, %v1465_v49 }
 0x1f7   : > { %v6490_v15 = vadd.f32 %v1479_v55, %v1478_v11  ;;  %v1467_v13 = vadd.f32 %v5238_v5, %v1466_v12 }
 0x1f9   : > { %5241 = vtanh.f32 %v6490_v15  ;;  %v1471_v17 = vsel %vm1470_vm10, %v5238_v5, %v1467_v13  ;;  %v8442_v5 = vld [vmem:[#allocation56_spill] sm:$0xff] }
 0x1fa   : > { %v1476_v54 = vsel %vm1473_vm11, %v1475_v28, %v1471_v17 }
 0x1ff   : > { %v5242_v21 = vpop.eup %5241 }
 0x200   : > { %v6493_v60 = vmul.f32 %v5242_v21, %v1476_v54 }
 0x202   : > { %1499 = vmatmul.f32.vlgmr.msrb.gmra.mxu0 %v6493_v60  ;;  %1519 = vmatmul.f32.vlgmr.msrb.gmra.mxu1 %v6493_v60 }
 0x203   : > { %1539 = vmatmul.f32.vlgmr.msrb.gmra.mxu2 %v6493_v60  ;;  %1559 = vmatmul.f32.vlgmr.msrb.gmra.mxu3 %v6493_v60 }
 0x204   : > { %1813 = vmatpush.msrb.mxu0 %v6148_v24  ;;  %1833 = vmatpush.msrb.mxu1 %v6150_v25  ;;  %v8406_v24 = vld [vmem:[#allocation20_spill] sm:$0xff]  ;;  %v8407_v25 = vld [vmem:[#allocation21_spill] sm:$0xff] }
 0x205   : > { %1853 = vmatpush.msrb.mxu2 %v6152_v26  ;;  %1873 = vmatpush.msrb.mxu3 %v6154_v27  ;;  %v8408_v26 = vld [vmem:[#allocation22_spill] sm:$0xff]  ;;  %v8409_v27 = vld [vmem:[#allocation23_spill] sm:$0xff] }
 0x206   : > { %1814 = vmatpush.msrb.mxu0 %v6158_v29  ;;  %1834 = vmatpush.msrb.mxu1 %v6160_v30  ;;  %v8410_v29 = vld [vmem:[#allocation24_spill] sm:$0xff]  ;;  %v8411_v30 = vld [vmem:[#allocation25_spill] sm:$0xff] }
 0x207   : > { %1854 = vmatpush.msrb.mxu2 %v6164_v61  ;;  %1874 = vmatpush.msrb.mxu3 %v6166_v62  ;;  %v8412_v61 = vld [vmem:[#allocation26_spill] sm:$0xff]  ;;  %v8413_v62 = vld [vmem:[#allocation27_spill] sm:$0xff] }
 0x208   : > { %1815 = vmatpush.msrb.mxu0 %v6170_v31  ;;  %1835 = vmatpush.msrb.mxu1 %v6172_v32  ;;  %v8414_v31 = vld [vmem:[#allocation28_spill] sm:$0xff]  ;;  %v8415_v32 = vld [vmem:[#allocation29_spill] sm:$0xff] }
 0x209   : > { %1855 = vmatpush.msrb.mxu2 %v6176_v33  ;;  %1875 = vmatpush.msrb.mxu3 %v6178_v3  ;;  %v8416_v33 = vld [vmem:[#allocation30_spill] sm:$0xff]  ;;  %v8417_v3 = vld [vmem:[#allocation31_spill] sm:$0xff] }
 0x20a   : > { %1816 = vmatpush.msrb.mxu0 %v6182_v34  ;;  %1836 = vmatpush.msrb.mxu1 %v6184_v35  ;;  %v8418_v34 = vld [vmem:[#allocation32_spill] sm:$0xff]  ;;  %v8419_v35 = vld [vmem:[#allocation33_spill] sm:$0xff] }
 0x20b   : > { %1856 = vmatpush.msrb.mxu2 %v6188_v36  ;;  %1876 = vmatpush.msrb.mxu3 %v6190_v37  ;;  %v8420_v36 = vld [vmem:[#allocation34_spill] sm:$0xff]  ;;  %v8421_v37 = vld [vmem:[#allocation35_spill] sm:$0xff] }
 0x20c   : > { %1817 = vmatpush.msrb.mxu0 %v6194_v38  ;;  %1837 = vmatpush.msrb.mxu1 %v6196_v39  ;;  %v8422_v38 = vld [vmem:[#allocation36_spill] sm:$0xff]  ;;  %v8423_v39 = vld [vmem:[#allocation37_spill] sm:$0xff] }
 0x20d   : > { %1857 = vmatpush.msrb.mxu2 %v6200_v40  ;;  %1877 = vmatpush.msrb.mxu3 %v6202_v41  ;;  %v8424_v40 = vld [vmem:[#allocation38_spill] sm:$0xff]  ;;  %v8425_v41 = vld [vmem:[#allocation39_spill] sm:$0xff] }
 0x20e   : > { %1818 = vmatpush.msrb.mxu0 %v6206_v42  ;;  %1838 = vmatpush.msrb.mxu1 %v6208_v43  ;;  %v8426_v42 = vld [vmem:[#allocation40_spill] sm:$0xff]  ;;  %v8427_v43 = vld [vmem:[#allocation41_spill] sm:$0xff] }
 0x20f   : > { %1858 = vmatpush.msrb.mxu2 %v6212_v44  ;;  %1878 = vmatpush.msrb.mxu3 %v6214_v16  ;;  %v8428_v44 = vld [vmem:[#allocation42_spill] sm:$0xff]  ;;  %v8429_v16 = vld [vmem:[#allocation43_spill] sm:$0xff] }
 0x210   : > { %1819 = vmatpush.msrb.mxu0 %v6218_v45  ;;  %1839 = vmatpush.msrb.mxu1 %v6222_v46  ;;  %v8430_v45 = vld [vmem:[#allocation44_spill] sm:$0xff]  ;;  %v8431_v46 = vld [vmem:[#allocation45_spill] sm:$0xff] }
 0x211   : > { %1859 = vmatpush.msrb.mxu2 %v8406_v24  ;;  %1879 = vmatpush.msrb.mxu3 %v8407_v25 }
 0x212   : > { %1820 = vmatpush.msrb.mxu0 %v8408_v26  ;;  %1840 = vmatpush.msrb.mxu1 %v8409_v27 }
 0x213   : > { %1860 = vmatpush.msrb.mxu2 %v8410_v29  ;;  %1880 = vmatpush.msrb.mxu3 %v8411_v30 }
 0x214   : > { %1821 = vmatpush.msrb.mxu0 %v8412_v61  ;;  %1841 = vmatpush.msrb.mxu1 %v8413_v62 }
 0x215   : > { %1861 = vmatpush.msrb.mxu2 %v8414_v31  ;;  %1881 = vmatpush.msrb.mxu3 %v8415_v32 }
 0x216   : > { %1822 = vmatpush.msrb.mxu0 %v8416_v33  ;;  %1842 = vmatpush.msrb.mxu1 %v8417_v3 }
 0x217   : > { %1862 = vmatpush.msrb.mxu2 %v8418_v34  ;;  %1882 = vmatpush.msrb.mxu3 %v8419_v35 }
 0x218   : > { %1823 = vmatpush.msrb.mxu0 %v8420_v36  ;;  %1843 = vmatpush.msrb.mxu1 %v8421_v37 }
 0x219   : > { %1863 = vmatpush.msrb.mxu2 %v8422_v38  ;;  %1883 = vmatpush.msrb.mxu3 %v8423_v39 }
 0x21a   : > { %1824 = vmatpush.msrb.mxu0 %v8424_v40  ;;  %1844 = vmatpush.msrb.mxu1 %v8425_v41 }
 0x21b   : > { %1864 = vmatpush.msrb.mxu2 %v8426_v42  ;;  %1884 = vmatpush.msrb.mxu3 %v8427_v43 }
 0x21c   : > { %1825 = vmatpush.msrb.mxu0 %v8428_v44  ;;  %1845 = vmatpush.msrb.mxu1 %v8429_v16 }
 0x21d   : > { %1865 = vmatpush.msrb.mxu2 %v8430_v45  ;;  %1885 = vmatpush.msrb.mxu3 %v8431_v46 }
 0x21e   : > { %1826 = vmatpush.msrb.mxu0 %v8432_v56  ;;  %1846 = vmatpush.msrb.mxu1 %v8433_v7 }
 0x21f   : > { %1866 = vmatpush.msrb.mxu2 %v8434_v18  ;;  %1886 = vmatpush.msrb.mxu3 %v8435_v9 }
 0x220   : > { %1827 = vmatpush.msrb.mxu0 %v8436_v22  ;;  %1847 = vmatpush.msrb.mxu1 %v8437_v52 }
 0x221   : > { %1867 = vmatpush.msrb.mxu2 %v8438_v2  ;;  %1887 = vmatpush.msrb.mxu3 %v8439_v23 }
 0x222   : > { %1828 = vmatpush.msrb.mxu0 %v8440_v1  ;;  %1848 = vmatpush.msrb.mxu1 %v8441_v0 }
 0x223   : > { %1868 = vmatpush.msrb.mxu2 %v8442_v5  ;;  %1888 = vmatpush.msrb.mxu3 %v8443_v4 }
 0x27f   : > { %v1500_v57 = vpop.f32.mrf.mxu0  ;;  %v1520_v58 = vpop.f32.mrf.mxu1 }
 0x280   : > { %v1567_v59 = vrot.slane %v1500_v57, 7  ;;  %v1568_v63 = vrot.slane %v1520_v58, 7 }
 0x282   : > { %v1575_v6 = vadd.f32 %v1567_v59, %v6478_v8  ;;  %v1576_v50 = vadd.f32 %v1568_v63, %v6480_v19 }
 0x284   : > { %v5063_v51 = vmul.f32 -1.442695, %v1575_v6  ;;  %v5064_v47 = vmul.f32 -1.442695, %v1576_v50 }
 0x286   : > { %5243 = vpow2.f32 %v5063_v51  ;;  %v1560_v49 = vpop.f32.mrf.mxu3  ;;  %v1540_v17 = vpop.f32.mrf.mxu2 }
 0x287   : > { %5245 = vpow2.f32 %v5064_v47  ;;  %v1570_v53 = vrot.slane %v1560_v49, 7  ;;  %v1569_v28 = vrot.slane %v1540_v17, 7 }
 0x289   : > { %v1578_v55 = vadd.f32 %v1570_v53, %v6484_v48  ;;  %v1577_v25 = vadd.f32 %v1569_v28, %v6487_v20 }
 0x28b   : > { %v5065_v11 = vmul.f32 -1.442695, %v1578_v55 }
 0x28c   : > { %v5244_v12 = vpop.eup %5243 }
 0x28d   : > { %v5246_v13 = vpop.eup %5245  ;;  %v1582_v14 = vadd.f32 1.0, %v5244_v12  ;;  %5247 = vpow2.f32 %v5065_v11  ;;  %v1638_v12 = vrot.slane %v6490_v15, 7 }
 0x28e   : > { %v1601_v10 = vadd.f32 1.0, %v5246_v13 }
 0x28f   : > { %5249 = vrcp.f32 %v1582_v14  ;;  %v1594_v58 = vand.u32 2147483648, %v1582_v14  ;;  %v1592_v6 = vand.u32 2147483647, %v1582_v14  ;;  %vm1588_vm14 = vweird.f32 %v1582_v14 }
 0x290   : > { %5251 = vrcp.f32 %v1601_v10  ;;  %v1613_v59 = vand.u32 2147483648, %v1601_v10  ;;  %v1611_v51 = vand.u32 2147483647, %v1601_v10  ;;  %vm1607_vm15 = vweird.f32 %v1601_v10 }
 0x291   : > { %v1595_v53 = vor.u32 1.1754944e-38, %v1594_v58  ;;  %vm1593_vm2 = vcmp.eq.f32.partialorder %v1592_v6, 8.507059e+37 }
 0x292   : > { %v1614_v13 = vor.u32 1.1754944e-38, %v1613_v59  ;;  %vm1612_vm3 = vcmp.eq.f32.partialorder %v1611_v51, 8.507059e+37 }
 0x293   : > { %v5248_v21 = vpop.eup %5247 }
 0x294   : > { %v1621_v54 = vadd.f32 1.0, %v5248_v21 }
 0x295   : > { %v5250_v24 = vpop.eup %5249 }
 0x296   : > { %v5252_v26 = vpop.eup %5251  ;;  %v1584_v27 = vmul.f32 %v5250_v24, %v1582_v14  ;;  %5253 = vrcp.f32 %v1621_v54  ;;  %vm1589_vm12 = vweird.f32 %v5250_v24  ;;  %v1633_v15 = vand.u32 2147483648, %v1621_v54 }
 0x297   : > { %v1603_v29 = vmul.f32 %v5252_v26, %v1601_v10  ;;  %5255 = vtanh.f32 %v1577_v25  ;;  %vm1608_vm13 = vweird.f32 %v5252_v26  ;;  %vm1590_vm0 = vmor %vm1588_vm14, %vm1589_vm12  ;;  %vm1627_vm5 = vweird.f32 %v1621_v54 }
 0x298   : > { %v1585_v30 = vsub.f32 1.0, %v1584_v27  ;;  %vm1609_vm1 = vmor %vm1607_vm15, %vm1608_vm13  ;;  %v1631_v59 = vand.u32 2147483647, %v1621_v54 }
 0x299   : > { %v1604_v57 = vsub.f32 1.0, %v1603_v29 }
 0x29a   : > { %v1586_v63 = vmul.f32 %v5250_v24, %v1585_v30  ;;  %vm1632_vm7 = vcmp.eq.f32.partialorder %v1631_v59, 8.507059e+37  ;;  %v6631_v59 = vld [vmem:[#allocation7 + $0x178] sm:$0xff] }
 0x29b   : > { %v1605_v50 = vmul.f32 %v5252_v26, %v1604_v57  ;;  %8444 = vst [vmem:[#allocation20_spill] sm:$0xff] %v6631_v59 }
 0x29c   : > { %v5254_v47 = vpop.eup %5253  ;;  %v1587_v49 = vadd.f32 %v5250_v24, %v1586_v63  ;;  %v1634_v63 = vor.u32 1.1754944e-38, %v1633_v15  ;;  %v6628_v15 = vld [vmem:[#allocation7 + $0x170] sm:$0xff] }
 0x29d   : > { %v1606_v55 = vadd.f32 %v5252_v26, %v1605_v50  ;;  %v1623_v11 = vmul.f32 %v5254_v47, %v1621_v54  ;;  %v5256_v28 = vpop.eup %5255  ;;  %vm1628_vm4 = vweird.f32 %v5254_v47  ;;  %v6580_v54 = vld [vmem:[#allocation7 + $0x1f0] sm:$0xff] }
 0x29e   : > { %v1591_v17 = vsel %vm1590_vm0, %v5250_v24, %v1587_v49  ;;  %vm1629_vm6 = vmor %vm1627_vm5, %vm1628_vm4  ;;  %v6574_v49 = vld [vmem:[#allocation7 + $0x1e0] sm:$0xff]  ;;  %vm2637_vm5 = vcmask 1041408  }
 0x29f   : > { %v1596_v21 = vsel %vm1593_vm2, %v1595_v53, %v1591_v17  ;;  %v1610_v25 = vsel %vm1609_vm1, %v5252_v26, %v1606_v55  ;;  %v1624_v27 = vsub.f32 1.0, %v1623_v11  ;;  %v6577_v53 = vld [vmem:[#allocation7 + $0x1e8] sm:$0xff]  ;;  %v6586_v55 = vld [vmem:[#allocation7 + $0x1c0] sm:$0xff] }
 0x2a0   : > { %v1615_v29 = vsel %vm1612_vm3, %v1614_v13, %v1610_v25  ;;  %v1641_v30 = vmul.f32 %v5256_v28, %v1596_v21  ;;  %v6589_v11 = vld [vmem:[#allocation7 + $0x1c8] sm:$0xff]  ;;  %v6595_v13 = vld [vmem:[#allocation7 + $0x1d8] sm:$0xff]  ;;  %v6598_v17 = vld [vmem:[#allocation7 + $0x1a0] sm:$0xff]  ;;  %vm2635_vm3 = vcmask 1040384  }
 0x2a1   : > { %v1640_v57 = vmul.f32 %v1638_v12, %v1615_v29  ;;  %v1625_v14 = vmul.f32 %v5254_v47, %v1624_v27  ;;  %v6592_v12 = vld [vmem:[#allocation7 + $0x1d0] sm:$0xff]  ;;  %v6601_v28 = vld [vmem:[#allocation7 + $0x1a8] sm:$0xff]  ;;  %v6607_v25 = vld [vmem:[#allocation7 + $0x1b8] sm:$0xff] }
 0x2a2   : > { %v6604_v21 = vld [vmem:[#allocation7 + $0x1b0] sm:$0xff]  ;;  %v6610_v27 = vld [vmem:[#allocation7 + $0x180] sm:$0xff]  ;;  %v6613_v29 = vld [vmem:[#allocation7 + $0x188] sm:$0xff] }
 0x2a3   : > { %v6568_v10 = vadd.f32 %v1641_v30, %v1640_v57  ;;  %v1626_v58 = vadd.f32 %v5254_v47, %v1625_v14  ;;  %v6616_v30 = vld [vmem:[#allocation7 + $0x190] sm:$0xff]  ;;  %v6619_v57 = vld [vmem:[#allocation7 + $0x198] sm:$0xff]  ;;  %v6622_v14 = vld [vmem:[#allocation7 + $0x160] sm:$0xff] }
 0x2a5   : > { %5257 = vtanh.f32 %v6568_v10  ;;  %v1630_v24 = vsel %vm1629_vm6, %v5254_v47, %v1626_v58  ;;  %v6583_v47 = vld [vmem:[#allocation7 + $0x1f8] sm:$0xff]  ;;  %v6625_v58 = vld [vmem:[#allocation7 + $0x168] sm:$0xff] }
 0x2a6   : > { %v1635_v6 = vsel %vm1632_vm7, %v1634_v63, %v1630_v24  ;;  %v6634_v24 = vld [vmem:[#allocation7 + $0x140] sm:$0xff]  ;;  %v6637_v63 = vld [vmem:[#allocation7 + $0x148] sm:$0xff] }
 0x2a7   : > { %8445 = vst [vmem:[#allocation21_spill] sm:$0xff] %v6634_v24 }
 0x2a8   : > { %8446 = vst [vmem:[#allocation22_spill] sm:$0xff] %v6637_v63 }
 0x2ab   : > { %v5258_v26 = vpop.eup %5257 }
 0x2ac   : > { %v6571_v50 = vmul.f32 %v5258_v26, %v1635_v6  ;;  %v6640_v26 = vld [vmem:[#allocation7 + $0x150] sm:$0xff]  ;;  %v6643_v6 = vld [vmem:[#allocation7 + $0x158] sm:$0xff] }
 0x2ad   : > { %8447 = vst [vmem:[#allocation23_spill] sm:$0xff] %v6640_v26 }
 0x2ae   : > { %v1646_v51 = vrot.slane %v6571_v50, 1  ;;  %8448 = vst [vmem:[#allocation24_spill] sm:$0xff] %v6643_v6 }
 0x2b0   : > { %1664 = vmatmul.f32.vlgmr.msra.gmra.mxu0 %v1646_v51  ;;  %1684 = vmatmul.f32.vlgmr.msra.gmra.mxu1 %v1646_v51 }
 0x2b1   : > { %1704 = vmatmul.f32.vlgmr.msra.gmra.mxu2 %v1646_v51  ;;  %1724 = vmatmul.f32.vlgmr.msra.gmra.mxu3 %v1646_v51  ;;  %v6646_v51 = vld [vmem:[#allocation7 + $0x120] sm:$0xff] }
 0x2b2   : > { %1978 = vmatpush.msra.mxu0 %v6574_v49  ;;  %1998 = vmatpush.msra.mxu1 %v6577_v53  ;;  %8449 = vst [vmem:[#allocation25_spill] sm:$0xff] %v6646_v51 }
 0x2b3   : > { %2018 = vmatpush.msra.mxu2 %v6580_v54  ;;  %2038 = vmatpush.msra.mxu3 %v6583_v47 }
 0x2b4   : > { %1979 = vmatpush.msra.mxu0 %v6586_v55  ;;  %1999 = vmatpush.msra.mxu1 %v6589_v11 }
 0x2b5   : > { %2019 = vmatpush.msra.mxu2 %v6592_v12  ;;  %2039 = vmatpush.msra.mxu3 %v6595_v13 }
 0x2b6   : > { %1980 = vmatpush.msra.mxu0 %v6598_v17  ;;  %2000 = vmatpush.msra.mxu1 %v6601_v28 }
 0x2b7   : > { %2020 = vmatpush.msra.mxu2 %v6604_v21  ;;  %2040 = vmatpush.msra.mxu3 %v6607_v25 }
 0x2b8   : > { %1981 = vmatpush.msra.mxu0 %v6610_v27  ;;  %2001 = vmatpush.msra.mxu1 %v6613_v29 }
 0x2b9   : > { %2021 = vmatpush.msra.mxu2 %v6616_v30  ;;  %2041 = vmatpush.msra.mxu3 %v6619_v57 }
 0x2ba   : > { %1982 = vmatpush.msra.mxu0 %v6622_v14  ;;  %2002 = vmatpush.msra.mxu1 %v6625_v58 }
 0x2bb   : > { %2022 = vmatpush.msra.mxu2 %v6628_v15  ;;  %2042 = vmatpush.msra.mxu3 %v6631_v59  ;;  %v6649_v59 = vld [vmem:[#allocation7 + $0x128] sm:$0xff] }
 0x2bc   : > { %1983 = vmatpush.msra.mxu0 %v6634_v24  ;;  %2003 = vmatpush.msra.mxu1 %v6637_v63  ;;  %8450 = vst [vmem:[#allocation26_spill] sm:$0xff] %v6649_v59  ;;  %v6652_v24 = vld [vmem:[#allocation7 + $0x130] sm:$0xff]  ;;  %v6655_v63 = vld [vmem:[#allocation7 + $0x138] sm:$0xff] }
 0x2bd   : > { %2023 = vmatpush.msra.mxu2 %v6640_v26  ;;  %2043 = vmatpush.msra.mxu3 %v6643_v6  ;;  %v6658_v26 = vld [vmem:[#allocation7 + $0x100] sm:$0xff]  ;;  %v6661_v6 = vld [vmem:[#allocation7 + $0x108] sm:$0xff] }
 0x2be   : > { %1984 = vmatpush.msra.mxu0 %v6646_v51  ;;  %2004 = vmatpush.msra.mxu1 %v6649_v59  ;;  %v6664_v51 = vld [vmem:[#allocation7 + $0x110] sm:$0xff]  ;;  %v6667_v59 = vld [vmem:[#allocation7 + $0x118] sm:$0xff] }
 0x2bf   : > { %2024 = vmatpush.msra.mxu2 %v6652_v24  ;;  %2044 = vmatpush.msra.mxu3 %v6655_v63 }
 0x2c0   : > { %1985 = vmatpush.msra.mxu0 %v6658_v26  ;;  %2005 = vmatpush.msra.mxu1 %v6661_v6 }
 0x2c1   : > { %2025 = vmatpush.msra.mxu2 %v6664_v51  ;;  %2045 = vmatpush.msra.mxu3 %v6667_v59 }
 0x2c2   : > { %1986 = vmatpush.msra.mxu0 %v8412_v61  ;;  %2006 = vmatpush.msra.mxu1 %v8413_v62 }
 0x2c3   : > { %2026 = vmatpush.msra.mxu2 %v8414_v31  ;;  %2046 = vmatpush.msra.mxu3 %v8415_v32 }
 0x2c4   : > { %1987 = vmatpush.msra.mxu0 %v8416_v33  ;;  %2007 = vmatpush.msra.mxu1 %v8417_v3 }
 0x2c5   : > { %2027 = vmatpush.msra.mxu2 %v8418_v34  ;;  %2047 = vmatpush.msra.mxu3 %v8419_v35 }
 0x2c6   : > { %1988 = vmatpush.msra.mxu0 %v8420_v36  ;;  %2008 = vmatpush.msra.mxu1 %v8421_v37 }
 0x2c7   : > { %2028 = vmatpush.msra.mxu2 %v8422_v38  ;;  %2048 = vmatpush.msra.mxu3 %v8423_v39 }
 0x2c8   : > { %1989 = vmatpush.msra.mxu0 %v8424_v40  ;;  %2009 = vmatpush.msra.mxu1 %v8425_v41 }
 0x2c9   : > { %2029 = vmatpush.msra.mxu2 %v8426_v42  ;;  %2049 = vmatpush.msra.mxu3 %v8427_v43 }
 0x2ca   : > { %1990 = vmatpush.msra.mxu0 %v8428_v44  ;;  %2010 = vmatpush.msra.mxu1 %v8429_v16 }
 0x2cb   : > { %2030 = vmatpush.msra.mxu2 %v8430_v45  ;;  %2050 = vmatpush.msra.mxu3 %v8431_v46 }
 0x2cc   : > { %1991 = vmatpush.msra.mxu0 %v8432_v56  ;;  %2011 = vmatpush.msra.mxu1 %v8433_v7 }
 0x2cd   : > { %2031 = vmatpush.msra.mxu2 %v8434_v18  ;;  %2051 = vmatpush.msra.mxu3 %v8435_v9 }
 0x2ce   : > { %1992 = vmatpush.msra.mxu0 %v8436_v22  ;;  %2012 = vmatpush.msra.mxu1 %v8437_v52 }
 0x2cf   : > { %2032 = vmatpush.msra.mxu2 %v8438_v2  ;;  %2052 = vmatpush.msra.mxu3 %v8439_v23 }
 0x2d0   : > { %1993 = vmatpush.msra.mxu0 %v8440_v1  ;;  %2013 = vmatpush.msra.mxu1 %v8441_v0 }
 0x2d1   : > { %2033 = vmatpush.msra.mxu2 %v8442_v5  ;;  %2053 = vmatpush.msra.mxu3 %v8443_v4 }
 0x32d   : > { %v1665_v61 = vpop.f32.mrf.mxu0  ;;  %v1685_v62 = vpop.f32.mrf.mxu1 }
 0x32e   : > { %v1732_v31 = vrot.slane %v1665_v61, 6  ;;  %v1733_v32 = vrot.slane %v1685_v62, 6 }
 0x330   : > { %v1740_v33 = vadd.f32 %v1732_v31, %v6478_v8  ;;  %v1741_v3 = vadd.f32 %v1733_v32, %v6480_v19 }
 0x332   : > { %v5066_v34 = vmul.f32 -1.442695, %v1740_v33  ;;  %v5067_v35 = vmul.f32 -1.442695, %v1741_v3 }
 0x334   : > { %5259 = vpow2.f32 %v5066_v34  ;;  %v1725_v36 = vpop.f32.mrf.mxu3  ;;  %v1705_v44 = vpop.f32.mrf.mxu2  ;;  %v1803_v34 = vrot.slane %v6568_v10, 7 }
 0x335   : > { %5261 = vpow2.f32 %v5067_v35  ;;  %v1735_v37 = vrot.slane %v1725_v36, 6  ;;  %v1734_v16 = vrot.slane %v1705_v44, 6 }
 0x337   : > { %v1743_v38 = vadd.f32 %v1735_v37, %v6484_v48  ;;  %v1742_v7 = vadd.f32 %v1734_v16, %v6487_v20 }
 0x339   : > { %v5068_v39 = vmul.f32 -1.442695, %v1743_v38 }
 0x33a   : > { %v5260_v40 = vpop.eup %5259 }
 0x33b   : > { %v5262_v41 = vpop.eup %5261  ;;  %v1747_v42 = vadd.f32 1.0, %v5260_v40  ;;  %5263 = vpow2.f32 %v5068_v39 }
 0x33c   : > { %v1766_v43 = vadd.f32 1.0, %v5262_v41 }
 0x33d   : > { %5265 = vrcp.f32 %v1747_v42  ;;  %v1759_v23 = vand.u32 2147483648, %v1747_v42  ;;  %v1757_v5 = vand.u32 2147483647, %v1747_v42  ;;  %vm1753_vm10 = vweird.f32 %v1747_v42 }
 0x33e   : > { %5267 = vrcp.f32 %v1766_v43  ;;  %v1778_v1 = vand.u32 2147483648, %v1766_v43  ;;  %v1776_v61 = vand.u32 2147483647, %v1766_v43  ;;  %vm1772_vm11 = vweird.f32 %v1766_v43 }
 0x33f   : > { %v1760_v32 = vor.u32 1.1754944e-38, %v1759_v23  ;;  %vm1758_vm14 = vcmp.eq.f32.partialorder %v1757_v5, 8.507059e+37  ;;  %v8455_v5 = vld [vmem:[#allocation24_spill] sm:$0xff] }
 0x340   : > { %v1779_v35 = vor.u32 1.1754944e-38, %v1778_v1  ;;  %vm1777_vm15 = vcmp.eq.f32.partialorder %v1776_v61, 8.507059e+37  ;;  %v8457_v61 = vld [vmem:[#allocation26_spill] sm:$0xff] }
 0x341   : > { %v5264_v45 = vpop.eup %5263 }
 0x342   : > { %v1786_v46 = vadd.f32 1.0, %v5264_v45 }
 0x343   : > { %v5266_v56 = vpop.eup %5265 }
 0x344   : > { %v5268_v18 = vpop.eup %5267  ;;  %v1749_v9 = vmul.f32 %v5266_v56, %v1747_v42  ;;  %5269 = vrcp.f32 %v1786_v46  ;;  %vm1754_vm8 = vweird.f32 %v5266_v56  ;;  %v1798_v10 = vand.u32 2147483648, %v1786_v46 }
 0x345   : > { %v1768_v22 = vmul.f32 %v5268_v18, %v1766_v43  ;;  %5271 = vtanh.f32 %v1742_v7  ;;  %vm1773_vm9 = vweird.f32 %v5268_v18  ;;  %vm1755_vm12 = vmor %vm1753_vm10, %vm1754_vm8  ;;  %vm1792_vm1 = vweird.f32 %v1786_v46 }
 0x346   : > { %v1750_v52 = vsub.f32 1.0, %v1749_v9  ;;  %vm1774_vm13 = vmor %vm1772_vm11, %vm1773_vm9  ;;  %v1796_v7 = vand.u32 2147483647, %v1786_v46  ;;  %v1799_v9 = vor.u32 1.1754944e-38, %v1798_v10  ;;  %v6799_v10 = vld [vmem:[#allocation7 + $0x68] sm:$0xff] }
 0x347   : > { %v1769_v2 = vsub.f32 1.0, %v1768_v22  ;;  %8470 = vst [vmem:[#allocation39_spill] sm:$0xff] %v6799_v10 }
 0x348   : > { %v1751_v0 = vmul.f32 %v5266_v56, %v1750_v52  ;;  %vm1797_vm4 = vcmp.eq.f32.partialorder %v1796_v7, 8.507059e+37  ;;  %v6802_v7 = vld [vmem:[#allocation7 + $0x70] sm:$0xff] }
 0x349   : > { %v1770_v4 = vmul.f32 %v5268_v18, %v1769_v2  ;;  %v2636_v2 = vsel %vm2635_vm3, %v6493_v60, %v6571_v50  ;;  %v8451_v60 = vld [vmem:[#allocation20_spill] sm:$0xff]  ;;  %v8452_v50 = vld [vmem:[#allocation21_spill] sm:$0xff]  ;;  %8471 = vst [vmem:[#allocation40_spill] sm:$0xff] %v6802_v7 }
 0x34a   : > { %v5270_v62 = vpop.eup %5269  ;;  %v1752_v31 = vadd.f32 %v5266_v56, %v1751_v0  ;;  %v8454_v0 = vld [vmem:[#allocation23_spill] sm:$0xff] }
 0x34b   : > { %v1771_v33 = vadd.f32 %v5268_v18, %v1770_v4  ;;  %v1788_v3 = vmul.f32 %v5270_v62, %v1786_v46  ;;  %v5272_v37 = vpop.eup %5271  ;;  %vm1793_vm0 = vweird.f32 %v5270_v62  ;;  %v8453_v46 = vld [vmem:[#allocation22_spill] sm:$0xff]  ;;  %v8456_v4 = vld [vmem:[#allocation25_spill] sm:$0xff] }
 0x34c   : > { %v1756_v36 = vsel %vm1755_vm12, %v5266_v56, %v1752_v31  ;;  %vm1794_vm2 = vmor %vm1792_vm1, %vm1793_vm0  ;;  %v6751_v31 = vld [vmem:[#allocation7 + $0xe8] sm:$0xff] }
 0x34d   : > { %v1761_v38 = vsel %vm1758_vm14, %v1760_v32, %v1756_v36  ;;  %v1775_v39 = vsel %vm1774_vm13, %v5268_v18, %v1771_v33  ;;  %v1789_v40 = vsub.f32 1.0, %v1788_v3  ;;  %v6754_v32 = vld [vmem:[#allocation7 + $0xf0] sm:$0xff]  ;;  %v6757_v33 = vld [vmem:[#allocation7 + $0xf8] sm:$0xff]  ;;  %v6760_v3 = vld [vmem:[#allocation7 + $0xc0] sm:$0xff] }
 0x34e   : > { %v1780_v41 = vsel %vm1777_vm15, %v1779_v35, %v1775_v39  ;;  %v1806_v44 = vmul.f32 %v5272_v37, %v1761_v38  ;;  %v6766_v35 = vld [vmem:[#allocation7 + $0xd0] sm:$0xff]  ;;  %v6769_v36 = vld [vmem:[#allocation7 + $0xd8] sm:$0xff]  ;;  %v6772_v37 = vld [vmem:[#allocation7 + $0xa0] sm:$0xff] }
 0x34f   : > { %v1805_v16 = vmul.f32 %v1803_v34, %v1780_v41  ;;  %v1790_v42 = vmul.f32 %v5270_v62, %v1789_v40  ;;  %v6763_v34 = vld [vmem:[#allocation7 + $0xc8] sm:$0xff]  ;;  %8459 = vst [vmem:[#allocation28_spill] sm:$0xff] %v6766_v35  ;;  %v6778_v39 = vld [vmem:[#allocation7 + $0xb0] sm:$0xff]  ;;  %v6781_v40 = vld [vmem:[#allocation7 + $0xb8] sm:$0xff] }
 0x350   : > { %8458 = vst [vmem:[#allocation27_spill] sm:$0xff] %v6763_v34  ;;  %v6775_v38 = vld [vmem:[#allocation7 + $0xa8] sm:$0xff]  ;;  %v6784_v41 = vld [vmem:[#allocation7 + $0x80] sm:$0xff] }
 0x351   : > { %v6707_v43 = vadd.f32 %v1806_v44, %v1805_v16  ;;  %v1791_v45 = vadd.f32 %v5270_v62, %v1790_v42  ;;  %8460 = vst [vmem:[#allocation29_spill] sm:$0xff] %v6769_v36  ;;  %v6787_v44 = vld [vmem:[#allocation7 + $0x88] sm:$0xff]  ;;  %v6790_v16 = vld [vmem:[#allocation7 + $0x90] sm:$0xff]  ;;  %v6793_v42 = vld [vmem:[#allocation7 + $0x98] sm:$0xff] }
 0x352   : > { %8461 = vst [vmem:[#allocation30_spill] sm:$0xff] %v6772_v37 }
 0x353   : > { %5273 = vtanh.f32 %v6707_v43  ;;  %v1795_v56 = vsel %vm1794_vm2, %v5270_v62, %v1791_v45  ;;  %v6748_v62 = vld [vmem:[#allocation7 + $0xe0] sm:$0xff]  ;;  %8462 = vst [vmem:[#allocation31_spill] sm:$0xff] %v6775_v38  ;;  %vm2639_vm2 = vcmask 1042432  }
 0x354   : > { %v1800_v22 = vsel %vm1797_vm4, %v1799_v9, %v1795_v56  ;;  %8463 = vst [vmem:[#allocation32_spill] sm:$0xff] %v6778_v39  ;;  %v6796_v45 = vld [vmem:[#allocation7 + $0x60] sm:$0xff]  ;;  %v6805_v56 = vld [vmem:[#allocation7 + $0x78] sm:$0xff] }
 0x355   : > { %8464 = vst [vmem:[#allocation33_spill] sm:$0xff] %v6781_v40  ;;  %v6808_v9 = vld [vmem:[#allocation7 + $0x40] sm:$0xff] }
 0x356   : > { %8465 = vst [vmem:[#allocation34_spill] sm:$0xff] %v6784_v41 }
 0x357   : > { %8466 = vst [vmem:[#allocation35_spill] sm:$0xff] %v6787_v44 }
 0x358   : > { %8467 = vst [vmem:[#allocation36_spill] sm:$0xff] %v6790_v16 }
 0x359   : > { %v5274_v18 = vpop.eup %5273  ;;  %8468 = vst [vmem:[#allocation37_spill] sm:$0xff] %v6793_v42 }
 0x35a   : > { %v1809_v52 = vmul.f32 %v5274_v18, %v1800_v22  ;;  %8469 = vst [vmem:[#allocation38_spill] sm:$0xff] %v6796_v45  ;;  %v6811_v18 = vld [vmem:[#allocation7 + $0x48] sm:$0xff]  ;;  %v6814_v22 = vld [vmem:[#allocation7 + $0x50] sm:$0xff] }
 0x35b   : > { %8472 = vst [vmem:[#allocation41_spill] sm:$0xff] %v6805_v56 }
 0x35c   : > { %v1811_v23 = vrot.slane %v1809_v52, 2  ;;  %v6714_v1 = vsel %vm2637_vm5, %v2636_v2, %v1809_v52  ;;  %8473 = vst [vmem:[#allocation42_spill] sm:$0xff] %v6808_v9  ;;  %v6817_v52 = vld [vmem:[#allocation7 + $0x58] sm:$0xff]  ;;  %v6820_v2 = vld [vmem:[#allocation7 + $0x20] sm:$0xff] }
 0x35d   : > { %8474 = vst [vmem:[#allocation43_spill] sm:$0xff] %v6811_v18 }
 0x35e   : > { %1829 = vmatmul.f32.vlgmr.msrb.gmra.mxu0 %v1811_v23  ;;  %1849 = vmatmul.f32.vlgmr.msrb.gmra.mxu1 %v1811_v23  ;;  %8475 = vst [vmem:[#allocation44_spill] sm:$0xff] %v6814_v22 }
 0x35f   : > { %1869 = vmatmul.f32.vlgmr.msrb.gmra.mxu2 %v1811_v23  ;;  %1889 = vmatmul.f32.vlgmr.msrb.gmra.mxu3 %v1811_v23  ;;  %8476 = vst [vmem:[#allocation45_spill] sm:$0xff] %v6817_v52  ;;  %v6823_v23 = vld [vmem:[#allocation7 + $0x28] sm:$0xff] }
 0x360   : > { %2143 = vmatpush.msrb.mxu0 %v6574_v49  ;;  %2163 = vmatpush.msrb.mxu1 %v6577_v53  ;;  %8477 = vst [vmem:[#allocation46_spill] sm:$0xff] %v6820_v2 }
 0x361   : > { %2183 = vmatpush.msrb.mxu2 %v6580_v54  ;;  %2203 = vmatpush.msrb.mxu3 %v6583_v47  ;;  %8478 = vst [vmem:[#allocation47_spill] sm:$0xff] %v6823_v23 }
 0x362   : > { %2144 = vmatpush.msrb.mxu0 %v6586_v55  ;;  %2164 = vmatpush.msrb.mxu1 %v6589_v11 }
 0x363   : > { %2184 = vmatpush.msrb.mxu2 %v6592_v12  ;;  %2204 = vmatpush.msrb.mxu3 %v6595_v13 }
 0x364   : > { %2145 = vmatpush.msrb.mxu0 %v6598_v17  ;;  %2165 = vmatpush.msrb.mxu1 %v6601_v28 }
 0x365   : > { %2185 = vmatpush.msrb.mxu2 %v6604_v21  ;;  %2205 = vmatpush.msrb.mxu3 %v6607_v25 }
 0x366   : > { %2146 = vmatpush.msrb.mxu0 %v6610_v27  ;;  %2166 = vmatpush.msrb.mxu1 %v6613_v29 }
 0x367   : > { %2186 = vmatpush.msrb.mxu2 %v6616_v30  ;;  %2206 = vmatpush.msrb.mxu3 %v6619_v57 }
 0x368   : > { %2147 = vmatpush.msrb.mxu0 %v6622_v14  ;;  %2167 = vmatpush.msrb.mxu1 %v6625_v58 }
 0x369   : > { %2187 = vmatpush.msrb.mxu2 %v6628_v15  ;;  %2207 = vmatpush.msrb.mxu3 %v8451_v60 }
 0x36a   : > { %2148 = vmatpush.msrb.mxu0 %v8452_v50  ;;  %2168 = vmatpush.msrb.mxu1 %v8453_v46 }
 0x36b   : > { %2188 = vmatpush.msrb.mxu2 %v8454_v0  ;;  %2208 = vmatpush.msrb.mxu3 %v8455_v5 }
 0x36c   : > { %2149 = vmatpush.msrb.mxu0 %v8456_v4  ;;  %2169 = vmatpush.msrb.mxu1 %v8457_v61 }
 0x36d   : > { %2189 = vmatpush.msrb.mxu2 %v6652_v24  ;;  %2209 = vmatpush.msrb.mxu3 %v6655_v63 }
 0x36e   : > { %2150 = vmatpush.msrb.mxu0 %v6658_v26  ;;  %2170 = vmatpush.msrb.mxu1 %v6661_v6 }
 0x36f   : > { %2190 = vmatpush.msrb.mxu2 %v6664_v51  ;;  %2210 = vmatpush.msrb.mxu3 %v6667_v59 }
 0x370   : > { %2151 = vmatpush.msrb.mxu0 %v6748_v62  ;;  %2171 = vmatpush.msrb.mxu1 %v6751_v31 }
 0x371   : > { %2191 = vmatpush.msrb.mxu2 %v6754_v32  ;;  %2211 = vmatpush.msrb.mxu3 %v6757_v33 }
 0x372   : > { %2152 = vmatpush.msrb.mxu0 %v6760_v3  ;;  %2172 = vmatpush.msrb.mxu1 %v6763_v34 }
 0x373   : > { %2192 = vmatpush.msrb.mxu2 %v6766_v35  ;;  %2212 = vmatpush.msrb.mxu3 %v6769_v36 }
 0x374   : > { %2153 = vmatpush.msrb.mxu0 %v6772_v37  ;;  %2173 = vmatpush.msrb.mxu1 %v6775_v38 }
 0x375   : > { %2193 = vmatpush.msrb.mxu2 %v6778_v39  ;;  %2213 = vmatpush.msrb.mxu3 %v6781_v40 }
 0x376   : > { %2154 = vmatpush.msrb.mxu0 %v6784_v41  ;;  %2174 = vmatpush.msrb.mxu1 %v6787_v44 }
 0x377   : > { %2194 = vmatpush.msrb.mxu2 %v6790_v16  ;;  %2214 = vmatpush.msrb.mxu3 %v6793_v42 }
 0x378   : > { %2155 = vmatpush.msrb.mxu0 %v6796_v45  ;;  %2175 = vmatpush.msrb.mxu1 %v6799_v10 }
 0x379   : > { %2195 = vmatpush.msrb.mxu2 %v6802_v7  ;;  %2215 = vmatpush.msrb.mxu3 %v6805_v56 }
 0x37a   : > { %2156 = vmatpush.msrb.mxu0 %v6808_v9  ;;  %2176 = vmatpush.msrb.mxu1 %v6811_v18  ;;  %v6826_v9 = vld [vmem:[#allocation7 + $0x30] sm:$0xff]  ;;  %v6829_v18 = vld [vmem:[#allocation7 + $0x38] sm:$0xff] }
 0x37b   : > { %2196 = vmatpush.msrb.mxu2 %v6814_v22  ;;  %2216 = vmatpush.msrb.mxu3 %v6817_v52  ;;  %8479 = vst [vmem:[#allocation48_spill] sm:$0xff] %v6826_v9  ;;  %v6832_v22 = vld [vmem:[#allocation7] sm:$0xff]  ;;  %v6835_v52 = vld [vmem:[#allocation7 + $0x8] sm:$0xff] }
 0x37c   : > { %2157 = vmatpush.msrb.mxu0 %v6820_v2  ;;  %2177 = vmatpush.msrb.mxu1 %v6823_v23  ;;  %8480 = vst [vmem:[#allocation49_spill] sm:$0xff] %v6829_v18  ;;  %v6838_v2 = vld [vmem:[#allocation7 + $0x10] sm:$0xff]  ;;  %v6841_v23 = vld [vmem:[#allocation7 + $0x18] sm:$0xff] }
 0x37d   : > { %2197 = vmatpush.msrb.mxu2 %v6826_v9  ;;  %2217 = vmatpush.msrb.mxu3 %v6829_v18  ;;  %8481 = vst [vmem:[#allocation50_spill] sm:$0xff] %v6832_v22 }
 0x37e   : > { %2158 = vmatpush.msrb.mxu0 %v6832_v22  ;;  %8482 = vst [vmem:[#allocation51_spill] sm:$0xff] %v6835_v52  ;;  %2178 = vmatpush.msrb.mxu1 %v6835_v52 }
 0x37f   : > { %8483 = vst [vmem:[#allocation52_spill] sm:$0xff] %v6838_v2  ;;  %2198 = vmatpush.msrb.mxu2 %v6838_v2  ;;  %2218 = vmatpush.msrb.mxu3 %v6841_v23 }
 0x380   : > { %8484 = vst [vmem:[#allocation53_spill] sm:$0xff] %v6841_v23 }
 0x3db   : > { %v1830_v9 = vpop.f32.mrf.mxu0  ;;  %v1850_v56 = vpop.f32.mrf.mxu1 }
 0x3dc   : > { %v1897_v7 = vrot.slane %v1830_v9, 5  ;;  %v1898_v18 = vrot.slane %v1850_v56, 5 }
 0x3de   : > { %v1905_v10 = vadd.f32 %v1897_v7, %v6478_v8  ;;  %v1906_v22 = vadd.f32 %v1898_v18, %v6480_v19 }
 0x3e0   : > { %v5069_v45 = vmul.f32 -1.442695, %v1905_v10  ;;  %v5070_v42 = vmul.f32 -1.442695, %v1906_v22 }
 0x3e2   : > { %5275 = vpow2.f32 %v5069_v45  ;;  %v1890_v52 = vpop.f32.mrf.mxu3  ;;  %v1870_v9 = vpop.f32.mrf.mxu2 }
 0x3e3   : > { %5277 = vpow2.f32 %v5070_v42  ;;  %v1900_v16 = vrot.slane %v1890_v52, 5  ;;  %v1899_v7 = vrot.slane %v1870_v9, 5 }
 0x3e5   : > { %v1908_v2 = vadd.f32 %v1900_v16, %v6484_v48  ;;  %v1907_v45 = vadd.f32 %v1899_v7, %v6487_v20 }
 0x3e7   : > { %v5071_v44 = vmul.f32 -1.442695, %v1908_v2 }
 0x3e8   : > { %v5276_v41 = vpop.eup %5275 }
 0x3e9   : > { %v5278_v40 = vpop.eup %5277  ;;  %v1912_v23 = vadd.f32 1.0, %v5276_v41  ;;  %5279 = vpow2.f32 %v5071_v44 }
 0x3ea   : > { %v1931_v39 = vadd.f32 1.0, %v5278_v40 }
 0x3eb   : > { %5281 = vrcp.f32 %v1912_v23  ;;  %v1924_v48 = vand.u32 2147483648, %v1912_v23  ;;  %v1922_v40 = vand.u32 2147483647, %v1912_v23  ;;  %vm1918_vm8 = vweird.f32 %v1912_v23 }
 0x3ec   : > { %5283 = vrcp.f32 %v1931_v39  ;;  %v1943_v41 = vand.u32 2147483648, %v1931_v39  ;;  %v1941_v9 = vand.u32 2147483647, %v1931_v39  ;;  %vm1937_vm9 = vweird.f32 %v1931_v39 }
 0x3ed   : > { %v1925_v7 = vor.u32 1.1754944e-38, %v1924_v48  ;;  %vm1923_vm12 = vcmp.eq.f32.partialorder %v1922_v40, 8.507059e+37  ;;  %v8490_v40 = vld [vmem:[#allocation32_spill] sm:$0xff] }
 0x3ee   : > { %vm1942_vm13 = vcmp.eq.f32.partialorder %v1941_v9, 8.507059e+37  ;;  %v8491_v9 = vld [vmem:[#allocation33_spill] sm:$0xff] }
 0x3ef   : > { %v5280_v56 = vpop.eup %5279 }
 0x3f0   : > { %v1951_v18 = vadd.f32 1.0, %v5280_v56 }
 0x3f1   : > { %v5282_v10 = vpop.eup %5281 }
 0x3f2   : > { %v5284_v22 = vpop.eup %5283  ;;  %v1914_v42 = vmul.f32 %v5282_v10, %v1912_v23  ;;  %5285 = vrcp.f32 %v1951_v18  ;;  %vm1919_vm6 = vweird.f32 %v5282_v10  ;;  %vm1957_vm15 = vweird.f32 %v1951_v18 }
 0x3f3   : > { %v1933_v52 = vmul.f32 %v5284_v22, %v1931_v39  ;;  %5287 = vtanh.f32 %v1907_v45  ;;  %vm1938_vm7 = vweird.f32 %v5284_v22  ;;  %vm1920_vm10 = vmor %vm1918_vm8, %vm1919_vm6 }
 0x3f4   : > { %v1915_v16 = vsub.f32 1.0, %v1914_v42  ;;  %v1968_v42 = vrot.slane %v6707_v43, 7  ;;  %vm1939_vm11 = vmor %vm1937_vm9, %vm1938_vm7  ;;  %v1961_v43 = vand.u32 2147483647, %v1951_v18 }
 0x3f5   : > { %v1934_v2 = vsub.f32 1.0, %v1933_v52  ;;  %v1944_v52 = vor.u32 1.1754944e-38, %v1943_v41 }
 0x3f6   : > { %v1916_v44 = vmul.f32 %v5282_v10, %v1915_v16  ;;  %vm1962_vm1 = vcmp.eq.f32.partialorder %v1961_v43, 8.507059e+37  ;;  %v8503_v43 = vld [vmem:[#allocation45_spill] sm:$0xff] }
 0x3f7   : > { %v1935_v19 = vmul.f32 %v5284_v22, %v1934_v2 }
 0x3f8   : > { %v5286_v8 = vpop.eup %5285  ;;  %v1917_v56 = vadd.f32 %v5282_v10, %v1916_v44 }
 0x3f9   : > { %v1936_v20 = vadd.f32 %v5284_v22, %v1935_v19  ;;  %v1953_v38 = vmul.f32 %v5286_v8, %v1951_v18  ;;  %v5288_v16 = vpop.eup %5287  ;;  %vm1958_vm14 = vweird.f32 %v5286_v8  ;;  %v1963_v19 = vand.u32 2147483648, %v1951_v18  ;;  %v8489_v18 = vld [vmem:[#allocation31_spill] sm:$0xff] }
 0x3fa   : > { %v1921_v45 = vsel %vm1920_vm10, %v5282_v10, %v1917_v56  ;;  %vm1959_vm0 = vmor %vm1957_vm15, %vm1958_vm14  ;;  %v8492_v56 = vld [vmem:[#allocation34_spill] sm:$0xff] }
 0x3fb   : > { %v1926_v37 = vsel %vm1923_vm12, %v1925_v7, %v1921_v45  ;;  %v1940_v36 = vsel %vm1939_vm11, %v5284_v22, %v1936_v20  ;;  %v1954_v2 = vsub.f32 1.0, %v1953_v38  ;;  %v1964_v41 = vor.u32 1.1754944e-38, %v1963_v19  ;;  %v8488_v38 = vld [vmem:[#allocation30_spill] sm:$0xff]  ;;  %v8493_v7 = vld [vmem:[#allocation35_spill] sm:$0xff]  ;;  %v8502_v19 = vld [vmem:[#allocation44_spill] sm:$0xff] }
 0x3fc   : > { %v1945_v35 = vsel %vm1942_vm13, %v1944_v52, %v1940_v36  ;;  %v1971_v34 = vmul.f32 %v5288_v16, %v1926_v37  ;;  %v8495_v52 = vld [vmem:[#allocation37_spill] sm:$0xff]  ;;  %v8496_v45 = vld [vmem:[#allocation38_spill] sm:$0xff]  ;;  %v8497_v16 = vld [vmem:[#allocation39_spill] sm:$0xff] }
 0x3fd   : > { %v1970_v44 = vmul.f32 %v1968_v42, %v1945_v35  ;;  %v1955_v23 = vmul.f32 %v5286_v8, %v1954_v2  ;;  %v8487_v35 = vld [vmem:[#allocation29_spill] sm:$0xff]  ;;  %v8494_v42 = vld [vmem:[#allocation36_spill] sm:$0xff] }
 0x3fe   : > { %v8498_v2 = vld [vmem:[#allocation40_spill] sm:$0xff] }
 0x3ff   : > { %v6849_v39 = vadd.f32 %v1971_v34, %v1970_v44  ;;  %v1956_v48 = vadd.f32 %v5286_v8, %v1955_v23  ;;  %v8499_v44 = vld [vmem:[#allocation41_spill] sm:$0xff]  ;;  %v8500_v23 = vld [vmem:[#allocation42_spill] sm:$0xff] }
 0x401   : > { %5289 = vtanh.f32 %v6849_v39  ;;  %v1960_v10 = vsel %vm1959_vm0, %v5286_v8, %v1956_v48  ;;  %v8485_v8 = vld [vmem:[#allocation27_spill] sm:$0xff] }
 0x402   : > { %v1965_v22 = vsel %vm1962_vm1, %v1964_v41, %v1960_v10  ;;  %v8501_v48 = vld [vmem:[#allocation43_spill] sm:$0xff]  ;;  %v8504_v10 = vld [vmem:[#allocation46_spill] sm:$0xff]  ;;  %vm2641_vm1 = vcmask 1043456  }
 0x403   : > { %v8505_v41 = vld [vmem:[#allocation47_spill] sm:$0xff] }
 0x407   : > { %v5290_v20 = vpop.eup %5289 }
 0x408   : > { %v1974_v36 = vmul.f32 %v5290_v20, %v1965_v22  ;;  %v8506_v20 = vld [vmem:[#allocation48_spill] sm:$0xff]  ;;  %v8507_v22 = vld [vmem:[#allocation49_spill] sm:$0xff] }
 0x40a   : > { %v1976_v37 = vrot.slane %v1974_v36, 3  ;;  %v6854_v34 = vsel %vm2639_vm2, %v6714_v1, %v1974_v36  ;;  %v8486_v1 = vld [vmem:[#allocation28_spill] sm:$0xff]  ;;  %v8508_v36 = vld [vmem:[#allocation50_spill] sm:$0xff] }
 0x40c   : > { %1994 = vmatmul.f32.vlgmr.msra.gmra.mxu0 %v1976_v37  ;;  %2014 = vmatmul.f32.vlgmr.msra.gmra.mxu1 %v1976_v37 }
 0x40d   : > { %2034 = vmatmul.f32.vlgmr.msra.gmra.mxu2 %v1976_v37  ;;  %2054 = vmatmul.f32.vlgmr.msra.gmra.mxu3 %v1976_v37  ;;  %v8509_v37 = vld [vmem:[#allocation51_spill] sm:$0xff] }
 0x40e   : > { %2308 = vmatpush.msra.mxu0 %v6574_v49  ;;  %2328 = vmatpush.msra.mxu1 %v6577_v53 }
 0x40f   : > { %2348 = vmatpush.msra.mxu2 %v6580_v54  ;;  %2368 = vmatpush.msra.mxu3 %v6583_v47 }
 0x410   : > { %2309 = vmatpush.msra.mxu0 %v6586_v55  ;;  %2329 = vmatpush.msra.mxu1 %v6589_v11 }
 0x411   : > { %2349 = vmatpush.msra.mxu2 %v6592_v12  ;;  %2369 = vmatpush.msra.mxu3 %v6595_v13 }
 0x412   : > { %2310 = vmatpush.msra.mxu0 %v6598_v17  ;;  %2330 = vmatpush.msra.mxu1 %v6601_v28 }
 0x413   : > { %2350 = vmatpush.msra.mxu2 %v6604_v21  ;;  %2370 = vmatpush.msra.mxu3 %v6607_v25 }
 0x414   : > { %2311 = vmatpush.msra.mxu0 %v6610_v27  ;;  %2331 = vmatpush.msra.mxu1 %v6613_v29 }
 0x415   : > { %2351 = vmatpush.msra.mxu2 %v6616_v30  ;;  %2371 = vmatpush.msra.mxu3 %v6619_v57 }
 0x416   : > { %2312 = vmatpush.msra.mxu0 %v6622_v14  ;;  %2332 = vmatpush.msra.mxu1 %v6625_v58 }
 0x417   : > { %2352 = vmatpush.msra.mxu2 %v6628_v15  ;;  %2372 = vmatpush.msra.mxu3 %v8451_v60 }
 0x418   : > { %2313 = vmatpush.msra.mxu0 %v8452_v50  ;;  %2333 = vmatpush.msra.mxu1 %v8453_v46 }
 0x419   : > { %2353 = vmatpush.msra.mxu2 %v8454_v0  ;;  %2373 = vmatpush.msra.mxu3 %v8455_v5 }
 0x41a   : > { %2314 = vmatpush.msra.mxu0 %v8456_v4  ;;  %2334 = vmatpush.msra.mxu1 %v8457_v61 }
 0x41b   : > { %2354 = vmatpush.msra.mxu2 %v6652_v24  ;;  %2374 = vmatpush.msra.mxu3 %v6655_v63 }
 0x41c   : > { %2315 = vmatpush.msra.mxu0 %v6658_v26  ;;  %2335 = vmatpush.msra.mxu1 %v6661_v6 }
 0x41d   : > { %2355 = vmatpush.msra.mxu2 %v6664_v51  ;;  %2375 = vmatpush.msra.mxu3 %v6667_v59 }
 0x41e   : > { %2316 = vmatpush.msra.mxu0 %v6748_v62  ;;  %2336 = vmatpush.msra.mxu1 %v6751_v31 }
 0x41f   : > { %2356 = vmatpush.msra.mxu2 %v6754_v32  ;;  %2376 = vmatpush.msra.mxu3 %v6757_v33 }
 0x420   : > { %2317 = vmatpush.msra.mxu0 %v6760_v3  ;;  %2337 = vmatpush.msra.mxu1 %v8485_v8 }
 0x421   : > { %2357 = vmatpush.msra.mxu2 %v8486_v1  ;;  %2377 = vmatpush.msra.mxu3 %v8487_v35 }
 0x422   : > { %2318 = vmatpush.msra.mxu0 %v8488_v38  ;;  %2338 = vmatpush.msra.mxu1 %v8489_v18 }
 0x423   : > { %2358 = vmatpush.msra.mxu2 %v8490_v40  ;;  %2378 = vmatpush.msra.mxu3 %v8491_v9 }
 0x424   : > { %2319 = vmatpush.msra.mxu0 %v8492_v56  ;;  %2339 = vmatpush.msra.mxu1 %v8493_v7 }
 0x425   : > { %2359 = vmatpush.msra.mxu2 %v8494_v42  ;;  %2379 = vmatpush.msra.mxu3 %v8495_v52  ;;  %v8514_v42 = vld [vmem:[#allocation60_spill] sm:$0xff] }
 0x426   : > { %2320 = vmatpush.msra.mxu0 %v8496_v45  ;;  %2340 = vmatpush.msra.mxu1 %v8497_v16  ;;  %v8512_v16 = vld [vmem:[#allocation58_spill] sm:$0xff]  ;;  %v8513_v45 = vld [vmem:[#allocation59_spill] sm:$0xff] }
 0x427   : > { %2360 = vmatpush.msra.mxu2 %v8498_v2  ;;  %2380 = vmatpush.msra.mxu3 %v8499_v44  ;;  %v8510_v44 = vld [vmem:[#allocation52_spill] sm:$0xff] }
 0x428   : > { %2321 = vmatpush.msra.mxu0 %v8500_v23  ;;  %2341 = vmatpush.msra.mxu1 %v8501_v48  ;;  %v8511_v23 = vld [vmem:[#allocation53_spill] sm:$0xff] }
 0x429   : > { %2361 = vmatpush.msra.mxu2 %v8502_v19  ;;  %2381 = vmatpush.msra.mxu3 %v8503_v43 }
 0x42a   : > { %2322 = vmatpush.msra.mxu0 %v8504_v10  ;;  %2342 = vmatpush.msra.mxu1 %v8505_v41 }
 0x42b   : > { %2362 = vmatpush.msra.mxu2 %v8506_v20  ;;  %2382 = vmatpush.msra.mxu3 %v8507_v22 }
 0x42c   : > { %2323 = vmatpush.msra.mxu0 %v8508_v36  ;;  %2343 = vmatpush.msra.mxu1 %v8509_v37 }
 0x42d   : > { %2363 = vmatpush.msra.mxu2 %v8510_v44  ;;  %2383 = vmatpush.msra.mxu3 %v8511_v23 }
 0x489   : > { %v1995_v48 = vpop.f32.mrf.mxu0  ;;  %v2015_v19 = vpop.f32.mrf.mxu1 }
 0x48a   : > { %v2062_v2 = vrot.slane %v1995_v48, 4  ;;  %v2063_v43 = vrot.slane %v2015_v19, 4 }
 0x48c   : > { %v2070_v10 = vadd.f32 %v2062_v2, %v8512_v16  ;;  %v2071_v41 = vadd.f32 %v2063_v43, %v8513_v45 }
 0x48e   : > { %v5072_v52 = vmul.f32 -1.442695, %v2070_v10  ;;  %v5073_v20 = vmul.f32 -1.442695, %v2071_v41  ;;  %v8515_v41 = vld [vmem:[#allocation61_spill] sm:$0xff] }
 0x490   : > { %5291 = vpow2.f32 %v5072_v52  ;;  %v2055_v22 = vpop.f32.mrf.mxu3  ;;  %v2035_v48 = vpop.f32.mrf.mxu2 }
 0x491   : > { %5293 = vpow2.f32 %v5073_v20  ;;  %v2065_v36 = vrot.slane %v2055_v22, 4  ;;  %v2064_v2 = vrot.slane %v2035_v48, 4 }
 0x493   : > { %v2073_v37 = vadd.f32 %v2065_v36, %v8514_v42  ;;  %v2072_v52 = vadd.f32 %v2064_v2, %v8515_v41 }
 0x495   : > { %v5074_v7 = vmul.f32 -1.442695, %v2073_v37 }
 0x496   : > { %v5292_v44 = vpop.eup %5291 }
 0x497   : > { %v5294_v56 = vpop.eup %5293  ;;  %v2077_v23 = vadd.f32 1.0, %v5292_v44  ;;  %5295 = vpow2.f32 %v5074_v7 }
 0x498   : > { %v2096_v9 = vadd.f32 1.0, %v5294_v56 }
 0x499   : > { %5297 = vrcp.f32 %v2077_v23  ;;  %v2089_v42 = vand.u32 2147483648, %v2077_v23  ;;  %v2087_v56 = vand.u32 2147483647, %v2077_v23  ;;  %vm2083_vm7 = vweird.f32 %v2077_v23 }
 0x49a   : > { %5299 = vrcp.f32 %v2096_v9  ;;  %v2108_v44 = vand.u32 2147483648, %v2096_v9  ;;  %v2106_v48 = vand.u32 2147483647, %v2096_v9  ;;  %vm2102_vm8 = vweird.f32 %v2096_v9 }
 0x49b   : > { %v2090_v2 = vor.u32 1.1754944e-38, %v2089_v42  ;;  %vm2088_vm11 = vcmp.eq.f32.partialorder %v2087_v56, 8.507059e+37 }
 0x49c   : > { %vm2107_vm12 = vcmp.eq.f32.partialorder %v2106_v48, 8.507059e+37 }
 0x49d   : > { %v5296_v19 = vpop.eup %5295 }
 0x49e   : > { %v2116_v43 = vadd.f32 1.0, %v5296_v19 }
 0x49f   : > { %v5298_v10 = vpop.eup %5297 }
 0x4a0   : > { %v5300_v45 = vpop.eup %5299  ;;  %v2079_v20 = vmul.f32 %v5298_v10, %v2077_v23  ;;  %5301 = vrcp.f32 %v2116_v43  ;;  %vm2084_vm4 = vweird.f32 %v5298_v10  ;;  %vm2122_vm14 = vweird.f32 %v2116_v43 }
 0x4a1   : > { %v2098_v22 = vmul.f32 %v5300_v45, %v2096_v9  ;;  %5303 = vtanh.f32 %v2072_v52  ;;  %vm2103_vm6 = vweird.f32 %v5300_v45  ;;  %vm2085_vm9 = vmor %vm2083_vm7, %vm2084_vm4 }
 0x4a2   : > { %v2080_v36 = vsub.f32 1.0, %v2079_v20  ;;  %v2133_v20 = vrot.slane %v6849_v39, 7  ;;  %vm2104_vm10 = vmor %vm2102_vm8, %vm2103_vm6  ;;  %v2128_v39 = vand.u32 2147483648, %v2116_v43 }
 0x4a3   : > { %v2099_v37 = vsub.f32 1.0, %v2098_v22  ;;  %v2109_v22 = vor.u32 1.1754944e-38, %v2108_v44 }
 0x4a4   : > { %v2081_v7 = vmul.f32 %v5298_v10, %v2080_v36  ;;  %v2129_v44 = vor.u32 1.1754944e-38, %v2128_v39 }
 0x4a5   : > { %v2100_v16 = vmul.f32 %v5300_v45, %v2099_v37 }
 0x4a6   : > { %v5302_v40 = vpop.eup %5301  ;;  %v2082_v19 = vadd.f32 %v5298_v10, %v2081_v7 }
 0x4a7   : > { %v2101_v41 = vadd.f32 %v5300_v45, %v2100_v16  ;;  %v2118_v18 = vmul.f32 %v5302_v40, %v2116_v43  ;;  %v5304_v36 = vpop.eup %5303  ;;  %vm2123_vm13 = vweird.f32 %v5302_v40  ;;  %v2126_v16 = vand.u32 2147483647, %v2116_v43 }
 0x4a8   : > { %v2086_v52 = vsel %vm2085_vm9, %v5298_v10, %v2082_v19  ;;  %vm2124_vm15 = vmor %vm2122_vm14, %vm2123_vm13 }
 0x4a9   : > { %v2091_v38 = vsel %vm2088_vm11, %v2090_v2, %v2086_v52  ;;  %v2105_v35 = vsel %vm2104_vm10, %v5300_v45, %v2101_v41  ;;  %v2119_v37 = vsub.f32 1.0, %v2118_v18  ;;  %vm2127_vm0 = vcmp.eq.f32.partialorder %v2126_v16, 8.507059e+37  ;;  %v8545_v18 = vld [vmem:[#allocation60_spill] sm:$0xff] }
 0x4aa   : > { %v2110_v1 = vsel %vm2107_vm12, %v2109_v22, %v2105_v35  ;;  %v2136_v8 = vmul.f32 %v5304_v36, %v2091_v38 }
 0x4ab   : > { %v2135_v7 = vmul.f32 %v2133_v20, %v2110_v1  ;;  %v2120_v23 = vmul.f32 %v5302_v40, %v2119_v37 }
 0x4ad   : > { %v6925_v9 = vadd.f32 %v2136_v8, %v2135_v7  ;;  %v2121_v42 = vadd.f32 %v5302_v40, %v2120_v23  ;;  %v8546_v7 = vld [vmem:[#allocation61_spill] sm:$0xff] }
 0x4af   : > { %5305 = vtanh.f32 %v6925_v9  ;;  %v2125_v10 = vsel %vm2124_vm15, %v5302_v40, %v2121_v42 }
 0x4b0   : > { %v2130_v41 = vsel %vm2127_vm0, %v2129_v44, %v2125_v10 }
 0x4b5   : > { %v5306_v45 = vpop.eup %5305 }
 0x4b6   : > { %v2139_v35 = vmul.f32 %v5306_v45, %v2130_v41 }
 0x4b8   : > { %v2141_v38 = vrot.slane %v2139_v35, 4  ;;  %v6930_v8 = vsel %vm2641_vm1, %v6854_v34, %v2139_v35 }
 0x4ba   : > { %2159 = vmatmul.f32.vlgmr.msrb.gmra.mxu0 %v2141_v38  ;;  %2179 = vmatmul.f32.vlgmr.msrb.gmra.mxu1 %v2141_v38 }
 0x4bb   : > { %2199 = vmatmul.f32.vlgmr.msrb.gmra.mxu2 %v2141_v38  ;;  %2219 = vmatmul.f32.vlgmr.msrb.gmra.mxu3 %v2141_v38 }
 0x4bc   : > { %2473 = vmatpush.msrb.mxu0 %v6574_v49  ;;  %2493 = vmatpush.msrb.mxu1 %v6577_v53  ;;  %v8516_v49 = vld [vmem:[#allocation27_spill] sm:$0xff]  ;;  %v8517_v53 = vld [vmem:[#allocation28_spill] sm:$0xff] }
 0x4bd   : > { %2513 = vmatpush.msrb.mxu2 %v6580_v54  ;;  %2533 = vmatpush.msrb.mxu3 %v6583_v47  ;;  %v8518_v54 = vld [vmem:[#allocation29_spill] sm:$0xff]  ;;  %v8519_v47 = vld [vmem:[#allocation30_spill] sm:$0xff] }
 0x4be   : > { %2474 = vmatpush.msrb.mxu0 %v6586_v55  ;;  %2494 = vmatpush.msrb.mxu1 %v6589_v11  ;;  %v8520_v55 = vld [vmem:[#allocation31_spill] sm:$0xff]  ;;  %v8521_v11 = vld [vmem:[#allocation32_spill] sm:$0xff] }
 0x4bf   : > { %2514 = vmatpush.msrb.mxu2 %v6592_v12  ;;  %2534 = vmatpush.msrb.mxu3 %v6595_v13  ;;  %v8522_v12 = vld [vmem:[#allocation33_spill] sm:$0xff]  ;;  %v8523_v13 = vld [vmem:[#allocation34_spill] sm:$0xff] }
 0x4c0   : > { %2475 = vmatpush.msrb.mxu0 %v6598_v17  ;;  %2495 = vmatpush.msrb.mxu1 %v6601_v28  ;;  %v8524_v17 = vld [vmem:[#allocation35_spill] sm:$0xff]  ;;  %v8525_v28 = vld [vmem:[#allocation36_spill] sm:$0xff] }
 0x4c1   : > { %2515 = vmatpush.msrb.mxu2 %v6604_v21  ;;  %2535 = vmatpush.msrb.mxu3 %v6607_v25  ;;  %v8526_v21 = vld [vmem:[#allocation37_spill] sm:$0xff]  ;;  %v8527_v25 = vld [vmem:[#allocation38_spill] sm:$0xff] }
 0x4c2   : > { %2476 = vmatpush.msrb.mxu0 %v6610_v27  ;;  %2496 = vmatpush.msrb.mxu1 %v6613_v29  ;;  %v8528_v27 = vld [vmem:[#allocation39_spill] sm:$0xff]  ;;  %v8529_v29 = vld [vmem:[#allocation40_spill] sm:$0xff] }
 0x4c3   : > { %2516 = vmatpush.msrb.mxu2 %v6616_v30  ;;  %2536 = vmatpush.msrb.mxu3 %v6619_v57  ;;  %v8530_v30 = vld [vmem:[#allocation41_spill] sm:$0xff]  ;;  %v8531_v57 = vld [vmem:[#allocation42_spill] sm:$0xff] }
 0x4c4   : > { %2477 = vmatpush.msrb.mxu0 %v6622_v14  ;;  %2497 = vmatpush.msrb.mxu1 %v6625_v58  ;;  %v8532_v14 = vld [vmem:[#allocation43_spill] sm:$0xff]  ;;  %v8533_v58 = vld [vmem:[#allocation44_spill] sm:$0xff] }
 0x4c5   : > { %2517 = vmatpush.msrb.mxu2 %v6628_v15  ;;  %2537 = vmatpush.msrb.mxu3 %v8451_v60  ;;  %v8534_v15 = vld [vmem:[#allocation45_spill] sm:$0xff]  ;;  %v8541_v60 = vld [vmem:[#allocation52_spill] sm:$0xff] }
 0x4c6   : > { %2478 = vmatpush.msrb.mxu0 %v8452_v50  ;;  %2498 = vmatpush.msrb.mxu1 %v8453_v46  ;;  %v8542_v50 = vld [vmem:[#allocation53_spill] sm:$0xff] }
 0x4c7   : > { %2518 = vmatpush.msrb.mxu2 %v8454_v0  ;;  %2538 = vmatpush.msrb.mxu3 %v8455_v5 }
 0x4c8   : > { %2479 = vmatpush.msrb.mxu0 %v8456_v4  ;;  %2499 = vmatpush.msrb.mxu1 %v8457_v61  ;;  %v8543_v61 = vld [vmem:[#allocation58_spill] sm:$0xff] }
 0x4c9   : > { %2519 = vmatpush.msrb.mxu2 %v6652_v24  ;;  %2539 = vmatpush.msrb.mxu3 %v6655_v63  ;;  %v8536_v24 = vld [vmem:[#allocation47_spill] sm:$0xff]  ;;  %v8537_v63 = vld [vmem:[#allocation48_spill] sm:$0xff] }
 0x4ca   : > { %2480 = vmatpush.msrb.mxu0 %v6658_v26  ;;  %2500 = vmatpush.msrb.mxu1 %v6661_v6  ;;  %v8538_v26 = vld [vmem:[#allocation49_spill] sm:$0xff]  ;;  %v8539_v6 = vld [vmem:[#allocation50_spill] sm:$0xff] }
 0x4cb   : > { %2520 = vmatpush.msrb.mxu2 %v6664_v51  ;;  %2540 = vmatpush.msrb.mxu3 %v6667_v59  ;;  %v8535_v59 = vld [vmem:[#allocation46_spill] sm:$0xff]  ;;  %v8540_v51 = vld [vmem:[#allocation51_spill] sm:$0xff] }
 0x4cc   : > { %2481 = vmatpush.msrb.mxu0 %v6748_v62  ;;  %2501 = vmatpush.msrb.mxu1 %v6751_v31  ;;  %v8544_v31 = vld [vmem:[#allocation59_spill] sm:$0xff] }
 0x4cd   : > { %2521 = vmatpush.msrb.mxu2 %v6754_v32  ;;  %2541 = vmatpush.msrb.mxu3 %v6757_v33 }
 0x4ce   : > { %2482 = vmatpush.msrb.mxu0 %v6760_v3  ;;  %2502 = vmatpush.msrb.mxu1 %v8516_v49 }
 0x4cf   : > { %2522 = vmatpush.msrb.mxu2 %v8517_v53  ;;  %2542 = vmatpush.msrb.mxu3 %v8518_v54 }
 0x4d0   : > { %2483 = vmatpush.msrb.mxu0 %v8519_v47  ;;  %2503 = vmatpush.msrb.mxu1 %v8520_v55 }
 0x4d1   : > { %2523 = vmatpush.msrb.mxu2 %v8521_v11  ;;  %2543 = vmatpush.msrb.mxu3 %v8522_v12 }
 0x4d2   : > { %2484 = vmatpush.msrb.mxu0 %v8523_v13  ;;  %2504 = vmatpush.msrb.mxu1 %v8524_v17  ;;  %v2298_v13 = vrot.slane %v6925_v9, 7 }
 0x4d3   : > { %2524 = vmatpush.msrb.mxu2 %v8525_v28  ;;  %2544 = vmatpush.msrb.mxu3 %v8526_v21 }
 0x4d4   : > { %2485 = vmatpush.msrb.mxu0 %v8527_v25  ;;  %2505 = vmatpush.msrb.mxu1 %v8528_v27 }
 0x4d5   : > { %2525 = vmatpush.msrb.mxu2 %v8529_v29  ;;  %2545 = vmatpush.msrb.mxu3 %v8530_v30 }
 0x4d6   : > { %2486 = vmatpush.msrb.mxu0 %v8531_v57  ;;  %2506 = vmatpush.msrb.mxu1 %v8532_v14 }
 0x4d7   : > { %2526 = vmatpush.msrb.mxu2 %v8533_v58  ;;  %2546 = vmatpush.msrb.mxu3 %v8534_v15 }
 0x4d8   : > { %2487 = vmatpush.msrb.mxu0 %v8535_v59  ;;  %2507 = vmatpush.msrb.mxu1 %v8536_v24 }
 0x4d9   : > { %2527 = vmatpush.msrb.mxu2 %v8537_v63  ;;  %2547 = vmatpush.msrb.mxu3 %v8538_v26 }
 0x4da   : > { %2488 = vmatpush.msrb.mxu0 %v8539_v6  ;;  %2508 = vmatpush.msrb.mxu1 %v8540_v51 }
 0x4db   : > { %2528 = vmatpush.msrb.mxu2 %v8541_v60  ;;  %2548 = vmatpush.msrb.mxu3 %v8542_v50 }
 0x537   : > { %v2160_v46 = vpop.f32.mrf.mxu0  ;;  %v2180_v0 = vpop.f32.mrf.mxu1 }
 0x538   : > { %v2227_v5 = vrot.slane %v2160_v46, 3  ;;  %v2228_v4 = vrot.slane %v2180_v0, 3  ;;  %v2709_v0 = vld [vmem:[#allocation10 + $0x1e0] sm:$0xff] }
 0x53a   : > { %v2235_v62 = vadd.f32 %v2227_v5, %v8543_v61  ;;  %v2236_v32 = vadd.f32 %v2228_v4, %v8544_v31  ;;  %v2773_v5 = vld [vmem:[#allocation10 + $0x3e0] sm:$0xff] }
 0x53b   : > { %v2837_v4 = vld [vmem:[#allocation10 + $0x5e0] sm:$0xff] }
 0x53c   : > { %v5075_v33 = vmul.f32 -1.442695, %v2235_v62  ;;  %v5076_v3 = vmul.f32 -1.442695, %v2236_v32  ;;  %v2901_v62 = vld [vmem:[#allocation10 + $0x7e0] sm:$0xff] }
 0x53d   : > { %v2705_v32 = vld [vmem:[#allocation10 + $0x1c0] sm:$0xff] }
 0x53e   : > { %5307 = vpow2.f32 %v5075_v33  ;;  %v2220_v34 = vpop.f32.mrf.mxu3  ;;  %v2200_v20 = vpop.f32.mrf.mxu2  ;;  %v2769_v33 = vld [vmem:[#allocation10 + $0x3c0] sm:$0xff] }
 0x53f   : > { %5309 = vpow2.f32 %v5076_v3  ;;  %v2230_v1 = vrot.slane %v2220_v34, 3  ;;  %v2229_v22 = vrot.slane %v2200_v20, 3  ;;  %v2833_v3 = vld [vmem:[#allocation10 + $0x5c0] sm:$0xff] }
 0x540   : > { %v2897_v34 = vld [vmem:[#allocation10 + $0x7c0] sm:$0xff] }
 0x541   : > { %v2238_v40 = vadd.f32 %v2230_v1, %v8545_v18  ;;  %v2237_v23 = vadd.f32 %v2229_v22, %v8546_v7  ;;  %v2765_v1 = vld [vmem:[#allocation10 + $0x3a0] sm:$0xff] }
 0x542   : > { %v2693_v20 = vld [vmem:[#allocation10 + $0x160] sm:$0xff] }
 0x543   : > { %v5077_v43 = vmul.f32 -1.442695, %v2238_v40  ;;  %v2829_v40 = vld [vmem:[#allocation10 + $0x5a0] sm:$0xff] }
 0x544   : > { %v5308_v56 = vpop.eup %5307  ;;  %v2757_v22 = vld [vmem:[#allocation10 + $0x360] sm:$0xff] }
 0x545   : > { %v5310_v48 = vpop.eup %5309  ;;  %v2242_v19 = vadd.f32 1.0, %v5308_v56  ;;  %5311 = vpow2.f32 %v5077_v43  ;;  %v2893_v43 = vld [vmem:[#allocation10 + $0x7a0] sm:$0xff] }
 0x546   : > { %v2261_v2 = vadd.f32 1.0, %v5310_v48  ;;  %v2697_v56 = vld [vmem:[#allocation10 + $0x180] sm:$0xff] }
 0x547   : > { %5313 = vrcp.f32 %v2242_v19  ;;  %v2254_v45 = vand.u32 2147483648, %v2242_v19  ;;  %v2252_v38 = vand.u32 2147483647, %v2242_v19  ;;  %vm2248_vm7 = vweird.f32 %v2242_v19  ;;  %v2761_v48 = vld [vmem:[#allocation10 + $0x380] sm:$0xff] }
 0x548   : > { %5315 = vrcp.f32 %v2261_v2  ;;  %v2273_v41 = vand.u32 2147483648, %v2261_v2  ;;  %v2271_v53 = vand.u32 2147483647, %v2261_v2  ;;  %vm2267_vm8 = vweird.f32 %v2261_v2 }
 0x549   : > { %v2255_v55 = vor.u32 1.1754944e-38, %v2254_v45  ;;  %vm2253_vm11 = vcmp.eq.f32.partialorder %v2252_v38, 8.507059e+37  ;;  %v2877_v45 = vld [vmem:[#allocation10 + $0x720] sm:$0xff] }
 0x54a   : > { %v2274_v17 = vor.u32 1.1754944e-38, %v2273_v41  ;;  %vm2272_vm12 = vcmp.eq.f32.partialorder %v2271_v53, 8.507059e+37  ;;  %v2681_v41 = vld [vmem:[#allocation10 + $0x100] sm:$0xff] }
 0x54b   : > { %v5312_v52 = vpop.eup %5311  ;;  %v2809_v38 = vld [vmem:[#allocation10 + $0x500] sm:$0xff] }
 0x54c   : > { %v2281_v36 = vadd.f32 1.0, %v5312_v52  ;;  %v2821_v52 = vld [vmem:[#allocation10 + $0x560] sm:$0xff] }
 0x54d   : > { %v5314_v37 = vpop.eup %5313 }
 0x54e   : > { %v5316_v42 = vpop.eup %5315  ;;  %v2244_v39 = vmul.f32 %v5314_v37, %v2242_v19  ;;  %5317 = vrcp.f32 %v2281_v36  ;;  %vm2249_vm4 = vweird.f32 %v5314_v37  ;;  %v2293_v9 = vand.u32 2147483648, %v2281_v36  ;;  %v2825_v19 = vld [vmem:[#allocation10 + $0x580] sm:$0xff] }
 0x54f   : > { %v2263_v16 = vmul.f32 %v5316_v42, %v2261_v2  ;;  %5319 = vtanh.f32 %v2237_v23  ;;  %vm2268_vm6 = vweird.f32 %v5316_v42  ;;  %vm2250_vm9 = vmor %vm2248_vm7, %vm2249_vm4  ;;  %vm2287_vm14 = vweird.f32 %v2281_v36  ;;  %v2889_v2 = vld [vmem:[#allocation10 + $0x780] sm:$0xff] }
 0x550   : > { %v2245_v10 = vsub.f32 1.0, %v2244_v39  ;;  %vm2269_vm10 = vmor %vm2267_vm8, %vm2268_vm6  ;;  %v2291_v24 = vand.u32 2147483647, %v2281_v36  ;;  %v2294_v26 = vor.u32 1.1754944e-38, %v2293_v9  ;;  %vm2643_vm4 = vcmask 1044480   ;;  %v2753_v23 = vld [vmem:[#allocation10 + $0x340] sm:$0xff] }
 0x551   : > { %v2264_v44 = vsub.f32 1.0, %v2263_v16  ;;  %v2881_v39 = vld [vmem:[#allocation10 + $0x740] sm:$0xff] }
 0x552   : > { %v2246_v35 = vmul.f32 %v5314_v37, %v2245_v10  ;;  %vm2292_vm0 = vcmp.eq.f32.partialorder %v2291_v24, 8.507059e+37  ;;  %v2685_v16 = vld [vmem:[#allocation10 + $0x120] sm:$0xff] }
 0x553   : > { %v2265_v49 = vmul.f32 %v5316_v42, %v2264_v44  ;;  %v2749_v10 = vld [vmem:[#allocation10 + $0x320] sm:$0xff] }
 0x554   : > { %v5318_v54 = vpop.eup %5317  ;;  %v2247_v47 = vadd.f32 %v5314_v37, %v2246_v35  ;;  %v2813_v44 = vld [vmem:[#allocation10 + $0x520] sm:$0xff] }
 0x555   : > { %v2266_v11 = vadd.f32 %v5316_v42, %v2265_v49  ;;  %v2283_v12 = vmul.f32 %v5318_v54, %v2281_v36  ;;  %v5320_v21 = vpop.eup %5319  ;;  %vm2288_vm13 = vweird.f32 %v5318_v54  ;;  %v2885_v36 = vld [vmem:[#allocation10 + $0x760] sm:$0xff] }
 0x556   : > { %v2251_v28 = vsel %vm2250_vm9, %v5314_v37, %v2247_v47  ;;  %vm2289_vm15 = vmor %vm2287_vm14, %vm2288_vm13  ;;  %v2689_v37 = vld [vmem:[#allocation10 + $0x140] sm:$0xff] }
 0x557   : > { %v2256_v25 = vsel %vm2253_vm11, %v2255_v55, %v2251_v28  ;;  %v2270_v27 = vsel %vm2269_vm10, %v5316_v42, %v2266_v11  ;;  %v2284_v29 = vsub.f32 1.0, %v2283_v12  ;;  %v2817_v42 = vld [vmem:[#allocation10 + $0x540] sm:$0xff] }
 0x558   : > { %v2275_v30 = vsel %vm2272_vm12, %v2274_v17, %v2270_v27  ;;  %v2301_v57 = vmul.f32 %v5320_v21, %v2256_v25  ;;  %v2745_v35 = vld [vmem:[#allocation10 + $0x300] sm:$0xff] }
 0x559   : > { %v2300_v14 = vmul.f32 %v2298_v13, %v2275_v30  ;;  %v2285_v58 = vmul.f32 %v5318_v54, %v2284_v29  ;;  %v2677_v11 = vld [vmem:[#allocation10 + $0xe0] sm:$0xff] }
 0x55a   : > { %v2741_v12 = vld [vmem:[#allocation10 + $0x2e0] sm:$0xff] }
 0x55b   : > { %v7001_v15 = vadd.f32 %v2301_v57, %v2300_v14  ;;  %v2286_v59 = vadd.f32 %v5318_v54, %v2285_v58  ;;  %v2805_v13 = vld [vmem:[#allocation10 + $0x4e0] sm:$0xff] }
 0x55c   : > { %v2869_v17 = vld [vmem:[#allocation10 + $0x6e0] sm:$0xff] }
 0x55d   : > { %5321 = vtanh.f32 %v7001_v15  ;;  %v2290_v63 = vsel %vm2289_vm15, %v5318_v54, %v2286_v59  ;;  %v2873_v54 = vld [vmem:[#allocation10 + $0x700] sm:$0xff] }
 0x55e   : > { %v2295_v51 = vsel %vm2292_vm0, %v2294_v26, %v2290_v63  ;;  %v2673_v25 = vld [vmem:[#allocation10 + $0xc0] sm:$0xff] }
 0x55f   : > { %v2737_v27 = vld [vmem:[#allocation10 + $0x2c0] sm:$0xff] }
 0x560   : > { %v2801_v29 = vld [vmem:[#allocation10 + $0x4c0] sm:$0xff] }
 0x561   : > { %v2865_v30 = vld [vmem:[#allocation10 + $0x6c0] sm:$0xff] }
 0x562   : > { %v2669_v58 = vld [vmem:[#allocation10 + $0xa0] sm:$0xff] }
 0x563   : > { %v5322_v6 = vpop.eup %5321  ;;  %v2733_v59 = vld [vmem:[#allocation10 + $0x2a0] sm:$0xff] }
 0x564   : > { %v2304_v60 = vmul.f32 %v5322_v6, %v2295_v51  ;;  %v2797_v9 = vld [vmem:[#allocation10 + $0x4a0] sm:$0xff] }
 0x565   : > { %v2861_v24 = vld [vmem:[#allocation10 + $0x6a0] sm:$0xff] }
 0x566   : > { %v2306_v50 = vrot.slane %v2304_v60, 5  ;;  %v7006_v46 = vsel %vm2643_vm4, %v6930_v8, %v2304_v60  ;;  %v2701_v8 = vld [vmem:[#allocation10 + $0x1a0] sm:$0xff] }
 0x567   : > { %v2665_v63 = vld [vmem:[#allocation10 + $0x80] sm:$0xff] }
 0x568   : > { %2324 = vmatmul.f32.vlgmr.msra.gmra.mxu0 %v2306_v50  ;;  %2344 = vmatmul.f32.vlgmr.msra.gmra.mxu1 %v2306_v50  ;;  %v2729_v6 = vld [vmem:[#allocation10 + $0x280] sm:$0xff] }
 0x569   : > { %2364 = vmatmul.f32.vlgmr.msra.gmra.mxu2 %v2306_v50  ;;  %2384 = vmatmul.f32.vlgmr.msra.gmra.mxu3 %v2306_v50  ;;  %v2793_v51 = vld [vmem:[#allocation10 + $0x480] sm:$0xff] }
 0x56a   : > { %3107 = vmatpush.msra.mxu0 %v2709_v0  ;;  %3127 = vmatpush.msra.mxu1 %v2773_v5  ;;  %v2857_v60 = vld [vmem:[#allocation10 + $0x680] sm:$0xff] }
 0x56b   : > { %3147 = vmatpush.msra.mxu2 %v2837_v4  ;;  %3167 = vmatpush.msra.mxu3 %v2901_v62  ;;  %v2661_v0 = vld [vmem:[#allocation10 + $0x60] sm:$0xff] }
 0x56c   : > { %3108 = vmatpush.msra.mxu0 %v2705_v32  ;;  %3128 = vmatpush.msra.mxu1 %v2769_v33  ;;  %v2725_v5 = vld [vmem:[#allocation10 + $0x260] sm:$0xff] }
 0x56d   : > { %3148 = vmatpush.msra.mxu2 %v2833_v3  ;;  %3168 = vmatpush.msra.mxu3 %v2897_v34  ;;  %v2789_v4 = vld [vmem:[#allocation10 + $0x460] sm:$0xff] }
 0x56e   : > { %3109 = vmatpush.msra.mxu0 %v2701_v8  ;;  %3129 = vmatpush.msra.mxu1 %v2765_v1  ;;  %v2853_v62 = vld [vmem:[#allocation10 + $0x660] sm:$0xff] }
 0x56f   : > { %3149 = vmatpush.msra.mxu2 %v2829_v40  ;;  %3169 = vmatpush.msra.mxu3 %v2893_v43  ;;  %v2657_v32 = vld [vmem:[#allocation10 + $0x40] sm:$0xff] }
 0x570   : > { %3110 = vmatpush.msra.mxu0 %v2697_v56  ;;  %3130 = vmatpush.msra.mxu1 %v2761_v48  ;;  %v2721_v33 = vld [vmem:[#allocation10 + $0x240] sm:$0xff] }
 0x571   : > { %3150 = vmatpush.msra.mxu2 %v2825_v19  ;;  %3170 = vmatpush.msra.mxu3 %v2889_v2  ;;  %v2785_v34 = vld [vmem:[#allocation10 + $0x440] sm:$0xff] }
 0x572   : > { %3111 = vmatpush.msra.mxu0 %v2693_v20  ;;  %3131 = vmatpush.msra.mxu1 %v2757_v22  ;;  %v2849_v8 = vld [vmem:[#allocation10 + $0x640] sm:$0xff] }
 0x573   : > { %3151 = vmatpush.msra.mxu2 %v2821_v52  ;;  %3171 = vmatpush.msra.mxu3 %v2885_v36  ;;  %v2653_v1 = vld [vmem:[#allocation10 + $0x20] sm:$0xff] }
 0x574   : > { %3112 = vmatpush.msra.mxu0 %v2689_v37  ;;  %3132 = vmatpush.msra.mxu1 %v2753_v23  ;;  %v2717_v40 = vld [vmem:[#allocation10 + $0x220] sm:$0xff] }
 0x575   : > { %3152 = vmatpush.msra.mxu2 %v2817_v42  ;;  %3172 = vmatpush.msra.mxu3 %v2881_v39  ;;  %v2781_v56 = vld [vmem:[#allocation10 + $0x420] sm:$0xff] }
 0x576   : > { %3113 = vmatpush.msra.mxu0 %v2685_v16  ;;  %3133 = vmatpush.msra.mxu1 %v2749_v10  ;;  %v2845_v48 = vld [vmem:[#allocation10 + $0x620] sm:$0xff] }
 0x577   : > { %3153 = vmatpush.msra.mxu2 %v2813_v44  ;;  %3173 = vmatpush.msra.mxu3 %v2877_v45  ;;  %v2649_v2 = vld [vmem:[#allocation10] sm:$0xff] }
 0x578   : > { %3114 = vmatpush.msra.mxu0 %v2681_v41  ;;  %3134 = vmatpush.msra.mxu1 %v2745_v35  ;;  %v2713_v20 = vld [vmem:[#allocation10 + $0x200] sm:$0xff] }
 0x579   : > { %3154 = vmatpush.msra.mxu2 %v2809_v38  ;;  %3174 = vmatpush.msra.mxu3 %v2873_v54  ;;  %v2777_v36 = vld [vmem:[#allocation10 + $0x400] sm:$0xff] }
 0x57a   : > { %3115 = vmatpush.msra.mxu0 %v2677_v11  ;;  %3135 = vmatpush.msra.mxu1 %v2741_v12  ;;  %v2841_v37 = vld [vmem:[#allocation10 + $0x600] sm:$0xff] }
 0x57b   : > { %3155 = vmatpush.msra.mxu2 %v2805_v13  ;;  %3175 = vmatpush.msra.mxu3 %v2869_v17 }
 0x57c   : > { %3116 = vmatpush.msra.mxu0 %v2673_v25  ;;  %3136 = vmatpush.msra.mxu1 %v2737_v27 }
 0x57d   : > { %3156 = vmatpush.msra.mxu2 %v2801_v29  ;;  %3176 = vmatpush.msra.mxu3 %v2865_v30  ;;  %v2463_v29 = vrot.slane %v7001_v15, 7 }
 0x57e   : > { %3117 = vmatpush.msra.mxu0 %v2669_v58  ;;  %3137 = vmatpush.msra.mxu1 %v2733_v59 }
 0x57f   : > { %3157 = vmatpush.msra.mxu2 %v2797_v9  ;;  %3177 = vmatpush.msra.mxu3 %v2861_v24 }
 0x580   : > { %3118 = vmatpush.msra.mxu0 %v2665_v63  ;;  %3138 = vmatpush.msra.mxu1 %v2729_v6 }
 0x581   : > { %3158 = vmatpush.msra.mxu2 %v2793_v51  ;;  %3178 = vmatpush.msra.mxu3 %v2857_v60 }
 0x582   : > { %3119 = vmatpush.msra.mxu0 %v2661_v0  ;;  %3139 = vmatpush.msra.mxu1 %v2725_v5 }
 0x583   : > { %3159 = vmatpush.msra.mxu2 %v2789_v4  ;;  %3179 = vmatpush.msra.mxu3 %v2853_v62 }
 0x584   : > { %3120 = vmatpush.msra.mxu0 %v2657_v32  ;;  %3140 = vmatpush.msra.mxu1 %v2721_v33 }
 0x585   : > { %3160 = vmatpush.msra.mxu2 %v2785_v34  ;;  %3180 = vmatpush.msra.mxu3 %v2849_v8  ;;  %v2965_v34 = vld [vmem:[#allocation10 + $0x9e0] sm:$0xff] }
 0x586   : > { %3121 = vmatpush.msra.mxu0 %v2653_v1  ;;  %3141 = vmatpush.msra.mxu1 %v2717_v40  ;;  %v3029_v8 = vld [vmem:[#allocation10 + $0xbe0] sm:$0xff]  ;;  %v2710_v1 = vld [vmem:[#allocation10 + $0x1e8] sm:$0xff] }
 0x587   : > { %3161 = vmatpush.msra.mxu2 %v2781_v56  ;;  %3181 = vmatpush.msra.mxu3 %v2845_v48  ;;  %v2774_v40 = vld [vmem:[#allocation10 + $0x3e8] sm:$0xff]  ;;  %v3025_v56 = vld [vmem:[#allocation10 + $0xbc0] sm:$0xff] }
 0x588   : > { %3122 = vmatpush.msra.mxu0 %v2649_v2  ;;  %3142 = vmatpush.msra.mxu1 %v2713_v20  ;;  %v2706_v48 = vld [vmem:[#allocation10 + $0x1c8] sm:$0xff]  ;;  %v2957_v2 = vld [vmem:[#allocation10 + $0x9a0] sm:$0xff] }
 0x589   : > { %3162 = vmatpush.msra.mxu2 %v2777_v36  ;;  %3182 = vmatpush.msra.mxu3 %v2841_v37  ;;  %v3021_v20 = vld [vmem:[#allocation10 + $0xba0] sm:$0xff]  ;;  %v2698_v37 = vld [vmem:[#allocation10 + $0x188] sm:$0xff] }
 0x58a   : > { %v3017_v36 = vld [vmem:[#allocation10 + $0xb80] sm:$0xff] }
 0x5e5   : > { %v2325_v49 = vpop.f32.mrf.mxu0  ;;  %v2345_v53 = vpop.f32.mrf.mxu1 }
 0x5e6   : > { %v2392_v47 = vrot.slane %v2325_v49, 2  ;;  %v2393_v55 = vrot.slane %v2345_v53, 2 }
 0x5e8   : > { %v2400_v28 = vadd.f32 %v2392_v47, %v8543_v61  ;;  %v2401_v21 = vadd.f32 %v2393_v55, %v8544_v31 }
 0x5ea   : > { %v5078_v57 = vmul.f32 -1.442695, %v2400_v28  ;;  %v5079_v14 = vmul.f32 -1.442695, %v2401_v21 }
 0x5ec   : > { %5323 = vpow2.f32 %v5078_v57  ;;  %v2385_v26 = vpop.f32.mrf.mxu3  ;;  %v2365_v42 = vpop.f32.mrf.mxu2 }
 0x5ed   : > { %5325 = vpow2.f32 %v5079_v14  ;;  %v2395_v50 = vrot.slane %v2385_v26, 2  ;;  %v2394_v39 = vrot.slane %v2365_v42, 2  ;;  %v2949_v42 = vld [vmem:[#allocation10 + $0x960] sm:$0xff] }
 0x5ef   : > { %v2403_v3 = vadd.f32 %v2395_v50, %v8545_v18  ;;  %v2402_v45 = vadd.f32 %v2394_v39, %v8546_v7  ;;  %v3013_v39 = vld [vmem:[#allocation10 + $0xb60] sm:$0xff] }
 0x5f1   : > { %v5080_v43 = vmul.f32 -1.442695, %v2403_v3 }
 0x5f2   : > { %v5324_v19 = vpop.eup %5323 }
 0x5f3   : > { %v5326_v22 = vpop.eup %5325  ;;  %v2407_v52 = vadd.f32 1.0, %v5324_v19  ;;  %5327 = vpow2.f32 %v5080_v43  ;;  %v2961_v43 = vld [vmem:[#allocation10 + $0x9c0] sm:$0xff]  ;;  %v2770_v19 = vld [vmem:[#allocation10 + $0x3c8] sm:$0xff] }
 0x5f4   : > { %v2426_v23 = vadd.f32 1.0, %v5326_v22  ;;  %v2766_v22 = vld [vmem:[#allocation10 + $0x3a8] sm:$0xff] }
 0x5f5   : > { %5329 = vrcp.f32 %v2407_v52  ;;  %v2419_v54 = vand.u32 2147483648, %v2407_v52  ;;  %v2417_v11 = vand.u32 2147483647, %v2407_v52  ;;  %vm2413_vm8 = vweird.f32 %v2407_v52 }
 0x5f6   : > { %5331 = vrcp.f32 %v2426_v23  ;;  %v2438_v47 = vand.u32 2147483648, %v2426_v23  ;;  %v2436_v13 = vand.u32 2147483647, %v2426_v23  ;;  %vm2432_vm9 = vweird.f32 %v2426_v23 }
 0x5f7   : > { %v2420_v21 = vor.u32 1.1754944e-38, %v2419_v54  ;;  %vm2418_vm12 = vcmp.eq.f32.partialorder %v2417_v11, 8.507059e+37  ;;  %v2750_v54 = vld [vmem:[#allocation10 + $0x328] sm:$0xff] }
 0x5f8   : > { %v2439_v30 = vor.u32 1.1754944e-38, %v2438_v47  ;;  %vm2437_vm13 = vcmp.eq.f32.partialorder %v2436_v13, 8.507059e+37  ;;  %v2937_v47 = vld [vmem:[#allocation10 + $0x900] sm:$0xff]  ;;  %v2682_v11 = vld [vmem:[#allocation10 + $0x108] sm:$0xff] }
 0x5f9   : > { %v5328_v16 = vpop.eup %5327  ;;  %v2933_v13 = vld [vmem:[#allocation10 + $0x8e0] sm:$0xff] }
 0x5fa   : > { %v2446_v10 = vadd.f32 1.0, %v5328_v16  ;;  %v2694_v16 = vld [vmem:[#allocation10 + $0x168] sm:$0xff] }
 0x5fb   : > { %v5330_v44 = vpop.eup %5329 }
 0x5fc   : > { %v5332_v41 = vpop.eup %5331  ;;  %v2409_v35 = vmul.f32 %v5330_v44, %v2407_v52  ;;  %5333 = vrcp.f32 %v2446_v10  ;;  %vm2414_vm6 = vweird.f32 %v5330_v44  ;;  %v2458_v15 = vand.u32 2147483648, %v2446_v10  ;;  %v2953_v52 = vld [vmem:[#allocation10 + $0x980] sm:$0xff] }
 0x5fd   : > { %v2428_v38 = vmul.f32 %v5332_v41, %v2426_v23  ;;  %5335 = vtanh.f32 %v2402_v45  ;;  %vm2433_vm7 = vweird.f32 %v5332_v41  ;;  %vm2415_vm10 = vmor %vm2413_vm8, %vm2414_vm6  ;;  %vm2452_vm15 = vweird.f32 %v2446_v10  ;;  %v2762_v23 = vld [vmem:[#allocation10 + $0x388] sm:$0xff]  ;;  %v3009_v45 = vld [vmem:[#allocation10 + $0xb40] sm:$0xff] }
 0x5fe   : > { %v2410_v49 = vsub.f32 1.0, %v2409_v35  ;;  %vm2434_vm11 = vmor %vm2432_vm9, %vm2433_vm7  ;;  %v2456_v50 = vand.u32 2147483647, %v2446_v10  ;;  %v2459_v5 = vor.u32 1.1754944e-38, %v2458_v15  ;;  %vm2645_vm7 = vcmask 1045504   ;;  %v2754_v35 = vld [vmem:[#allocation10 + $0x348] sm:$0xff] }
 0x5ff   : > { %v2429_v53 = vsub.f32 1.0, %v2428_v38  ;;  %v2941_v38 = vld [vmem:[#allocation10 + $0x920] sm:$0xff]  ;;  %v2662_v15 = vld [vmem:[#allocation10 + $0x68] sm:$0xff] }
 0x600   : > { %v2411_v55 = vmul.f32 %v5330_v44, %v2410_v49  ;;  %vm2457_vm6 = vcmp.eq.f32.partialorder %v2456_v50, 8.507059e+37  ;;  %v3005_v49 = vld [vmem:[#allocation10 + $0xb20] sm:$0xff]  ;;  %v2726_v50 = vld [vmem:[#allocation10 + $0x268] sm:$0xff] }
 0x601   : > { %v2430_v12 = vmul.f32 %v5332_v41, %v2429_v53  ;;  %v2686_v53 = vld [vmem:[#allocation10 + $0x128] sm:$0xff] }
 0x602   : > { %v5334_v17 = vpop.eup %5333  ;;  %v2412_v28 = vadd.f32 %v5330_v44, %v2411_v55  ;;  %v3001_v55 = vld [vmem:[#allocation10 + $0xb00] sm:$0xff] }
 0x603   : > { %v2431_v25 = vadd.f32 %v5332_v41, %v2430_v12  ;;  %v2448_v27 = vmul.f32 %v5334_v17, %v2446_v10  ;;  %v5336_v14 = vpop.eup %5335  ;;  %vm2453_vm14 = vweird.f32 %v5334_v17  ;;  %v2758_v10 = vld [vmem:[#allocation10 + $0x368] sm:$0xff] }
 0x604   : > { %v2416_v57 = vsel %vm2415_vm10, %v5330_v44, %v2412_v28  ;;  %vm2454_vm0 = vmor %vm2452_vm15, %vm2453_vm14  ;;  %v2945_v44 = vld [vmem:[#allocation10 + $0x940] sm:$0xff]  ;;  %v2746_v12 = vld [vmem:[#allocation10 + $0x308] sm:$0xff] }
 0x605   : > { %v2421_v58 = vsel %vm2418_vm12, %v2420_v21, %v2416_v57  ;;  %v2435_v59 = vsel %vm2434_vm11, %v5332_v41, %v2431_v25  ;;  %v2449_v9 = vsub.f32 1.0, %v2448_v27  ;;  %v2690_v41 = vld [vmem:[#allocation10 + $0x148] sm:$0xff]  ;;  %v2929_v25 = vld [vmem:[#allocation10 + $0x8c0] sm:$0xff] }
 0x606   : > { %v2440_v24 = vsel %vm2437_vm13, %v2439_v30, %v2435_v59  ;;  %v2466_v63 = vmul.f32 %v5336_v14, %v2421_v58  ;;  %v2678_v28 = vld [vmem:[#allocation10 + $0xe8] sm:$0xff]  ;;  %v2993_v27 = vld [vmem:[#allocation10 + $0xac0] sm:$0xff] }
 0x607   : > { %v2465_v26 = vmul.f32 %v2463_v29, %v2440_v24  ;;  %v2450_v6 = vmul.f32 %v5334_v17, %v2449_v9  ;;  %v2742_v21 = vld [vmem:[#allocation10 + $0x2e8] sm:$0xff]  ;;  %v2925_v57 = vld [vmem:[#allocation10 + $0x8a0] sm:$0xff] }
 0x608   : > { %v2674_v29 = vld [vmem:[#allocation10 + $0xc8] sm:$0xff]  ;;  %v2989_v14 = vld [vmem:[#allocation10 + $0xaa0] sm:$0xff] }
 0x609   : > { %v7013_v51 = vadd.f32 %v2466_v63, %v2465_v26  ;;  %v2451_v60 = vadd.f32 %v5334_v17, %v2450_v6  ;;  %v2738_v30 = vld [vmem:[#allocation10 + $0x2c8] sm:$0xff]  ;;  %v2921_v9 = vld [vmem:[#allocation10 + $0x880] sm:$0xff] }
 0x60a   : > { %v2670_v58 = vld [vmem:[#allocation10 + $0xa8] sm:$0xff]  ;;  %v2985_v24 = vld [vmem:[#allocation10 + $0xa80] sm:$0xff] }
 0x60b   : > { %5337 = vtanh.f32 %v7013_v51  ;;  %v2455_v0 = vsel %vm2454_vm0, %v5334_v17, %v2451_v60  ;;  %v2997_v17 = vld [vmem:[#allocation10 + $0xae0] sm:$0xff]  ;;  %v2734_v59 = vld [vmem:[#allocation10 + $0x2a8] sm:$0xff] }
 0x60c   : > { %v2460_v62 = vsel %vm2457_vm6, %v2459_v5, %v2455_v0  ;;  %v2666_v63 = vld [vmem:[#allocation10 + $0x88] sm:$0xff]  ;;  %v2917_v6 = vld [vmem:[#allocation10 + $0x860] sm:$0xff] }
 0x60d   : > { %v2730_v26 = vld [vmem:[#allocation10 + $0x288] sm:$0xff]  ;;  %v2981_v60 = vld [vmem:[#allocation10 + $0xa60] sm:$0xff] }
 0x60e   : > { %v2913_v0 = vld [vmem:[#allocation10 + $0x840] sm:$0xff] }
 0x60f   : > { %v2977_v5 = vld [vmem:[#allocation10 + $0xa40] sm:$0xff] }
 0x611   : > { %v5338_v4 = vpop.eup %5337 }
 0x612   : > { %v2469_v32 = vmul.f32 %v5338_v4, %v2460_v62  ;;  %v2658_v4 = vld [vmem:[#allocation10 + $0x48] sm:$0xff] }
 0x613   : > { %v2722_v62 = vld [vmem:[#allocation10 + $0x248] sm:$0xff] }
 0x614   : > { %v2471_v33 = vrot.slane %v2469_v32, 6  ;;  %v7018_v3 = vsel %vm2645_vm7, %v7006_v46, %v2469_v32  ;;  %v2702_v46 = vld [vmem:[#allocation10 + $0x1a8] sm:$0xff]  ;;  %v2909_v32 = vld [vmem:[#allocation10 + $0x820] sm:$0xff] }
 0x616   : > { %2489 = vmatmul.f32.vlgmr.msrb.gmra.mxu0 %v2471_v33  ;;  %2509 = vmatmul.f32.vlgmr.msrb.gmra.mxu1 %v2471_v33 }
 0x617   : > { %2529 = vmatmul.f32.vlgmr.msrb.gmra.mxu2 %v2471_v33  ;;  %2549 = vmatmul.f32.vlgmr.msrb.gmra.mxu3 %v2471_v33  ;;  %v2973_v33 = vld [vmem:[#allocation10 + $0xa20] sm:$0xff] }
 0x618   : > { %3187 = vmatpush.msrb.mxu0 %v2965_v34  ;;  %3207 = vmatpush.msrb.mxu1 %v3029_v8  ;;  %v2654_v34 = vld [vmem:[#allocation10 + $0x28] sm:$0xff] }
 0x619   : > { %3227 = vmatpush.msrb.mxu2 %v2710_v1  ;;  %3247 = vmatpush.msrb.mxu3 %v2774_v40  ;;  %v2718_v8 = vld [vmem:[#allocation10 + $0x228] sm:$0xff]  ;;  %v2905_v40 = vld [vmem:[#allocation10 + $0x800] sm:$0xff] }
 0x61a   : > { %3188 = vmatpush.msrb.mxu0 %v2961_v43  ;;  %3208 = vmatpush.msrb.mxu1 %v3025_v56  ;;  %v7021_v1 = vld [vmem:[%s6094_s14 + $0x10] sm:$0xff] }
 0x61b   : > { %3228 = vmatpush.msrb.mxu2 %v2706_v48  ;;  %3248 = vmatpush.msrb.mxu3 %v2770_v19  ;;  %v2969_v43 = vld [vmem:[#allocation10 + $0xa00] sm:$0xff]  ;;  %v2650_v56 = vld [vmem:[#allocation10 + $0x8] sm:$0xff] }
 0x61c   : > { %3189 = vmatpush.msrb.mxu0 %v2957_v2  ;;  %3209 = vmatpush.msrb.mxu1 %v3021_v20  ;;  %v7025_v48 = vld [vmem:[%s6094_s14] sm:$0xff]  ;;  %v7029_v2 = vld [vmem:[%s6094_s14 + $0x18] sm:$0xff] }
 0x61d   : > { %3229 = vmatpush.msrb.mxu2 %v2702_v46  ;;  %3249 = vmatpush.msrb.mxu3 %v2766_v22  ;;  %v2714_v19 = vld [vmem:[#allocation10 + $0x208] sm:$0xff] }
 0x61e   : > { %3190 = vmatpush.msrb.mxu0 %v2953_v52  ;;  %3210 = vmatpush.msrb.mxu1 %v3017_v36  ;;  %v2838_v20 = vld [vmem:[#allocation10 + $0x5e8] sm:$0xff] }
 0x61f   : > { %3230 = vmatpush.msrb.mxu2 %v2698_v37  ;;  %3250 = vmatpush.msrb.mxu3 %v2762_v23  ;;  %v2902_v46 = vld [vmem:[#allocation10 + $0x7e8] sm:$0xff] }
 0x620   : > { %3191 = vmatpush.msrb.mxu0 %v2949_v42  ;;  %3211 = vmatpush.msrb.mxu1 %v3013_v39  ;;  %v2966_v22 = vld [vmem:[#allocation10 + $0x9e8] sm:$0xff] }
 0x621   : > { %3231 = vmatpush.msrb.mxu2 %v2694_v16  ;;  %3251 = vmatpush.msrb.mxu3 %v2758_v10  ;;  %v3030_v52 = vld [vmem:[#allocation10 + $0xbe8] sm:$0xff] }
 0x622   : > { %3192 = vmatpush.msrb.mxu0 %v2945_v44  ;;  %3212 = vmatpush.msrb.mxu1 %v3009_v45  ;;  %v7033_v36 = vld [vmem:[%s6094_s14 + $0x8] sm:$0xff] }
 0x623   : > { %3232 = vmatpush.msrb.mxu2 %v2690_v41  ;;  %3252 = vmatpush.msrb.mxu3 %v2754_v35  ;;  %v2834_v37 = vld [vmem:[#allocation10 + $0x5c8] sm:$0xff] }
 0x624   : > { %3193 = vmatpush.msrb.mxu0 %v2941_v38  ;;  %3213 = vmatpush.msrb.mxu1 %v3005_v49  ;;  %v2898_v23 = vld [vmem:[#allocation10 + $0x7c8] sm:$0xff] }
 0x625   : > { %3233 = vmatpush.msrb.mxu2 %v2686_v53  ;;  %3253 = vmatpush.msrb.mxu3 %v2750_v54  ;;  %v2962_v42 = vld [vmem:[#allocation10 + $0x9c8] sm:$0xff] }
 0x626   : > { %3194 = vmatpush.msrb.mxu0 %v2937_v47  ;;  %3214 = vmatpush.msrb.mxu1 %v3001_v55  ;;  %v3026_v39 = vld [vmem:[#allocation10 + $0xbc8] sm:$0xff] }
 0x627   : > { %3234 = vmatpush.msrb.mxu2 %v2682_v11  ;;  %3254 = vmatpush.msrb.mxu3 %v2746_v12  ;;  %v2830_v16 = vld [vmem:[#allocation10 + $0x5a8] sm:$0xff] }
 0x628   : > { %3195 = vmatpush.msrb.mxu0 %v2933_v13  ;;  %3215 = vmatpush.msrb.mxu1 %v2997_v17  ;;  %v2894_v10 = vld [vmem:[#allocation10 + $0x7a8] sm:$0xff] }
 0x629   : > { %3235 = vmatpush.msrb.mxu2 %v2678_v28  ;;  %3255 = vmatpush.msrb.mxu3 %v2742_v21  ;;  %v2958_v44 = vld [vmem:[#allocation10 + $0x9a8] sm:$0xff] }
 0x62a   : > { %3196 = vmatpush.msrb.mxu0 %v2929_v25  ;;  %3216 = vmatpush.msrb.mxu1 %v2993_v27  ;;  %v3022_v45 = vld [vmem:[#allocation10 + $0xba8] sm:$0xff] }
 0x62b   : > { %3236 = vmatpush.msrb.mxu2 %v2674_v29  ;;  %3256 = vmatpush.msrb.mxu3 %v2738_v30  ;;  %v2890_v41 = vld [vmem:[#allocation10 + $0x788] sm:$0xff] }
 0x62c   : > { %3197 = vmatpush.msrb.mxu0 %v2925_v57  ;;  %3217 = vmatpush.msrb.mxu1 %v2989_v14  ;;  %v2826_v35 = vld [vmem:[#allocation10 + $0x588] sm:$0xff] }
 0x62d   : > { %3237 = vmatpush.msrb.mxu2 %v2670_v58  ;;  %3257 = vmatpush.msrb.mxu3 %v2734_v59  ;;  %v2954_v38 = vld [vmem:[#allocation10 + $0x988] sm:$0xff] }
 0x62e   : > { %3198 = vmatpush.msrb.mxu0 %v2921_v9  ;;  %3218 = vmatpush.msrb.mxu1 %v2985_v24  ;;  %v3018_v49 = vld [vmem:[#allocation10 + $0xb88] sm:$0xff] }
 0x62f   : > { %3238 = vmatpush.msrb.mxu2 %v2666_v63  ;;  %3258 = vmatpush.msrb.mxu3 %v2730_v26  ;;  %v7037_v53 = vld [vmem:[%s6094_s14 + $0x20] sm:$0xff]  ;;  %v7041_v12 = vld [vmem:[%s6094_s14 + $0x28] sm:$0xff] }
 0x630   : > { %3199 = vmatpush.msrb.mxu0 %v2917_v6  ;;  %3219 = vmatpush.msrb.mxu1 %v2981_v60  ;;  %v2822_v54 = vld [vmem:[#allocation10 + $0x568] sm:$0xff] }
 0x631   : > { %3239 = vmatpush.msrb.mxu2 %v2662_v15  ;;  %3259 = vmatpush.msrb.mxu3 %v2726_v50  ;;  %v2886_v47 = vld [vmem:[#allocation10 + $0x768] sm:$0xff] }
 0x632   : > { %3200 = vmatpush.msrb.mxu0 %v2913_v0  ;;  %3220 = vmatpush.msrb.mxu1 %v2977_v5  ;;  %v2950_v55 = vld [vmem:[#allocation10 + $0x968] sm:$0xff] }
 0x633   : > { %3240 = vmatpush.msrb.mxu2 %v2658_v4  ;;  %3260 = vmatpush.msrb.mxu3 %v2722_v62  ;;  %v3014_v11 = vld [vmem:[#allocation10 + $0xb68] sm:$0xff] }
 0x634   : > { %3163 = vmatmul.f32.vlgmr.msra.gmra.mxu2 %v7021_v1  ;;  %3201 = vmatpush.msrb.mxu0 %v2909_v32  ;;  %v2818_v13 = vld [vmem:[#allocation10 + $0x548] sm:$0xff] }
 0x635   : > { %3221 = vmatpush.msrb.mxu1 %v2973_v33  ;;  %3241 = vmatpush.msrb.mxu2 %v2654_v34  ;;  %v2882_v17 = vld [vmem:[#allocation10 + $0x748] sm:$0xff] }
 0x636   : > { %3261 = vmatpush.msrb.mxu3 %v2718_v8  ;;  %3123 = vmatmul.f32.vlgmr.msra.gmra.mxu0 %v7025_v48  ;;  %v2946_v28 = vld [vmem:[#allocation10 + $0x948] sm:$0xff] }
 0x637   : > { %3183 = vmatmul.f32.vlgmr.msra.gmra.mxu3 %v7029_v2  ;;  %3202 = vmatpush.msrb.mxu0 %v2905_v40  ;;  %v3010_v21 = vld [vmem:[#allocation10 + $0xb48] sm:$0xff] }
 0x638   : > { %3222 = vmatpush.msrb.mxu1 %v2969_v43  ;;  %3242 = vmatpush.msrb.mxu2 %v2650_v56  ;;  %v2814_v25 = vld [vmem:[#allocation10 + $0x528] sm:$0xff] }
 0x639   : > { %3262 = vmatpush.msrb.mxu3 %v2714_v19  ;;  %3143 = vmatmul.f32.vlgmr.msra.gmra.mxu1 %v7033_v36  ;;  %v2878_v27 = vld [vmem:[#allocation10 + $0x728] sm:$0xff] }
 0x63a   : > { %3267 = vmatpush.msra.mxu0 %v2838_v20  ;;  %3287 = vmatpush.msra.mxu1 %v2902_v46  ;;  %v2942_v29 = vld [vmem:[#allocation10 + $0x928] sm:$0xff] }
 0x63b   : > { %3307 = vmatpush.msra.mxu2 %v2966_v22  ;;  %3327 = vmatpush.msra.mxu3 %v3030_v52  ;;  %v3006_v30 = vld [vmem:[#allocation10 + $0xb28] sm:$0xff] }
 0x63c   : > { %3268 = vmatpush.msra.mxu0 %v2834_v37  ;;  %3288 = vmatpush.msra.mxu1 %v2898_v23  ;;  %v2810_v57 = vld [vmem:[#allocation10 + $0x508] sm:$0xff] }
 0x63d   : > { %3308 = vmatpush.msra.mxu2 %v2962_v42  ;;  %3328 = vmatpush.msra.mxu3 %v3026_v39  ;;  %v2874_v14 = vld [vmem:[#allocation10 + $0x708] sm:$0xff] }
 0x63e   : > { %3269 = vmatpush.msra.mxu0 %v2830_v16  ;;  %3289 = vmatpush.msra.mxu1 %v2894_v10  ;;  %v2938_v58 = vld [vmem:[#allocation10 + $0x908] sm:$0xff] }
 0x63f   : > { %3309 = vmatpush.msra.mxu2 %v2958_v44  ;;  %3329 = vmatpush.msra.mxu3 %v3022_v45  ;;  %v3002_v59 = vld [vmem:[#allocation10 + $0xb08] sm:$0xff] }
 0x640   : > { %3203 = vmatmul.f32.vlgmr.msrb.gmra.mxu0 %v7037_v53  ;;  %3290 = vmatpush.msra.mxu1 %v2890_v41  ;;  %v2806_v9 = vld [vmem:[#allocation10 + $0x4e8] sm:$0xff]  ;;  %v2711_v41 = vld [vmem:[#allocation10 + $0x1f0] sm:$0xff] }
 0x641   : > { %3270 = vmatpush.msra.mxu0 %v2826_v35  ;;  %3310 = vmatpush.msra.mxu2 %v2954_v38  ;;  %v2870_v24 = vld [vmem:[#allocation10 + $0x6e8] sm:$0xff]  ;;  %v2775_v35 = vld [vmem:[#allocation10 + $0x3f0] sm:$0xff] }
 0x642   : > { %3330 = vmatpush.msra.mxu3 %v3018_v49  ;;  %3223 = vmatmul.f32.vlgmr.msrb.gmra.mxu1 %v7041_v12  ;;  %v2934_v63 = vld [vmem:[#allocation10 + $0x8e8] sm:$0xff]  ;;  %v2839_v38 = vld [vmem:[#allocation10 + $0x5f0] sm:$0xff] }
 0x643   : > { %3271 = vmatpush.msra.mxu0 %v2822_v54  ;;  %3291 = vmatpush.msra.mxu1 %v2886_v47  ;;  %v2998_v26 = vld [vmem:[#allocation10 + $0xae8] sm:$0xff]  ;;  %v2903_v49 = vld [vmem:[#allocation10 + $0x7f0] sm:$0xff] }
 0x644   : > { %3311 = vmatpush.msra.mxu2 %v2950_v55  ;;  %3331 = vmatpush.msra.mxu3 %v3014_v11  ;;  %v2802_v6 = vld [vmem:[#allocation10 + $0x4c8] sm:$0xff]  ;;  %v2707_v54 = vld [vmem:[#allocation10 + $0x1d0] sm:$0xff] }
 0x645   : > { %3272 = vmatpush.msra.mxu0 %v2818_v13  ;;  %3292 = vmatpush.msra.mxu1 %v2882_v17  ;;  %v2866_v60 = vld [vmem:[#allocation10 + $0x6c8] sm:$0xff]  ;;  %v2771_v47 = vld [vmem:[#allocation10 + $0x3d0] sm:$0xff] }
 0x646   : > { %3312 = vmatpush.msra.mxu2 %v2946_v28  ;;  %3332 = vmatpush.msra.mxu3 %v3010_v21  ;;  %v2930_v15 = vld [vmem:[#allocation10 + $0x8c8] sm:$0xff]  ;;  %v2835_v55 = vld [vmem:[#allocation10 + $0x5d0] sm:$0xff] }
 0x647   : > { %3273 = vmatpush.msra.mxu0 %v2814_v25  ;;  %3293 = vmatpush.msra.mxu1 %v2878_v27  ;;  %v2994_v50 = vld [vmem:[#allocation10 + $0xac8] sm:$0xff]  ;;  %v2899_v11 = vld [vmem:[#allocation10 + $0x7d0] sm:$0xff] }
 0x648   : > { %3313 = vmatpush.msra.mxu2 %v2942_v29  ;;  %3333 = vmatpush.msra.mxu3 %v3006_v30  ;;  %v2798_v0 = vld [vmem:[#allocation10 + $0x4a8] sm:$0xff]  ;;  %v2703_v13 = vld [vmem:[#allocation10 + $0x1b0] sm:$0xff] }
 0x649   : > { %3274 = vmatpush.msra.mxu0 %v2810_v57  ;;  %3294 = vmatpush.msra.mxu1 %v2874_v14  ;;  %v2862_v5 = vld [vmem:[#allocation10 + $0x6a8] sm:$0xff]  ;;  %v2767_v17 = vld [vmem:[#allocation10 + $0x3b0] sm:$0xff] }
 0x64a   : > { %3314 = vmatpush.msra.mxu2 %v2938_v58  ;;  %3334 = vmatpush.msra.mxu3 %v3002_v59  ;;  %v2926_v4 = vld [vmem:[#allocation10 + $0x8a8] sm:$0xff]  ;;  %v2831_v28 = vld [vmem:[#allocation10 + $0x5b0] sm:$0xff] }
 0x64b   : > { %3275 = vmatpush.msra.mxu0 %v2806_v9  ;;  %3295 = vmatpush.msra.mxu1 %v2870_v24  ;;  %v2990_v62 = vld [vmem:[#allocation10 + $0xaa8] sm:$0xff]  ;;  %v2895_v21 = vld [vmem:[#allocation10 + $0x7b0] sm:$0xff] }
 0x64c   : > { %3315 = vmatpush.msra.mxu2 %v2934_v63  ;;  %3335 = vmatpush.msra.mxu3 %v2998_v26  ;;  %v2794_v32 = vld [vmem:[#allocation10 + $0x488] sm:$0xff]  ;;  %v2699_v25 = vld [vmem:[#allocation10 + $0x190] sm:$0xff] }
 0x64d   : > { %3276 = vmatpush.msra.mxu0 %v2802_v6  ;;  %3296 = vmatpush.msra.mxu1 %v2866_v60  ;;  %v2858_v33 = vld [vmem:[#allocation10 + $0x688] sm:$0xff]  ;;  %v2763_v27 = vld [vmem:[#allocation10 + $0x390] sm:$0xff] }
 0x64e   : > { %3316 = vmatpush.msra.mxu2 %v2930_v15  ;;  %3336 = vmatpush.msra.mxu3 %v2994_v50  ;;  %v2922_v34 = vld [vmem:[#allocation10 + $0x888] sm:$0xff]  ;;  %v2827_v29 = vld [vmem:[#allocation10 + $0x590] sm:$0xff] }
 0x64f   : > { %3277 = vmatpush.msra.mxu0 %v2798_v0  ;;  %3297 = vmatpush.msra.mxu1 %v2862_v5  ;;  %v2986_v8 = vld [vmem:[#allocation10 + $0xa88] sm:$0xff]  ;;  %v2891_v30 = vld [vmem:[#allocation10 + $0x790] sm:$0xff] }
 0x650   : > { %3317 = vmatpush.msra.mxu2 %v2926_v4  ;;  %3337 = vmatpush.msra.mxu3 %v2990_v62  ;;  %v2790_v40 = vld [vmem:[#allocation10 + $0x468] sm:$0xff]  ;;  %v2695_v57 = vld [vmem:[#allocation10 + $0x170] sm:$0xff] }
 0x651   : > { %v2854_v43 = vld [vmem:[#allocation10 + $0x668] sm:$0xff]  ;;  %3278 = vmatpush.msra.mxu0 %v2794_v32  ;;  %3298 = vmatpush.msra.mxu1 %v2858_v33  ;;  %v2759_v14 = vld [vmem:[#allocation10 + $0x370] sm:$0xff] }
 0x652   : > { %v2918_v56 = vld [vmem:[#allocation10 + $0x868] sm:$0xff]  ;;  %3318 = vmatpush.msra.mxu2 %v2922_v34  ;;  %3338 = vmatpush.msra.mxu3 %v2986_v8  ;;  %v2823_v58 = vld [vmem:[#allocation10 + $0x570] sm:$0xff] }
 0x653   : > { %v2982_v19 = vld [vmem:[#allocation10 + $0xa68] sm:$0xff]  ;;  %3279 = vmatpush.msra.mxu0 %v2790_v40  ;;  %3299 = vmatpush.msra.mxu1 %v2854_v43  ;;  %v2887_v59 = vld [vmem:[#allocation10 + $0x770] sm:$0xff] }
 0x654   : > { %v2786_v20 = vld [vmem:[#allocation10 + $0x448] sm:$0xff]  ;;  %3319 = vmatpush.msra.mxu2 %v2918_v56  ;;  %3339 = vmatpush.msra.mxu3 %v2982_v19  ;;  %v2691_v9 = vld [vmem:[#allocation10 + $0x150] sm:$0xff] }
 0x655   : > { %v2850_v46 = vld [vmem:[#allocation10 + $0x648] sm:$0xff]  ;;  %3280 = vmatpush.msra.mxu0 %v2786_v20  ;;  %3243 = vmatmul.f32.vlgmr.msrb.gmra.mxu2 %v7025_v48  ;;  %v2755_v24 = vld [vmem:[#allocation10 + $0x350] sm:$0xff] }
 0x656   : > { %v2914_v22 = vld [vmem:[#allocation10 + $0x848] sm:$0xff]  ;;  %3300 = vmatpush.msra.mxu1 %v2850_v46  ;;  %3263 = vmatmul.f32.vlgmr.msrb.gmra.mxu3 %v7033_v36  ;;  %v2819_v63 = vld [vmem:[#allocation10 + $0x550] sm:$0xff] }
 0x657   : > { %v2978_v52 = vld [vmem:[#allocation10 + $0xa48] sm:$0xff]  ;;  %3320 = vmatpush.msra.mxu2 %v2914_v22  ;;  %v2883_v26 = vld [vmem:[#allocation10 + $0x750] sm:$0xff] }
 0x658   : > { %v2782_v37 = vld [vmem:[#allocation10 + $0x428] sm:$0xff]  ;;  %3340 = vmatpush.msra.mxu3 %v2978_v52  ;;  %v2687_v6 = vld [vmem:[#allocation10 + $0x130] sm:$0xff] }
 0x659   : > { %v2846_v23 = vld [vmem:[#allocation10 + $0x628] sm:$0xff]  ;;  %3281 = vmatpush.msra.mxu0 %v2782_v37  ;;  %v2751_v60 = vld [vmem:[#allocation10 + $0x330] sm:$0xff] }
 0x65a   : > { %v2910_v42 = vld [vmem:[#allocation10 + $0x828] sm:$0xff]  ;;  %3301 = vmatpush.msra.mxu1 %v2846_v23  ;;  %v2815_v15 = vld [vmem:[#allocation10 + $0x530] sm:$0xff] }
 0x65b   : > { %v2974_v39 = vld [vmem:[#allocation10 + $0xa28] sm:$0xff]  ;;  %3321 = vmatpush.msra.mxu2 %v2910_v42  ;;  %v2879_v50 = vld [vmem:[#allocation10 + $0x730] sm:$0xff] }
 0x65c   : > { %v2778_v16 = vld [vmem:[#allocation10 + $0x408] sm:$0xff]  ;;  %3341 = vmatpush.msra.mxu3 %v2974_v39  ;;  %v2683_v0 = vld [vmem:[#allocation10 + $0x110] sm:$0xff] }
 0x65d   : > { %v2842_v10 = vld [vmem:[#allocation10 + $0x608] sm:$0xff]  ;;  %3282 = vmatpush.msra.mxu0 %v2778_v16  ;;  %v2747_v5 = vld [vmem:[#allocation10 + $0x310] sm:$0xff] }
 0x65e   : > { %v2906_v44 = vld [vmem:[#allocation10 + $0x808] sm:$0xff]  ;;  %3302 = vmatpush.msra.mxu1 %v2842_v10  ;;  %v2811_v4 = vld [vmem:[#allocation10 + $0x510] sm:$0xff]  ;;  %3283 = vmatmul.f32.vlgmr.msra.gmra.mxu0 %v7021_v1 }
 0x65f   : > { %v2970_v45 = vld [vmem:[#allocation10 + $0xa08] sm:$0xff]  ;;  %3322 = vmatpush.msra.mxu2 %v2906_v44  ;;  %3347 = vmatpush.msrb.mxu0 %v2711_v41  ;;  %v2875_v62 = vld [vmem:[#allocation10 + $0x710] sm:$0xff] }
 0x660   : > { %3342 = vmatpush.msra.mxu3 %v2970_v45  ;;  %3367 = vmatpush.msrb.mxu1 %v2775_v35  ;;  %v2679_v32 = vld [vmem:[#allocation10 + $0xf0] sm:$0xff] }
 0x661   : > { %3387 = vmatpush.msrb.mxu2 %v2839_v38  ;;  %3348 = vmatpush.msrb.mxu0 %v2707_v54  ;;  %v2743_v33 = vld [vmem:[#allocation10 + $0x2f0] sm:$0xff] }
 0x662   : > { %3407 = vmatpush.msrb.mxu3 %v2903_v49  ;;  %3368 = vmatpush.msrb.mxu1 %v2771_v47  ;;  %v2807_v34 = vld [vmem:[#allocation10 + $0x4f0] sm:$0xff] }
 0x663   : > { %3388 = vmatpush.msrb.mxu2 %v2835_v55  ;;  %3349 = vmatpush.msrb.mxu0 %v2703_v13  ;;  %v2871_v8 = vld [vmem:[#allocation10 + $0x6f0] sm:$0xff] }
 0x664   : > { %3408 = vmatpush.msrb.mxu3 %v2899_v11  ;;  %3369 = vmatpush.msrb.mxu1 %v2767_v17  ;;  %v2675_v40 = vld [vmem:[#allocation10 + $0xd0] sm:$0xff] }
 0x665   : > { %3389 = vmatpush.msrb.mxu2 %v2831_v28  ;;  %3350 = vmatpush.msrb.mxu0 %v2699_v25  ;;  %v2739_v43 = vld [vmem:[#allocation10 + $0x2d0] sm:$0xff] }
 0x666   : > { %3409 = vmatpush.msrb.mxu3 %v2895_v21  ;;  %3370 = vmatpush.msrb.mxu1 %v2763_v27  ;;  %v2803_v56 = vld [vmem:[#allocation10 + $0x4d0] sm:$0xff] }
 0x667   : > { %3390 = vmatpush.msrb.mxu2 %v2827_v29  ;;  %3351 = vmatpush.msrb.mxu0 %v2695_v57  ;;  %v2867_v19 = vld [vmem:[#allocation10 + $0x6d0] sm:$0xff]  ;;  %v2712_v29 = vld [vmem:[#allocation10 + $0x1f8] sm:$0xff] }
 0x668   : > { %3410 = vmatpush.msrb.mxu3 %v2891_v30  ;;  %3371 = vmatpush.msrb.mxu1 %v2759_v14  ;;  %v2671_v20 = vld [vmem:[#allocation10 + $0xb0] sm:$0xff]  ;;  %v2776_v30 = vld [vmem:[#allocation10 + $0x3f8] sm:$0xff] }
 0x669   : > { %3391 = vmatpush.msrb.mxu2 %v2823_v58  ;;  %3352 = vmatpush.msrb.mxu0 %v2691_v9  ;;  %v2735_v46 = vld [vmem:[#allocation10 + $0x2b0] sm:$0xff]  ;;  %v2708_v58 = vld [vmem:[#allocation10 + $0x1d8] sm:$0xff] }
 0x66a   : > { %3411 = vmatpush.msrb.mxu3 %v2887_v59  ;;  %3372 = vmatpush.msrb.mxu1 %v2755_v24  ;;  %v2799_v22 = vld [vmem:[#allocation10 + $0x4b0] sm:$0xff]  ;;  %v2772_v59 = vld [vmem:[#allocation10 + $0x3d8] sm:$0xff] }
 0x66b   : > { %3392 = vmatpush.msrb.mxu2 %v2819_v63  ;;  %3353 = vmatpush.msrb.mxu0 %v2687_v6  ;;  %v2863_v52 = vld [vmem:[#allocation10 + $0x6b0] sm:$0xff]  ;;  %v2704_v63 = vld [vmem:[#allocation10 + $0x1b8] sm:$0xff] }
 0x66c   : > { %3412 = vmatpush.msrb.mxu3 %v2883_v26  ;;  %3323 = vmatmul.f32.vlgmr.msra.gmra.mxu2 %v7037_v53  ;;  %v2667_v37 = vld [vmem:[#allocation10 + $0x90] sm:$0xff]  ;;  %v2768_v26 = vld [vmem:[#allocation10 + $0x3b8] sm:$0xff] }
 0x66d   : > { %3373 = vmatpush.msrb.mxu1 %v2751_v60  ;;  %3393 = vmatpush.msrb.mxu2 %v2815_v15  ;;  %v2731_v23 = vld [vmem:[#allocation10 + $0x290] sm:$0xff]  ;;  %v2700_v15 = vld [vmem:[#allocation10 + $0x198] sm:$0xff] }
 0x66e   : > { %3413 = vmatpush.msrb.mxu3 %v2879_v50  ;;  %3354 = vmatpush.msrb.mxu0 %v2683_v0  ;;  %v2795_v42 = vld [vmem:[#allocation10 + $0x490] sm:$0xff]  ;;  %v2764_v50 = vld [vmem:[#allocation10 + $0x398] sm:$0xff] }
 0x66f   : > { %3343 = vmatmul.f32.vlgmr.msra.gmra.mxu3 %v7041_v12  ;;  %3374 = vmatpush.msrb.mxu1 %v2747_v5  ;;  %v2859_v39 = vld [vmem:[#allocation10 + $0x690] sm:$0xff] }
 0x670   : > { %3394 = vmatpush.msrb.mxu2 %v2811_v4  ;;  %3414 = vmatpush.msrb.mxu3 %v2875_v62  ;;  %v2663_v16 = vld [vmem:[#allocation10 + $0x70] sm:$0xff]  ;;  %v2696_v4 = vld [vmem:[#allocation10 + $0x178] sm:$0xff] }
 0x671   : > { %3303 = vmatmul.f32.vlgmr.msra.gmra.mxu1 %v7029_v2  ;;  %3355 = vmatpush.msrb.mxu0 %v2679_v32  ;;  %v2727_v10 = vld [vmem:[#allocation10 + $0x270] sm:$0xff]  ;;  %v2760_v62 = vld [vmem:[#allocation10 + $0x378] sm:$0xff] }
 0x672   : > { %3375 = vmatpush.msrb.mxu1 %v2743_v33  ;;  %3395 = vmatpush.msrb.mxu2 %v2807_v34  ;;  %v2791_v44 = vld [vmem:[#allocation10 + $0x470] sm:$0xff]  ;;  %v2692_v34 = vld [vmem:[#allocation10 + $0x158] sm:$0xff] }
 0x673   : > { %3415 = vmatpush.msrb.mxu3 %v2871_v8  ;;  %3356 = vmatpush.msrb.mxu0 %v2675_v40  ;;  %v2855_v45 = vld [vmem:[#allocation10 + $0x670] sm:$0xff]  ;;  %v2756_v8 = vld [vmem:[#allocation10 + $0x358] sm:$0xff] }
 0x674   : > { %3376 = vmatpush.msrb.mxu1 %v2739_v43  ;;  %3396 = vmatpush.msrb.mxu2 %v2803_v56  ;;  %v2659_v41 = vld [vmem:[#allocation10 + $0x50] sm:$0xff]  ;;  %v2688_v56 = vld [vmem:[#allocation10 + $0x138] sm:$0xff] }
 0x675   : > { %3416 = vmatpush.msrb.mxu3 %v2867_v19  ;;  %3357 = vmatpush.msrb.mxu0 %v2671_v20  ;;  %v2723_v35 = vld [vmem:[#allocation10 + $0x250] sm:$0xff]  ;;  %v2752_v19 = vld [vmem:[#allocation10 + $0x338] sm:$0xff] }
 0x676   : > { %3377 = vmatpush.msrb.mxu1 %v2735_v46  ;;  %3397 = vmatpush.msrb.mxu2 %v2799_v22  ;;  %v2787_v38 = vld [vmem:[#allocation10 + $0x450] sm:$0xff]  ;;  %v2684_v22 = vld [vmem:[#allocation10 + $0x118] sm:$0xff] }
 0x677   : > { %3417 = vmatpush.msrb.mxu3 %v2863_v52  ;;  %3358 = vmatpush.msrb.mxu0 %v2667_v37  ;;  %v2851_v49 = vld [vmem:[#allocation10 + $0x650] sm:$0xff]  ;;  %v2748_v52 = vld [vmem:[#allocation10 + $0x318] sm:$0xff] }
 0x678   : > { %3378 = vmatpush.msrb.mxu1 %v2731_v23  ;;  %3398 = vmatpush.msrb.mxu2 %v2795_v42  ;;  %v2655_v54 = vld [vmem:[#allocation10 + $0x30] sm:$0xff]  ;;  %v2680_v42 = vld [vmem:[#allocation10 + $0xf8] sm:$0xff] }
 0x679   : > { %3418 = vmatpush.msrb.mxu3 %v2859_v39  ;;  %3359 = vmatpush.msrb.mxu0 %v2663_v16  ;;  %v2719_v47 = vld [vmem:[#allocation10 + $0x230] sm:$0xff]  ;;  %v2744_v39 = vld [vmem:[#allocation10 + $0x2f8] sm:$0xff] }
 0x67a   : > { %3379 = vmatpush.msrb.mxu1 %v2727_v10  ;;  %3399 = vmatpush.msrb.mxu2 %v2791_v44  ;;  %v2783_v55 = vld [vmem:[#allocation10 + $0x430] sm:$0xff]  ;;  %v2676_v44 = vld [vmem:[#allocation10 + $0xd8] sm:$0xff] }
 0x67b   : > { %3419 = vmatpush.msrb.mxu3 %v2855_v45  ;;  %3360 = vmatpush.msrb.mxu0 %v2659_v41  ;;  %v2847_v11 = vld [vmem:[#allocation10 + $0x630] sm:$0xff]  ;;  %v2740_v45 = vld [vmem:[#allocation10 + $0x2d8] sm:$0xff] }
 0x67c   : > { %3380 = vmatpush.msrb.mxu1 %v2723_v35  ;;  %3400 = vmatpush.msrb.mxu2 %v2787_v38  ;;  %v2651_v13 = vld [vmem:[#allocation10 + $0x10] sm:$0xff]  ;;  %v2672_v38 = vld [vmem:[#allocation10 + $0xb8] sm:$0xff] }
 0x67d   : > { %3420 = vmatpush.msrb.mxu3 %v2851_v49  ;;  %v2715_v17 = vld [vmem:[#allocation10 + $0x210] sm:$0xff]  ;;  %3361 = vmatpush.msrb.mxu0 %v2655_v54  ;;  %v2736_v49 = vld [vmem:[#allocation10 + $0x2b8] sm:$0xff] }
 0x67e   : > { %3381 = vmatpush.msrb.mxu1 %v2719_v47  ;;  %v2779_v28 = vld [vmem:[#allocation10 + $0x410] sm:$0xff]  ;;  %3401 = vmatpush.msrb.mxu2 %v2783_v55  ;;  %v2668_v55 = vld [vmem:[#allocation10 + $0x98] sm:$0xff] }
 0x67f   : > { %v2843_v21 = vld [vmem:[#allocation10 + $0x610] sm:$0xff]  ;;  %3421 = vmatpush.msrb.mxu3 %v2847_v11  ;;  %3362 = vmatpush.msrb.mxu0 %v2651_v13  ;;  %v2732_v11 = vld [vmem:[#allocation10 + $0x298] sm:$0xff] }
 0x680   : > { %v2967_v25 = vld [vmem:[#allocation10 + $0x9f0] sm:$0xff]  ;;  %3382 = vmatpush.msrb.mxu1 %v2715_v17  ;;  %3402 = vmatpush.msrb.mxu2 %v2779_v28 }
 0x681   : > { %v3031_v27 = vld [vmem:[#allocation10 + $0xbf0] sm:$0xff]  ;;  %3422 = vmatpush.msrb.mxu3 %v2843_v21  ;;  %3427 = vmatpush.msra.mxu0 %v2967_v25  ;;  %v2664_v25 = vld [vmem:[#allocation10 + $0x78] sm:$0xff] }
 0x682   : > { %v2963_v57 = vld [vmem:[#allocation10 + $0x9d0] sm:$0xff]  ;;  %3447 = vmatpush.msra.mxu1 %v3031_v27  ;;  %3467 = vmatpush.msra.mxu2 %v2712_v29  ;;  %v2728_v27 = vld [vmem:[#allocation10 + $0x278] sm:$0xff] }
 0x683   : > { %v3027_v14 = vld [vmem:[#allocation10 + $0xbd0] sm:$0xff]  ;;  %3487 = vmatpush.msra.mxu3 %v2776_v30  ;;  %3428 = vmatpush.msra.mxu0 %v2963_v57 }
 0x684   : > { %v2959_v9 = vld [vmem:[#allocation10 + $0x9b0] sm:$0xff]  ;;  %3448 = vmatpush.msra.mxu1 %v3027_v14  ;;  %3468 = vmatpush.msra.mxu2 %v2708_v58  ;;  %v2660_v58 = vld [vmem:[#allocation10 + $0x58] sm:$0xff] }
 0x685   : > { %v3023_v24 = vld [vmem:[#allocation10 + $0xbb0] sm:$0xff]  ;;  %3488 = vmatpush.msra.mxu3 %v2772_v59  ;;  %3429 = vmatpush.msra.mxu0 %v2959_v9  ;;  %v2724_v59 = vld [vmem:[#allocation10 + $0x258] sm:$0xff] }
 0x686   : > { %v2955_v6 = vld [vmem:[#allocation10 + $0x990] sm:$0xff]  ;;  %3449 = vmatpush.msra.mxu1 %v3023_v24  ;;  %3469 = vmatpush.msra.mxu2 %v2704_v63 }
 0x687   : > { %v3019_v60 = vld [vmem:[#allocation10 + $0xb90] sm:$0xff]  ;;  %3489 = vmatpush.msra.mxu3 %v2768_v26  ;;  %3430 = vmatpush.msra.mxu0 %v2955_v6  ;;  %v2656_v6 = vld [vmem:[#allocation10 + $0x38] sm:$0xff] }
 0x688   : > { %v2951_v0 = vld [vmem:[#allocation10 + $0x970] sm:$0xff]  ;;  %3450 = vmatpush.msra.mxu1 %v3019_v60  ;;  %3470 = vmatpush.msra.mxu2 %v2700_v15 }
 0x689   : > { %v3015_v5 = vld [vmem:[#allocation10 + $0xb70] sm:$0xff]  ;;  %3490 = vmatpush.msra.mxu3 %v2764_v50  ;;  %3431 = vmatpush.msra.mxu0 %v2951_v0  ;;  %v2720_v50 = vld [vmem:[#allocation10 + $0x238] sm:$0xff] }
 0x68a   : > { %v2947_v32 = vld [vmem:[#allocation10 + $0x950] sm:$0xff]  ;;  %3451 = vmatpush.msra.mxu1 %v3015_v5  ;;  %3471 = vmatpush.msra.mxu2 %v2696_v4  ;;  %v2652_v5 = vld [vmem:[#allocation10 + $0x18] sm:$0xff] }
 0x68b   : > { %v3011_v33 = vld [vmem:[#allocation10 + $0xb50] sm:$0xff]  ;;  %3491 = vmatpush.msra.mxu3 %v2760_v62  ;;  %3432 = vmatpush.msra.mxu0 %v2947_v32  ;;  %v2716_v62 = vld [vmem:[#allocation10 + $0x218] sm:$0xff] }
 0x68c   : > { %v2943_v40 = vld [vmem:[#allocation10 + $0x930] sm:$0xff]  ;;  %3452 = vmatpush.msra.mxu1 %v3011_v33  ;;  %3472 = vmatpush.msra.mxu2 %v2692_v34  ;;  %v2840_v32 = vld [vmem:[#allocation10 + $0x5f8] sm:$0xff] }
 0x68d   : > { %v3007_v43 = vld [vmem:[#allocation10 + $0xb30] sm:$0xff]  ;;  %3492 = vmatpush.msra.mxu3 %v2756_v8  ;;  %3433 = vmatpush.msra.mxu0 %v2943_v40  ;;  %v2904_v33 = vld [vmem:[#allocation10 + $0x7f8] sm:$0xff] }
 0x68e   : > { %v2939_v20 = vld [vmem:[#allocation10 + $0x910] sm:$0xff]  ;;  %3453 = vmatpush.msra.mxu1 %v3007_v43  ;;  %3473 = vmatpush.msra.mxu2 %v2688_v56  ;;  %v2968_v34 = vld [vmem:[#allocation10 + $0x9f8] sm:$0xff] }
 0x68f   : > { %v3003_v46 = vld [vmem:[#allocation10 + $0xb10] sm:$0xff]  ;;  %3493 = vmatpush.msra.mxu3 %v2752_v19  ;;  %3434 = vmatpush.msra.mxu0 %v2939_v20  ;;  %v3032_v8 = vld [vmem:[#allocation10 + $0xbf8] sm:$0xff] }
 0x690   : > { %v2935_v37 = vld [vmem:[#allocation10 + $0x8f0] sm:$0xff]  ;;  %3454 = vmatpush.msra.mxu1 %v3003_v46  ;;  %3474 = vmatpush.msra.mxu2 %v2684_v22  ;;  %v2836_v40 = vld [vmem:[#allocation10 + $0x5d8] sm:$0xff] }
 0x691   : > { %v2999_v23 = vld [vmem:[#allocation10 + $0xaf0] sm:$0xff]  ;;  %3494 = vmatpush.msra.mxu3 %v2748_v52  ;;  %3435 = vmatpush.msra.mxu0 %v2935_v37  ;;  %v2900_v43 = vld [vmem:[#allocation10 + $0x7d8] sm:$0xff] }
 0x692   : > { %v2931_v16 = vld [vmem:[#allocation10 + $0x8d0] sm:$0xff]  ;;  %3455 = vmatpush.msra.mxu1 %v2999_v23  ;;  %3475 = vmatpush.msra.mxu2 %v2680_v42  ;;  %v2896_v22 = vld [vmem:[#allocation10 + $0x7b8] sm:$0xff] }
 0x693   : > { %v2995_v10 = vld [vmem:[#allocation10 + $0xad0] sm:$0xff]  ;;  %3495 = vmatpush.msra.mxu3 %v2744_v39  ;;  %3436 = vmatpush.msra.mxu0 %v2931_v16  ;;  %v2490_v28 = vpop.f32.mrf.mxu0  ;;  %v2510_v21 = vpop.f32.mrf.mxu1  ;;  %v3024_v37 = vld [vmem:[#allocation10 + $0xbb8] sm:$0xff] }
 0x694   : > { %v2927_v41 = vld [vmem:[#allocation10 + $0x8b0] sm:$0xff]  ;;  %3456 = vmatpush.msra.mxu1 %v2995_v10  ;;  %3476 = vmatpush.msra.mxu2 %v2676_v44  ;;  %v2557_v29 = vrot.slane %v2490_v28, 1  ;;  %v2558_v30 = vrot.slane %v2510_v21, 1  ;;  %v2892_v42 = vld [vmem:[#allocation10 + $0x798] sm:$0xff] }
 0x695   : > { %v2991_v35 = vld [vmem:[#allocation10 + $0xab0] sm:$0xff]  ;;  %3496 = vmatpush.msra.mxu3 %v2740_v45  ;;  %3437 = vmatpush.msra.mxu0 %v2927_v41  ;;  %v2828_v39 = vld [vmem:[#allocation10 + $0x598] sm:$0xff] }
 0x696   : > { %v2923_v54 = vld [vmem:[#allocation10 + $0x890] sm:$0xff]  ;;  %3457 = vmatpush.msra.mxu1 %v2991_v35  ;;  %3477 = vmatpush.msra.mxu2 %v2672_v38  ;;  %v2565_v9 = vadd.f32 %v2557_v29, %v8543_v61  ;;  %v2566_v24 = vadd.f32 %v2558_v30, %v8544_v31  ;;  %v2956_v16 = vld [vmem:[#allocation10 + $0x998] sm:$0xff] }
 0x697   : > { %v2987_v47 = vld [vmem:[#allocation10 + $0xa90] sm:$0xff]  ;;  %3497 = vmatpush.msra.mxu3 %v2736_v49  ;;  %3438 = vmatpush.msra.mxu0 %v2923_v54  ;;  %v3020_v10 = vld [vmem:[#allocation10 + $0xb98] sm:$0xff] }
 0x698   : > { %v2919_v13 = vld [vmem:[#allocation10 + $0x870] sm:$0xff]  ;;  %3458 = vmatpush.msra.mxu1 %v2987_v47  ;;  %3478 = vmatpush.msra.mxu2 %v2668_v55  ;;  %v5081_v60 = vmul.f32 -1.442695, %v2565_v9  ;;  %v5082_v15 = vmul.f32 -1.442695, %v2566_v24  ;;  %v2824_v45 = vld [vmem:[#allocation10 + $0x578] sm:$0xff] }
 0x699   : > { %v2983_v17 = vld [vmem:[#allocation10 + $0xa70] sm:$0xff]  ;;  %3498 = vmatpush.msra.mxu3 %v2732_v11  ;;  %3439 = vmatpush.msra.mxu0 %v2919_v13  ;;  %v2888_v41 = vld [vmem:[#allocation10 + $0x778] sm:$0xff] }
 0x69a   : > { %v2915_v57 = vld [vmem:[#allocation10 + $0x850] sm:$0xff]  ;;  %3459 = vmatpush.msra.mxu1 %v2983_v17  ;;  %3479 = vmatpush.msra.mxu2 %v2664_v25  ;;  %5339 = vpow2.f32 %v5081_v60  ;;  %v2550_v61 = vpop.f32.mrf.mxu3  ;;  %v2530_v23 = vpop.f32.mrf.mxu2  ;;  %v2952_v38 = vld [vmem:[#allocation10 + $0x978] sm:$0xff] }
 0x69b   : > { %v2979_v14 = vld [vmem:[#allocation10 + $0xa50] sm:$0xff]  ;;  %3499 = vmatpush.msra.mxu3 %v2728_v27  ;;  %3440 = vmatpush.msra.mxu0 %v2915_v57  ;;  %5341 = vpow2.f32 %v5082_v15  ;;  %v2560_v4 = vrot.slane %v2550_v61, 1  ;;  %v2559_v44 = vrot.slane %v2530_v23, 1  ;;  %v3016_v49 = vld [vmem:[#allocation10 + $0xb78] sm:$0xff] }
 0x69c   : > { %v2911_v63 = vld [vmem:[#allocation10 + $0x830] sm:$0xff]  ;;  %3460 = vmatpush.msra.mxu1 %v2979_v14  ;;  %3480 = vmatpush.msra.mxu2 %v2660_v58  ;;  %v2820_v47 = vld [vmem:[#allocation10 + $0x558] sm:$0xff] }
 0x69d   : > { %v2975_v26 = vld [vmem:[#allocation10 + $0xa30] sm:$0xff]  ;;  %3500 = vmatpush.msra.mxu3 %v2724_v59  ;;  %3403 = vmatmul.f32.vlgmr.msrb.gmra.mxu2 %v7021_v1  ;;  %v2568_v1 = vadd.f32 %v2560_v4, %v8545_v18  ;;  %v2832_v18 = vld [vmem:[#allocation10 + $0x5b8] sm:$0xff]  ;;  %v2567_v13 = vadd.f32 %v2559_v44, %v8546_v7 }
 0x69e   : > { %3441 = vmatpush.msra.mxu0 %v2911_v63  ;;  %v2907_v0 = vld [vmem:[#allocation10 + $0x810] sm:$0xff]  ;;  %3461 = vmatpush.msra.mxu1 %v2975_v26  ;;  %v2884_v55 = vld [vmem:[#allocation10 + $0x758] sm:$0xff] }
 0x69f   : > { %3481 = vmatpush.msra.mxu2 %v2656_v6  ;;  %v2971_v31 = vld [vmem:[#allocation10 + $0xa10] sm:$0xff]  ;;  %3501 = vmatpush.msra.mxu3 %v2720_v50  ;;  %v5083_v56 = vmul.f32 -1.442695, %v2568_v1  ;;  %v3012_v17 = vld [vmem:[#allocation10 + $0xb58] sm:$0xff] }
 0x6a0   : > { %3363 = vmatmul.f32.vlgmr.msrb.gmra.mxu0 %v7025_v48  ;;  %3423 = vmatmul.f32.vlgmr.msrb.gmra.mxu3 %v7029_v2  ;;  %v5340_v19 = vpop.eup %5339  ;;  %v2964_v48 = vld [vmem:[#allocation10 + $0x9d8] sm:$0xff] }
 0x6a1   : > { %3442 = vmatpush.msra.mxu0 %v2907_v0  ;;  %3462 = vmatpush.msra.mxu1 %v2971_v31  ;;  %v3028_v2 = vld [vmem:[#allocation10 + $0xbd8] sm:$0xff]  ;;  %v5342_v20 = vpop.eup %5341  ;;  %v7057_v46 = vadd.f32 1.0, %v5340_v19  ;;  %5343 = vpow2.f32 %v5083_v56  ;;  %v2628_v56 = vrot.slane %v7013_v51, 7  ;;  %v7181_v19 = vld [vmem:[#allocation11 + $0x160] sm:$0xff] }
 0x6a2   : > { %3482 = vmatpush.msra.mxu2 %v2652_v5  ;;  %3502 = vmatpush.msra.mxu3 %v2716_v62  ;;  %v7059_v52 = vadd.f32 1.0, %v5342_v20  ;;  %v2880_v25 = vld [vmem:[#allocation10 + $0x738] sm:$0xff] }
 0x6a3   : > { %3383 = vmatmul.f32.vlgmr.msrb.gmra.mxu1 %v7033_v36  ;;  %3507 = vmatpush.msrb.mxu0 %v2840_v32  ;;  %v2960_v36 = vld [vmem:[#allocation10 + $0x9b8] sm:$0xff]  ;;  %5345 = vrcp.f32 %v7057_v46  ;;  %v2584_v59 = vand.u32 2147483648, %v7057_v46  ;;  %v2582_v6 = vand.u32 2147483647, %v7057_v46  ;;  %vm2578_vm10 = vweird.f32 %v7057_v46 }
 0x6a4   : > { %3527 = vmatpush.msrb.mxu1 %v2904_v33  ;;  %3547 = vmatpush.msrb.mxu2 %v2968_v34  ;;  %5347 = vrcp.f32 %v7059_v52  ;;  %v2944_v7 = vld [vmem:[#allocation10 + $0x938] sm:$0xff]  ;;  %v2603_v63 = vand.u32 2147483648, %v7059_v52  ;;  %v2601_v0 = vand.u32 2147483647, %v7059_v52  ;;  %vm2597_vm11 = vweird.f32 %v7059_v52  ;;  %v7152_v33 = vld [vmem:[#allocation11 + $0x1a0] sm:$0xff] }
 0x6a5   : > { %3567 = vmatpush.msrb.mxu3 %v3032_v8  ;;  %3508 = vmatpush.msrb.mxu0 %v2836_v40  ;;  %v3008_v29 = vld [vmem:[#allocation10 + $0xb38] sm:$0xff]  ;;  %v2585_v1 = vor.u32 1.1754944e-38, %v2584_v59  ;;  %vm2583_vm14 = vcmp.eq.f32.partialorder %v2582_v6, 8.507059e+37 }
 0x6a6   : > { %3528 = vmatpush.msrb.mxu1 %v2900_v43  ;;  %3548 = vmatpush.msrb.mxu2 %v2964_v48  ;;  %v2812_v57 = vld [vmem:[#allocation10 + $0x518] sm:$0xff]  ;;  %v2604_v48 = vor.u32 1.1754944e-38, %v2603_v63  ;;  %vm2602_vm15 = vcmp.eq.f32.partialorder %v2601_v0, 8.507059e+37  ;;  %v7128_v63 = vld [vmem:[#allocation11 + $0x1e0] sm:$0xff] }
 0x6a7   : > { %3568 = vmatpush.msrb.mxu3 %v3028_v2  ;;  %3509 = vmatpush.msrb.mxu0 %v2832_v18  ;;  %v5344_v35 = vpop.eup %5343  ;;  %v2876_v14 = vld [vmem:[#allocation10 + $0x718] sm:$0xff] }
 0x6a8   : > { %3529 = vmatpush.msrb.mxu1 %v2896_v22  ;;  %3549 = vmatpush.msrb.mxu2 %v2960_v36  ;;  %v7064_v54 = vadd.f32 1.0, %v5344_v35  ;;  %v2940_v9 = vld [vmem:[#allocation10 + $0x918] sm:$0xff] }
 0x6a9   : > { %3569 = vmatpush.msrb.mxu3 %v3024_v37  ;;  %3443 = vmatmul.f32.vlgmr.msra.gmra.mxu0 %v7037_v53  ;;  %v7067_v11 = vpop.eup %5345  ;;  %v2948_v53 = vld [vmem:[#allocation10 + $0x958] sm:$0xff] }
 0x6aa   : > { %3530 = vmatpush.msrb.mxu1 %v2892_v42  ;;  %3510 = vmatpush.msrb.mxu0 %v2828_v39  ;;  %v7070_v28 = vpop.eup %5347  ;;  %v2574_v21 = vmul.f32 %v7067_v11, %v7057_v46  ;;  %5349 = vrcp.f32 %v7064_v54  ;;  %v3004_v24 = vld [vmem:[#allocation10 + $0xb18] sm:$0xff]  ;;  %vm2579_vm8 = vweird.f32 %v7067_v11  ;;  %vm2617_vm6 = vweird.f32 %v7064_v54 }
 0x6ab   : > { %3550 = vmatpush.msrb.mxu2 %v2956_v16  ;;  %3570 = vmatpush.msrb.mxu3 %v3020_v10  ;;  %v2593_v27 = vmul.f32 %v7070_v28, %v7059_v52  ;;  %5351 = vtanh.f32 %v2567_v13  ;;  %v2808_v60 = vld [vmem:[#allocation10 + $0x4f8] sm:$0xff]  ;;  %vm2598_vm9 = vweird.f32 %v7070_v28  ;;  %vm7092_vm12 = vmor %vm2578_vm10, %vm2579_vm8  ;;  %vm2647_vm10 = vcmask 1046528  }
 0x6ac   : > { %3463 = vmatmul.f32.vlgmr.msra.gmra.mxu1 %v7041_v12  ;;  %3511 = vmatpush.msrb.mxu0 %v2824_v45  ;;  %v2816_v12 = vld [vmem:[#allocation10 + $0x538] sm:$0xff]  ;;  %v2575_v30 = vsub.f32 1.0, %v2574_v21  ;;  %vm7102_vm13 = vmor %vm2597_vm11, %vm2598_vm9 }
 0x6ad   : > { %3531 = vmatpush.msrb.mxu1 %v2888_v41  ;;  %3551 = vmatpush.msrb.mxu2 %v2952_v38  ;;  %v2594_v58 = vsub.f32 1.0, %v2593_v27  ;;  %v2872_v15 = vld [vmem:[#allocation10 + $0x6f8] sm:$0xff] }
 0x6ae   : > { %3571 = vmatpush.msrb.mxu3 %v3016_v49  ;;  %3512 = vmatpush.msrb.mxu0 %v2820_v47  ;;  %v2576_v26 = vmul.f32 %v7067_v11, %v2575_v30  ;;  %v2936_v61 = vld [vmem:[#allocation10 + $0x8f8] sm:$0xff] }
 0x6af   : > { %3532 = vmatpush.msrb.mxu1 %v2884_v55  ;;  %3552 = vmatpush.msrb.mxu2 %v2948_v53  ;;  %v2595_v50 = vmul.f32 %v7070_v28, %v2594_v58  ;;  %v3000_v31 = vld [vmem:[#allocation10 + $0xaf8] sm:$0xff] }
 0x6b0   : > { %3572 = vmatpush.msrb.mxu3 %v3012_v17  ;;  %3513 = vmatpush.msrb.mxu0 %v2816_v12  ;;  %v7085_v5 = vpop.eup %5349  ;;  %v2577_v4 = vadd.f32 %v7067_v11, %v2576_v26  ;;  %v2804_v62 = vld [vmem:[#allocation10 + $0x4d8] sm:$0xff]  ;;  %v2623_v17 = vand.u32 2147483648, %v7064_v54  ;;  %v2621_v12 = vand.u32 2147483647, %v7064_v54  ;;  %v7130_v26 = vld [vmem:[#allocation11 + $0x1e8] sm:$0xff] }
 0x6b1   : > { %3533 = vmatpush.msrb.mxu1 %v2880_v25  ;;  %3553 = vmatpush.msrb.mxu2 %v2944_v7  ;;  %v2868_v32 = vld [vmem:[#allocation10 + $0x6d8] sm:$0xff]  ;;  %v2596_v34 = vadd.f32 %v7070_v28, %v2595_v50  ;;  %v2613_v8 = vmul.f32 %v7085_v5, %v7064_v54  ;;  %v5352_v18 = vpop.eup %5351  ;;  %vm2618_vm0 = vweird.f32 %v7085_v5  ;;  %v7271_v7 = vld [vmem:[#allocation11 + $0x88] sm:$0xff] }
 0x6b2   : > { %3573 = vmatpush.msrb.mxu3 %v3008_v29  ;;  %3514 = vmatpush.msrb.mxu0 %v2812_v57  ;;  %v2932_v40 = vld [vmem:[#allocation10 + $0x8d8] sm:$0xff]  ;;  %v2581_v2 = vsel %vm7092_vm12, %v7067_v11, %v2577_v4  ;;  %vm7120_vm8 = vmor %vm2617_vm6, %vm2618_vm0  ;;  %v2624_v58 = vor.u32 1.1754944e-38, %v2623_v17  ;;  %vm2622_vm9 = vcmp.eq.f32.partialorder %v2621_v12, 8.507059e+37  ;;  %v7144_v4 = vld [vmem:[#allocation11 + $0x1d0] sm:$0xff]  ;;  %8574 = vst [vmem:[#allocation37_spill] sm:$0xff] %v7271_v7 }
 0x6b3   : > { %3534 = vmatpush.msrb.mxu1 %v2876_v14  ;;  %3554 = vmatpush.msrb.mxu2 %v2940_v9  ;;  %v2996_v43 = vld [vmem:[#allocation10 + $0xad8] sm:$0xff]  ;;  %v2586_v22 = vsel %vm2583_vm14, %v2585_v1, %v2581_v2  ;;  %v2600_v51 = vsel %vm7102_vm13, %v7070_v28, %v2596_v34  ;;  %v2614_v52 = vsub.f32 1.0, %v2613_v8  ;;  %v7154_v1 = vld [vmem:[#allocation11 + $0x1a8] sm:$0xff]  ;;  %v7163_v34 = vld [vmem:[#allocation11 + $0x1b0] sm:$0xff] }
 0x6b4   : > { %3574 = vmatpush.msrb.mxu3 %v3004_v24  ;;  %3515 = vmatpush.msrb.mxu0 %v2808_v60  ;;  %v2800_v20 = vld [vmem:[#allocation10 + $0x4b8] sm:$0xff]  ;;  %v2605_v23 = vsel %vm2602_vm15, %v2604_v48, %v2600_v51  ;;  %v2631_v42 = vmul.f32 %v5352_v18, %v2586_v22  ;;  %v7132_v60 = vld [vmem:[#allocation11 + $0x1f0] sm:$0xff]  ;;  %v7169_v8 = vld [vmem:[#allocation11 + $0x180] sm:$0xff] }
 0x6b5   : > { %3535 = vmatpush.msrb.mxu1 %v2872_v15  ;;  %3555 = vmatpush.msrb.mxu2 %v2936_v61  ;;  %v2864_v46 = vld [vmem:[#allocation10 + $0x6b8] sm:$0xff]  ;;  %v2630_v10 = vmul.f32 %v2628_v56, %v2605_v23  ;;  %v2615_v44 = vmul.f32 %v7085_v5, %v2614_v52  ;;  %v7183_v48 = vld [vmem:[#allocation11 + $0x168] sm:$0xff]  ;;  %v7187_v2 = vld [vmem:[#allocation11 + $0x170] sm:$0xff] }
 0x6b6   : > { %3575 = vmatpush.msrb.mxu3 %v3000_v31  ;;  %3516 = vmatpush.msrb.mxu0 %v2804_v62  ;;  %v2928_v36 = vld [vmem:[#allocation10 + $0x8b8] sm:$0xff]  ;;  %v7138_v31 = vld [vmem:[#allocation11 + $0x1c0] sm:$0xff]  ;;  %v7195_v18 = vld [vmem:[#allocation11 + $0x148] sm:$0xff] }
 0x6b7   : > { %3536 = vmatpush.msrb.mxu1 %v2868_v32  ;;  %v2992_v37 = vld [vmem:[#allocation10 + $0xab8] sm:$0xff]  ;;  %3556 = vmatpush.msrb.mxu2 %v2932_v40  ;;  %v2632_v49 = vadd.f32 %v2631_v42, %v2630_v10  ;;  %v2616_v11 = vadd.f32 %v7085_v5, %v2615_v44  ;;  %v7171_v40 = vld [vmem:[#allocation11 + $0x188] sm:$0xff]  ;;  %v7199_v22 = vld [vmem:[#allocation11 + $0x150] sm:$0xff] }
 0x6b8   : > { %3576 = vmatpush.msrb.mxu3 %v2996_v43  ;;  %v2796_v39 = vld [vmem:[#allocation10 + $0x498] sm:$0xff]  ;;  %3517 = vmatpush.msrb.mxu0 %v2800_v20  ;;  %v7175_v43 = vld [vmem:[#allocation11 + $0x190] sm:$0xff]  ;;  %v7205_v52 = vld [vmem:[#allocation11 + $0x120] sm:$0xff] }
 0x6b9   : > { %v2860_v16 = vld [vmem:[#allocation10 + $0x698] sm:$0xff]  ;;  %3537 = vmatpush.msrb.mxu1 %v2864_v46  ;;  %3557 = vmatpush.msrb.mxu2 %v2928_v36  ;;  %5353 = vtanh.f32 %v2632_v49  ;;  %v2620_v54 = vsel %vm7120_vm8, %v7085_v5, %v2616_v11  ;;  %v7140_v5 = vld [vmem:[#allocation11 + $0x1c8] sm:$0xff]  ;;  %v7193_v46 = vld [vmem:[#allocation11 + $0x140] sm:$0xff]  ;;  %8553 = vst [vmem:[#allocation54_spill] sm:$0xff] %v7205_v52 }
 0x6ba   : > { %v2924_v45 = vld [vmem:[#allocation10 + $0x898] sm:$0xff]  ;;  %3577 = vmatpush.msrb.mxu3 %v2992_v37  ;;  %3518 = vmatpush.msrb.mxu0 %v2796_v39  ;;  %v2625_v6 = vsel %vm2622_vm9, %v2624_v58, %v2620_v54  ;;  %v7209_v36 = vld [vmem:[#allocation11 + $0x128] sm:$0xff]  ;;  %v7211_v37 = vld [vmem:[#allocation11 + $0x130] sm:$0xff] }
 0x6bb   : > { %v2988_v41 = vld [vmem:[#allocation10 + $0xa98] sm:$0xff]  ;;  %3538 = vmatpush.msrb.mxu1 %v2860_v16  ;;  %3558 = vmatpush.msrb.mxu2 %v2924_v45  ;;  %8554 = vst [vmem:[#allocation55_spill] sm:$0xff] %v7209_v36  ;;  %v7219_v39 = vld [vmem:[#allocation11 + $0x100] sm:$0xff]  ;;  %v7223_v16 = vld [vmem:[#allocation11 + $0x108] sm:$0xff] }
 0x6bc   : > { %v2792_v35 = vld [vmem:[#allocation10 + $0x478] sm:$0xff]  ;;  %3578 = vmatpush.msrb.mxu3 %v2988_v41  ;;  %8555 = vst [vmem:[#allocation56_spill] sm:$0xff] %v7211_v37  ;;  %v7225_v10 = vld [vmem:[#allocation11 + $0x110] sm:$0xff]  ;;  %v7245_v11 = vld [vmem:[#allocation11 + $0xc0] sm:$0xff] }
 0x6bd   : > { %v2856_v38 = vld [vmem:[#allocation10 + $0x678] sm:$0xff]  ;;  %3519 = vmatpush.msrb.mxu0 %v2792_v35  ;;  %8557 = vst [vmem:[#allocation20_spill] sm:$0xff] %v7219_v39  ;;  %v7233_v35 = vld [vmem:[#allocation11 + $0xe0] sm:$0xff]  ;;  %v7239_v49 = vld [vmem:[#allocation11 + $0xf0] sm:$0xff] }
 0x6be   : > { %v2920_v47 = vld [vmem:[#allocation10 + $0x878] sm:$0xff]  ;;  %3539 = vmatpush.msrb.mxu1 %v2856_v38  ;;  %8558 = vst [vmem:[#allocation21_spill] sm:$0xff] %v7223_v16  ;;  %v7235_v38 = vld [vmem:[#allocation11 + $0xe8] sm:$0xff]  ;;  %v7263_v12 = vld [vmem:[#allocation11 + $0xb0] sm:$0xff] }
 0x6bf   : > { %v2984_v55 = vld [vmem:[#allocation10 + $0xa78] sm:$0xff]  ;;  %3559 = vmatpush.msrb.mxu2 %v2920_v47  ;;  %v5354_v24 = vpop.eup %5353  ;;  %8559 = vst [vmem:[#allocation22_spill] sm:$0xff] %v7225_v10  ;;  %v7287_v54 = vld [vmem:[#allocation11 + $0x70] sm:$0xff] }
 0x6c0   : > { %v2788_v13 = vld [vmem:[#allocation10 + $0x458] sm:$0xff]  ;;  %3579 = vmatpush.msrb.mxu3 %v2984_v55  ;;  %v2634_v50 = vmul.f32 %v5354_v24, %v2625_v6  ;;  %8561 = vst [vmem:[#allocation24_spill] sm:$0xff] %v7233_v35  ;;  %v7299_v24 = vld [vmem:[#allocation11 + $0x50] sm:$0xff] }
 0x6c1   : > { %v2852_v53 = vld [vmem:[#allocation10 + $0x658] sm:$0xff]  ;;  %3520 = vmatpush.msrb.mxu0 %v2788_v13  ;;  %8562 = vst [vmem:[#allocation25_spill] sm:$0xff] %v7235_v38  ;;  %v7247_v13 = vld [vmem:[#allocation11 + $0xc8] sm:$0xff] }
 0x6c2   : > { %v2916_v28 = vld [vmem:[#allocation10 + $0x858] sm:$0xff]  ;;  %3540 = vmatpush.msrb.mxu1 %v2852_v53  ;;  %v2648_v32 = vsel %vm2647_vm10, %v7018_v3, %v2634_v50  ;;  %8563 = vst [vmem:[#allocation26_spill] sm:$0xff] %v7239_v49  ;;  %v7251_v53 = vld [vmem:[#allocation11 + $0xd0] sm:$0xff]  ;;  %v7305_v50 = vld [vmem:[#allocation11 + $0x20] sm:$0xff] }
 0x6c3   : > { %v2980_v21 = vld [vmem:[#allocation10 + $0xa58] sm:$0xff]  ;;  %3560 = vmatpush.msrb.mxu2 %v2916_v28  ;;  %4896 = vst [vmem:[%s7158_s9] sm:$0xff] %v2648_v32  ;;  %v7257_v28 = vld [vmem:[#allocation11 + $0xa0] sm:$0xff] }
 0x6c4   : > { %v2784_v25 = vld [vmem:[#allocation10 + $0x438] sm:$0xff]  ;;  %3580 = vmatpush.msrb.mxu3 %v2980_v21  ;;  %8565 = vst [vmem:[#allocation28_spill] sm:$0xff] %v7245_v11  ;;  %v7259_v21 = vld [vmem:[#allocation11 + $0xa8] sm:$0xff] }
 0x6c5   : > { %v2848_v27 = vld [vmem:[#allocation10 + $0x638] sm:$0xff]  ;;  %3521 = vmatpush.msrb.mxu0 %v2784_v25  ;;  %8566 = vst [vmem:[#allocation29_spill] sm:$0xff] %v7247_v13 }
 0x6c6   : > { %v2912_v29 = vld [vmem:[#allocation10 + $0x838] sm:$0xff]  ;;  %3541 = vmatpush.msrb.mxu1 %v2848_v27  ;;  %8567 = vst [vmem:[#allocation30_spill] sm:$0xff] %v7251_v53  ;;  %v7269_v27 = vld [vmem:[#allocation11 + $0x80] sm:$0xff] }
 0x6c7   : > { %v2976_v30 = vld [vmem:[#allocation10 + $0xa38] sm:$0xff]  ;;  %3561 = vmatpush.msrb.mxu2 %v2912_v29  ;;  %8569 = vst [vmem:[#allocation32_spill] sm:$0xff] %v7257_v28  ;;  %v7275_v29 = vld [vmem:[#allocation11 + $0x90] sm:$0xff] }
 0x6c8   : > { %v2780_v57 = vld [vmem:[#allocation10 + $0x418] sm:$0xff]  ;;  %3581 = vmatpush.msrb.mxu3 %v2976_v30  ;;  %8570 = vst [vmem:[#allocation33_spill] sm:$0xff] %v7259_v21 }
 0x6c9   : > { %v2844_v14 = vld [vmem:[#allocation10 + $0x618] sm:$0xff]  ;;  %3522 = vmatpush.msrb.mxu0 %v2780_v57  ;;  %8571 = vst [vmem:[#allocation34_spill] sm:$0xff] %v7263_v12  ;;  %v7281_v57 = vld [vmem:[#allocation11 + $0x60] sm:$0xff] }
 0x6ca   : > { %v2908_v59 = vld [vmem:[#allocation10 + $0x818] sm:$0xff]  ;;  %3542 = vmatpush.msrb.mxu1 %v2844_v14  ;;  %8573 = vst [vmem:[#allocation36_spill] sm:$0xff] %v7269_v27  ;;  %v7283_v14 = vld [vmem:[#allocation11 + $0x68] sm:$0xff] }
 0x6cb   : > { %v2972_v9 = vld [vmem:[#allocation10 + $0xa18] sm:$0xff]  ;;  %3562 = vmatpush.msrb.mxu2 %v2908_v59  ;;  %3587 = vmatpush.msra.mxu0 %v7128_v63  ;;  %8575 = vst [vmem:[#allocation38_spill] sm:$0xff] %v7275_v29  ;;  %v7293_v59 = vld [vmem:[#allocation11 + $0x40] sm:$0xff] }
 0x6cc   : > { %3582 = vmatpush.msrb.mxu3 %v2972_v9  ;;  %v7134_v15 = vld [vmem:[#allocation11 + $0x1f8] sm:$0xff]  ;;  %3607 = vmatpush.msra.mxu1 %v7130_v26  ;;  %8577 = vst [vmem:[#allocation40_spill] sm:$0xff] %v7281_v57  ;;  %v7295_v9 = vld [vmem:[#allocation11 + $0x48] sm:$0xff] }
 0x6cd   : > { %v5559_v0 = vld [vmem:[%s6094_s14] sm:$0xff]  ;;  %v5560_v61 = vld [vmem:[%s6094_s14 + $0x8] sm:$0xff]  ;;  %3588 = vmatpush.msra.mxu0 %v7138_v31  ;;  %v5562_v44 = vld [vmem:[%s6094_s14 + $0x10] sm:$0xff]  ;;  %8578 = vst [vmem:[#allocation41_spill] sm:$0xff] %v7283_v14 }
 0x6ce   : > { %3483 = vmatmul.f32.vlgmr.msra.gmra.mxu2 %v5559_v0  ;;  %3503 = vmatmul.f32.vlgmr.msra.gmra.mxu3 %v5560_v61  ;;  %v7146_v62 = vld [vmem:[#allocation11 + $0x1d8] sm:$0xff]  ;;  %8579 = vst [vmem:[#allocation42_spill] sm:$0xff] %v7287_v54  ;;  %v7307_v0 = vld [vmem:[#allocation11 + $0x28] sm:$0xff]  ;;  %v7311_v61 = vld [vmem:[#allocation11 + $0x30] sm:$0xff] }
 0x6cf   : > { %3627 = vmatpush.msra.mxu2 %v7132_v60  ;;  %3647 = vmatpush.msra.mxu3 %v7134_v15  ;;  %v7165_v3 = vld [vmem:[#allocation11 + $0x1b8] sm:$0xff]  ;;  %8581 = vst [vmem:[#allocation44_spill] sm:$0xff] %v7293_v59 }
 0x6d0   : > { %3608 = vmatpush.msra.mxu1 %v7140_v5  ;;  %3589 = vmatpush.msra.mxu0 %v7152_v33  ;;  %v7177_v56 = vld [vmem:[#allocation11 + $0x198] sm:$0xff]  ;;  %8582 = vst [vmem:[#allocation45_spill] sm:$0xff] %v7295_v9 }
 0x6d1   : > { %3628 = vmatpush.msra.mxu2 %v7144_v4  ;;  %3648 = vmatpush.msra.mxu3 %v7146_v62  ;;  %v7189_v20 = vld [vmem:[#allocation11 + $0x178] sm:$0xff]  ;;  %8583 = vst [vmem:[#allocation46_spill] sm:$0xff] %v7299_v24 }
 0x6d2   : > { %3609 = vmatpush.msra.mxu1 %v7154_v1  ;;  %3590 = vmatpush.msra.mxu0 %v7169_v8  ;;  %v7201_v51 = vld [vmem:[#allocation11 + $0x158] sm:$0xff]  ;;  %8585 = vst [vmem:[#allocation48_spill] sm:$0xff] %v7305_v50 }
 0x6d3   : > { %3629 = vmatpush.msra.mxu2 %v7163_v34  ;;  %3649 = vmatpush.msra.mxu3 %v7165_v3  ;;  %v7215_v23 = vld [vmem:[#allocation11 + $0x138] sm:$0xff]  ;;  %8586 = vst [vmem:[#allocation49_spill] sm:$0xff] %v7307_v0 }
 0x6d4   : > { %3610 = vmatpush.msra.mxu1 %v7171_v40  ;;  %3591 = vmatpush.msra.mxu0 %v7181_v19  ;;  %8556 = vst [vmem:[#allocation57_spill] sm:$0xff] %v7215_v23  ;;  %v5561_v42 = vld [vmem:[%s6094_s14 + $0x20] sm:$0xff]  ;;  %v5563_v41 = vld [vmem:[%s6094_s14 + $0x28] sm:$0xff]  ;;  %v5564_v55 = vld [vmem:[%s6094_s14 + $0x18] sm:$0xff] }
 0x6d5   : > { %3630 = vmatpush.msra.mxu2 %v7175_v43  ;;  %3650 = vmatpush.msra.mxu3 %v7177_v56  ;;  %v7229_v45 = vld [vmem:[#allocation11 + $0x118] sm:$0xff]  ;;  %8587 = vst [vmem:[#allocation50_spill] sm:$0xff] %v7311_v61 }
 0x6d6   : > { %3611 = vmatpush.msra.mxu1 %v7183_v48  ;;  %3592 = vmatpush.msra.mxu0 %v7193_v46  ;;  %8560 = vst [vmem:[#allocation23_spill] sm:$0xff] %v7229_v45  ;;  %v7241_v47 = vld [vmem:[#allocation11 + $0xf8] sm:$0xff] }
 0x6d7   : > { %3631 = vmatpush.msra.mxu2 %v7187_v2  ;;  %3651 = vmatpush.msra.mxu3 %v7189_v20  ;;  %8564 = vst [vmem:[#allocation27_spill] sm:$0xff] %v7241_v47  ;;  %v7253_v17 = vld [vmem:[#allocation11 + $0xd8] sm:$0xff] }
 0x6d8   : > { %3612 = vmatpush.msra.mxu1 %v7195_v18  ;;  %3563 = vmatmul.f32.vlgmr.msrb.gmra.mxu2 %v5561_v42  ;;  %8568 = vst [vmem:[#allocation31_spill] sm:$0xff] %v7253_v17  ;;  %v7265_v25 = vld [vmem:[#allocation11 + $0xb8] sm:$0xff]  ;;  %v7317_v42 = vld [vmem:[#allocation11] sm:$0xff] }
 0x6d9   : > { %3632 = vmatpush.msra.mxu2 %v7199_v22  ;;  %3652 = vmatpush.msra.mxu3 %v7201_v51  ;;  %8572 = vst [vmem:[#allocation35_spill] sm:$0xff] %v7265_v25  ;;  %v7277_v30 = vld [vmem:[#allocation11 + $0x98] sm:$0xff] }
 0x6da   : > { %3593 = vmatpush.msra.mxu0 %v7205_v52  ;;  %3613 = vmatpush.msra.mxu1 %v7209_v36  ;;  %8576 = vst [vmem:[#allocation39_spill] sm:$0xff] %v7277_v30  ;;  %v7289_v58 = vld [vmem:[#allocation11 + $0x78] sm:$0xff] }
 0x6db   : > { %3633 = vmatpush.msra.mxu2 %v7211_v37  ;;  %3653 = vmatpush.msra.mxu3 %v7215_v23  ;;  %8580 = vst [vmem:[#allocation43_spill] sm:$0xff] %v7289_v58  ;;  %v7301_v6 = vld [vmem:[#allocation11 + $0x58] sm:$0xff] }
 0x6dc   : > { %3523 = vmatmul.f32.vlgmr.msrb.gmra.mxu0 %v5562_v44  ;;  %3583 = vmatmul.f32.vlgmr.msrb.gmra.mxu3 %v5563_v41  ;;  %8584 = vst [vmem:[#allocation47_spill] sm:$0xff] %v7301_v6  ;;  %v7313_v32 = vld [vmem:[#allocation11 + $0x38] sm:$0xff]  ;;  %v7319_v44 = vld [vmem:[#allocation11 + $0x8] sm:$0xff]  ;;  %v7323_v41 = vld [vmem:[#allocation11 + $0x10] sm:$0xff] }
 0x6dd   : > { %3594 = vmatpush.msra.mxu0 %v7219_v39  ;;  %3614 = vmatpush.msra.mxu1 %v7223_v16  ;;  %8588 = vst [vmem:[#allocation51_spill] sm:$0xff] %v7313_v32 }
 0x6de   : > { %3634 = vmatpush.msra.mxu2 %v7225_v10  ;;  %3654 = vmatpush.msra.mxu3 %v7229_v45  ;;  %8589 = vst [vmem:[#allocation52_spill] sm:$0xff] %v7317_v42 }
 0x6df   : > { %3543 = vmatmul.f32.vlgmr.msrb.gmra.mxu1 %v5564_v55  ;;  %3595 = vmatpush.msra.mxu0 %v7233_v35  ;;  %8590 = vst [vmem:[#allocation53_spill] sm:$0xff] %v7319_v44  ;;  %v7325_v55 = vld [vmem:[#allocation11 + $0x18] sm:$0xff] }
 0x6e0   : > { %3615 = vmatpush.msra.mxu1 %v7235_v38  ;;  %3635 = vmatpush.msra.mxu2 %v7239_v49  ;;  %8591 = vst [vmem:[#allocation58_spill] sm:$0xff] %v7323_v41 }
 0x6e1   : > { %3655 = vmatpush.msra.mxu3 %v7241_v47  ;;  %3596 = vmatpush.msra.mxu0 %v7245_v11  ;;  %8592 = vst [vmem:[#allocation59_spill] sm:$0xff] %v7325_v55 }
 0x6e2   : > { %3616 = vmatpush.msra.mxu1 %v7247_v13  ;;  %3636 = vmatpush.msra.mxu2 %v7251_v53 }
 0x6e3   : > { %3656 = vmatpush.msra.mxu3 %v7253_v17  ;;  %3597 = vmatpush.msra.mxu0 %v7257_v28 }
 0x6e4   : > { %3617 = vmatpush.msra.mxu1 %v7259_v21  ;;  %3637 = vmatpush.msra.mxu2 %v7263_v12 }
 0x6e5   : > { %3657 = vmatpush.msra.mxu3 %v7265_v25  ;;  %3598 = vmatpush.msra.mxu0 %v7269_v27 }
 0x6e6   : > { %3618 = vmatpush.msra.mxu1 %v7271_v7  ;;  %3638 = vmatpush.msra.mxu2 %v7275_v29 }
 0x6e7   : > { %3658 = vmatpush.msra.mxu3 %v7277_v30  ;;  %3599 = vmatpush.msra.mxu0 %v7281_v57 }
 0x6e8   : > { %3619 = vmatpush.msra.mxu1 %v7283_v14  ;;  %3639 = vmatpush.msra.mxu2 %v7287_v54 }
 0x6e9   : > { %3659 = vmatpush.msra.mxu3 %v7289_v58  ;;  %3600 = vmatpush.msra.mxu0 %v7293_v59 }
 0x6ea   : > { %3620 = vmatpush.msra.mxu1 %v7295_v9  ;;  %3640 = vmatpush.msra.mxu2 %v7299_v24 }
 0x6eb   : > { %3660 = vmatpush.msra.mxu3 %v7301_v6  ;;  %3601 = vmatpush.msra.mxu0 %v7305_v50  ;;  %v8593_v6 = vmov 0.0  }
 0x6ec   : > { %3621 = vmatpush.msra.mxu1 %v7307_v0  ;;  %3641 = vmatpush.msra.mxu2 %v7311_v61 }
 0x6ed   : > { %3661 = vmatpush.msra.mxu3 %v7313_v32  ;;  %3602 = vmatpush.msra.mxu0 %v7317_v42 }
 0x6ee   : > { %3622 = vmatpush.msra.mxu1 %v7319_v44  ;;  %3642 = vmatpush.msra.mxu2 %v7323_v41 }
 0x6ef   : > { %3662 = vmatpush.msra.mxu3 %v7325_v55  ;;  %3603 = vmatmul.f32.vlgmr.msra.gmra.mxu0 %v8593_v6 }
 0x6f0   : > { %3623 = vmatmul.f32.vlgmr.msra.gmra.mxu1 %v8593_v6  ;;  %3643 = vmatmul.f32.vlgmr.msra.gmra.mxu2 %v8593_v6 }
 0x6f1   : > { %3663 = vmatmul.f32.vlgmr.msra.gmra.mxu3 %v8593_v6  ;;  %3749 = vmatpush.msrb.mxu0 %v7128_v63  ;;  %v8594_v6 = vld [vmem:[#allocation47_spill] sm:$0xff] }
 0x6f2   : > { %3769 = vmatpush.msrb.mxu1 %v7130_v26  ;;  %3789 = vmatpush.msrb.mxu2 %v7132_v60 }
 0x6f3   : > { %3809 = vmatpush.msrb.mxu3 %v7134_v15  ;;  %3750 = vmatpush.msrb.mxu0 %v7138_v31 }
 0x6f4   : > { %3770 = vmatpush.msrb.mxu1 %v7140_v5  ;;  %3790 = vmatpush.msrb.mxu2 %v7144_v4 }
 0x6f5   : > { %3810 = vmatpush.msrb.mxu3 %v7146_v62  ;;  %3751 = vmatpush.msrb.mxu0 %v7152_v33 }
 0x6f6   : > { %3771 = vmatpush.msrb.mxu1 %v7154_v1  ;;  %3791 = vmatpush.msrb.mxu2 %v7163_v34 }
 0x6f7   : > { %3811 = vmatpush.msrb.mxu3 %v7165_v3  ;;  %3752 = vmatpush.msrb.mxu0 %v7169_v8 }
 0x6f8   : > { %3772 = vmatpush.msrb.mxu1 %v7171_v40  ;;  %3792 = vmatpush.msrb.mxu2 %v7175_v43 }
 0x6f9   : > { %3812 = vmatpush.msrb.mxu3 %v7177_v56  ;;  %3753 = vmatpush.msrb.mxu0 %v7181_v19 }
 0x6fa   : > { %3773 = vmatpush.msrb.mxu1 %v7183_v48  ;;  %3793 = vmatpush.msrb.mxu2 %v7187_v2 }
 0x6fb   : > { %3813 = vmatpush.msrb.mxu3 %v7189_v20  ;;  %3754 = vmatpush.msrb.mxu0 %v7193_v46 }
 0x6fc   : > { %3774 = vmatpush.msrb.mxu1 %v7195_v18  ;;  %3794 = vmatpush.msrb.mxu2 %v7199_v22 }
 0x6fd   : > { %3814 = vmatpush.msrb.mxu3 %v7201_v51  ;;  %3755 = vmatpush.msrb.mxu0 %v7205_v52 }
 0x6fe   : > { %3775 = vmatpush.msrb.mxu1 %v7209_v36  ;;  %3795 = vmatpush.msrb.mxu2 %v7211_v37 }
 0x6ff   : > { %3815 = vmatpush.msrb.mxu3 %v7215_v23  ;;  %3756 = vmatpush.msrb.mxu0 %v7219_v39 }
 0x700   : > { %3776 = vmatpush.msrb.mxu1 %v7223_v16  ;;  %3796 = vmatpush.msrb.mxu2 %v7225_v10 }
 0x701   : > { %3816 = vmatpush.msrb.mxu3 %v7229_v45  ;;  %3757 = vmatpush.msrb.mxu0 %v7233_v35 }
 0x702   : > { %3777 = vmatpush.msrb.mxu1 %v7235_v38  ;;  %3797 = vmatpush.msrb.mxu2 %v7239_v49 }
 0x703   : > { %3817 = vmatpush.msrb.mxu3 %v7241_v47  ;;  %3758 = vmatpush.msrb.mxu0 %v7245_v11 }
 0x704   : > { %3778 = vmatpush.msrb.mxu1 %v7247_v13  ;;  %3798 = vmatpush.msrb.mxu2 %v7251_v53 }
 0x705   : > { %3818 = vmatpush.msrb.mxu3 %v7253_v17  ;;  %3759 = vmatpush.msrb.mxu0 %v7257_v28 }
 0x706   : > { %3779 = vmatpush.msrb.mxu1 %v7259_v21  ;;  %3799 = vmatpush.msrb.mxu2 %v7263_v12 }
 0x707   : > { %3819 = vmatpush.msrb.mxu3 %v7265_v25  ;;  %3760 = vmatpush.msrb.mxu0 %v7269_v27 }
 0x708   : > { %3780 = vmatpush.msrb.mxu1 %v7271_v7  ;;  %3800 = vmatpush.msrb.mxu2 %v7275_v29 }
 0x709   : > { %3820 = vmatpush.msrb.mxu3 %v7277_v30  ;;  %3761 = vmatpush.msrb.mxu0 %v7281_v57 }
 0x70a   : > { %3781 = vmatpush.msrb.mxu1 %v7283_v14  ;;  %3801 = vmatpush.msrb.mxu2 %v7287_v54 }
 0x70b   : > { %3821 = vmatpush.msrb.mxu3 %v7289_v58  ;;  %3762 = vmatpush.msrb.mxu0 %v7293_v59 }
 0x70c   : > { %3782 = vmatpush.msrb.mxu1 %v7295_v9  ;;  %3802 = vmatpush.msrb.mxu2 %v7299_v24 }
 0x70d   : > { %3822 = vmatpush.msrb.mxu3 %v8594_v6  ;;  %3763 = vmatpush.msrb.mxu0 %v7305_v50 }
 0x70e   : > { %3783 = vmatpush.msrb.mxu1 %v7307_v0  ;;  %3803 = vmatpush.msrb.mxu2 %v7311_v61 }
 0x70f   : > { %3823 = vmatpush.msrb.mxu3 %v7313_v32  ;;  %3764 = vmatpush.msrb.mxu0 %v7317_v42 }
 0x710   : > { %3784 = vmatpush.msrb.mxu1 %v7319_v44  ;;  %3804 = vmatpush.msrb.mxu2 %v7323_v41 }
 0x711   : > { %3824 = vmatpush.msrb.mxu3 %v7325_v55  ;;  %3914 = vmatpush.msra.mxu0 %v7128_v63 }
 0x712   : > { %3934 = vmatpush.msra.mxu1 %v7130_v26  ;;  %3954 = vmatpush.msra.mxu2 %v7132_v60 }
 0x713   : > { %3974 = vmatpush.msra.mxu3 %v7134_v15  ;;  %3915 = vmatpush.msra.mxu0 %v7138_v31 }
 0x714   : > { %3935 = vmatpush.msra.mxu1 %v7140_v5  ;;  %3955 = vmatpush.msra.mxu2 %v7144_v4 }
 0x715   : > { %3975 = vmatpush.msra.mxu3 %v7146_v62  ;;  %3916 = vmatpush.msra.mxu0 %v7152_v33 }
 0x716   : > { %3936 = vmatpush.msra.mxu1 %v7154_v1  ;;  %3956 = vmatpush.msra.mxu2 %v7163_v34 }
 0x717   : > { %3976 = vmatpush.msra.mxu3 %v7165_v3  ;;  %3917 = vmatpush.msra.mxu0 %v7169_v8 }
 0x718   : > { %3937 = vmatpush.msra.mxu1 %v7171_v40  ;;  %3957 = vmatpush.msra.mxu2 %v7175_v43 }
 0x719   : > { %3977 = vmatpush.msra.mxu3 %v7177_v56  ;;  %3918 = vmatpush.msra.mxu0 %v7181_v19 }
 0x71a   : > { %3938 = vmatpush.msra.mxu1 %v7183_v48  ;;  %3958 = vmatpush.msra.mxu2 %v7187_v2 }
 0x71b   : > { %3978 = vmatpush.msra.mxu3 %v7189_v20  ;;  %3919 = vmatpush.msra.mxu0 %v7193_v46 }
 0x71c   : > { %3939 = vmatpush.msra.mxu1 %v7195_v18  ;;  %3959 = vmatpush.msra.mxu2 %v7199_v22 }
 0x71d   : > { %3979 = vmatpush.msra.mxu3 %v7201_v51  ;;  %3920 = vmatpush.msra.mxu0 %v7205_v52 }
 0x71e   : > { %3940 = vmatpush.msra.mxu1 %v7209_v36  ;;  %3960 = vmatpush.msra.mxu2 %v7211_v37 }
 0x71f   : > { %3980 = vmatpush.msra.mxu3 %v7215_v23  ;;  %3921 = vmatpush.msra.mxu0 %v7219_v39 }
 0x720   : > { %3941 = vmatpush.msra.mxu1 %v7223_v16  ;;  %3961 = vmatpush.msra.mxu2 %v7225_v10 }
 0x721   : > { %3981 = vmatpush.msra.mxu3 %v7229_v45  ;;  %3922 = vmatpush.msra.mxu0 %v7233_v35 }
 0x722   : > { %3942 = vmatpush.msra.mxu1 %v7235_v38  ;;  %3962 = vmatpush.msra.mxu2 %v7239_v49 }
 0x723   : > { %3982 = vmatpush.msra.mxu3 %v7241_v47  ;;  %3923 = vmatpush.msra.mxu0 %v7245_v11 }
 0x724   : > { %3943 = vmatpush.msra.mxu1 %v7247_v13  ;;  %3963 = vmatpush.msra.mxu2 %v7251_v53 }
 0x725   : > { %3983 = vmatpush.msra.mxu3 %v7253_v17  ;;  %3924 = vmatpush.msra.mxu0 %v7257_v28 }
 0x726   : > { %3944 = vmatpush.msra.mxu1 %v7259_v21  ;;  %3964 = vmatpush.msra.mxu2 %v7263_v12 }
 0x727   : > { %3984 = vmatpush.msra.mxu3 %v7265_v25  ;;  %3925 = vmatpush.msra.mxu0 %v7269_v27 }
 0x728   : > { %3945 = vmatpush.msra.mxu1 %v7271_v7  ;;  %3965 = vmatpush.msra.mxu2 %v7275_v29 }
 0x729   : > { %3985 = vmatpush.msra.mxu3 %v7277_v30  ;;  %3926 = vmatpush.msra.mxu0 %v7281_v57  ;;  %v3097_v30 = vld [vmem:[#allocation13] sm:$0xf] }
 0x72a   : > { %3946 = vmatpush.msra.mxu1 %v7283_v14  ;;  %3966 = vmatpush.msra.mxu2 %v7287_v54  ;;  %v3100_v7 = vperm.slane %v3097_v30, 1  ;;  %v3102_v28 = vperm.slane %v3097_v30, 3  ;;  %v3101_v23 = vperm.slane %v3097_v30, 2 }
 0x72b   : > { %3986 = vmatpush.msra.mxu3 %v7289_v58  ;;  %3927 = vmatpush.msra.mxu0 %v7293_v59  ;;  %v3164_v59 = vpop.f32.mrf.mxu2 }
 0x72c   : > { %3947 = vmatpush.msra.mxu1 %v7295_v9  ;;  %3967 = vmatpush.msra.mxu2 %v7299_v24  ;;  %v3124_v9 = vpop.f32.mrf.mxu0  ;;  %v3144_v24 = vpop.f32.mrf.mxu1 }
 0x72d   : > { %3987 = vmatpush.msra.mxu3 %v8594_v6  ;;  %3928 = vmatpush.msra.mxu0 %v7305_v50  ;;  %v3184_v6 = vpop.f32.mrf.mxu3 }
 0x72e   : > { %3948 = vmatpush.msra.mxu1 %v7307_v0  ;;  %3968 = vmatpush.msra.mxu2 %v7311_v61 }
 0x72f   : > { %3988 = vmatpush.msra.mxu3 %v7313_v32  ;;  %3929 = vmatpush.msra.mxu0 %v7317_v42 }
 0x730   : > { %3949 = vmatpush.msra.mxu1 %v7319_v44  ;;  %3969 = vmatpush.msra.mxu2 %v7323_v41  ;;  %v3099_v44 = vperm.slane %v3097_v30, 0 }
 0x731   : > { %3989 = vmatpush.msra.mxu3 %v7325_v55 }
 0x732   : > { %v3125_v27 = vadd.f32 %v3124_v9, %v3099_v44 }
 0x733   : > { %v3244_v54 = vpop.f32.mrf.mxu2 }
 0x734   : > { %v3204_v58 = vpop.f32.mrf.mxu0  ;;  %v3224_v50 = vpop.f32.mrf.mxu1  ;;  %v3245_v55 = vadd.f32 %v3244_v54, %v3100_v7  ;;  %v3145_v17 = vadd.f32 %v3144_v24, %v3125_v27 }
 0x735   : > { %v3264_v0 = vpop.f32.mrf.mxu3 }
 0x736   : > { %v3265_v53 = vadd.f32 %v3264_v0, %v3245_v55  ;;  %v3165_v47 = vadd.f32 %v3164_v59, %v3145_v17 }
 0x738   : > { %v3185_v16 = vadd.f32 %v3184_v6, %v3165_v47 }
 0x73a   : > { %v3205_v9 = vadd.f32 %v3204_v58, %v3185_v16 }
 0x73b   : > { %v3324_v57 = vpop.f32.mrf.mxu2 }
 0x73c   : > { %v3284_v14 = vpop.f32.mrf.mxu0  ;;  %v3304_v61 = vpop.f32.mrf.mxu1  ;;  %v7465_v24 = vadd.f32 %v3224_v50, %v3205_v9 }
 0x73d   : > { %v3344_v32 = vpop.f32.mrf.mxu3  ;;  %v3285_v49 = vadd.f32 %v3284_v14, %v3265_v53 }
 0x73e   : > { %8595 = vst [vmem:[#allocation60_spill] sm:$0xff] %v7465_v24 }
 0x73f   : > { %v3305_v39 = vadd.f32 %v3304_v61, %v3285_v49 }
 0x741   : > { %v3325_v7 = vadd.f32 %v3324_v57, %v3305_v39 }
 0x743   : > { %v3404_v41 = vpop.f32.mrf.mxu2 }
 0x744   : > { %v3364_v42 = vpop.f32.mrf.mxu0  ;;  %v3384_v29 = vpop.f32.mrf.mxu1 }
 0x745   : > { %v3424_v25 = vpop.f32.mrf.mxu3  ;;  %v3365_v44 = vadd.f32 %v3364_v42, %v3101_v23 }
 0x747   : > { %v3385_v47 = vadd.f32 %v3384_v29, %v3365_v44 }
 0x74c   : > { %v3444_v12 = vpop.f32.mrf.mxu0  ;;  %v3464_v21 = vpop.f32.mrf.mxu1 }
 0x751   : > { %v3484_v13 = vpop.f32.mrf.mxu2  ;;  %v3504_v38 = vpop.f32.mrf.mxu3 }
 0x752   : > { %v3485_v11 = vadd.f32 %v3484_v13, %v3102_v28  ;;  %v7467_v13 = vadd.f32 %v3344_v32, %v3325_v7 }
 0x754   : > { %v3505_v35 = vadd.f32 %v3504_v38, %v3485_v11  ;;  %8596 = vst [vmem:[#allocation61_spill] sm:$0xff] %v7467_v13 }
 0x759   : > { %v3524_v45 = vpop.f32.mrf.mxu0 }
 0x75a   : > { %v3525_v37 = vadd.f32 %v3524_v45, %v3505_v35 }
 0x75b   : > { %v3564_v53 = vpop.f32.mrf.mxu2 }
 0x75c   : > { %v3544_v10 = vpop.f32.mrf.mxu1 }
 0x75d   : > { %v3545_v36 = vadd.f32 %v3544_v10, %v3525_v37  ;;  %v3405_v37 = vadd.f32 %v3404_v41, %v3385_v47 }
 0x75f   : > { %v3584_v54 = vpop.f32.mrf.mxu3  ;;  %v3565_v45 = vadd.f32 %v3564_v53, %v3545_v36  ;;  %v3425_v30 = vadd.f32 %v3424_v25, %v3405_v37 }
 0x761   : > { %v7471_v10 = vadd.f32 %v3584_v54, %v3565_v45  ;;  %v3445_v36 = vadd.f32 %v3444_v12, %v3425_v30 }
 0x763   : > { %8597 = vst [vmem:[#allocation62_spill] sm:$0xff] %v7471_v10  ;;  %v7474_v61 = vadd.f32 %v3464_v21, %v3445_v36 }
 0x765   : > { %8598 = vst [vmem:[#allocation63_spill] sm:$0xff] %v7474_v61 }
 0x76c   : > { %v3604_v52 = vpop.f32.mrf.mxu0 }
 0x76d   : > { %v3624_v27 = vpop.f32.mrf.mxu1  ;;  %v3671_v17 = vrot.slane %v3604_v52, 1 }
 0x76e   : > { %v3672_v38 = vrot.slane %v3624_v27, 1 }
 0x76f   : > { %v3679_v11 = vadd.f32 %v3671_v17, %v7465_v24 }
 0x770   : > { %v3680_v49 = vadd.f32 %v3672_v38, %v7467_v13 }
 0x771   : > { %v5084_v16 = vmul.f32 -1.442695, %v3679_v11 }
 0x772   : > { %v5085_v39 = vmul.f32 -1.442695, %v3680_v49 }
 0x773   : > { %5355 = vpow2.f32 %v5084_v16  ;;  %v3644_v29 = vpop.f32.mrf.mxu2 }
 0x774   : > { %v3664_v23 = vpop.f32.mrf.mxu3  ;;  %5357 = vpow2.f32 %v5085_v39  ;;  %v3673_v50 = vrot.slane %v3644_v29, 1 }
 0x775   : > { %v3674_v35 = vrot.slane %v3664_v23, 1 }
 0x776   : > { %v3681_v41 = vadd.f32 %v3673_v50, %v7474_v61 }
 0x777   : > { %v3682_v28 = vadd.f32 %v3674_v35, %v7471_v10 }
 0x779   : > { %v5086_v52 = vmul.f32 -1.442695, %v3682_v28  ;;  %v5356_v57 = vpop.eup %5355 }
 0x77a   : > { %v5358_v14 = vpop.eup %5357  ;;  %v3686_v58 = vadd.f32 1.0, %v5356_v57 }
 0x77b   : > { %5359 = vpow2.f32 %v5086_v52  ;;  %v3705_v59 = vadd.f32 1.0, %v5358_v14 }
 0x77c   : > { %5361 = vrcp.f32 %v3686_v58  ;;  %v3698_v54 = vand.u32 2147483648, %v3686_v58  ;;  %v3696_v27 = vand.u32 2147483647, %v3686_v58  ;;  %vm3692_vm13 = vweird.f32 %v3686_v58 }
 0x77d   : > { %5363 = vrcp.f32 %v3705_v59  ;;  %v3717_v44 = vand.u32 2147483648, %v3705_v59  ;;  %v3715_v21 = vand.u32 2147483647, %v3705_v59  ;;  %vm3711_vm14 = vweird.f32 %v3705_v59 }
 0x77e   : > { %v3699_v11 = vor.u32 1.1754944e-38, %v3698_v54  ;;  %vm3697_vm0 = vcmp.eq.f32.partialorder %v3696_v27, 8.507059e+37  ;;  %v8629_v54 = vld [vmem:[#allocation45_spill] sm:$0xff]  ;;  %v8632_v27 = vld [vmem:[#allocation48_spill] sm:$0xff] }
 0x77f   : > { %v3718_v45 = vor.u32 1.1754944e-38, %v3717_v44  ;;  %vm3716_vm8 = vcmp.eq.f32.partialorder %v3715_v21, 8.507059e+37  ;;  %v8630_v44 = vld [vmem:[#allocation46_spill] sm:$0xff] }
 0x780   : > { %v8634_v21 = vld [vmem:[#allocation50_spill] sm:$0xff] }
 0x781   : > { %v5360_v0 = vpop.eup %5359 }
 0x782   : > { %v3725_v32 = vadd.f32 1.0, %v5360_v0  ;;  %v5362_v42 = vpop.eup %5361 }
 0x783   : > { %v5364_v55 = vpop.eup %5363  ;;  %v3688_v25 = vmul.f32 %v5362_v42, %v3686_v58  ;;  %vm3693_vm11 = vweird.f32 %v5362_v42 }
 0x784   : > { %5365 = vrcp.f32 %v3725_v32  ;;  %v3707_v6 = vmul.f32 %v5364_v55, %v3705_v59  ;;  %vm3712_vm12 = vweird.f32 %v5364_v55  ;;  %vm3694_vm15 = vmor %vm3692_vm13, %vm3693_vm11  ;;  %v3737_v59 = vand.u32 2147483648, %v3725_v32 }
 0x785   : > { %v3689_v9 = vsub.f32 1.0, %v3688_v25  ;;  %5367 = vtanh.f32 %v3681_v41  ;;  %vm3713_vm6 = vmor %vm3711_vm14, %vm3712_vm12  ;;  %vm3731_vm11 = vweird.f32 %v3725_v32  ;;  %v3735_v29 = vand.u32 2147483647, %v3725_v32  ;;  %v8625_v25 = vld [vmem:[#allocation41_spill] sm:$0xff] }
 0x786   : > { %v3708_v7 = vsub.f32 1.0, %v3707_v6  ;;  %v3738_v50 = vor.u32 1.1754944e-38, %v3737_v59  ;;  %v8626_v6 = vld [vmem:[#allocation42_spill] sm:$0xff] }
 0x787   : > { %v3690_v12 = vmul.f32 %v5362_v42, %v3689_v9  ;;  %vm3736_vm12 = vcmp.eq.f32.partialorder %v3735_v29, 8.507059e+37  ;;  %v8627_v9 = vld [vmem:[#allocation43_spill] sm:$0xff] }
 0x788   : > { %v3709_v53 = vmul.f32 %v5364_v55, %v3708_v7  ;;  %v8628_v7 = vld [vmem:[#allocation44_spill] sm:$0xff] }
 0x789   : > { %v3691_v38 = vadd.f32 %v5362_v42, %v3690_v12  ;;  %v8631_v12 = vld [vmem:[#allocation47_spill] sm:$0xff] }
 0x78a   : > { %v5366_v17 = vpop.eup %5365  ;;  %v3710_v49 = vadd.f32 %v5364_v55, %v3709_v53  ;;  %v8633_v53 = vld [vmem:[#allocation49_spill] sm:$0xff] }
 0x78b   : > { %v3727_v47 = vmul.f32 %v5366_v17, %v3725_v32  ;;  %v3695_v16 = vsel %vm3694_vm15, %v5362_v42, %v3691_v38  ;;  %v5368_v39 = vpop.eup %5367  ;;  %vm3732_vm9 = vweird.f32 %v5366_v17  ;;  %v8624_v32 = vld [vmem:[#allocation40_spill] sm:$0xff] }
 0x78c   : > { %v3700_v23 = vsel %vm3697_vm0, %v3699_v11, %v3695_v16  ;;  %v3714_v37 = vsel %vm3713_vm6, %v5364_v55, %v3710_v49  ;;  %vm3733_vm13 = vmor %vm3731_vm11, %vm3732_vm9  ;;  %v8636_v38 = vld [vmem:[#allocation52_spill] sm:$0xff]  ;;  %v8637_v11 = vld [vmem:[#allocation53_spill] sm:$0xff] }
 0x78d   : > { %v3728_v35 = vsub.f32 1.0, %v3727_v47  ;;  %v3719_v28 = vsel %vm3716_vm8, %v3718_v45, %v3714_v37  ;;  %v3742_v30 = vmul.f32 %v5368_v39, %v3700_v23  ;;  %v8638_v49 = vld [vmem:[#allocation58_spill] sm:$0xff]  ;;  %v8639_v47 = vld [vmem:[#allocation59_spill] sm:$0xff] }
 0x78e   : > { %v3741_v52 = vmul.f32 0.0, %v3719_v28 }
 0x78f   : > { %v3729_v57 = vmul.f32 %v5366_v17, %v3728_v35 }
 0x790   : > { %v7477_v14 = vadd.f32 %v3742_v30, %v3741_v52 }
 0x791   : > { %v3730_v58 = vadd.f32 %v5366_v17, %v3729_v57 }
 0x792   : > { %5369 = vtanh.f32 %v7477_v14 }
 0x793   : > { %v3734_v36 = vsel %vm3733_vm13, %v5366_v17, %v3730_v58  ;;  %v8635_v17 = vld [vmem:[#allocation51_spill] sm:$0xff] }
 0x794   : > { %v3739_v42 = vsel %vm3736_vm12, %v3738_v50, %v3734_v36 }
 0x798   : > { %v5370_v0 = vpop.eup %5369 }
 0x799   : > { %v7480_v41 = vmul.f32 %v5370_v0, %v3739_v42 }
 0x79b   : > { %8599 = vst [vmem:[#allocation64_spill] sm:$0xff] %v7480_v41  ;;  %v3747_v55 = vrot.slane %v7480_v41, 7  ;;  %v7645_v41 = vld [vmem:[#allocation11 + $0x108] sm:$0xff] }
 0x79d   : > { %3765 = vmatmul.f32.vlgmr.msrb.gmra.mxu0 %v3747_v55  ;;  %3785 = vmatmul.f32.vlgmr.msrb.gmra.mxu1 %v3747_v55 }
 0x79e   : > { %3805 = vmatmul.f32.vlgmr.msrb.gmra.mxu2 %v3747_v55  ;;  %3825 = vmatmul.f32.vlgmr.msrb.gmra.mxu3 %v3747_v55 }
 0x79f   : > { %4079 = vmatpush.msrb.mxu0 %v7128_v63  ;;  %4099 = vmatpush.msrb.mxu1 %v7130_v26  ;;  %v8600_v63 = vld [vmem:[#allocation54_spill] sm:$0xff]  ;;  %v8601_v26 = vld [vmem:[#allocation55_spill] sm:$0xff] }
 0x7a0   : > { %4119 = vmatpush.msrb.mxu2 %v7132_v60  ;;  %4139 = vmatpush.msrb.mxu3 %v7134_v15  ;;  %v8602_v60 = vld [vmem:[#allocation56_spill] sm:$0xff]  ;;  %v8603_v15 = vld [vmem:[#allocation57_spill] sm:$0xff] }
 0x7a1   : > { %4080 = vmatpush.msrb.mxu0 %v7138_v31  ;;  %4100 = vmatpush.msrb.mxu1 %v7140_v5  ;;  %v8604_v31 = vld [vmem:[#allocation20_spill] sm:$0xff]  ;;  %v8605_v5 = vld [vmem:[#allocation21_spill] sm:$0xff] }
 0x7a2   : > { %4120 = vmatpush.msrb.mxu2 %v7144_v4  ;;  %4140 = vmatpush.msrb.mxu3 %v7146_v62  ;;  %v8606_v4 = vld [vmem:[#allocation22_spill] sm:$0xff]  ;;  %v8607_v62 = vld [vmem:[#allocation23_spill] sm:$0xff]  ;;  %8645 = vst [vmem:[#allocation21_spill] sm:$0xff] %v7645_v41 }
 0x7a3   : > { %4081 = vmatpush.msrb.mxu0 %v7152_v33  ;;  %4101 = vmatpush.msrb.mxu1 %v7154_v1  ;;  %v8608_v33 = vld [vmem:[#allocation24_spill] sm:$0xff]  ;;  %v8609_v1 = vld [vmem:[#allocation25_spill] sm:$0xff] }
 0x7a4   : > { %4121 = vmatpush.msrb.mxu2 %v7163_v34  ;;  %4141 = vmatpush.msrb.mxu3 %v7165_v3  ;;  %v8610_v34 = vld [vmem:[#allocation26_spill] sm:$0xff]  ;;  %v8611_v3 = vld [vmem:[#allocation27_spill] sm:$0xff] }
 0x7a5   : > { %4082 = vmatpush.msrb.mxu0 %v7169_v8  ;;  %4102 = vmatpush.msrb.mxu1 %v7171_v40  ;;  %v8612_v8 = vld [vmem:[#allocation28_spill] sm:$0xff]  ;;  %v8613_v40 = vld [vmem:[#allocation29_spill] sm:$0xff] }
 0x7a6   : > { %4122 = vmatpush.msrb.mxu2 %v7175_v43  ;;  %4142 = vmatpush.msrb.mxu3 %v7177_v56  ;;  %v8614_v43 = vld [vmem:[#allocation30_spill] sm:$0xff]  ;;  %v8615_v56 = vld [vmem:[#allocation31_spill] sm:$0xff] }
 0x7a7   : > { %4083 = vmatpush.msrb.mxu0 %v7181_v19  ;;  %4103 = vmatpush.msrb.mxu1 %v7183_v48  ;;  %v8616_v19 = vld [vmem:[#allocation32_spill] sm:$0xff]  ;;  %v8617_v48 = vld [vmem:[#allocation33_spill] sm:$0xff] }
 0x7a8   : > { %4123 = vmatpush.msrb.mxu2 %v7187_v2  ;;  %4143 = vmatpush.msrb.mxu3 %v7189_v20  ;;  %v8618_v2 = vld [vmem:[#allocation34_spill] sm:$0xff]  ;;  %v8619_v20 = vld [vmem:[#allocation35_spill] sm:$0xff] }
 0x7a9   : > { %4084 = vmatpush.msrb.mxu0 %v7193_v46  ;;  %4104 = vmatpush.msrb.mxu1 %v7195_v18  ;;  %v8620_v46 = vld [vmem:[#allocation36_spill] sm:$0xff]  ;;  %v8621_v18 = vld [vmem:[#allocation37_spill] sm:$0xff] }
 0x7aa   : > { %4124 = vmatpush.msrb.mxu2 %v7199_v22  ;;  %4144 = vmatpush.msrb.mxu3 %v7201_v51  ;;  %v8622_v22 = vld [vmem:[#allocation38_spill] sm:$0xff]  ;;  %v8623_v51 = vld [vmem:[#allocation39_spill] sm:$0xff] }
 0x7ab   : > { %4085 = vmatpush.msrb.mxu0 %v8600_v63  ;;  %4105 = vmatpush.msrb.mxu1 %v8601_v26 }
 0x7ac   : > { %4125 = vmatpush.msrb.mxu2 %v8602_v60  ;;  %4145 = vmatpush.msrb.mxu3 %v8603_v15 }
 0x7ad   : > { %4086 = vmatpush.msrb.mxu0 %v8604_v31  ;;  %4106 = vmatpush.msrb.mxu1 %v8605_v5 }
 0x7ae   : > { %4126 = vmatpush.msrb.mxu2 %v8606_v4  ;;  %4146 = vmatpush.msrb.mxu3 %v8607_v62 }
 0x7af   : > { %4087 = vmatpush.msrb.mxu0 %v8608_v33  ;;  %4107 = vmatpush.msrb.mxu1 %v8609_v1 }
 0x7b0   : > { %4127 = vmatpush.msrb.mxu2 %v8610_v34  ;;  %4147 = vmatpush.msrb.mxu3 %v8611_v3 }
 0x7b1   : > { %4088 = vmatpush.msrb.mxu0 %v8612_v8  ;;  %4108 = vmatpush.msrb.mxu1 %v8613_v40 }
 0x7b2   : > { %4128 = vmatpush.msrb.mxu2 %v8614_v43  ;;  %4148 = vmatpush.msrb.mxu3 %v8615_v56 }
 0x7b3   : > { %4089 = vmatpush.msrb.mxu0 %v8616_v19  ;;  %4109 = vmatpush.msrb.mxu1 %v8617_v48 }
 0x7b4   : > { %4129 = vmatpush.msrb.mxu2 %v8618_v2  ;;  %4149 = vmatpush.msrb.mxu3 %v8619_v20 }
 0x7b5   : > { %4090 = vmatpush.msrb.mxu0 %v8620_v46  ;;  %4110 = vmatpush.msrb.mxu1 %v8621_v18 }
 0x7b6   : > { %4130 = vmatpush.msrb.mxu2 %v8622_v22  ;;  %4150 = vmatpush.msrb.mxu3 %v8623_v51 }
 0x7b7   : > { %4091 = vmatpush.msrb.mxu0 %v8624_v32  ;;  %4111 = vmatpush.msrb.mxu1 %v8625_v25 }
 0x7b8   : > { %4131 = vmatpush.msrb.mxu2 %v8626_v6  ;;  %4151 = vmatpush.msrb.mxu3 %v8627_v9 }
 0x7b9   : > { %4092 = vmatpush.msrb.mxu0 %v8628_v7  ;;  %4112 = vmatpush.msrb.mxu1 %v8629_v54 }
 0x7ba   : > { %4132 = vmatpush.msrb.mxu2 %v8630_v44  ;;  %4152 = vmatpush.msrb.mxu3 %v8631_v12 }
 0x7bb   : > { %4093 = vmatpush.msrb.mxu0 %v8632_v27  ;;  %4113 = vmatpush.msrb.mxu1 %v8633_v53 }
 0x7bc   : > { %4133 = vmatpush.msrb.mxu2 %v8634_v21  ;;  %4153 = vmatpush.msrb.mxu3 %v8635_v17 }
 0x7bd   : > { %4094 = vmatpush.msrb.mxu0 %v8636_v38  ;;  %4114 = vmatpush.msrb.mxu1 %v8637_v11 }
 0x7be   : > { %4134 = vmatpush.msrb.mxu2 %v8638_v49  ;;  %4154 = vmatpush.msrb.mxu3 %v8639_v47 }
 0x81a   : > { %v3766_v45 = vpop.f32.mrf.mxu0  ;;  %v3786_v16 = vpop.f32.mrf.mxu1 }
 0x81b   : > { %v3833_v39 = vrot.slane %v3766_v45, 2  ;;  %v3834_v23 = vrot.slane %v3786_v16, 2 }
 0x81d   : > { %v3841_v37 = vadd.f32 %v3833_v39, %v7465_v24  ;;  %v3842_v35 = vadd.f32 %v3834_v23, %v7467_v13 }
 0x81f   : > { %v5087_v28 = vmul.f32 -1.442695, %v3841_v37  ;;  %v5088_v30 = vmul.f32 -1.442695, %v3842_v35 }
 0x821   : > { %5371 = vpow2.f32 %v5087_v28  ;;  %v3826_v52 = vpop.f32.mrf.mxu3  ;;  %v3806_v42 = vpop.f32.mrf.mxu2 }
 0x822   : > { %5373 = vpow2.f32 %v5088_v30  ;;  %v3836_v57 = vrot.slane %v3826_v52, 2  ;;  %v3835_v55 = vrot.slane %v3806_v42, 2  ;;  %v3904_v52 = vrot.slane %v7477_v14, 1 }
 0x824   : > { %v3844_v58 = vadd.f32 %v3836_v57, %v7471_v10  ;;  %v3843_v15 = vadd.f32 %v3835_v55, %v7474_v61 }
 0x826   : > { %v5089_v59 = vmul.f32 -1.442695, %v3844_v58 }
 0x827   : > { %v5372_v29 = vpop.eup %5371 }
 0x828   : > { %v5374_v36 = vpop.eup %5373  ;;  %v3848_v50 = vadd.f32 1.0, %v5372_v29  ;;  %5375 = vpow2.f32 %v5089_v59 }
 0x829   : > { %v3867_v0 = vadd.f32 1.0, %v5374_v36 }
 0x82a   : > { %5377 = vrcp.f32 %v3848_v50  ;;  %v3860_v1 = vand.u32 2147483648, %v3848_v50  ;;  %v3858_v45 = vand.u32 2147483647, %v3848_v50  ;;  %vm3854_vm0 = vweird.f32 %v3848_v50 }
 0x82b   : > { %5379 = vrcp.f32 %v3867_v0  ;;  %v3879_v34 = vand.u32 2147483648, %v3867_v0  ;;  %v3877_v39 = vand.u32 2147483647, %v3867_v0  ;;  %vm3873_vm6 = vweird.f32 %v3867_v0 }
 0x82c   : > { %v3861_v35 = vor.u32 1.1754944e-38, %v3860_v1  ;;  %vm3859_vm11 = vcmp.eq.f32.partialorder %v3858_v45, 8.507059e+37  ;;  %v7561_v45 = vld [vmem:[#allocation11 + $0x1e8] sm:$0xff] }
 0x82d   : > { %v3880_v57 = vor.u32 1.1754944e-38, %v3879_v34  ;;  %vm3878_vm13 = vcmp.eq.f32.partialorder %v3877_v39, 8.507059e+37  ;;  %v7570_v39 = vld [vmem:[#allocation11 + $0x1c0] sm:$0xff] }
 0x82e   : > { %v5376_v63 = vpop.eup %5375 }
 0x82f   : > { %v3887_v26 = vadd.f32 1.0, %v5376_v63 }
 0x830   : > { %v5378_v60 = vpop.eup %5377 }
 0x831   : > { %v5380_v31 = vpop.eup %5379  ;;  %v3850_v5 = vmul.f32 %v5378_v60, %v3848_v50  ;;  %5381 = vrcp.f32 %v3887_v26  ;;  %vm3855_vm14 = vweird.f32 %v5378_v60  ;;  %v3899_v14 = vand.u32 2147483648, %v3887_v26 }
 0x832   : > { %v3869_v4 = vmul.f32 %v5380_v31, %v3867_v0  ;;  %5383 = vtanh.f32 %v3843_v15  ;;  %vm3874_vm15 = vweird.f32 %v5380_v31  ;;  %vm3856_vm8 = vmor %vm3854_vm0, %vm3855_vm14  ;;  %vm3893_vm14 = vweird.f32 %v3887_v26 }
 0x833   : > { %v3851_v62 = vsub.f32 1.0, %v3850_v5  ;;  %vm3875_vm9 = vmor %vm3873_vm6, %vm3874_vm15 }
 0x834   : > { %v3870_v33 = vsub.f32 1.0, %v3869_v4  ;;  %v3897_v4 = vand.u32 2147483647, %v3887_v26 }
 0x835   : > { %v3852_v3 = vmul.f32 %v5378_v60, %v3851_v62  ;;  %v3900_v62 = vor.u32 1.1754944e-38, %v3899_v14  ;;  %v7624_v14 = vld [vmem:[#allocation11 + $0x150] sm:$0xff] }
 0x836   : > { %v3871_v16 = vmul.f32 %v5380_v31, %v3870_v33  ;;  %vm3898_vm0 = vcmp.eq.f32.partialorder %v3897_v4, 8.507059e+37  ;;  %v7627_v4 = vld [vmem:[#allocation11 + $0x158] sm:$0xff] }
 0x837   : > { %v5382_v23 = vpop.eup %5381  ;;  %v3853_v37 = vadd.f32 %v5378_v60, %v3852_v3  ;;  %v7558_v3 = vld [vmem:[#allocation11 + $0x1e0] sm:$0xff] }
 0x838   : > { %v3872_v28 = vadd.f32 %v5380_v31, %v3871_v16  ;;  %v3889_v30 = vmul.f32 %v5382_v23, %v3887_v26  ;;  %v5384_v59 = vpop.eup %5383  ;;  %vm3894_vm12 = vweird.f32 %v5382_v23  ;;  %v7564_v26 = vld [vmem:[#allocation11 + $0x1f0] sm:$0xff]  ;;  %v7567_v16 = vld [vmem:[#allocation11 + $0x1f8] sm:$0xff] }
 0x839   : > { %v3857_v58 = vsel %vm3856_vm8, %v5378_v60, %v3853_v37  ;;  %vm3895_vm15 = vmor %vm3893_vm14, %vm3894_vm12  ;;  %v7576_v37 = vld [vmem:[#allocation11 + $0x1d0] sm:$0xff] }
 0x83a   : > { %v3862_v29 = vsel %vm3859_vm11, %v3861_v35, %v3857_v58  ;;  %v3876_v36 = vsel %vm3875_vm9, %v5380_v31, %v3872_v28  ;;  %v3890_v42 = vsub.f32 1.0, %v3889_v30  ;;  %v7579_v35 = vld [vmem:[#allocation11 + $0x1d8] sm:$0xff]  ;;  %v7582_v28 = vld [vmem:[#allocation11 + $0x1a0] sm:$0xff]  ;;  %v7585_v30 = vld [vmem:[#allocation11 + $0x1a8] sm:$0xff] }
 0x83b   : > { %v3881_v55 = vsel %vm3878_vm13, %v3880_v57, %v3876_v36  ;;  %v3907_v63 = vmul.f32 %v5384_v59, %v3862_v29  ;;  %v7591_v57 = vld [vmem:[#allocation11 + $0x1b8] sm:$0xff]  ;;  %v7594_v58 = vld [vmem:[#allocation11 + $0x180] sm:$0xff]  ;;  %v7597_v59 = vld [vmem:[#allocation11 + $0x188] sm:$0xff] }
 0x83c   : > { %v3906_v15 = vmul.f32 %v3904_v52, %v3881_v55  ;;  %v3891_v50 = vmul.f32 %v5382_v23, %v3890_v42  ;;  %v7588_v52 = vld [vmem:[#allocation11 + $0x1b0] sm:$0xff]  ;;  %v7603_v36 = vld [vmem:[#allocation11 + $0x198] sm:$0xff]  ;;  %v7606_v42 = vld [vmem:[#allocation11 + $0x160] sm:$0xff] }
 0x83d   : > { %v7600_v29 = vld [vmem:[#allocation11 + $0x190] sm:$0xff]  ;;  %v7609_v55 = vld [vmem:[#allocation11 + $0x168] sm:$0xff] }
 0x83e   : > { %v7552_v0 = vadd.f32 %v3907_v63, %v3906_v15  ;;  %v3892_v5 = vadd.f32 %v5382_v23, %v3891_v50  ;;  %v7612_v63 = vld [vmem:[#allocation11 + $0x170] sm:$0xff]  ;;  %v7615_v15 = vld [vmem:[#allocation11 + $0x178] sm:$0xff]  ;;  %v7618_v50 = vld [vmem:[#allocation11 + $0x140] sm:$0xff] }
 0x840   : > { %5385 = vtanh.f32 %v7552_v0  ;;  %v3896_v60 = vsel %vm3895_vm15, %v5382_v23, %v3892_v5  ;;  %v7573_v23 = vld [vmem:[#allocation11 + $0x1c8] sm:$0xff] }
 0x841   : > { %v3901_v33 = vsel %vm3898_vm0, %v3900_v62, %v3896_v60  ;;  %v7621_v5 = vld [vmem:[#allocation11 + $0x148] sm:$0xff]  ;;  %v7630_v60 = vld [vmem:[#allocation11 + $0x120] sm:$0xff] }
 0x842   : > { %v7633_v62 = vld [vmem:[#allocation11 + $0x128] sm:$0xff] }
 0x843   : > { %8641 = vst [vmem:[#allocation55_spill] sm:$0xff] %v7633_v62 }
 0x846   : > { %v5386_v31 = vpop.eup %5385 }
 0x847   : > { %v7555_v1 = vmul.f32 %v5386_v31, %v3901_v33  ;;  %v7636_v31 = vld [vmem:[#allocation11 + $0x130] sm:$0xff]  ;;  %v7639_v33 = vld [vmem:[#allocation11 + $0x138] sm:$0xff] }
 0x848   : > { %8642 = vst [vmem:[#allocation56_spill] sm:$0xff] %v7636_v31 }
 0x849   : > { %8640 = vst [vmem:[#allocation54_spill] sm:$0xff] %v7555_v1  ;;  %v3912_v34 = vrot.slane %v7555_v1, 6  ;;  %v7648_v1 = vld [vmem:[#allocation11 + $0x110] sm:$0xff] }
 0x84a   : > { %8643 = vst [vmem:[#allocation57_spill] sm:$0xff] %v7639_v33 }
 0x84b   : > { %3930 = vmatmul.f32.vlgmr.msra.gmra.mxu0 %v3912_v34  ;;  %3950 = vmatmul.f32.vlgmr.msra.gmra.mxu1 %v3912_v34 }
 0x84c   : > { %3970 = vmatmul.f32.vlgmr.msra.gmra.mxu2 %v3912_v34  ;;  %3990 = vmatmul.f32.vlgmr.msra.gmra.mxu3 %v3912_v34  ;;  %v7642_v34 = vld [vmem:[#allocation11 + $0x100] sm:$0xff] }
 0x84d   : > { %4244 = vmatpush.msra.mxu0 %v7558_v3  ;;  %4264 = vmatpush.msra.mxu1 %v7561_v45  ;;  %8644 = vst [vmem:[#allocation20_spill] sm:$0xff] %v7642_v34 }
 0x84e   : > { %4284 = vmatpush.msra.mxu2 %v7564_v26  ;;  %4304 = vmatpush.msra.mxu3 %v7567_v16 }
 0x84f   : > { %4245 = vmatpush.msra.mxu0 %v7570_v39  ;;  %4265 = vmatpush.msra.mxu1 %v7573_v23 }
 0x850   : > { %4285 = vmatpush.msra.mxu2 %v7576_v37  ;;  %4305 = vmatpush.msra.mxu3 %v7579_v35 }
 0x851   : > { %4246 = vmatpush.msra.mxu0 %v7582_v28  ;;  %4266 = vmatpush.msra.mxu1 %v7585_v30 }
 0x852   : > { %4286 = vmatpush.msra.mxu2 %v7588_v52  ;;  %4306 = vmatpush.msra.mxu3 %v7591_v57 }
 0x853   : > { %4247 = vmatpush.msra.mxu0 %v7594_v58  ;;  %4267 = vmatpush.msra.mxu1 %v7597_v59 }
 0x854   : > { %4287 = vmatpush.msra.mxu2 %v7600_v29  ;;  %4307 = vmatpush.msra.mxu3 %v7603_v36 }
 0x855   : > { %4248 = vmatpush.msra.mxu0 %v7606_v42  ;;  %4268 = vmatpush.msra.mxu1 %v7609_v55 }
 0x856   : > { %4288 = vmatpush.msra.mxu2 %v7612_v63  ;;  %4308 = vmatpush.msra.mxu3 %v7615_v15 }
 0x857   : > { %4249 = vmatpush.msra.mxu0 %v7618_v50  ;;  %4269 = vmatpush.msra.mxu1 %v7621_v5 }
 0x858   : > { %4289 = vmatpush.msra.mxu2 %v7624_v14  ;;  %4309 = vmatpush.msra.mxu3 %v7627_v4 }
 0x859   : > { %4250 = vmatpush.msra.mxu0 %v7630_v60  ;;  %4270 = vmatpush.msra.mxu1 %v7633_v62  ;;  %v7651_v62 = vld [vmem:[#allocation11 + $0x118] sm:$0xff] }
 0x85a   : > { %4290 = vmatpush.msra.mxu2 %v7636_v31  ;;  %4310 = vmatpush.msra.mxu3 %v7639_v33  ;;  %v7654_v31 = vld [vmem:[#allocation11 + $0xe0] sm:$0xff]  ;;  %v7657_v33 = vld [vmem:[#allocation11 + $0xe8] sm:$0xff] }
 0x85b   : > { %4251 = vmatpush.msra.mxu0 %v7642_v34  ;;  %4271 = vmatpush.msra.mxu1 %v7645_v41  ;;  %v7660_v34 = vld [vmem:[#allocation11 + $0xf0] sm:$0xff]  ;;  %v7663_v41 = vld [vmem:[#allocation11 + $0xf8] sm:$0xff] }
 0x85c   : > { %4291 = vmatpush.msra.mxu2 %v7648_v1  ;;  %4311 = vmatpush.msra.mxu3 %v7651_v62 }
 0x85d   : > { %4252 = vmatpush.msra.mxu0 %v7654_v31  ;;  %4272 = vmatpush.msra.mxu1 %v7657_v33 }
 0x85e   : > { %4292 = vmatpush.msra.mxu2 %v7660_v34  ;;  %4312 = vmatpush.msra.mxu3 %v7663_v41 }
 0x85f   : > { %4253 = vmatpush.msra.mxu0 %v8612_v8  ;;  %4273 = vmatpush.msra.mxu1 %v8613_v40 }
 0x860   : > { %4293 = vmatpush.msra.mxu2 %v8614_v43  ;;  %4313 = vmatpush.msra.mxu3 %v8615_v56 }
 0x861   : > { %4254 = vmatpush.msra.mxu0 %v8616_v19  ;;  %4274 = vmatpush.msra.mxu1 %v8617_v48 }
 0x862   : > { %4294 = vmatpush.msra.mxu2 %v8618_v2  ;;  %4314 = vmatpush.msra.mxu3 %v8619_v20 }
 0x863   : > { %4255 = vmatpush.msra.mxu0 %v8620_v46  ;;  %4275 = vmatpush.msra.mxu1 %v8621_v18 }
 0x864   : > { %4295 = vmatpush.msra.mxu2 %v8622_v22  ;;  %4315 = vmatpush.msra.mxu3 %v8623_v51 }
 0x865   : > { %4256 = vmatpush.msra.mxu0 %v8624_v32  ;;  %4276 = vmatpush.msra.mxu1 %v8625_v25 }
 0x866   : > { %4296 = vmatpush.msra.mxu2 %v8626_v6  ;;  %4316 = vmatpush.msra.mxu3 %v8627_v9 }
 0x867   : > { %4257 = vmatpush.msra.mxu0 %v8628_v7  ;;  %4277 = vmatpush.msra.mxu1 %v8629_v54 }
 0x868   : > { %4297 = vmatpush.msra.mxu2 %v8630_v44  ;;  %4317 = vmatpush.msra.mxu3 %v8631_v12 }
 0x869   : > { %4258 = vmatpush.msra.mxu0 %v8632_v27  ;;  %4278 = vmatpush.msra.mxu1 %v8633_v53 }
 0x86a   : > { %4298 = vmatpush.msra.mxu2 %v8634_v21  ;;  %4318 = vmatpush.msra.mxu3 %v8635_v17 }
 0x86b   : > { %4259 = vmatpush.msra.mxu0 %v8636_v38  ;;  %4279 = vmatpush.msra.mxu1 %v8637_v11 }
 0x86c   : > { %4299 = vmatpush.msra.mxu2 %v8638_v49  ;;  %4319 = vmatpush.msra.mxu3 %v8639_v47 }
 0x8c8   : > { %v3931_v8 = vpop.f32.mrf.mxu0  ;;  %v3951_v40 = vpop.f32.mrf.mxu1 }
 0x8c9   : > { %v3998_v43 = vrot.slane %v3931_v8, 3  ;;  %v3999_v56 = vrot.slane %v3951_v40, 3 }
 0x8cb   : > { %v4006_v19 = vadd.f32 %v3998_v43, %v7465_v24  ;;  %v4007_v48 = vadd.f32 %v3999_v56, %v7467_v13 }
 0x8cd   : > { %v5090_v2 = vmul.f32 -1.442695, %v4006_v19  ;;  %v5091_v20 = vmul.f32 -1.442695, %v4007_v48 }
 0x8cf   : > { %5387 = vpow2.f32 %v5090_v2  ;;  %v3991_v46 = vpop.f32.mrf.mxu3  ;;  %v3971_v7 = vpop.f32.mrf.mxu2 }
 0x8d0   : > { %5389 = vpow2.f32 %v5091_v20  ;;  %v4001_v18 = vrot.slane %v3991_v46, 3  ;;  %v4000_v54 = vrot.slane %v3971_v7, 3 }
 0x8d2   : > { %v4009_v22 = vadd.f32 %v4001_v18, %v7471_v10  ;;  %v4008_v53 = vadd.f32 %v4000_v54, %v7474_v61 }
 0x8d4   : > { %v5092_v51 = vmul.f32 -1.442695, %v4009_v22  ;;  %v4069_v22 = vrot.slane %v7552_v0, 1 }
 0x8d5   : > { %v5388_v32 = vpop.eup %5387 }
 0x8d6   : > { %v5390_v25 = vpop.eup %5389  ;;  %v4013_v6 = vadd.f32 1.0, %v5388_v32  ;;  %5391 = vpow2.f32 %v5092_v51 }
 0x8d7   : > { %v4032_v9 = vadd.f32 1.0, %v5390_v25 }
 0x8d8   : > { %5393 = vrcp.f32 %v4013_v6  ;;  %v4025_v47 = vand.u32 2147483648, %v4013_v6  ;;  %v4023_v43 = vand.u32 2147483647, %v4013_v6  ;;  %vm4019_vm9 = vweird.f32 %v4013_v6 }
 0x8d9   : > { %5395 = vrcp.f32 %v4032_v9  ;;  %v4044_v8 = vand.u32 2147483648, %v4032_v9  ;;  %v4042_v19 = vand.u32 2147483647, %v4032_v9  ;;  %vm4038_vm11 = vweird.f32 %v4032_v9 }
 0x8da   : > { %v4026_v20 = vor.u32 1.1754944e-38, %v4025_v47  ;;  %vm4024_vm14 = vcmp.eq.f32.partialorder %v4023_v43, 8.507059e+37 }
 0x8db   : > { %v4045_v51 = vor.u32 1.1754944e-38, %v4044_v8  ;;  %vm4043_vm15 = vcmp.eq.f32.partialorder %v4042_v19, 8.507059e+37  ;;  %v8649_v19 = vld [vmem:[#allocation57_spill] sm:$0xff] }
 0x8dc   : > { %v5392_v44 = vpop.eup %5391 }
 0x8dd   : > { %v4052_v12 = vadd.f32 1.0, %v5392_v44 }
 0x8de   : > { %v5394_v27 = vpop.eup %5393 }
 0x8df   : > { %v5396_v21 = vpop.eup %5395  ;;  %v4015_v17 = vmul.f32 %v5394_v27, %v4013_v6  ;;  %5397 = vrcp.f32 %v4052_v12  ;;  %vm4020_vm6 = vweird.f32 %v5394_v27  ;;  %v4064_v0 = vand.u32 2147483648, %v4052_v12 }
 0x8e0   : > { %v4034_v38 = vmul.f32 %v5396_v21, %v4032_v9  ;;  %5399 = vtanh.f32 %v4008_v53  ;;  %vm4039_vm8 = vweird.f32 %v5396_v21  ;;  %vm4021_vm13 = vmor %vm4019_vm9, %vm4020_vm6  ;;  %vm4058_vm6 = vweird.f32 %v4052_v12 }
 0x8e1   : > { %v4016_v11 = vsub.f32 1.0, %v4015_v17  ;;  %vm4040_vm12 = vmor %vm4038_vm11, %vm4039_vm8  ;;  %v4065_v47 = vor.u32 1.1754944e-38, %v4064_v0  ;;  %v7786_v0 = vld [vmem:[#allocation11 + $0x78] sm:$0xff] }
 0x8e2   : > { %v4035_v49 = vsub.f32 1.0, %v4034_v38  ;;  %8665 = vst [vmem:[#allocation36_spill] sm:$0xff] %v7786_v0 }
 0x8e3   : > { %v4017_v40 = vmul.f32 %v5394_v27, %v4016_v11 }
 0x8e4   : > { %v4036_v56 = vmul.f32 %v5396_v21, %v4035_v49  ;;  %v4062_v49 = vand.u32 2147483647, %v4052_v12 }
 0x8e5   : > { %v5398_v48 = vpop.eup %5397  ;;  %v4018_v2 = vadd.f32 %v5394_v27, %v4017_v40 }
 0x8e6   : > { %v4037_v46 = vadd.f32 %v5396_v21, %v4036_v56  ;;  %v4054_v18 = vmul.f32 %v5398_v48, %v4052_v12  ;;  %v5400_v25 = vpop.eup %5399  ;;  %vm4059_vm0 = vweird.f32 %v5398_v48  ;;  %vm4063_vm9 = vcmp.eq.f32.partialorder %v4062_v49, 8.507059e+37  ;;  %v8647_v12 = vld [vmem:[#allocation55_spill] sm:$0xff]  ;;  %v8648_v56 = vld [vmem:[#allocation56_spill] sm:$0xff] }
 0x8e7   : > { %v4022_v32 = vsel %vm4021_vm13, %v5394_v27, %v4018_v2  ;;  %vm4060_vm8 = vmor %vm4058_vm6, %vm4059_vm0  ;;  %v8651_v2 = vld [vmem:[#allocation21_spill] sm:$0xff]  ;;  %v7789_v49 = vld [vmem:[#allocation11 + $0x40] sm:$0xff] }
 0x8e8   : > { %v4027_v7 = vsel %vm4024_vm14, %v4026_v20, %v4022_v32  ;;  %v4041_v54 = vsel %vm4040_vm12, %v5396_v21, %v4037_v46  ;;  %v4055_v44 = vsub.f32 1.0, %v4054_v18  ;;  %v7741_v20 = vld [vmem:[#allocation11 + $0xc0] sm:$0xff]  ;;  %v7744_v46 = vld [vmem:[#allocation11 + $0xc8] sm:$0xff]  ;;  %v7747_v18 = vld [vmem:[#allocation11 + $0xd0] sm:$0xff]  ;;  %8666 = vst [vmem:[#allocation37_spill] sm:$0xff] %v7789_v49 }
 0x8e9   : > { %v4046_v53 = vsel %vm4043_vm15, %v4045_v51, %v4041_v54  ;;  %v4072_v17 = vmul.f32 %v5400_v25, %v4027_v7  ;;  %8652 = vst [vmem:[#allocation23_spill] sm:$0xff] %v7747_v18  ;;  %v7753_v51 = vld [vmem:[#allocation11 + $0xa0] sm:$0xff]  ;;  %v7756_v32 = vld [vmem:[#allocation11 + $0xa8] sm:$0xff]  ;;  %v7759_v25 = vld [vmem:[#allocation11 + $0xb0] sm:$0xff] }
 0x8ea   : > { %v4071_v38 = vmul.f32 %v4069_v22, %v4046_v53  ;;  %v4056_v6 = vmul.f32 %v5398_v48, %v4055_v44  ;;  %v7750_v22 = vld [vmem:[#allocation11 + $0xd8] sm:$0xff]  ;;  %8654 = vst [vmem:[#allocation25_spill] sm:$0xff] %v7753_v51  ;;  %v7765_v54 = vld [vmem:[#allocation11 + $0x80] sm:$0xff]  ;;  %v7768_v44 = vld [vmem:[#allocation11 + $0x88] sm:$0xff] }
 0x8eb   : > { %8653 = vst [vmem:[#allocation24_spill] sm:$0xff] %v7750_v22  ;;  %v7762_v7 = vld [vmem:[#allocation11 + $0xb8] sm:$0xff]  ;;  %v7771_v53 = vld [vmem:[#allocation11 + $0x90] sm:$0xff] }
 0x8ec   : > { %v7699_v9 = vadd.f32 %v4072_v17, %v4071_v38  ;;  %v4057_v11 = vadd.f32 %v5398_v48, %v4056_v6  ;;  %8655 = vst [vmem:[#allocation26_spill] sm:$0xff] %v7756_v32  ;;  %v7774_v17 = vld [vmem:[#allocation11 + $0x98] sm:$0xff]  ;;  %v7777_v38 = vld [vmem:[#allocation11 + $0x60] sm:$0xff]  ;;  %v7780_v6 = vld [vmem:[#allocation11 + $0x68] sm:$0xff] }
 0x8ed   : > { %8656 = vst [vmem:[#allocation27_spill] sm:$0xff] %v7759_v25 }
 0x8ee   : > { %5401 = vtanh.f32 %v7699_v9  ;;  %v4061_v27 = vsel %vm4060_vm8, %v5398_v48, %v4057_v11  ;;  %v8650_v48 = vld [vmem:[#allocation20_spill] sm:$0xff]  ;;  %8657 = vst [vmem:[#allocation28_spill] sm:$0xff] %v7762_v7  ;;  %v7783_v11 = vld [vmem:[#allocation11 + $0x70] sm:$0xff] }
 0x8ef   : > { %v4066_v8 = vsel %vm4063_vm9, %v4065_v47, %v4061_v27  ;;  %8658 = vst [vmem:[#allocation29_spill] sm:$0xff] %v7765_v54  ;;  %v7792_v27 = vld [vmem:[#allocation11 + $0x48] sm:$0xff]  ;;  %v7795_v47 = vld [vmem:[#allocation11 + $0x50] sm:$0xff] }
 0x8f0   : > { %8659 = vst [vmem:[#allocation30_spill] sm:$0xff] %v7768_v44 }
 0x8f1   : > { %8660 = vst [vmem:[#allocation31_spill] sm:$0xff] %v7771_v53 }
 0x8f2   : > { %8661 = vst [vmem:[#allocation32_spill] sm:$0xff] %v7774_v17 }
 0x8f3   : > { %8662 = vst [vmem:[#allocation33_spill] sm:$0xff] %v7777_v38 }
 0x8f4   : > { %v5402_v21 = vpop.eup %5401  ;;  %8663 = vst [vmem:[#allocation34_spill] sm:$0xff] %v7780_v6 }
 0x8f5   : > { %v7702_v40 = vmul.f32 %v5402_v21, %v4066_v8  ;;  %8664 = vst [vmem:[#allocation35_spill] sm:$0xff] %v7783_v11  ;;  %v7798_v21 = vld [vmem:[#allocation11 + $0x58] sm:$0xff]  ;;  %v7801_v8 = vld [vmem:[#allocation11 + $0x20] sm:$0xff] }
 0x8f6   : > { %8667 = vst [vmem:[#allocation38_spill] sm:$0xff] %v7792_v27 }
 0x8f7   : > { %8646 = vst [vmem:[#allocation22_spill] sm:$0xff] %v7702_v40  ;;  %v4077_v43 = vrot.slane %v7702_v40, 5  ;;  %v7807_v40 = vld [vmem:[#allocation11 + $0x30] sm:$0xff] }
 0x8f8   : > { %8668 = vst [vmem:[#allocation39_spill] sm:$0xff] %v7795_v47 }
 0x8f9   : > { %4095 = vmatmul.f32.vlgmr.msrb.gmra.mxu0 %v4077_v43  ;;  %4115 = vmatmul.f32.vlgmr.msrb.gmra.mxu1 %v4077_v43  ;;  %8669 = vst [vmem:[#allocation40_spill] sm:$0xff] %v7798_v21 }
 0x8fa   : > { %4135 = vmatmul.f32.vlgmr.msrb.gmra.mxu2 %v4077_v43  ;;  %4155 = vmatmul.f32.vlgmr.msrb.gmra.mxu3 %v4077_v43  ;;  %8670 = vst [vmem:[#allocation41_spill] sm:$0xff] %v7801_v8  ;;  %v7804_v43 = vld [vmem:[#allocation11 + $0x28] sm:$0xff] }
 0x8fb   : > { %4409 = vmatpush.msrb.mxu0 %v7558_v3  ;;  %4429 = vmatpush.msrb.mxu1 %v7561_v45  ;;  %8671 = vst [vmem:[#allocation42_spill] sm:$0xff] %v7804_v43 }
 0x8fc   : > { %4449 = vmatpush.msrb.mxu2 %v7564_v26  ;;  %4469 = vmatpush.msrb.mxu3 %v7567_v16  ;;  %8672 = vst [vmem:[#allocation43_spill] sm:$0xff] %v7807_v40 }
 0x8fd   : > { %4410 = vmatpush.msrb.mxu0 %v7570_v39  ;;  %4430 = vmatpush.msrb.mxu1 %v7573_v23 }
 0x8fe   : > { %4450 = vmatpush.msrb.mxu2 %v7576_v37  ;;  %4470 = vmatpush.msrb.mxu3 %v7579_v35 }
 0x8ff   : > { %4411 = vmatpush.msrb.mxu0 %v7582_v28  ;;  %4431 = vmatpush.msrb.mxu1 %v7585_v30 }
 0x900   : > { %4451 = vmatpush.msrb.mxu2 %v7588_v52  ;;  %4471 = vmatpush.msrb.mxu3 %v7591_v57 }
 0x901   : > { %4412 = vmatpush.msrb.mxu0 %v7594_v58  ;;  %4432 = vmatpush.msrb.mxu1 %v7597_v59 }
 0x902   : > { %4452 = vmatpush.msrb.mxu2 %v7600_v29  ;;  %4472 = vmatpush.msrb.mxu3 %v7603_v36 }
 0x903   : > { %4413 = vmatpush.msrb.mxu0 %v7606_v42  ;;  %4433 = vmatpush.msrb.mxu1 %v7609_v55 }
 0x904   : > { %4453 = vmatpush.msrb.mxu2 %v7612_v63  ;;  %4473 = vmatpush.msrb.mxu3 %v7615_v15 }
 0x905   : > { %4414 = vmatpush.msrb.mxu0 %v7618_v50  ;;  %4434 = vmatpush.msrb.mxu1 %v7621_v5 }
 0x906   : > { %4454 = vmatpush.msrb.mxu2 %v7624_v14  ;;  %4474 = vmatpush.msrb.mxu3 %v7627_v4 }
 0x907   : > { %4415 = vmatpush.msrb.mxu0 %v7630_v60  ;;  %4435 = vmatpush.msrb.mxu1 %v8647_v12 }
 0x908   : > { %4455 = vmatpush.msrb.mxu2 %v8648_v56  ;;  %4475 = vmatpush.msrb.mxu3 %v8649_v19 }
 0x909   : > { %4416 = vmatpush.msrb.mxu0 %v8650_v48  ;;  %4436 = vmatpush.msrb.mxu1 %v8651_v2 }
 0x90a   : > { %4456 = vmatpush.msrb.mxu2 %v7648_v1  ;;  %4476 = vmatpush.msrb.mxu3 %v7651_v62 }
 0x90b   : > { %4417 = vmatpush.msrb.mxu0 %v7654_v31  ;;  %4437 = vmatpush.msrb.mxu1 %v7657_v33 }
 0x90c   : > { %4457 = vmatpush.msrb.mxu2 %v7660_v34  ;;  %4477 = vmatpush.msrb.mxu3 %v7663_v41 }
 0x90d   : > { %4418 = vmatpush.msrb.mxu0 %v7741_v20  ;;  %4438 = vmatpush.msrb.mxu1 %v7744_v46 }
 0x90e   : > { %4458 = vmatpush.msrb.mxu2 %v7747_v18  ;;  %4478 = vmatpush.msrb.mxu3 %v7750_v22 }
 0x90f   : > { %4419 = vmatpush.msrb.mxu0 %v7753_v51  ;;  %4439 = vmatpush.msrb.mxu1 %v7756_v32 }
 0x910   : > { %4459 = vmatpush.msrb.mxu2 %v7759_v25  ;;  %4479 = vmatpush.msrb.mxu3 %v7762_v7 }
 0x911   : > { %4420 = vmatpush.msrb.mxu0 %v7765_v54  ;;  %4440 = vmatpush.msrb.mxu1 %v7768_v44 }
 0x912   : > { %4460 = vmatpush.msrb.mxu2 %v7771_v53  ;;  %4480 = vmatpush.msrb.mxu3 %v7774_v17 }
 0x913   : > { %4421 = vmatpush.msrb.mxu0 %v7777_v38  ;;  %4441 = vmatpush.msrb.mxu1 %v7780_v6 }
 0x914   : > { %4461 = vmatpush.msrb.mxu2 %v7783_v11  ;;  %4481 = vmatpush.msrb.mxu3 %v7786_v0 }
 0x915   : > { %4422 = vmatpush.msrb.mxu0 %v7789_v49  ;;  %4442 = vmatpush.msrb.mxu1 %v7792_v27  ;;  %v7810_v27 = vld [vmem:[#allocation11 + $0x38] sm:$0xff] }
 0x916   : > { %4462 = vmatpush.msrb.mxu2 %v7795_v47  ;;  %4482 = vmatpush.msrb.mxu3 %v7798_v21  ;;  %8673 = vst [vmem:[#allocation44_spill] sm:$0xff] %v7810_v27  ;;  %v7813_v47 = vld [vmem:[#allocation11] sm:$0xff]  ;;  %v7816_v21 = vld [vmem:[#allocation11 + $0x8] sm:$0xff] }
 0x917   : > { %4423 = vmatpush.msrb.mxu0 %v7801_v8  ;;  %4443 = vmatpush.msrb.mxu1 %v7804_v43  ;;  %8674 = vst [vmem:[#allocation45_spill] sm:$0xff] %v7813_v47  ;;  %v7819_v8 = vld [vmem:[#allocation11 + $0x10] sm:$0xff]  ;;  %v7822_v43 = vld [vmem:[#allocation11 + $0x18] sm:$0xff] }
 0x918   : > { %4463 = vmatpush.msrb.mxu2 %v7807_v40  ;;  %4483 = vmatpush.msrb.mxu3 %v7810_v27  ;;  %8675 = vst [vmem:[#allocation46_spill] sm:$0xff] %v7816_v21 }
 0x919   : > { %4424 = vmatpush.msrb.mxu0 %v7813_v47  ;;  %4444 = vmatpush.msrb.mxu1 %v7816_v21  ;;  %8676 = vst [vmem:[#allocation47_spill] sm:$0xff] %v7819_v8 }
 0x91a   : > { %4464 = vmatpush.msrb.mxu2 %v7819_v8  ;;  %8677 = vst [vmem:[#allocation48_spill] sm:$0xff] %v7822_v43  ;;  %4484 = vmatpush.msrb.mxu3 %v7822_v43 }
 0x976   : > { %v4096_v40 = vpop.f32.mrf.mxu0  ;;  %v4116_v49 = vpop.f32.mrf.mxu1 }
 0x977   : > { %v4163_v0 = vrot.slane %v4096_v40, 4  ;;  %v4164_v27 = vrot.slane %v4116_v49, 4 }
 0x979   : > { %v4171_v11 = vadd.f32 %v4163_v0, %v7465_v24  ;;  %v4172_v47 = vadd.f32 %v4164_v27, %v7467_v13 }
 0x97b   : > { %v5093_v6 = vmul.f32 -1.442695, %v4171_v11  ;;  %v5094_v38 = vmul.f32 -1.442695, %v4172_v47 }
 0x97d   : > { %5403 = vpow2.f32 %v5093_v6  ;;  %v4156_v21 = vpop.f32.mrf.mxu3  ;;  %v4136_v40 = vpop.f32.mrf.mxu2 }
 0x97e   : > { %5405 = vpow2.f32 %v5094_v38  ;;  %v4166_v17 = vrot.slane %v4156_v21, 4  ;;  %v4165_v0 = vrot.slane %v4136_v40, 4 }
 0x980   : > { %v4174_v8 = vadd.f32 %v4166_v17, %v7471_v10  ;;  %v4173_v6 = vadd.f32 %v4165_v0, %v7474_v61 }
 0x982   : > { %v5095_v53 = vmul.f32 -1.442695, %v4174_v8 }
 0x983   : > { %v5404_v44 = vpop.eup %5403 }
 0x984   : > { %v5406_v54 = vpop.eup %5405  ;;  %v4178_v43 = vadd.f32 1.0, %v5404_v44  ;;  %5407 = vpow2.f32 %v5095_v53 }
 0x985   : > { %v4197_v7 = vadd.f32 1.0, %v5406_v54 }
 0x986   : > { %5409 = vrcp.f32 %v4178_v43  ;;  %v4190_v10 = vand.u32 2147483648, %v4178_v43  ;;  %v4188_v54 = vand.u32 2147483647, %v4178_v43  ;;  %vm4184_vm12 = vweird.f32 %v4178_v43 }
 0x987   : > { %5411 = vrcp.f32 %v4197_v7  ;;  %v4209_v44 = vand.u32 2147483648, %v4197_v7  ;;  %v4207_v40 = vand.u32 2147483647, %v4197_v7  ;;  %vm4203_vm14 = vweird.f32 %v4197_v7 }
 0x988   : > { %v4191_v0 = vor.u32 1.1754944e-38, %v4190_v10  ;;  %vm4189_vm6 = vcmp.eq.f32.partialorder %v4188_v54, 8.507059e+37  ;;  %v8684_v54 = vld [vmem:[#allocation28_spill] sm:$0xff] }
 0x989   : > { %vm4208_vm8 = vcmp.eq.f32.partialorder %v4207_v40, 8.507059e+37  ;;  %v8685_v40 = vld [vmem:[#allocation29_spill] sm:$0xff] }
 0x98a   : > { %v5408_v49 = vpop.eup %5407 }
 0x98b   : > { %v4217_v27 = vadd.f32 1.0, %v5408_v49 }
 0x98c   : > { %v5410_v11 = vpop.eup %5409 }
 0x98d   : > { %v5412_v47 = vpop.eup %5411  ;;  %v4180_v38 = vmul.f32 %v5410_v11, %v4178_v43  ;;  %5413 = vrcp.f32 %v4217_v27  ;;  %vm4185_vm11 = vweird.f32 %v5410_v11  ;;  %v4229_v10 = vand.u32 2147483648, %v4217_v27 }
 0x98e   : > { %v4199_v21 = vmul.f32 %v5412_v47, %v4197_v7  ;;  %5415 = vtanh.f32 %v4173_v6  ;;  %vm4204_vm13 = vweird.f32 %v5412_v47  ;;  %vm4186_vm15 = vmor %vm4184_vm12, %vm4185_vm11  ;;  %vm4223_vm11 = vweird.f32 %v4217_v27 }
 0x98f   : > { %v4181_v17 = vsub.f32 1.0, %v4180_v38  ;;  %v4234_v38 = vrot.slane %v7699_v9, 1  ;;  %vm4205_vm0 = vmor %vm4203_vm14, %vm4204_vm13  ;;  %v4227_v9 = vand.u32 2147483647, %v4217_v27 }
 0x990   : > { %v4200_v8 = vsub.f32 1.0, %v4199_v21  ;;  %v4210_v21 = vor.u32 1.1754944e-38, %v4209_v44  ;;  %v4230_v44 = vor.u32 1.1754944e-38, %v4229_v10  ;;  %v8696_v10 = vld [vmem:[#allocation40_spill] sm:$0xff] }
 0x991   : > { %v4182_v53 = vmul.f32 %v5410_v11, %v4181_v17  ;;  %vm4228_vm12 = vcmp.eq.f32.partialorder %v4227_v9, 8.507059e+37  ;;  %v8697_v9 = vld [vmem:[#allocation41_spill] sm:$0xff] }
 0x992   : > { %v4201_v13 = vmul.f32 %v5412_v47, %v4200_v8 }
 0x993   : > { %v5414_v24 = vpop.eup %5413  ;;  %v4183_v49 = vadd.f32 %v5410_v11, %v4182_v53 }
 0x994   : > { %v4202_v61 = vadd.f32 %v5412_v47, %v4201_v13  ;;  %v4219_v25 = vmul.f32 %v5414_v24, %v4217_v27  ;;  %v5416_v17 = vpop.eup %5415  ;;  %vm4224_vm9 = vweird.f32 %v5414_v24  ;;  %v8683_v27 = vld [vmem:[#allocation27_spill] sm:$0xff] }
 0x995   : > { %v4187_v6 = vsel %vm4186_vm15, %v5410_v11, %v4183_v49  ;;  %vm4225_vm13 = vmor %vm4223_vm11, %vm4224_vm9  ;;  %v8686_v49 = vld [vmem:[#allocation30_spill] sm:$0xff] }
 0x996   : > { %v4192_v32 = vsel %vm4189_vm6, %v4191_v0, %v4187_v6  ;;  %v4206_v51 = vsel %vm4205_vm0, %v5412_v47, %v4202_v61  ;;  %v4220_v8 = vsub.f32 1.0, %v4219_v25  ;;  %v8687_v0 = vld [vmem:[#allocation31_spill] sm:$0xff]  ;;  %v8690_v6 = vld [vmem:[#allocation34_spill] sm:$0xff] }
 0x997   : > { %v4211_v22 = vsel %vm4208_vm8, %v4210_v21, %v4206_v51  ;;  %v4237_v18 = vmul.f32 %v5416_v17, %v4192_v32  ;;  %v8681_v51 = vld [vmem:[#allocation25_spill] sm:$0xff]  ;;  %v8682_v32 = vld [vmem:[#allocation26_spill] sm:$0xff]  ;;  %v8691_v17 = vld [vmem:[#allocation35_spill] sm:$0xff] }
 0x998   : > { %v4236_v53 = vmul.f32 %v4234_v38, %v4211_v22  ;;  %v4221_v43 = vmul.f32 %v5414_v24, %v4220_v8  ;;  %v8688_v38 = vld [vmem:[#allocation32_spill] sm:$0xff]  ;;  %v8689_v21 = vld [vmem:[#allocation33_spill] sm:$0xff] }
 0x999   : > { %v8692_v8 = vld [vmem:[#allocation36_spill] sm:$0xff] }
 0x99a   : > { %v7830_v7 = vadd.f32 %v4237_v18, %v4236_v53  ;;  %v4222_v13 = vadd.f32 %v5414_v24, %v4221_v43  ;;  %v8680_v18 = vld [vmem:[#allocation24_spill] sm:$0xff]  ;;  %v8693_v53 = vld [vmem:[#allocation37_spill] sm:$0xff]  ;;  %v8694_v43 = vld [vmem:[#allocation38_spill] sm:$0xff] }
 0x99c   : > { %5417 = vtanh.f32 %v7830_v7  ;;  %v4226_v11 = vsel %vm4225_vm13, %v5414_v24, %v4222_v13  ;;  %v8679_v24 = vld [vmem:[#allocation23_spill] sm:$0xff] }
 0x99d   : > { %v4231_v47 = vsel %vm4228_vm12, %v4230_v44, %v4226_v11  ;;  %v8695_v13 = vld [vmem:[#allocation39_spill] sm:$0xff]  ;;  %v8698_v11 = vld [vmem:[#allocation42_spill] sm:$0xff] }
 0x99e   : > { %v8699_v44 = vld [vmem:[#allocation43_spill] sm:$0xff] }
 0x9a2   : > { %v5418_v61 = vpop.eup %5417 }
 0x9a3   : > { %v7833_v25 = vmul.f32 %v5418_v61, %v4231_v47  ;;  %v8700_v61 = vld [vmem:[#allocation44_spill] sm:$0xff]  ;;  %v8701_v47 = vld [vmem:[#allocation45_spill] sm:$0xff] }
 0x9a5   : > { %8678 = vst [vmem:[#allocation49_spill] sm:$0xff] %v7833_v25  ;;  %v4242_v22 = vrot.slane %v7833_v25, 4  ;;  %v8703_v25 = vld [vmem:[#allocation47_spill] sm:$0xff] }
 0x9a7   : > { %4260 = vmatmul.f32.vlgmr.msra.gmra.mxu0 %v4242_v22  ;;  %4280 = vmatmul.f32.vlgmr.msra.gmra.mxu1 %v4242_v22 }
 0x9a8   : > { %4300 = vmatmul.f32.vlgmr.msra.gmra.mxu2 %v4242_v22  ;;  %4320 = vmatmul.f32.vlgmr.msra.gmra.mxu3 %v4242_v22  ;;  %v8702_v22 = vld [vmem:[#allocation46_spill] sm:$0xff] }
 0x9a9   : > { %4574 = vmatpush.msra.mxu0 %v7558_v3  ;;  %4594 = vmatpush.msra.mxu1 %v7561_v45 }
 0x9aa   : > { %4614 = vmatpush.msra.mxu2 %v7564_v26  ;;  %4634 = vmatpush.msra.mxu3 %v7567_v16 }
 0x9ab   : > { %4575 = vmatpush.msra.mxu0 %v7570_v39  ;;  %4595 = vmatpush.msra.mxu1 %v7573_v23 }
 0x9ac   : > { %4615 = vmatpush.msra.mxu2 %v7576_v37  ;;  %4635 = vmatpush.msra.mxu3 %v7579_v35 }
 0x9ad   : > { %4576 = vmatpush.msra.mxu0 %v7582_v28  ;;  %4596 = vmatpush.msra.mxu1 %v7585_v30 }
 0x9ae   : > { %4616 = vmatpush.msra.mxu2 %v7588_v52  ;;  %4636 = vmatpush.msra.mxu3 %v7591_v57 }
 0x9af   : > { %4577 = vmatpush.msra.mxu0 %v7594_v58  ;;  %4597 = vmatpush.msra.mxu1 %v7597_v59 }
 0x9b0   : > { %4617 = vmatpush.msra.mxu2 %v7600_v29  ;;  %4637 = vmatpush.msra.mxu3 %v7603_v36 }
 0x9b1   : > { %4578 = vmatpush.msra.mxu0 %v7606_v42  ;;  %4598 = vmatpush.msra.mxu1 %v7609_v55 }
 0x9b2   : > { %4618 = vmatpush.msra.mxu2 %v7612_v63  ;;  %4638 = vmatpush.msra.mxu3 %v7615_v15 }
 0x9b3   : > { %4579 = vmatpush.msra.mxu0 %v7618_v50  ;;  %4599 = vmatpush.msra.mxu1 %v7621_v5 }
 0x9b4   : > { %4619 = vmatpush.msra.mxu2 %v7624_v14  ;;  %4639 = vmatpush.msra.mxu3 %v7627_v4 }
 0x9b5   : > { %4580 = vmatpush.msra.mxu0 %v7630_v60  ;;  %4600 = vmatpush.msra.mxu1 %v8647_v12 }
 0x9b6   : > { %4620 = vmatpush.msra.mxu2 %v8648_v56  ;;  %4640 = vmatpush.msra.mxu3 %v8649_v19 }
 0x9b7   : > { %4581 = vmatpush.msra.mxu0 %v8650_v48  ;;  %4601 = vmatpush.msra.mxu1 %v8651_v2 }
 0x9b8   : > { %4621 = vmatpush.msra.mxu2 %v7648_v1  ;;  %4641 = vmatpush.msra.mxu3 %v7651_v62 }
 0x9b9   : > { %4582 = vmatpush.msra.mxu0 %v7654_v31  ;;  %4602 = vmatpush.msra.mxu1 %v7657_v33 }
 0x9ba   : > { %4622 = vmatpush.msra.mxu2 %v7660_v34  ;;  %4642 = vmatpush.msra.mxu3 %v7663_v41 }
 0x9bb   : > { %4583 = vmatpush.msra.mxu0 %v7741_v20  ;;  %4603 = vmatpush.msra.mxu1 %v7744_v46 }
 0x9bc   : > { %4623 = vmatpush.msra.mxu2 %v8679_v24  ;;  %4643 = vmatpush.msra.mxu3 %v8680_v18 }
 0x9bd   : > { %4584 = vmatpush.msra.mxu0 %v8681_v51  ;;  %4604 = vmatpush.msra.mxu1 %v8682_v32 }
 0x9be   : > { %4624 = vmatpush.msra.mxu2 %v8683_v27  ;;  %4644 = vmatpush.msra.mxu3 %v8684_v54 }
 0x9bf   : > { %4585 = vmatpush.msra.mxu0 %v8685_v40  ;;  %4605 = vmatpush.msra.mxu1 %v8686_v49 }
 0x9c0   : > { %4625 = vmatpush.msra.mxu2 %v8687_v0  ;;  %4645 = vmatpush.msra.mxu3 %v8688_v38  ;;  %v8707_v38 = vld [vmem:[#allocation62_spill] sm:$0xff] }
 0x9c1   : > { %4586 = vmatpush.msra.mxu0 %v8689_v21  ;;  %4606 = vmatpush.msra.mxu1 %v8690_v6  ;;  %v8706_v6 = vld [vmem:[#allocation61_spill] sm:$0xff] }
 0x9c2   : > { %4626 = vmatpush.msra.mxu2 %v8691_v17  ;;  %4646 = vmatpush.msra.mxu3 %v8692_v8  ;;  %v8705_v17 = vld [vmem:[#allocation60_spill] sm:$0xff] }
 0x9c3   : > { %4587 = vmatpush.msra.mxu0 %v8693_v53  ;;  %4607 = vmatpush.msra.mxu1 %v8694_v43  ;;  %v8704_v53 = vld [vmem:[#allocation48_spill] sm:$0xff] }
 0x9c4   : > { %4627 = vmatpush.msra.mxu2 %v8695_v13  ;;  %4647 = vmatpush.msra.mxu3 %v8696_v10 }
 0x9c5   : > { %4588 = vmatpush.msra.mxu0 %v8697_v9  ;;  %4608 = vmatpush.msra.mxu1 %v8698_v11 }
 0x9c6   : > { %4628 = vmatpush.msra.mxu2 %v8699_v44  ;;  %4648 = vmatpush.msra.mxu3 %v8700_v61 }
 0x9c7   : > { %4589 = vmatpush.msra.mxu0 %v8701_v47  ;;  %4609 = vmatpush.msra.mxu1 %v8702_v22 }
 0x9c8   : > { %4629 = vmatpush.msra.mxu2 %v8703_v25  ;;  %4649 = vmatpush.msra.mxu3 %v8704_v53 }
 0xa24   : > { %v4261_v43 = vpop.f32.mrf.mxu0  ;;  %v4281_v13 = vpop.f32.mrf.mxu1 }
 0xa25   : > { %v4328_v8 = vrot.slane %v4261_v43, 5  ;;  %v4329_v10 = vrot.slane %v4281_v13, 5 }
 0xa27   : > { %v4336_v9 = vadd.f32 %v4328_v8, %v8705_v17  ;;  %v4337_v11 = vadd.f32 %v4329_v10, %v8706_v6 }
 0xa29   : > { %v5096_v21 = vmul.f32 -1.442695, %v4336_v9  ;;  %v5097_v44 = vmul.f32 -1.442695, %v4337_v11  ;;  %v8708_v11 = vld [vmem:[#allocation63_spill] sm:$0xff] }
 0xa2b   : > { %5419 = vpow2.f32 %v5096_v21  ;;  %v4321_v61 = vpop.f32.mrf.mxu3  ;;  %v4301_v43 = vpop.f32.mrf.mxu2 }
 0xa2c   : > { %5421 = vpow2.f32 %v5097_v44  ;;  %v4331_v47 = vrot.slane %v4321_v61, 5  ;;  %v4330_v8 = vrot.slane %v4301_v43, 5 }
 0xa2e   : > { %v4339_v22 = vadd.f32 %v4331_v47, %v8707_v38  ;;  %v4338_v21 = vadd.f32 %v4330_v8, %v8708_v11 }
 0xa30   : > { %v5098_v0 = vmul.f32 -1.442695, %v4339_v22 }
 0xa31   : > { %v5420_v25 = vpop.eup %5419 }
 0xa32   : > { %v5422_v49 = vpop.eup %5421  ;;  %v4343_v53 = vadd.f32 1.0, %v5420_v25  ;;  %5423 = vpow2.f32 %v5098_v0 }
 0xa33   : > { %v4362_v40 = vadd.f32 1.0, %v5422_v49 }
 0xa34   : > { %5425 = vrcp.f32 %v4343_v53  ;;  %v4355_v38 = vand.u32 2147483648, %v4343_v53  ;;  %v4353_v49 = vand.u32 2147483647, %v4343_v53  ;;  %vm4349_vm0 = vweird.f32 %v4343_v53 }
 0xa35   : > { %5427 = vrcp.f32 %v4362_v40  ;;  %v4374_v25 = vand.u32 2147483648, %v4362_v40  ;;  %v4372_v43 = vand.u32 2147483647, %v4362_v40  ;;  %vm4368_vm6 = vweird.f32 %v4362_v40 }
 0xa36   : > { %v4356_v8 = vor.u32 1.1754944e-38, %v4355_v38  ;;  %vm4354_vm11 = vcmp.eq.f32.partialorder %v4353_v49, 8.507059e+37 }
 0xa37   : > { %vm4373_vm13 = vcmp.eq.f32.partialorder %v4372_v43, 8.507059e+37 }
 0xa38   : > { %v5424_v13 = vpop.eup %5423 }
 0xa39   : > { %v4382_v10 = vadd.f32 1.0, %v5424_v13 }
 0xa3a   : > { %v5426_v9 = vpop.eup %5425 }
 0xa3b   : > { %v5428_v6 = vpop.eup %5427  ;;  %v4345_v44 = vmul.f32 %v5426_v9, %v4343_v53  ;;  %5429 = vrcp.f32 %v4382_v10  ;;  %vm4350_vm14 = vweird.f32 %v5426_v9 }
 0xa3c   : > { %v4364_v61 = vmul.f32 %v5428_v6, %v4362_v40  ;;  %5431 = vtanh.f32 %v4338_v21  ;;  %vm4369_vm15 = vweird.f32 %v5428_v6  ;;  %vm4351_vm8 = vmor %vm4349_vm0, %vm4350_vm14  ;;  %vm4388_vm14 = vweird.f32 %v4382_v10 }
 0xa3d   : > { %v4346_v47 = vsub.f32 1.0, %v4345_v44  ;;  %v4399_v44 = vrot.slane %v7830_v7, 1  ;;  %vm4370_vm9 = vmor %vm4368_vm6, %vm4369_vm15  ;;  %v4394_v7 = vand.u32 2147483648, %v4382_v10 }
 0xa3e   : > { %v4365_v22 = vsub.f32 1.0, %v4364_v61  ;;  %v4375_v61 = vor.u32 1.1754944e-38, %v4374_v25 }
 0xa3f   : > { %v4347_v0 = vmul.f32 %v5426_v9, %v4346_v47  ;;  %v4395_v25 = vor.u32 1.1754944e-38, %v4394_v7 }
 0xa40   : > { %v4366_v17 = vmul.f32 %v5428_v6, %v4365_v22 }
 0xa41   : > { %v5430_v54 = vpop.eup %5429  ;;  %v4348_v13 = vadd.f32 %v5426_v9, %v4347_v0 }
 0xa42   : > { %v4367_v11 = vadd.f32 %v5428_v6, %v4366_v17  ;;  %v4384_v27 = vmul.f32 %v5430_v54, %v4382_v10  ;;  %v5432_v47 = vpop.eup %5431  ;;  %vm4389_vm12 = vweird.f32 %v5430_v54  ;;  %v4392_v17 = vand.u32 2147483647, %v4382_v10 }
 0xa43   : > { %v4352_v21 = vsel %vm4351_vm8, %v5426_v9, %v4348_v13  ;;  %vm4390_vm15 = vmor %vm4388_vm14, %vm4389_vm12 }
 0xa44   : > { %v4357_v32 = vsel %vm4354_vm11, %v4356_v8, %v4352_v21  ;;  %v4371_v51 = vsel %vm4370_vm9, %v5428_v6, %v4367_v11  ;;  %v4385_v22 = vsub.f32 1.0, %v4384_v27  ;;  %vm4393_vm0 = vcmp.eq.f32.partialorder %v4392_v17, 8.507059e+37 }
 0xa45   : > { %v4376_v18 = vsel %vm4373_vm13, %v4375_v61, %v4371_v51  ;;  %v4402_v24 = vmul.f32 %v5432_v47, %v4357_v32  ;;  %v8738_v47 = vld [vmem:[#allocation63_spill] sm:$0xff] }
 0xa46   : > { %v4401_v0 = vmul.f32 %v4399_v44, %v4376_v18  ;;  %v4386_v53 = vmul.f32 %v5430_v54, %v4385_v22 }
 0xa48   : > { %v7905_v40 = vadd.f32 %v4402_v24, %v4401_v0  ;;  %v4387_v38 = vadd.f32 %v5430_v54, %v4386_v53  ;;  %v8737_v24 = vld [vmem:[#allocation62_spill] sm:$0xff] }
 0xa4a   : > { %5433 = vtanh.f32 %v7905_v40  ;;  %v4391_v9 = vsel %vm4390_vm15, %v5430_v54, %v4387_v38 }
 0xa4b   : > { %v4396_v11 = vsel %vm4393_vm0, %v4395_v25, %v4391_v9 }
 0xa50   : > { %v5434_v6 = vpop.eup %5433 }
 0xa51   : > { %v7908_v27 = vmul.f32 %v5434_v6, %v4396_v11 }
 0xa53   : > { %v4407_v18 = vrot.slane %v7908_v27, 3 }
 0xa55   : > { %4425 = vmatmul.f32.vlgmr.msrb.gmra.mxu0 %v4407_v18  ;;  %4445 = vmatmul.f32.vlgmr.msrb.gmra.mxu1 %v4407_v18 }
 0xa56   : > { %4465 = vmatmul.f32.vlgmr.msrb.gmra.mxu2 %v4407_v18  ;;  %4485 = vmatmul.f32.vlgmr.msrb.gmra.mxu3 %v4407_v18 }
 0xa57   : > { %4739 = vmatpush.msrb.mxu0 %v7558_v3  ;;  %4759 = vmatpush.msrb.mxu1 %v7561_v45  ;;  %v8709_v3 = vld [vmem:[#allocation23_spill] sm:$0xff]  ;;  %v8710_v45 = vld [vmem:[#allocation24_spill] sm:$0xff] }
 0xa58   : > { %4779 = vmatpush.msrb.mxu2 %v7564_v26  ;;  %4799 = vmatpush.msrb.mxu3 %v7567_v16  ;;  %v8711_v26 = vld [vmem:[#allocation25_spill] sm:$0xff]  ;;  %v8713_v16 = vld [vmem:[#allocation27_spill] sm:$0xff] }
 0xa59   : > { %4740 = vmatpush.msrb.mxu0 %v7570_v39  ;;  %4760 = vmatpush.msrb.mxu1 %v7573_v23  ;;  %v8714_v39 = vld [vmem:[#allocation28_spill] sm:$0xff]  ;;  %v8715_v23 = vld [vmem:[#allocation29_spill] sm:$0xff] }
 0xa5a   : > { %4780 = vmatpush.msrb.mxu2 %v7576_v37  ;;  %4800 = vmatpush.msrb.mxu3 %v7579_v35  ;;  %v8716_v37 = vld [vmem:[#allocation30_spill] sm:$0xff]  ;;  %v8718_v35 = vld [vmem:[#allocation32_spill] sm:$0xff] }
 0xa5b   : > { %4741 = vmatpush.msrb.mxu0 %v7582_v28  ;;  %4761 = vmatpush.msrb.mxu1 %v7585_v30  ;;  %v8719_v28 = vld [vmem:[#allocation33_spill] sm:$0xff]  ;;  %v8720_v30 = vld [vmem:[#allocation34_spill] sm:$0xff] }
 0xa5c   : > { %4781 = vmatpush.msrb.mxu2 %v7588_v52  ;;  %4801 = vmatpush.msrb.mxu3 %v7591_v57  ;;  %v8721_v52 = vld [vmem:[#allocation35_spill] sm:$0xff]  ;;  %v8722_v57 = vld [vmem:[#allocation36_spill] sm:$0xff] }
 0xa5d   : > { %4742 = vmatpush.msrb.mxu0 %v7594_v58  ;;  %4762 = vmatpush.msrb.mxu1 %v7597_v59  ;;  %v8723_v58 = vld [vmem:[#allocation37_spill] sm:$0xff]  ;;  %v8724_v59 = vld [vmem:[#allocation38_spill] sm:$0xff] }
 0xa5e   : > { %4782 = vmatpush.msrb.mxu2 %v7600_v29  ;;  %4802 = vmatpush.msrb.mxu3 %v7603_v36  ;;  %v8725_v29 = vld [vmem:[#allocation39_spill] sm:$0xff]  ;;  %v8726_v36 = vld [vmem:[#allocation40_spill] sm:$0xff] }
 0xa5f   : > { %4743 = vmatpush.msrb.mxu0 %v7606_v42  ;;  %4763 = vmatpush.msrb.mxu1 %v7609_v55  ;;  %v8727_v42 = vld [vmem:[#allocation41_spill] sm:$0xff]  ;;  %v8728_v55 = vld [vmem:[#allocation42_spill] sm:$0xff] }
 0xa60   : > { %4783 = vmatpush.msrb.mxu2 %v7612_v63  ;;  %4803 = vmatpush.msrb.mxu3 %v7615_v15  ;;  %v8729_v63 = vld [vmem:[#allocation43_spill] sm:$0xff]  ;;  %v8730_v15 = vld [vmem:[#allocation44_spill] sm:$0xff] }
 0xa61   : > { %4744 = vmatpush.msrb.mxu0 %v7618_v50  ;;  %4764 = vmatpush.msrb.mxu1 %v7621_v5  ;;  %v8731_v50 = vld [vmem:[#allocation45_spill] sm:$0xff]  ;;  %v8732_v5 = vld [vmem:[#allocation46_spill] sm:$0xff] }
 0xa62   : > { %4784 = vmatpush.msrb.mxu2 %v7624_v14  ;;  %4804 = vmatpush.msrb.mxu3 %v7627_v4  ;;  %v8733_v14 = vld [vmem:[#allocation47_spill] sm:$0xff]  ;;  %v8734_v4 = vld [vmem:[#allocation48_spill] sm:$0xff] }
 0xa63   : > { %4745 = vmatpush.msrb.mxu0 %v7630_v60  ;;  %4765 = vmatpush.msrb.mxu1 %v8647_v12 }
 0xa64   : > { %4785 = vmatpush.msrb.mxu2 %v8648_v56  ;;  %4805 = vmatpush.msrb.mxu3 %v8649_v19  ;;  %v8736_v56 = vld [vmem:[#allocation61_spill] sm:$0xff] }
 0xa65   : > { %4746 = vmatpush.msrb.mxu0 %v8650_v48  ;;  %4766 = vmatpush.msrb.mxu1 %v8651_v2 }
 0xa66   : > { %4786 = vmatpush.msrb.mxu2 %v7648_v1  ;;  %4806 = vmatpush.msrb.mxu3 %v7651_v62  ;;  %v8712_v1 = vld [vmem:[#allocation26_spill] sm:$0xff] }
 0xa67   : > { %4747 = vmatpush.msrb.mxu0 %v7654_v31  ;;  %4767 = vmatpush.msrb.mxu1 %v7657_v33 }
 0xa68   : > { %4787 = vmatpush.msrb.mxu2 %v7660_v34  ;;  %4807 = vmatpush.msrb.mxu3 %v7663_v41  ;;  %v8717_v41 = vld [vmem:[#allocation31_spill] sm:$0xff]  ;;  %v8735_v34 = vld [vmem:[#allocation60_spill] sm:$0xff] }
 0xa69   : > { %4748 = vmatpush.msrb.mxu0 %v7741_v20  ;;  %4768 = vmatpush.msrb.mxu1 %v7744_v46 }
 0xa6a   : > { %4788 = vmatpush.msrb.mxu2 %v8709_v3  ;;  %4808 = vmatpush.msrb.mxu3 %v8710_v45 }
 0xa6b   : > { %4749 = vmatpush.msrb.mxu0 %v8711_v26  ;;  %4769 = vmatpush.msrb.mxu1 %v8712_v1 }
 0xa6c   : > { %4789 = vmatpush.msrb.mxu2 %v8713_v16  ;;  %4809 = vmatpush.msrb.mxu3 %v8714_v39 }
 0xa6d   : > { %4750 = vmatpush.msrb.mxu0 %v8715_v23  ;;  %4770 = vmatpush.msrb.mxu1 %v8716_v37  ;;  %v4564_v23 = vrot.slane %v7905_v40, 1 }
 0xa6e   : > { %4790 = vmatpush.msrb.mxu2 %v8717_v41  ;;  %4810 = vmatpush.msrb.mxu3 %v8718_v35 }
 0xa6f   : > { %4751 = vmatpush.msrb.mxu0 %v8719_v28  ;;  %4771 = vmatpush.msrb.mxu1 %v8720_v30 }
 0xa70   : > { %4791 = vmatpush.msrb.mxu2 %v8721_v52  ;;  %4811 = vmatpush.msrb.mxu3 %v8722_v57 }
 0xa71   : > { %4752 = vmatpush.msrb.mxu0 %v8723_v58  ;;  %4772 = vmatpush.msrb.mxu1 %v8724_v59 }
 0xa72   : > { %4792 = vmatpush.msrb.mxu2 %v8725_v29  ;;  %4812 = vmatpush.msrb.mxu3 %v8726_v36 }
 0xa73   : > { %4753 = vmatpush.msrb.mxu0 %v8727_v42  ;;  %4773 = vmatpush.msrb.mxu1 %v8728_v55 }
 0xa74   : > { %4793 = vmatpush.msrb.mxu2 %v8729_v63  ;;  %4813 = vmatpush.msrb.mxu3 %v8730_v15 }
 0xa75   : > { %4754 = vmatpush.msrb.mxu0 %v8731_v50  ;;  %4774 = vmatpush.msrb.mxu1 %v8732_v5 }
 0xa76   : > { %4794 = vmatpush.msrb.mxu2 %v8733_v14  ;;  %4814 = vmatpush.msrb.mxu3 %v8734_v4 }
 0xad2   : > { %v4426_v60 = vpop.f32.mrf.mxu0  ;;  %v4446_v62 = vpop.f32.mrf.mxu1 }
 0xad3   : > { %v4493_v31 = vrot.slane %v4426_v60, 6  ;;  %v4494_v33 = vrot.slane %v4446_v62, 6 }
 0xad5   : > { %v4501_v12 = vadd.f32 %v4493_v31, %v8735_v34  ;;  %v4502_v19 = vadd.f32 %v4494_v33, %v8736_v56 }
 0xad7   : > { %v5099_v48 = vmul.f32 -1.442695, %v4501_v12  ;;  %v5100_v2 = vmul.f32 -1.442695, %v4502_v19 }
 0xad9   : > { %5435 = vpow2.f32 %v5099_v48  ;;  %v4486_v20 = vpop.f32.mrf.mxu3  ;;  %v4466_v13 = vpop.f32.mrf.mxu2 }
 0xada   : > { %5437 = vpow2.f32 %v5100_v2  ;;  %v4496_v46 = vrot.slane %v4486_v20, 6  ;;  %v4495_v8 = vrot.slane %v4466_v13, 6 }
 0xadc   : > { %v4504_v51 = vadd.f32 %v4496_v46, %v8737_v24  ;;  %v4503_v22 = vadd.f32 %v4495_v8, %v8738_v47 }
 0xade   : > { %v5101_v32 = vmul.f32 -1.442695, %v4504_v51 }
 0xadf   : > { %v5436_v54 = vpop.eup %5435 }
 0xae0   : > { %v5438_v10 = vpop.eup %5437  ;;  %v4508_v49 = vadd.f32 1.0, %v5436_v54  ;;  %5439 = vpow2.f32 %v5101_v32 }
 0xae1   : > { %v4527_v43 = vadd.f32 1.0, %v5438_v10 }
 0xae2   : > { %5441 = vrcp.f32 %v4508_v49  ;;  %v4520_v9 = vand.u32 2147483648, %v4508_v49  ;;  %v4518_v11 = vand.u32 2147483647, %v4508_v49  ;;  %vm4514_vm9 = vweird.f32 %v4508_v49 }
 0xae3   : > { %5443 = vrcp.f32 %v4527_v43  ;;  %v4539_v25 = vand.u32 2147483648, %v4527_v43  ;;  %v4537_v3 = vand.u32 2147483647, %v4527_v43  ;;  %vm4533_vm11 = vweird.f32 %v4527_v43 }
 0xae4   : > { %v4521_v1 = vor.u32 1.1754944e-38, %v4520_v9  ;;  %vm4519_vm14 = vcmp.eq.f32.partialorder %v4518_v11, 8.507059e+37 }
 0xae5   : > { %v4540_v37 = vor.u32 1.1754944e-38, %v4539_v25  ;;  %vm4538_vm15 = vcmp.eq.f32.partialorder %v4537_v3, 8.507059e+37 }
 0xae6   : > { %v5440_v44 = vpop.eup %5439 }
 0xae7   : > { %v4547_v61 = vadd.f32 1.0, %v5440_v44 }
 0xae8   : > { %v5442_v21 = vpop.eup %5441 }
 0xae9   : > { %v5444_v0 = vpop.eup %5443  ;;  %v4510_v53 = vmul.f32 %v5442_v21, %v4508_v49  ;;  %5445 = vrcp.f32 %v4547_v61  ;;  %vm4515_vm6 = vweird.f32 %v5442_v21  ;;  %v4559_v40 = vand.u32 2147483648, %v4547_v61 }
 0xaea   : > { %v4529_v38 = vmul.f32 %v5444_v0, %v4527_v43  ;;  %5447 = vtanh.f32 %v4503_v22  ;;  %vm4534_vm8 = vweird.f32 %v5444_v0  ;;  %vm4516_vm13 = vmor %vm4514_vm9, %vm4515_vm6  ;;  %vm4553_vm6 = vweird.f32 %v4547_v61 }
 0xaeb   : > { %v4511_v7 = vsub.f32 1.0, %v4510_v53  ;;  %vm4535_vm12 = vmor %vm4533_vm11, %vm4534_vm8  ;;  %v4557_v55 = vand.u32 2147483647, %v4547_v61  ;;  %v4560_v15 = vor.u32 1.1754944e-38, %v4559_v40 }
 0xaec   : > { %v4530_v17 = vsub.f32 1.0, %v4529_v38 }
 0xaed   : > { %v4512_v6 = vmul.f32 %v5442_v21, %v4511_v7  ;;  %vm4558_vm9 = vcmp.eq.f32.partialorder %v4557_v55, 8.507059e+37 }
 0xaee   : > { %v4531_v18 = vmul.f32 %v5444_v0, %v4530_v17 }
 0xaef   : > { %v5446_v45 = vpop.eup %5445  ;;  %v4513_v26 = vadd.f32 %v5442_v21, %v4512_v6 }
 0xaf0   : > { %v4532_v16 = vadd.f32 %v5444_v0, %v4531_v18  ;;  %v4549_v39 = vmul.f32 %v5446_v45, %v4547_v61  ;;  %v5448_v35 = vpop.eup %5447  ;;  %vm4554_vm0 = vweird.f32 %v5446_v45 }
 0xaf1   : > { %v4517_v41 = vsel %vm4516_vm13, %v5442_v21, %v4513_v26  ;;  %vm4555_vm8 = vmor %vm4553_vm6, %vm4554_vm0 }
 0xaf2   : > { %v4522_v28 = vsel %vm4519_vm14, %v4521_v1, %v4517_v41  ;;  %v4536_v30 = vsel %vm4535_vm12, %v5444_v0, %v4532_v16  ;;  %v4550_v52 = vsub.f32 1.0, %v4549_v39 }
 0xaf3   : > { %v4541_v57 = vsel %vm4538_vm15, %v4540_v37, %v4536_v30  ;;  %v4567_v58 = vmul.f32 %v5448_v35, %v4522_v28 }
 0xaf4   : > { %v4566_v59 = vmul.f32 %v4564_v23, %v4541_v57  ;;  %v4551_v29 = vmul.f32 %v5446_v45, %v4550_v52 }
 0xaf6   : > { %v7980_v36 = vadd.f32 %v4567_v58, %v4566_v59  ;;  %v4552_v42 = vadd.f32 %v5446_v45, %v4551_v29 }
 0xaf8   : > { %5449 = vtanh.f32 %v7980_v36  ;;  %v4556_v63 = vsel %vm4555_vm8, %v5446_v45, %v4552_v42  ;;  %v4729_v23 = vrot.slane %v7980_v36, 1 }
 0xaf9   : > { %v4561_v5 = vsel %vm4558_vm9, %v4560_v15, %v4556_v63 }
 0xafe   : > { %v5450_v50 = vpop.eup %5449 }
 0xaff   : > { %v7983_v14 = vmul.f32 %v5450_v50, %v4561_v5 }
 0xb01   : > { %v4572_v4 = vrot.slane %v7983_v14, 2 }
 0xb03   : > { %4590 = vmatmul.f32.vlgmr.msra.gmra.mxu0 %v4572_v4  ;;  %4610 = vmatmul.f32.vlgmr.msra.gmra.mxu1 %v4572_v4 }
 0xb04   : > { %4630 = vmatmul.f32.vlgmr.msra.gmra.mxu2 %v4572_v4  ;;  %4650 = vmatmul.f32.vlgmr.msra.gmra.mxu3 %v4572_v4 }
 0xb80   : > { %v4591_v60 = vpop.f32.mrf.mxu0  ;;  %v4611_v62 = vpop.f32.mrf.mxu1 }
 0xb81   : > { %v4658_v31 = vrot.slane %v4591_v60, 7  ;;  %v4659_v33 = vrot.slane %v4611_v62, 7 }
 0xb83   : > { %v4666_v12 = vadd.f32 %v4658_v31, %v8735_v34  ;;  %v4667_v19 = vadd.f32 %v4659_v33, %v8736_v56 }
 0xb85   : > { %v5102_v48 = vmul.f32 -1.442695, %v4666_v12  ;;  %v5103_v2 = vmul.f32 -1.442695, %v4667_v19 }
 0xb87   : > { %5451 = vpow2.f32 %v5102_v48  ;;  %v4651_v20 = vpop.f32.mrf.mxu3  ;;  %v4631_v13 = vpop.f32.mrf.mxu2 }
 0xb88   : > { %5453 = vpow2.f32 %v5103_v2  ;;  %v4661_v46 = vrot.slane %v4651_v20, 7  ;;  %v4660_v8 = vrot.slane %v4631_v13, 7 }
 0xb8a   : > { %v4669_v51 = vadd.f32 %v4661_v46, %v8737_v24  ;;  %v4668_v22 = vadd.f32 %v4660_v8, %v8738_v47 }
 0xb8c   : > { %v5104_v32 = vmul.f32 -1.442695, %v4669_v51 }
 0xb8d   : > { %v5452_v54 = vpop.eup %5451 }
 0xb8e   : > { %v5454_v10 = vpop.eup %5453  ;;  %v4673_v49 = vadd.f32 1.0, %v5452_v54  ;;  %5455 = vpow2.f32 %v5104_v32 }
 0xb8f   : > { %v4692_v43 = vadd.f32 1.0, %v5454_v10 }
 0xb90   : > { %5457 = vrcp.f32 %v4673_v49  ;;  %v4685_v9 = vand.u32 2147483648, %v4673_v49  ;;  %v4683_v11 = vand.u32 2147483647, %v4673_v49  ;;  %vm4679_vm12 = vweird.f32 %v4673_v49 }
 0xb91   : > { %5459 = vrcp.f32 %v4692_v43  ;;  %v4704_v25 = vand.u32 2147483648, %v4692_v43  ;;  %v4702_v3 = vand.u32 2147483647, %v4692_v43  ;;  %vm4698_vm14 = vweird.f32 %v4692_v43 }
 0xb92   : > { %v4686_v1 = vor.u32 1.1754944e-38, %v4685_v9  ;;  %vm4684_vm6 = vcmp.eq.f32.partialorder %v4683_v11, 8.507059e+37 }
 0xb93   : > { %v4705_v37 = vor.u32 1.1754944e-38, %v4704_v25  ;;  %vm4703_vm8 = vcmp.eq.f32.partialorder %v4702_v3, 8.507059e+37 }
 0xb94   : > { %v5456_v44 = vpop.eup %5455 }
 0xb95   : > { %v4712_v61 = vadd.f32 1.0, %v5456_v44 }
 0xb96   : > { %v5458_v21 = vpop.eup %5457 }
 0xb97   : > { %v5460_v0 = vpop.eup %5459  ;;  %v4675_v53 = vmul.f32 %v5458_v21, %v4673_v49  ;;  %5461 = vrcp.f32 %v4712_v61  ;;  %vm4680_vm11 = vweird.f32 %v5458_v21  ;;  %v4724_v36 = vand.u32 2147483648, %v4712_v61 }
 0xb98   : > { %v4694_v38 = vmul.f32 %v5460_v0, %v4692_v43  ;;  %5463 = vtanh.f32 %v4668_v22  ;;  %vm4699_vm13 = vweird.f32 %v5460_v0  ;;  %vm4681_vm15 = vmor %vm4679_vm12, %vm4680_vm11  ;;  %vm4718_vm11 = vweird.f32 %v4712_v61 }
 0xb99   : > { %v4676_v7 = vsub.f32 1.0, %v4675_v53  ;;  %vm4700_vm0 = vmor %vm4698_vm14, %vm4699_vm13  ;;  %v4722_v55 = vand.u32 2147483647, %v4712_v61  ;;  %v4725_v15 = vor.u32 1.1754944e-38, %v4724_v36 }
 0xb9a   : > { %v4695_v17 = vsub.f32 1.0, %v4694_v38 }
 0xb9b   : > { %v4677_v6 = vmul.f32 %v5458_v21, %v4676_v7  ;;  %vm4723_vm12 = vcmp.eq.f32.partialorder %v4722_v55, 8.507059e+37 }
 0xb9c   : > { %v4696_v18 = vmul.f32 %v5460_v0, %v4695_v17 }
 0xb9d   : > { %v5462_v45 = vpop.eup %5461  ;;  %v4678_v26 = vadd.f32 %v5458_v21, %v4677_v6 }
 0xb9e   : > { %v4697_v16 = vadd.f32 %v5460_v0, %v4696_v18  ;;  %v4714_v39 = vmul.f32 %v5462_v45, %v4712_v61  ;;  %v5464_v35 = vpop.eup %5463  ;;  %vm4719_vm9 = vweird.f32 %v5462_v45 }
 0xb9f   : > { %v4682_v41 = vsel %vm4681_vm15, %v5458_v21, %v4678_v26  ;;  %vm4720_vm13 = vmor %vm4718_vm11, %vm4719_vm9 }
 0xba0   : > { %v4687_v28 = vsel %vm4684_vm6, %v4686_v1, %v4682_v41  ;;  %v4701_v30 = vsel %vm4700_vm0, %v5460_v0, %v4697_v16  ;;  %v4715_v52 = vsub.f32 1.0, %v4714_v39 }
 0xba1   : > { %v4706_v57 = vsel %vm4703_vm8, %v4705_v37, %v4701_v30  ;;  %v4732_v58 = vmul.f32 %v5464_v35, %v4687_v28 }
 0xba2   : > { %v4731_v59 = vmul.f32 %v4729_v23, %v4706_v57  ;;  %v4716_v29 = vmul.f32 %v5462_v45, %v4715_v52 }
 0xba4   : > { %v7991_v42 = vadd.f32 %v4732_v58, %v4731_v59  ;;  %v4717_v40 = vadd.f32 %v5462_v45, %v4716_v29 }
 0xba6   : > { %5465 = vtanh.f32 %v7991_v42  ;;  %v4721_v63 = vsel %vm4720_vm13, %v5462_v45, %v4717_v40  ;;  %v4882_v45 = vrot.slane %v7991_v42, 1 }
 0xba7   : > { %v4726_v5 = vsel %vm4723_vm12, %v4725_v15, %v4721_v63  ;;  %v8739_v15 = vld [vmem:[#allocation49_spill] sm:$0xff] }
 0xbac   : > { %v5466_v50 = vpop.eup %5465 }
 0xbad   : > { %v7994_v4 = vmul.f32 %v5466_v50, %v4726_v5  ;;  %v8740_v5 = vld [vmem:[#allocation22_spill] sm:$0xff] }
 0xbaf   : > { %v4737_v60 = vrot.slane %v7994_v4, 1 }
 0xbb1   : > { %4755 = vmatmul.f32.vlgmr.msrb.gmra.mxu0 %v4737_v60  ;;  %4775 = vmatmul.f32.vlgmr.msrb.gmra.mxu1 %v4737_v60 }
 0xbb2   : > { %4795 = vmatmul.f32.vlgmr.msrb.gmra.mxu2 %v4737_v60  ;;  %4815 = vmatmul.f32.vlgmr.msrb.gmra.mxu3 %v4737_v60 }
 0xc2e   : > { %v4756_v62 = vpop.f32.mrf.mxu0  ;;  %v4776_v31 = vpop.f32.mrf.mxu1 }
 0xc2f   : > { %v4819_v33 = vadd.f32 %v4756_v62, %v8735_v34  ;;  %v4820_v12 = vadd.f32 %v4776_v31, %v8736_v56  ;;  %v8741_v62 = vld [vmem:[#allocation54_spill] sm:$0xff] }
 0xc31   : > { %v5105_v19 = vmul.f32 -1.442695, %v4819_v33  ;;  %v5106_v48 = vmul.f32 -1.442695, %v4820_v12 }
 0xc33   : > { %5467 = vpow2.f32 %v5105_v19 }
 0xc34   : > { %5469 = vpow2.f32 %v5106_v48 }
 0xc35   : > { %v4816_v2 = vpop.f32.mrf.mxu3  ;;  %v4796_v49 = vpop.f32.mrf.mxu2 }
 0xc36   : > { %v4822_v20 = vadd.f32 %v4816_v2, %v8737_v24  ;;  %v4821_v56 = vadd.f32 %v4796_v49, %v8738_v47 }
 0xc38   : > { %v5107_v46 = vmul.f32 -1.442695, %v4822_v20 }
 0xc39   : > { %v5468_v51 = vpop.eup %5467 }
 0xc3a   : > { %v5470_v32 = vpop.eup %5469  ;;  %v4826_v54 = vadd.f32 1.0, %v5468_v51  ;;  %5471 = vpow2.f32 %v5107_v46 }
 0xc3b   : > { %v4845_v10 = vadd.f32 1.0, %v5470_v32 }
 0xc3c   : > { %5473 = vrcp.f32 %v4826_v54  ;;  %v4838_v22 = vand.u32 2147483648, %v4826_v54  ;;  %v4836_v38 = vand.u32 2147483647, %v4826_v54  ;;  %vm4832_vm0 = vweird.f32 %v4826_v54 }
 0xc3d   : > { %5475 = vrcp.f32 %v4845_v10  ;;  %v4857_v0 = vand.u32 2147483648, %v4845_v10  ;;  %v4855_v17 = vand.u32 2147483647, %v4845_v10  ;;  %vm4851_vm6 = vweird.f32 %v4845_v10 }
 0xc3e   : > { %v4839_v47 = vor.u32 1.1754944e-38, %v4838_v22  ;;  %vm4837_vm11 = vcmp.eq.f32.partialorder %v4836_v38, 8.507059e+37 }
 0xc3f   : > { %v4858_v18 = vor.u32 1.1754944e-38, %v4857_v0  ;;  %vm4856_vm13 = vcmp.eq.f32.partialorder %v4855_v17, 8.507059e+37 }
 0xc40   : > { %v5472_v43 = vpop.eup %5471 }
 0xc41   : > { %v4865_v34 = vadd.f32 1.0, %v5472_v43 }
 0xc42   : > { %v5474_v13 = vpop.eup %5473 }
 0xc43   : > { %v5476_v8 = vpop.eup %5475  ;;  %v4828_v44 = vmul.f32 %v5474_v13, %v4826_v54  ;;  %5477 = vrcp.f32 %v4865_v34  ;;  %vm4833_vm14 = vweird.f32 %v5474_v13  ;;  %v4877_v52 = vand.u32 2147483648, %v4865_v34 }
 0xc44   : > { %v4847_v61 = vmul.f32 %v5476_v8, %v4845_v10  ;;  %5479 = vtanh.f32 %v4821_v56  ;;  %vm4852_vm15 = vweird.f32 %v5476_v8  ;;  %vm4834_vm8 = vmor %vm4832_vm0, %vm4833_vm14  ;;  %vm4871_vm14 = vweird.f32 %v4865_v34 }
 0xc45   : > { %v4829_v21 = vsub.f32 1.0, %v4828_v44  ;;  %vm4853_vm9 = vmor %vm4851_vm6, %vm4852_vm15  ;;  %v4875_v57 = vand.u32 2147483647, %v4865_v34  ;;  %v4878_v59 = vor.u32 1.1754944e-38, %v4877_v52 }
 0xc46   : > { %v4848_v24 = vsub.f32 1.0, %v4847_v61 }
 0xc47   : > { %v4830_v53 = vmul.f32 %v5474_v13, %v4829_v21  ;;  %vm4876_vm0 = vcmp.eq.f32.partialorder %v4875_v57, 8.507059e+37 }
 0xc48   : > { %v4849_v7 = vmul.f32 %v5476_v8, %v4848_v24 }
 0xc49   : > { %v5478_v9 = vpop.eup %5477  ;;  %v4831_v25 = vadd.f32 %v5474_v13, %v4830_v53 }
 0xc4a   : > { %v4850_v6 = vadd.f32 %v5476_v8, %v4849_v7  ;;  %v4867_v11 = vmul.f32 %v5478_v9, %v4865_v34  ;;  %v5480_v26 = vpop.eup %5479  ;;  %vm4872_vm12 = vweird.f32 %v5478_v9 }
 0xc4b   : > { %v4835_v3 = vsel %vm4834_vm8, %v5474_v13, %v4831_v25  ;;  %vm4873_vm15 = vmor %vm4871_vm14, %vm4872_vm12 }
 0xc4c   : > { %v4840_v1 = vsel %vm4837_vm11, %v4839_v47, %v4835_v3  ;;  %v4854_v16 = vsel %vm4853_vm9, %v5476_v8, %v4850_v6  ;;  %v4868_v39 = vsub.f32 1.0, %v4867_v11 }
 0xc4d   : > { %v4859_v23 = vsel %vm4856_vm13, %v4858_v18, %v4854_v16  ;;  %v4885_v37 = vmul.f32 %v5480_v26, %v4840_v1 }
 0xc4e   : > { %v4884_v41 = vmul.f32 %v4882_v45, %v4859_v23  ;;  %v4869_v35 = vmul.f32 %v5478_v9, %v4868_v39 }
 0xc50   : > { %v4886_v28 = vadd.f32 %v4885_v37, %v4884_v41  ;;  %v4870_v30 = vadd.f32 %v5478_v9, %v4869_v35 }
 0xc52   : > { %5481 = vtanh.f32 %v4886_v28  ;;  %v4874_v58 = vsel %vm4873_vm15, %v5478_v9, %v4870_v30 }
 0xc53   : > { %v4879_v42 = vsel %vm4876_vm0, %v4878_v59, %v4874_v58 }
 0xc58   : > { %v5482_v29 = vpop.eup %5481 }
 0xc59   : > { %v4888_v40 = vmul.f32 %v5482_v29, %v4879_v42 }
 0xc5b   : > { %v4889_v36 = vsel %vm2635_vm3, %v4888_v40, %v7994_v4  ;;  %v8742_v4 = vld [vmem:[#allocation64_spill] sm:$0xff] }
 0xc5c   : > { %v4890_v55 = vsel %vm2637_vm5, %v4889_v36, %v7983_v14 }
 0xc5d   : > { %v4891_v63 = vsel %vm2639_vm2, %v4890_v55, %v7908_v27 }
 0xc5e   : > { %v4892_v50 = vsel %vm2641_vm1, %v4891_v63, %v8739_v15 }
 0xc5f   : > { %v4893_v60 = vsel %vm2643_vm4, %v4892_v50, %v8740_v5 }
 0xc60   : > { %v4894_v31 = vsel %vm2645_vm7, %v4893_v60, %v8741_v62 }
 0xc61   : > { %v4895_v14 = vsel %vm2647_vm10, %v4894_v31, %v8742_v4 }
 0xc62   : > { %4897 = vst [vmem:[%s7158_s9 + $0x8] sm:$0xff] %v4895_v14 }
 0xc63   : > { %5866 = shalt.err (!%p5863_p9)
}
 0xc64   : > { %5143 = dma.vmem_to_hbm [thread:$0]  (%p6061_p4), %s4913_s8, 256, %s4915_s29, %s4899_s10  }
 0xc65 PF: > { %s4926_s15 = sand.u32 1, %s5905_s24   ;;  %p8743_p10 = scmp.ge.s32.totalorder %s5917_s27, 2 }
 0xc66   : > { %s4927_s14 = scalar_lea.sflag [#allocation4], %s4926_s15 }
 0xc67   : > { %p5169_p11 = pnand %p8743_p10, %p6065_p6 }
 0xc69   : > { %p5170_p13 = pneg %p5169_p11 }
 0xc6b   : > { %5900 = dma.done.wait (%p5170_p13), %s4927_s14, 256  }
 0xc6c   : > { %5902 = vsyncadd (%p5170_p13), %s4927_s14, 4294967040  ;;  %p23_p0 = scmp.ge.s32.totalorder %s6039_s12, 4   ;;  %s8744_s24 = smov %s5909_s25 }
 0xc6d   : > { %s8745_s25 = smov %s5913_s26  ;;  %s8746_s26 = smov %s6050_s21 }
 0xc6e   : > { %s8747_s27 = smov %s6039_s12  ;;  %25 = sbr.rel (!%p23_p0) target bundleno = 12 (0xc), region = 117 }
 0xc73   :  { %4933 = vsyncpa [#allocation3], 1 }
 0xc74   :  { %4935 = vsyncpa [#allocation3 + $0x1], 1 }
 0xc75   :  { %4936 = vsyncpa [#allocation6], 1 }
 0xc76   :  { %4937 = vsyncpa [#allocation9], 1 }
 0xc77   :  { %4938 = vsyncpa [#allocation12], 1 }
 0xc78   :  { %4939 = vsyncpa [#allocation4], 1 }
 0xc79   :  { %4941 = vsyncpa [#allocation4 + $0x1], 1 }

</bundles_post_ra>
